<compile_context>
chip_gen: v7x
topology: tpu7x:2x2x1
jax: 0.10.0
libtpu: 0.0.40
codegen_flags: <defaults>
</compile_context>

<pallas_src>
import math
from functools import partial

import jax
import jax.numpy as jnp
from jax import lax
from jax.experimental import pallas as pl
from jax.experimental.pallas import tpu as pltpu

# ----------------------------------------------------------------------------
# Small model configuration (consistent with the DOFA module semantics).
# ----------------------------------------------------------------------------
IMG_SIZE = 16
PATCH_SIZE = 8            # kernel_size of the dynamic conv == ViT patch size
EMBED_DIM = 32            # transformer embedding dim
DEPTH = 2                 # number of ViT blocks
NUM_HEADS = 4
DYN_DIM = 128             # dynamic_embed_dim (hard-coded to 128 in DOFA)
NUM_CLASSES = 45
MLP_RATIO = 4.0
HIDDEN = int(EMBED_DIM * MLP_RATIO)
WT_NUM = 128              # weight tokens in TransformerWeightGenerator
WG_HEADS = 4              # nn.TransformerEncoderLayer nhead
WG_FFN = 2048             # nn.TransformerEncoderLayer default dim_feedforward
NUM_KERNEL = PATCH_SIZE * PATCH_SIZE * EMBED_DIM
SCALER = 0.01
NUM_PATCHES = (IMG_SIZE // PATCH_SIZE) ** 2
SEQ_LEN = NUM_PATCHES + 1

VMEM_LIMIT_BYTES = 32 * 1024 * 1024   # safe on v5e / v6e / v7x


# ----------------------------------------------------------------------------
# In-kernel math helpers
# ----------------------------------------------------------------------------
def _erf_f32(x):
    # Abramowitz & Stegun 7.1.26 polynomial erf (max abs err ~1.5e-7).
    a1, a2, a3, a4, a5 = 0.254829592, -0.284496736, 1.421413741, -1.453152027, 1.061405429
    p = 0.3275911
    ax = jnp.abs(x)
    t = 1.0 / (1.0 + p * ax)
    poly = ((((a5 * t + a4) * t + a3) * t + a2) * t + a1) * t
    y = 1.0 - poly * jnp.exp(-ax * ax)
    return jnp.where(x >= 0, y, -y)


def _gelu_exact(x):
    return 0.5 * x * (1.0 + _erf_f32(x * 0.7071067811865476))


def _layernorm(x, g, b, eps):
    mean = jnp.mean(x, axis=-1, keepdims=True)
    xc = x - mean
    var = jnp.mean(xc * xc, axis=-1, keepdims=True)
    return xc * lax.rsqrt(var + eps) * g + b


def _softmax_rows(s):
    s = s - jnp.max(s, axis=-1, keepdims=True)
    p = jnp.exp(s)
    # reciprocal on the EUP slot (approx) instead of a VALU divide
    return p * pl.reciprocal(jnp.sum(p, axis=-1, keepdims=True), approx=True)


def _const_spec(shape):
    nd = len(shape)
    return pl.BlockSpec(tuple(shape), lambda *_: (0,) * nd)


# ----------------------------------------------------------------------------
# Kernel 1: fused weight generator
#   FCResLayer -> sequence assembly -> (K/V over all 133 tokens, Q / out_proj /
#   LN1 / FFN / LN2 / fc_weight / fc_bias over the consumed 5-token tail,
#   padded to 8 rows) -> dynamic conv weight + bias.
# ----------------------------------------------------------------------------
def _wg_kernel(waves_ref, r1w_ref, r1b_ref, r2w_ref, r2b_ref,
               wt_ref, bt_ref,
               wq_ref, bq_ref, wk_ref, bk_ref, wv_ref, bv_ref,
               wo_ref, ob_ref, n1g_ref, n1b_ref,
               l1w_ref, l1b_ref, l2w_ref, l2b_ref, n2g_ref, n2b_ref,
               fww_ref, fwb_ref, fbw_ref, fbb_ref,
               w_out_ref, b_out_ref,
               *, num_heads, wt_num, n_chan, tail_pad, eps):
    dim = waves_ref.shape[-1]
    seq_pad = wt_num + tail_pad
    n_valid = wt_num + n_chan + 1

    # --- FCResLayer on the wavelength embedding (fused in) ---
    w0 = waves_ref[...]                                           # (C, D)
    y = jnp.maximum(jnp.dot(w0, r1w_ref[...],
                            preferred_element_type=jnp.float32) + r1b_ref[...], 0.0)
    y = jnp.maximum(jnp.dot(y, r2w_ref[...],
                            preferred_element_type=jnp.float32) + r2b_ref[...], 0.0)
    waves_fc = w0 + y                                             # (C, D)

    # --- assemble the padded token sequence: [weight_tokens; waves; bias_token; 0pad] ---
    pieces = [waves_fc, bt_ref[...]]
    if tail_pad - n_chan - 1 > 0:
        pieces.append(jnp.zeros((tail_pad - n_chan - 1, dim), jnp.float32))
    x_tail = jnp.concatenate(pieces, axis=0)                      # (tail_pad, D)
    seq = jnp.concatenate([wt_ref[...], x_tail], axis=0)          # (seq_pad, D)

    # key mask for the zero-padded rows (keeps softmax exact)
    col = lax.broadcasted_iota(jnp.int32, (1, seq_pad), 1)
    kmask = jnp.where(col < n_valid, 0.0, -1e30).astype(jnp.float32)

    # --- nn.MultiheadAttention: Q only for the consumed tail rows ---
    dh = dim // num_heads
    scale = 1.0 / math.sqrt(dh)
    acc = jnp.zeros((tail_pad, dim), jnp.float32)
    for hd in range(num_heads):
        qh = jnp.dot(x_tail, wq_ref[hd], preferred_element_type=jnp.float32) + bq_ref[hd]
        kh = jnp.dot(seq, wk_ref[hd], preferred_element_type=jnp.float32) + bk_ref[hd]
        vh = jnp.dot(seq, wv_ref[hd], preferred_element_type=jnp.float32) + bv_ref[hd]
        s = lax.dot_general(qh, kh, (((1,), (1,)), ((), ())),
                            preferred_element_type=jnp.float32) * scale + kmask
        p = _softmax_rows(s)
        oh = jnp.dot(p, vh, preferred_element_type=jnp.float32)   # (tail_pad, dh)
        # fold the out_proj per-head slab -> no lane concat of heads
        acc = acc + jnp.dot(oh, wo_ref[hd], preferred_element_type=jnp.float32)
    attn = acc + ob_ref[...]

    # --- post-norm encoder layer (norm_first=False, dropout=0), tail rows only ---
    y1 = _layernorm(x_tail + attn, n1g_ref[...], n1b_ref[...], eps)
    h = jnp.dot(y1.astype(jnp.bfloat16), l1w_ref[...],
                preferred_element_type=jnp.float32) + l1b_ref[...]
    h = _gelu_exact(h)
    h = jnp.dot(h.astype(jnp.bfloat16), l2w_ref[...],
                preferred_element_type=jnp.float32) + l2b_ref[...]
    y2 = _layernorm(y1 + h, n2g_ref[...], n2b_ref[...], eps)

    # --- dynamic conv weight / bias heads ---
    # fc_weight(out[wt_num:-1] + pos_wave): rows >= n_chan are discarded in the wrapper.
    w_in = y2 + x_tail
    w_out_ref[...] = (jnp.dot(w_in.astype(jnp.bfloat16), fww_ref[...],
                              preferred_element_type=jnp.float32)
                      + fwb_ref[...]).astype(w_out_ref.dtype)
    b_out_ref[...] = (jnp.dot(y2, fbw_ref[...], preferred_element_type=jnp.float32)
                      + fbb_ref[...]).astype(b_out_ref.dtype)


def pallas_weight_generator(waves_raw, params, n_chan):
    wg = params["wg"]
    tail_pad = max(8, ((n_chan + 1 + 7) // 8) * 8)
    args = (
        waves_raw.astype(jnp.float32),
        params["fcres_w1"], params["fcres_b1"], params["fcres_w2"], params["fcres_b2"],
        wg["weight_tokens"], wg["bias_token"],
        wg["wq"], wg["bq"], wg["wk"], wg["bk"], wg["wv"], wg["bv"],
        wg["wo"], wg["ob"], wg["n1g"], wg["n1b"],
        wg["l1w"].astype(jnp.bfloat16), wg["l1b"],
        wg["l2w"].astype(jnp.bfloat16), wg["l2b"],
        wg["n2g"], wg["n2b"],
        wg["fww"].astype(jnp.bfloat16), wg["fwb"],
        wg["fbw"], wg["fbb"],
    )
    out_shape = (jax.ShapeDtypeStruct((tail_pad, NUM_KERNEL), jnp.float32),
                 jax.ShapeDtypeStruct((tail_pad, EMBED_DIM), jnp.float32))
    w_out, b_out = pl.pallas_call(
        partial(_wg_kernel, num_heads=WG_HEADS, wt_num=WT_NUM, n_chan=n_chan,
                tail_pad=tail_pad, eps=1e-5),
        out_shape=out_shape,
        grid=(1,),
        in_specs=[_const_spec(a.shape) for a in args],
        out_specs=(_const_spec((tail_pad, NUM_KERNEL)), _const_spec((tail_pad, EMBED_DIM))),
        compiler_params=pltpu.CompilerParams(vmem_limit_bytes=VMEM_LIMIT_BYTES),
    )(*args)
    # rows 0..C-1 are the dynamic conv weight tokens, row C is the bias token
    return w_out[:n_chan], b_out[n_chan]


# ----------------------------------------------------------------------------
# Kernel 2: fused ViT trunk
#   patch-embed matmul (+scaler,+bias) -> +pos_embed -> cls concat ->
#   DEPTH ViT blocks -> mean pool -> fc_norm -> head.  grid=(B,) "parallel".
# ----------------------------------------------------------------------------
def _trunk_kernel(p_ref, wmat_ref, cb_ref, pos_ref, cls_ref,
                  n1g_ref, n1b_ref, wq_ref, bq_ref, wk_ref, bk_ref, wv_ref, bv_ref,
                  wo_ref, pb_ref, n2g_ref, n2b_ref,
                  f1w_ref, f1b_ref, f2w_ref, f2b_ref,
                  fng_ref, fnb_ref, hw_ref, hb_ref, o_ref,
                  *, depth, num_heads, eps, scaler):
    emb = wmat_ref.shape[-1]

    # dynamic-conv patch embedding; scaler folded in (scales both W and b)
    tok = (jnp.dot(p_ref[0], wmat_ref[...], preferred_element_type=jnp.float32)
           + cb_ref[...]) * scaler                                # (P, E)
    tok = tok + pos_ref[1:, :]
    cls = cls_ref[...] + pos_ref[:1, :]
    x = jnp.concatenate([cls, tok], axis=0)                       # (L, E)
    L = x.shape[0]
    scale = (emb // num_heads) ** -0.5

    for d in range(depth):
        h = _layernorm(x, n1g_ref[d], n1b_ref[d], eps)
        acc = jnp.zeros((L, emb), jnp.float32)
        for hd in range(num_heads):
            idx = d * num_heads + hd
            qh = jnp.dot(h, wq_ref[idx], preferred_element_type=jnp.float32) + bq_ref[idx]
            kh = jnp.dot(h, wk_ref[idx], preferred_element_type=jnp.float32) + bk_ref[idx]
            vh = jnp.dot(h, wv_ref[idx], preferred_element_type=jnp.float32) + bv_ref[idx]
            s = lax.dot_general(qh, kh, (((1,), (1,)), ((), ())),
                                preferred_element_type=jnp.float32) * scale
            ph = _softmax_rows(s)
            oh = jnp.dot(ph, vh, preferred_element_type=jnp.float32)
            acc = acc + jnp.dot(oh, wo_ref[idx], preferred_element_type=jnp.float32)
        x = x + acc + pb_ref[d]
        h2 = _layernorm(x, n2g_ref[d], n2b_ref[d], eps)
        m = _gelu_exact(jnp.dot(h2, f1w_ref[d], preferred_element_type=jnp.float32)
                        + f1b_ref[d])
        m = jnp.dot(m, f2w_ref[d], preferred_element_type=jnp.float32) + f2b_ref[d]
        x = x + m

    pooled = jnp.mean(x[1:, :], axis=0, keepdims=True)            # global pool (no cls)
    yn = _layernorm(pooled, fng_ref[...], fnb_ref[...], eps)
    o_ref[0] = (jnp.dot(yn, hw_ref[...], preferred_element_type=jnp.float32)
                + hb_ref[...]).astype(o_ref.dtype)


def pallas_trunk(patches, w_mat, conv_b, params):
    t = params["trunk"]
    B, P, CKK = patches.shape
    args = (
        patches.astype(jnp.float32),
        w_mat.astype(jnp.float32),
        conv_b.reshape(1, -1).astype(jnp.float32),
        t["pos_embed"], t["cls_token"],
        t["n1g"], t["n1b"], t["wq"], t["bq"], t["wk"], t["bk"], t["wv"], t["bv"],
        t["wo"], t["pb"], t["n2g"], t["n2b"],
        t["f1w"], t["f1b"], t["f2w"], t["f2b"],
        t["fng"], t["fnb"], t["hw"], t["hb"],
    )
    in_specs = [pl.BlockSpec((1, P, CKK), lambda b: (b, 0, 0))]
    in_specs += [_const_spec(a.shape) for a in args[1:]]
    out = pl.pallas_call(
        partial(_trunk_kernel, depth=DEPTH, num_heads=NUM_HEADS, eps=1e-6, scaler=SCALER),
        out_shape=jax.ShapeDtypeStruct((B, 1, NUM_CLASSES), jnp.float32),
        grid=(B,),                                                # batch across TCs on v7x
        in_specs=in_specs,
        out_specs=pl.BlockSpec((1, 1, NUM_CLASSES), lambda b: (b, 0, 0)),
        compiler_params=pltpu.CompilerParams(
            dimension_semantics=("parallel",), vmem_limit_bytes=VMEM_LIMIT_BYTES),
    )(*args)
    return out[:, 0, :]


# ----------------------------------------------------------------------------
# Deterministic parameter initialization (synthetic; shapes follow __init__).
# Attention weights are stored pre-split per head (and stacked across depth)
# so the kernels never lane-slice the fused QKV / proj matrices.
# ----------------------------------------------------------------------------
def _init_linear(key, din, dout, std=0.02, bias_fill=0.01):
    w = jax.random.normal(key, (din, dout), jnp.float32) * std     # stored (in, out)
    b = jnp.full((1, dout), bias_fill, jnp.float32)
    return w, b


def _split_qkv_heads(w, b, dim, heads):
    """(dim, 3*dim), (1, 3*dim) -> per-head stacked wq,bq,wk,bk,wv,bv."""
    dh = dim // heads
    b = b.reshape(3 * dim)
    out = []
    for i in range(3):
        wp = w[:, i * dim:(i + 1) * dim].reshape(dim, heads, dh).transpose(1, 0, 2)
        bp = b[i * dim:(i + 1) * dim].reshape(heads, 1, dh)
        out += [wp, bp]
    return out


def _split_out_heads(w, dim, heads):
    """(dim, dim) projection -> per-head (heads, dh, dim) row slabs."""
    return w.reshape(heads, dim // heads, dim)


def init_params(key):
    ks = iter(jax.random.split(key, 40))
    p = {}

    # FCResLayer
    p["fcres_w1"], p["fcres_b1"] = _init_linear(next(ks), DYN_DIM, DYN_DIM)
    p["fcres_w2"], p["fcres_b2"] = _init_linear(next(ks), DYN_DIM, DYN_DIM)

    # TransformerWeightGenerator
    ipw, ipb = _init_linear(next(ks), DYN_DIM, 3 * DYN_DIM)
    opw, opb = _init_linear(next(ks), DYN_DIM, DYN_DIM)
    l1w, l1b = _init_linear(next(ks), DYN_DIM, WG_FFN)
    l2w, l2b = _init_linear(next(ks), WG_FFN, DYN_DIM)
    fww, fwb = _init_linear(next(ks), DYN_DIM, NUM_KERNEL)
    fbw, fbb = _init_linear(next(ks), DYN_DIM, EMBED_DIM)
    wq, bq, wk, bk, wv, bv = _split_qkv_heads(ipw, ipb, DYN_DIM, WG_HEADS)
    p["wg"] = dict(
        weight_tokens=jax.random.normal(next(ks), (WT_NUM, DYN_DIM), jnp.float32) * 0.02,
        bias_token=jax.random.normal(next(ks), (1, DYN_DIM), jnp.float32) * 0.02,
        wq=wq, bq=bq, wk=wk, bk=bk, wv=wv, bv=bv,
        wo=_split_out_heads(opw, DYN_DIM, WG_HEADS), ob=opb,
        n1g=jnp.ones((1, DYN_DIM), jnp.float32), n1b=jnp.zeros((1, DYN_DIM), jnp.float32),
        l1w=l1w, l1b=l1b, l2w=l2w, l2b=l2b,
        n2g=jnp.ones((1, DYN_DIM), jnp.float32), n2b=jnp.zeros((1, DYN_DIM), jnp.float32),
        fww=fww, fwb=fwb, fbw=fbw, fbb=fbb,
    )

    # ViT trunk blocks (stacked across depth, attention pre-split per head)
    blocks = []
    for _ in range(DEPTH):
        qkvw, qkvb = _init_linear(next(ks), EMBED_DIM, 3 * EMBED_DIM)
        pw, pbias = _init_linear(next(ks), EMBED_DIM, EMBED_DIM)
        f1w, f1b = _init_linear(next(ks), EMBED_DIM, HIDDEN)
        f2w, f2b = _init_linear(next(ks), HIDDEN, EMBED_DIM)
        bwq, bbq, bwk, bbk, bwv, bbv = _split_qkv_heads(qkvw, qkvb, EMBED_DIM, NUM_HEADS)
        blocks.append(dict(wq=bwq, bq=bbq, wk=bwk, bk=bbk, wv=bwv, bv=bbv,
                           wo=_split_out_heads(pw, EMBED_DIM, NUM_HEADS), pb=pbias,
                           f1w=f1w, f1b=f1b, f2w=f2w, f2b=f2b))

    def stk(name):
        return jnp.stack([blk[name] for blk in blocks], axis=0)

    dh = EMBED_DIM // NUM_HEADS
    ones_e = jnp.ones((1, EMBED_DIM), jnp.float32)
    zeros_e = jnp.zeros((1, EMBED_DIM), jnp.float32)
    hw, hb = _init_linear(next(ks), EMBED_DIM, NUM_CLASSES)
    p["trunk"] = dict(
        cls_token=jnp.zeros((1, EMBED_DIM), jnp.float32),          # zeros as in __init__
        pos_embed=jnp.zeros((SEQ_LEN, EMBED_DIM), jnp.float32),
        n1g=jnp.stack([ones_e] * DEPTH), n1b=jnp.stack([zeros_e] * DEPTH),
        n2g=jnp.stack([ones_e] * DEPTH), n2b=jnp.stack([zeros_e] * DEPTH),
        wq=stk("wq").reshape(DEPTH * NUM_HEADS, EMBED_DIM, dh),
        bq=stk("bq").reshape(DEPTH * NUM_HEADS, 1, dh),
        wk=stk("wk").reshape(DEPTH * NUM_HEADS, EMBED_DIM, dh),
        bk=stk("bk").reshape(DEPTH * NUM_HEADS, 1, dh),
        wv=stk("wv").reshape(DEPTH * NUM_HEADS, EMBED_DIM, dh),
        bv=stk("bv").reshape(DEPTH * NUM_HEADS, 1, dh),
        wo=stk("wo").reshape(DEPTH * NUM_HEADS, dh, EMBED_DIM),
        pb=stk("pb"),
        f1w=stk("f1w"), f1b=stk("f1b"), f2w=stk("f2w"), f2b=stk("f2b"),
        fng=ones_e, fnb=zeros_e, hw=hw, hb=hb,
    )
    return p


# ----------------------------------------------------------------------------
# Forward pass (tiny XLA glue: sinusoidal wavelength embedding, patch layout).
# ----------------------------------------------------------------------------
def position_embedding(embed_dim, pos):
    """1D sine/cosine position embedding, (M,) -> (M, embed_dim)."""
    omega = jnp.arange(embed_dim // 2, dtype=jnp.float32) / (embed_dim / 2.0)
    omega = 1.0 / (10000.0 ** omega)
    pos = pos.reshape(-1).astype(jnp.float32)
    out = pos[:, None] * omega[None, :]
    return jnp.concatenate([jnp.sin(out), jnp.cos(out)], axis=1)


def dofa_forward(params, x, wavelengths):
    """DOFA.forward: x (B, C, H, W) NCHW, wavelengths (C,) -> logits (B, NUM_CLASSES)."""
    B, C, H, W = x.shape
    k = PATCH_SIZE

    waves_raw = position_embedding(DYN_DIM, wavelengths * 1000.0)        # (C, 128)
    weight, bias = pallas_weight_generator(waves_raw, params, C)         # (C, NUM_KERNEL), (E,)

    # conv-as-matmul: W[(c,kh,kw), e] == weight.view(C,k,k,E)[c,kh,kw,e]
    w_mat = weight.reshape(C * k * k, EMBED_DIM)

    # F.conv2d(x, W, bias, stride=k, padding=1): stride == kernel -> one reshape/transpose
    xp = jnp.pad(x, ((0, 0), (0, 0), (1, 1), (1, 1)))
    out_h = (H + 2 - k) // k + 1
    out_w = (W + 2 - k) // k + 1
    xc = xp[:, :, :out_h * k, :out_w * k]
    patches = xc.reshape(B, C, out_h, k, out_w, k).transpose(0, 2, 4, 1, 3, 5)
    patches = patches.reshape(B, out_h * out_w, C * k * k)

    # one fused kernel: patch-embed -> pos -> cls -> blocks -> pool -> fc_norm -> head
    return pallas_trunk(patches, w_mat, bias, params)


if __name__ == "__main__":
    key = jax.random.PRNGKey(0)
    pkey, xkey = jax.random.split(key)
    params = init_params(pkey)

    B, C = 2, 4
    x = jax.random.normal(xkey, (B, C, IMG_SIZE, IMG_SIZE), jnp.float32)
    wavelengths = jnp.array([0.665, 0.560, 0.490, 0.842], jnp.float32)   # μm

    fwd = jax.jit(dofa_forward)
    out = jax.block_until_ready(fwd(params, x, wavelengths))
    assert out.shape == (B, NUM_CLASSES), out.shape
    assert bool(jnp.all(jnp.isfinite(out)))
    print("KERNEL_OK")
</pallas_src>

<mosaic_0001>
module attributes {stable_mosaic.version = 11 : i64} {
  func.func @_wg_kernel(%arg0: i32, %arg1: memref<4x128xf32, #tpu.memory_space<vmem>>, %arg2: memref<128x128xf32, #tpu.memory_space<vmem>>, %arg3: memref<1x128xf32, #tpu.memory_space<vmem>>, %arg4: memref<128x128xf32, #tpu.memory_space<vmem>>, %arg5: memref<1x128xf32, #tpu.memory_space<vmem>>, %arg6: memref<128x128xf32, #tpu.memory_space<vmem>>, %arg7: memref<1x128xf32, #tpu.memory_space<vmem>>, %arg8: memref<4x128x32xf32, #tpu.memory_space<vmem>>, %arg9: memref<4x1x32xf32, #tpu.memory_space<vmem>>, %arg10: memref<4x128x32xf32, #tpu.memory_space<vmem>>, %arg11: memref<4x1x32xf32, #tpu.memory_space<vmem>>, %arg12: memref<4x128x32xf32, #tpu.memory_space<vmem>>, %arg13: memref<4x1x32xf32, #tpu.memory_space<vmem>>, %arg14: memref<4x32x128xf32, #tpu.memory_space<vmem>>, %arg15: memref<1x128xf32, #tpu.memory_space<vmem>>, %arg16: memref<1x128xf32, #tpu.memory_space<vmem>>, %arg17: memref<1x128xf32, #tpu.memory_space<vmem>>, %arg18: memref<128x2048xbf16, #tpu.memory_space<vmem>>, %arg19: memref<1x2048xf32, #tpu.memory_space<vmem>>, %arg20: memref<2048x128xbf16, #tpu.memory_space<vmem>>, %arg21: memref<1x128xf32, #tpu.memory_space<vmem>>, %arg22: memref<1x128xf32, #tpu.memory_space<vmem>>, %arg23: memref<1x128xf32, #tpu.memory_space<vmem>>, %arg24: memref<128x2048xbf16, #tpu.memory_space<vmem>>, %arg25: memref<1x2048xf32, #tpu.memory_space<vmem>>, %arg26: memref<128x32xf32, #tpu.memory_space<vmem>>, %arg27: memref<1x32xf32, #tpu.memory_space<vmem>>, %arg28: memref<8x2048xf32, #tpu.memory_space<vmem>>, %arg29: memref<8x32xf32, #tpu.memory_space<vmem>>) attributes {dimension_semantics = [#tpu.dimension_semantics<arbitrary>], iteration_bounds = array<i64: 1>, scalar_prefetch = 0 : i64, scratch_operands = 0 : i64, tpu.core_type = #tpu.core_type<tc>, window_params = [{pipeline_mode = #tpu.pipeline_mode<synchronous>, transform_indices = @transform_0, window_bounds = array<i64: 4, 128>}, {pipeline_mode = #tpu.pipeline_mode<synchronous>, transform_indices = @transform_1, window_bounds = array<i64: 128, 128>}, {pipeline_mode = #tpu.pipeline_mode<synchronous>, transform_indices = @transform_2, window_bounds = array<i64: 1, 128>}, {pipeline_mode = #tpu.pipeline_mode<synchronous>, transform_indices = @transform_3, window_bounds = array<i64: 128, 128>}, {pipeline_mode = #tpu.pipeline_mode<synchronous>, transform_indices = @transform_4, window_bounds = array<i64: 1, 128>}, {pipeline_mode = #tpu.pipeline_mode<synchronous>, transform_indices = @transform_5, window_bounds = array<i64: 128, 128>}, {pipeline_mode = #tpu.pipeline_mode<synchronous>, transform_indices = @transform_6, window_bounds = array<i64: 1, 128>}, {pipeline_mode = #tpu.pipeline_mode<synchronous>, transform_indices = @transform_7, window_bounds = array<i64: 4, 128, 32>}, {pipeline_mode = #tpu.pipeline_mode<synchronous>, transform_indices = @transform_8, window_bounds = array<i64: 4, 1, 32>}, {pipeline_mode = #tpu.pipeline_mode<synchronous>, transform_indices = @transform_9, window_bounds = array<i64: 4, 128, 32>}, {pipeline_mode = #tpu.pipeline_mode<synchronous>, transform_indices = @transform_10, window_bounds = array<i64: 4, 1, 32>}, {pipeline_mode = #tpu.pipeline_mode<synchronous>, transform_indices = @transform_11, window_bounds = array<i64: 4, 128, 32>}, {pipeline_mode = #tpu.pipeline_mode<synchronous>, transform_indices = @transform_12, window_bounds = array<i64: 4, 1, 32>}, {pipeline_mode = #tpu.pipeline_mode<synchronous>, transform_indices = @transform_13, window_bounds = array<i64: 4, 32, 128>}, {pipeline_mode = #tpu.pipeline_mode<synchronous>, transform_indices = @transform_14, window_bounds = array<i64: 1, 128>}, {pipeline_mode = #tpu.pipeline_mode<synchronous>, transform_indices = @transform_15, window_bounds = array<i64: 1, 128>}, {pipeline_mode = #tpu.pipeline_mode<synchronous>, transform_indices = @transform_16, window_bounds = array<i64: 1, 128>}, {pipeline_mode = #tpu.pipeline_mode<synchronous>, transform_indices = @transform_17, window_bounds = array<i64: 128, 2048>}, {pipeline_mode = #tpu.pipeline_mode<synchronous>, transform_indices = @transform_18, window_bounds = array<i64: 1, 2048>}, {pipeline_mode = #tpu.pipeline_mode<synchronous>, transform_indices = @transform_19, window_bounds = array<i64: 2048, 128>}, {pipeline_mode = #tpu.pipeline_mode<synchronous>, transform_indices = @transform_20, window_bounds = array<i64: 1, 128>}, {pipeline_mode = #tpu.pipeline_mode<synchronous>, transform_indices = @transform_21, window_bounds = array<i64: 1, 128>}, {pipeline_mode = #tpu.pipeline_mode<synchronous>, transform_indices = @transform_22, window_bounds = array<i64: 1, 128>}, {pipeline_mode = #tpu.pipeline_mode<synchronous>, transform_indices = @transform_23, window_bounds = array<i64: 128, 2048>}, {pipeline_mode = #tpu.pipeline_mode<synchronous>, transform_indices = @transform_24, window_bounds = array<i64: 1, 2048>}, {pipeline_mode = #tpu.pipeline_mode<synchronous>, transform_indices = @transform_25, window_bounds = array<i64: 128, 32>}, {pipeline_mode = #tpu.pipeline_mode<synchronous>, transform_indices = @transform_26, window_bounds = array<i64: 1, 32>}, {pipeline_mode = #tpu.pipeline_mode<synchronous>, transform_indices = @transform_27, window_bounds = array<i64: 8, 2048>}, {pipeline_mode = #tpu.pipeline_mode<synchronous>, transform_indices = @transform_28, window_bounds = array<i64: 8, 32>}]} {
    %c0 = arith.constant 0 : index
    %c0_0 = arith.constant 0 : index
    %0 = vector.load %arg1[%c0, %c0_0] : memref<4x128xf32, #tpu.memory_space<vmem>>, vector<4x128xf32>
    %c0_1 = arith.constant 0 : index
    %c0_2 = arith.constant 0 : index
    %1 = vector.load %arg2[%c0_1, %c0_2] : memref<128x128xf32, #tpu.memory_space<vmem>>, vector<128x128xf32>
    %cst = arith.constant dense<0.000000e+00> : vector<4x128xf32>
    %2 = tpu.matmul %0, %1, %cst {dimension_numbers = #tpu.dot_dimension_numbers<[1], [0], [0], [1], [0, 0, 1, 1], [], []>} : vector<4x128xf32>, vector<128x128xf32>, vector<4x128xf32> -> vector<4x128xf32>
    %c0_3 = arith.constant 0 : index
    %c0_4 = arith.constant 0 : index
    %3 = vector.load %arg3[%c0_3, %c0_4] : memref<1x128xf32, #tpu.memory_space<vmem>>, vector<1x128xf32>
    %4 = vector.broadcast %3 : vector<1x128xf32> to vector<4x128xf32>
    %5 = arith.addf %2, %4 : vector<4x128xf32>
    %cst_5 = arith.constant 0.000000e+00 : f32
    %6 = vector.broadcast %cst_5 : f32 to vector<4x128xf32>
    %7 = arith.maximumf %5, %6 : vector<4x128xf32>
    %c0_6 = arith.constant 0 : index
    %c0_7 = arith.constant 0 : index
    %8 = vector.load %arg4[%c0_6, %c0_7] : memref<128x128xf32, #tpu.memory_space<vmem>>, vector<128x128xf32>
    %cst_8 = arith.constant dense<0.000000e+00> : vector<4x128xf32>
    %9 = tpu.matmul %7, %8, %cst_8 {dimension_numbers = #tpu.dot_dimension_numbers<[1], [0], [0], [1], [0, 0, 1, 1], [], []>} : vector<4x128xf32>, vector<128x128xf32>, vector<4x128xf32> -> vector<4x128xf32>
    %c0_9 = arith.constant 0 : index
    %c0_10 = arith.constant 0 : index
    %10 = vector.load %arg5[%c0_9, %c0_10] : memref<1x128xf32, #tpu.memory_space<vmem>>, vector<1x128xf32>
    %11 = vector.broadcast %10 : vector<1x128xf32> to vector<4x128xf32>
    %12 = arith.addf %9, %11 : vector<4x128xf32>
    %cst_11 = arith.constant 0.000000e+00 : f32
    %13 = vector.broadcast %cst_11 : f32 to vector<4x128xf32>
    %14 = arith.maximumf %12, %13 : vector<4x128xf32>
    %15 = arith.addf %0, %14 : vector<4x128xf32>
    %c0_12 = arith.constant 0 : index
    %c0_13 = arith.constant 0 : index
    %16 = vector.load %arg7[%c0_12, %c0_13] : memref<1x128xf32, #tpu.memory_space<vmem>>, vector<1x128xf32>
    %cst_14 = arith.constant 0.000000e+00 : f32
    %17 = vector.broadcast %cst_14 : f32 to vector<3x128xf32>
    %18 = tpu.concatenate %15, %16, %17 in 0 : vector<4x128xf32>, vector<1x128xf32>, vector<3x128xf32> -> vector<8x128xf32>
    %c0_15 = arith.constant 0 : index
    %c0_16 = arith.constant 0 : index
    %19 = vector.load %arg6[%c0_15, %c0_16] : memref<128x128xf32, #tpu.memory_space<vmem>>, vector<128x128xf32>
    %20 = tpu.concatenate %19, %18 in 0 : vector<128x128xf32>, vector<8x128xf32> -> vector<136x128xf32>
    %21 = tpu.iota {dimensions = array<i32: 1>} : vector<1x136xi32>
    %c133_i32 = arith.constant 133 : i32
    %22 = vector.broadcast %c133_i32 : i32 to vector<1x136xi32>
    %23 = arith.cmpi slt, %21, %22 : vector<1x136xi32>
    %cst_17 = arith.constant 0.000000e+00 : f32
    %cst_18 = arith.constant -1.000000e+30 : f32
    %24 = vector.broadcast %cst_17 : f32 to vector<1x136xf32>
    %25 = vector.broadcast %cst_18 : f32 to vector<1x136xf32>
    %26 = arith.select %23, %24, %25 : vector<1x136xi1>, vector<1x136xf32>
    %cst_19 = arith.constant 0.000000e+00 : f32
    %27 = vector.broadcast %cst_19 : f32 to vector<8x128xf32>
    %c0_20 = arith.constant 0 : index
    %c0_21 = arith.constant 0 : index
    %c0_22 = arith.constant 0 : index
    %28 = vector.load %arg8[%c0_20, %c0_21, %c0_22] : memref<4x128x32xf32, #tpu.memory_space<vmem>>, vector<1x128x32xf32>
    %29 = vector.shape_cast %28 : vector<1x128x32xf32> to vector<128x32xf32>
    %cst_23 = arith.constant dense<0.000000e+00> : vector<8x32xf32>
    %30 = tpu.matmul %18, %29, %cst_23 {dimension_numbers = #tpu.dot_dimension_numbers<[1], [0], [0], [1], [0, 0, 1, 1], [], []>} : vector<8x128xf32>, vector<128x32xf32>, vector<8x32xf32> -> vector<8x32xf32>
    %c0_24 = arith.constant 0 : index
    %c0_25 = arith.constant 0 : index
    %c0_26 = arith.constant 0 : index
    %31 = vector.load %arg9[%c0_24, %c0_25, %c0_26] : memref<4x1x32xf32, #tpu.memory_space<vmem>>, vector<1x1x32xf32>
    %32 = vector.shape_cast %31 : vector<1x1x32xf32> to vector<1x32xf32>
    %33 = vector.broadcast %32 : vector<1x32xf32> to vector<8x32xf32>
    %34 = arith.addf %30, %33 : vector<8x32xf32>
    %c0_27 = arith.constant 0 : index
    %c0_28 = arith.constant 0 : index
    %c0_29 = arith.constant 0 : index
    %35 = vector.load %arg10[%c0_27, %c0_28, %c0_29] : memref<4x128x32xf32, #tpu.memory_space<vmem>>, vector<1x128x32xf32>
    %36 = vector.shape_cast %35 : vector<1x128x32xf32> to vector<128x32xf32>
    %cst_30 = arith.constant dense<0.000000e+00> : vector<136x32xf32>
    %37 = tpu.matmul %20, %36, %cst_30 {dimension_numbers = #tpu.dot_dimension_numbers<[1], [0], [0], [1], [0, 0, 1, 1], [], []>} : vector<136x128xf32>, vector<128x32xf32>, vector<136x32xf32> -> vector<136x32xf32>
    %c0_31 = arith.constant 0 : index
    %c0_32 = arith.constant 0 : index
    %c0_33 = arith.constant 0 : index
    %38 = vector.load %arg11[%c0_31, %c0_32, %c0_33] : memref<4x1x32xf32, #tpu.memory_space<vmem>>, vector<1x1x32xf32>
    %39 = vector.shape_cast %38 : vector<1x1x32xf32> to vector<1x32xf32>
    %40 = vector.broadcast %39 : vector<1x32xf32> to vector<136x32xf32>
    %41 = arith.addf %37, %40 : vector<136x32xf32>
    %c0_34 = arith.constant 0 : index
    %c0_35 = arith.constant 0 : index
    %c0_36 = arith.constant 0 : index
    %42 = vector.load %arg12[%c0_34, %c0_35, %c0_36] : memref<4x128x32xf32, #tpu.memory_space<vmem>>, vector<1x128x32xf32>
    %43 = vector.shape_cast %42 : vector<1x128x32xf32> to vector<128x32xf32>
    %cst_37 = arith.constant dense<0.000000e+00> : vector<136x32xf32>
    %44 = tpu.matmul %20, %43, %cst_37 {dimension_numbers = #tpu.dot_dimension_numbers<[1], [0], [0], [1], [0, 0, 1, 1], [], []>} : vector<136x128xf32>, vector<128x32xf32>, vector<136x32xf32> -> vector<136x32xf32>
    %c0_38 = arith.constant 0 : index
    %c0_39 = arith.constant 0 : index
    %c0_40 = arith.constant 0 : index
    %45 = vector.load %arg13[%c0_38, %c0_39, %c0_40] : memref<4x1x32xf32, #tpu.memory_space<vmem>>, vector<1x1x32xf32>
    %46 = vector.shape_cast %45 : vector<1x1x32xf32> to vector<1x32xf32>
    %47 = vector.broadcast %46 : vector<1x32xf32> to vector<136x32xf32>
    %48 = arith.addf %44, %47 : vector<136x32xf32>
    %cst_41 = arith.constant dense<0.000000e+00> : vector<8x136xf32>
    %49 = tpu.matmul %34, %41, %cst_41 {dimension_numbers = #tpu.dot_dimension_numbers<[1], [1], [0], [0], [0, 0, 1, 0], [], []>} : vector<8x32xf32>, vector<136x32xf32>, vector<8x136xf32> -> vector<8x136xf32>
    %cst_42 = arith.constant 0.176776692 : f32
    %50 = vector.broadcast %cst_42 : f32 to vector<8x136xf32>
    %51 = arith.mulf %49, %50 : vector<8x136xf32>
    %52 = vector.broadcast %26 : vector<1x136xf32> to vector<8x136xf32>
    %53 = arith.addf %51, %52 : vector<8x136xf32>
    %cst_43 = arith.constant dense<0xFF800000> : vector<8xf32>
    %54 = vector.multi_reduction <maximumf>, %53, %cst_43 [1] : vector<8x136xf32> to vector<8xf32>
    %55 = vector.shape_cast %54 : vector<8xf32> to vector<8x1xf32>
    %56 = vector.broadcast %55 : vector<8x1xf32> to vector<8x136xf32>
    %57 = arith.subf %53, %56 : vector<8x136xf32>
    %58 = math.exp %57 : vector<8x136xf32>
    %cst_44 = arith.constant dense<0.000000e+00> : vector<8xf32>
    %59 = vector.multi_reduction <add>, %58, %cst_44 [1] : vector<8x136xf32> to vector<8xf32>
    %60 = vector.shape_cast %59 : vector<8xf32> to vector<8x1xf32>
    %61 = tpu.reciprocal %60 {approx = true} : vector<8x1xf32> -> vector<8x1xf32>
    %62 = vector.broadcast %61 : vector<8x1xf32> to vector<8x136xf32>
    %63 = arith.mulf %58, %62 : vector<8x136xf32>
    %cst_45 = arith.constant dense<0.000000e+00> : vector<8x32xf32>
    %64 = tpu.matmul %63, %48, %cst_45 {dimension_numbers = #tpu.dot_dimension_numbers<[1], [0], [0], [1], [0, 0, 1, 1], [], []>} : vector<8x136xf32>, vector<136x32xf32>, vector<8x32xf32> -> vector<8x32xf32>
    %c0_46 = arith.constant 0 : index
    %c0_47 = arith.constant 0 : index
    %c0_48 = arith.constant 0 : index
    %65 = vector.load %arg14[%c0_46, %c0_47, %c0_48] : memref<4x32x128xf32, #tpu.memory_space<vmem>>, vector<1x32x128xf32>
    %66 = vector.shape_cast %65 : vector<1x32x128xf32> to vector<32x128xf32>
    %cst_49 = arith.constant dense<0.000000e+00> : vector<8x128xf32>
    %67 = tpu.matmul %64, %66, %cst_49 {dimension_numbers = #tpu.dot_dimension_numbers<[1], [0], [0], [1], [0, 0, 1, 1], [], []>} : vector<8x32xf32>, vector<32x128xf32>, vector<8x128xf32> -> vector<8x128xf32>
    %68 = arith.addf %27, %67 : vector<8x128xf32>
    %c1 = arith.constant 1 : index
    %c0_50 = arith.constant 0 : index
    %c0_51 = arith.constant 0 : index
    %69 = vector.load %arg8[%c1, %c0_50, %c0_51] : memref<4x128x32xf32, #tpu.memory_space<vmem>>, vector<1x128x32xf32>
    %70 = vector.shape_cast %69 : vector<1x128x32xf32> to vector<128x32xf32>
    %cst_52 = arith.constant dense<0.000000e+00> : vector<8x32xf32>
    %71 = tpu.matmul %18, %70, %cst_52 {dimension_numbers = #tpu.dot_dimension_numbers<[1], [0], [0], [1], [0, 0, 1, 1], [], []>} : vector<8x128xf32>, vector<128x32xf32>, vector<8x32xf32> -> vector<8x32xf32>
    %c1_53 = arith.constant 1 : index
    %c0_54 = arith.constant 0 : index
    %c0_55 = arith.constant 0 : index
    %72 = vector.load %arg9[%c1_53, %c0_54, %c0_55] : memref<4x1x32xf32, #tpu.memory_space<vmem>>, vector<1x1x32xf32>
    %73 = vector.shape_cast %72 : vector<1x1x32xf32> to vector<1x32xf32>
    %74 = vector.broadcast %73 : vector<1x32xf32> to vector<8x32xf32>
    %75 = arith.addf %71, %74 : vector<8x32xf32>
    %c1_56 = arith.constant 1 : index
    %c0_57 = arith.constant 0 : index
    %c0_58 = arith.constant 0 : index
    %76 = vector.load %arg10[%c1_56, %c0_57, %c0_58] : memref<4x128x32xf32, #tpu.memory_space<vmem>>, vector<1x128x32xf32>
    %77 = vector.shape_cast %76 : vector<1x128x32xf32> to vector<128x32xf32>
    %cst_59 = arith.constant dense<0.000000e+00> : vector<136x32xf32>
    %78 = tpu.matmul %20, %77, %cst_59 {dimension_numbers = #tpu.dot_dimension_numbers<[1], [0], [0], [1], [0, 0, 1, 1], [], []>} : vector<136x128xf32>, vector<128x32xf32>, vector<136x32xf32> -> vector<136x32xf32>
    %c1_60 = arith.constant 1 : index
    %c0_61 = arith.constant 0 : index
    %c0_62 = arith.constant 0 : index
    %79 = vector.load %arg11[%c1_60, %c0_61, %c0_62] : memref<4x1x32xf32, #tpu.memory_space<vmem>>, vector<1x1x32xf32>
    %80 = vector.shape_cast %79 : vector<1x1x32xf32> to vector<1x32xf32>
    %81 = vector.broadcast %80 : vector<1x32xf32> to vector<136x32xf32>
    %82 = arith.addf %78, %81 : vector<136x32xf32>
    %c1_63 = arith.constant 1 : index
    %c0_64 = arith.constant 0 : index
    %c0_65 = arith.constant 0 : index
    %83 = vector.load %arg12[%c1_63, %c0_64, %c0_65] : memref<4x128x32xf32, #tpu.memory_space<vmem>>, vector<1x128x32xf32>
    %84 = vector.shape_cast %83 : vector<1x128x32xf32> to vector<128x32xf32>
    %cst_66 = arith.constant dense<0.000000e+00> : vector<136x32xf32>
    %85 = tpu.matmul %20, %84, %cst_66 {dimension_numbers = #tpu.dot_dimension_numbers<[1], [0], [0], [1], [0, 0, 1, 1], [], []>} : vector<136x128xf32>, vector<128x32xf32>, vector<136x32xf32> -> vector<136x32xf32>
    %c1_67 = arith.constant 1 : index
    %c0_68 = arith.constant 0 : index
    %c0_69 = arith.constant 0 : index
    %86 = vector.load %arg13[%c1_67, %c0_68, %c0_69] : memref<4x1x32xf32, #tpu.memory_space<vmem>>, vector<1x1x32xf32>
    %87 = vector.shape_cast %86 : vector<1x1x32xf32> to vector<1x32xf32>
    %88 = vector.broadcast %87 : vector<1x32xf32> to vector<136x32xf32>
    %89 = arith.addf %85, %88 : vector<136x32xf32>
    %cst_70 = arith.constant dense<0.000000e+00> : vector<8x136xf32>
    %90 = tpu.matmul %75, %82, %cst_70 {dimension_numbers = #tpu.dot_dimension_numbers<[1], [1], [0], [0], [0, 0, 1, 0], [], []>} : vector<8x32xf32>, vector<136x32xf32>, vector<8x136xf32> -> vector<8x136xf32>
    %cst_71 = arith.constant 0.176776692 : f32
    %91 = vector.broadcast %cst_71 : f32 to vector<8x136xf32>
    %92 = arith.mulf %90, %91 : vector<8x136xf32>
    %93 = vector.broadcast %26 : vector<1x136xf32> to vector<8x136xf32>
    %94 = arith.addf %92, %93 : vector<8x136xf32>
    %cst_72 = arith.constant dense<0xFF800000> : vector<8xf32>
    %95 = vector.multi_reduction <maximumf>, %94, %cst_72 [1] : vector<8x136xf32> to vector<8xf32>
    %96 = vector.shape_cast %95 : vector<8xf32> to vector<8x1xf32>
    %97 = vector.broadcast %96 : vector<8x1xf32> to vector<8x136xf32>
    %98 = arith.subf %94, %97 : vector<8x136xf32>
    %99 = math.exp %98 : vector<8x136xf32>
    %cst_73 = arith.constant dense<0.000000e+00> : vector<8xf32>
    %100 = vector.multi_reduction <add>, %99, %cst_73 [1] : vector<8x136xf32> to vector<8xf32>
    %101 = vector.shape_cast %100 : vector<8xf32> to vector<8x1xf32>
    %102 = tpu.reciprocal %101 {approx = true} : vector<8x1xf32> -> vector<8x1xf32>
    %103 = vector.broadcast %102 : vector<8x1xf32> to vector<8x136xf32>
    %104 = arith.mulf %99, %103 : vector<8x136xf32>
    %cst_74 = arith.constant dense<0.000000e+00> : vector<8x32xf32>
    %105 = tpu.matmul %104, %89, %cst_74 {dimension_numbers = #tpu.dot_dimension_numbers<[1], [0], [0], [1], [0, 0, 1, 1], [], []>} : vector<8x136xf32>, vector<136x32xf32>, vector<8x32xf32> -> vector<8x32xf32>
    %c1_75 = arith.constant 1 : index
    %c0_76 = arith.constant 0 : index
    %c0_77 = arith.constant 0 : index
    %106 = vector.load %arg14[%c1_75, %c0_76, %c0_77] : memref<4x32x128xf32, #tpu.memory_space<vmem>>, vector<1x32x128xf32>
    %107 = vector.shape_cast %106 : vector<1x32x128xf32> to vector<32x128xf32>
    %cst_78 = arith.constant dense<0.000000e+00> : vector<8x128xf32>
    %108 = tpu.matmul %105, %107, %cst_78 {dimension_numbers = #tpu.dot_dimension_numbers<[1], [0], [0], [1], [0, 0, 1, 1], [], []>} : vector<8x32xf32>, vector<32x128xf32>, vector<8x128xf32> -> vector<8x128xf32>
    %109 = arith.addf %68, %108 : vector<8x128xf32>
    %c2 = arith.constant 2 : index
    %c0_79 = arith.constant 0 : index
    %c0_80 = arith.constant 0 : index
    %110 = vector.load %arg8[%c2, %c0_79, %c0_80] : memref<4x128x32xf32, #tpu.memory_space<vmem>>, vector<1x128x32xf32>
    %111 = vector.shape_cast %110 : vector<1x128x32xf32> to vector<128x32xf32>
    %cst_81 = arith.constant dense<0.000000e+00> : vector<8x32xf32>
    %112 = tpu.matmul %18, %111, %cst_81 {dimension_numbers = #tpu.dot_dimension_numbers<[1], [0], [0], [1], [0, 0, 1, 1], [], []>} : vector<8x128xf32>, vector<128x32xf32>, vector<8x32xf32> -> vector<8x32xf32>
    %c2_82 = arith.constant 2 : index
    %c0_83 = arith.constant 0 : index
    %c0_84 = arith.constant 0 : index
    %113 = vector.load %arg9[%c2_82, %c0_83, %c0_84] : memref<4x1x32xf32, #tpu.memory_space<vmem>>, vector<1x1x32xf32>
    %114 = vector.shape_cast %113 : vector<1x1x32xf32> to vector<1x32xf32>
    %115 = vector.broadcast %114 : vector<1x32xf32> to vector<8x32xf32>
    %116 = arith.addf %112, %115 : vector<8x32xf32>
    %c2_85 = arith.constant 2 : index
    %c0_86 = arith.constant 0 : index
    %c0_87 = arith.constant 0 : index
    %117 = vector.load %arg10[%c2_85, %c0_86, %c0_87] : memref<4x128x32xf32, #tpu.memory_space<vmem>>, vector<1x128x32xf32>
    %118 = vector.shape_cast %117 : vector<1x128x32xf32> to vector<128x32xf32>
    %cst_88 = arith.constant dense<0.000000e+00> : vector<136x32xf32>
    %119 = tpu.matmul %20, %118, %cst_88 {dimension_numbers = #tpu.dot_dimension_numbers<[1], [0], [0], [1], [0, 0, 1, 1], [], []>} : vector<136x128xf32>, vector<128x32xf32>, vector<136x32xf32> -> vector<136x32xf32>
    %c2_89 = arith.constant 2 : index
    %c0_90 = arith.constant 0 : index
    %c0_91 = arith.constant 0 : index
    %120 = vector.load %arg11[%c2_89, %c0_90, %c0_91] : memref<4x1x32xf32, #tpu.memory_space<vmem>>, vector<1x1x32xf32>
    %121 = vector.shape_cast %120 : vector<1x1x32xf32> to vector<1x32xf32>
    %122 = vector.broadcast %121 : vector<1x32xf32> to vector<136x32xf32>
    %123 = arith.addf %119, %122 : vector<136x32xf32>
    %c2_92 = arith.constant 2 : index
    %c0_93 = arith.constant 0 : index
    %c0_94 = arith.constant 0 : index
    %124 = vector.load %arg12[%c2_92, %c0_93, %c0_94] : memref<4x128x32xf32, #tpu.memory_space<vmem>>, vector<1x128x32xf32>
    %125 = vector.shape_cast %124 : vector<1x128x32xf32> to vector<128x32xf32>
    %cst_95 = arith.constant dense<0.000000e+00> : vector<136x32xf32>
    %126 = tpu.matmul %20, %125, %cst_95 {dimension_numbers = #tpu.dot_dimension_numbers<[1], [0], [0], [1], [0, 0, 1, 1], [], []>} : vector<136x128xf32>, vector<128x32xf32>, vector<136x32xf32> -> vector<136x32xf32>
    %c2_96 = arith.constant 2 : index
    %c0_97 = arith.constant 0 : index
    %c0_98 = arith.constant 0 : index
    %127 = vector.load %arg13[%c2_96, %c0_97, %c0_98] : memref<4x1x32xf32, #tpu.memory_space<vmem>>, vector<1x1x32xf32>
    %128 = vector.shape_cast %127 : vector<1x1x32xf32> to vector<1x32xf32>
    %129 = vector.broadcast %128 : vector<1x32xf32> to vector<136x32xf32>
    %130 = arith.addf %126, %129 : vector<136x32xf32>
    %cst_99 = arith.constant dense<0.000000e+00> : vector<8x136xf32>
    %131 = tpu.matmul %116, %123, %cst_99 {dimension_numbers = #tpu.dot_dimension_numbers<[1], [1], [0], [0], [0, 0, 1, 0], [], []>} : vector<8x32xf32>, vector<136x32xf32>, vector<8x136xf32> -> vector<8x136xf32>
    %cst_100 = arith.constant 0.176776692 : f32
    %132 = vector.broadcast %cst_100 : f32 to vector<8x136xf32>
    %133 = arith.mulf %131, %132 : vector<8x136xf32>
    %134 = vector.broadcast %26 : vector<1x136xf32> to vector<8x136xf32>
    %135 = arith.addf %133, %134 : vector<8x136xf32>
    %cst_101 = arith.constant dense<0xFF800000> : vector<8xf32>
    %136 = vector.multi_reduction <maximumf>, %135, %cst_101 [1] : vector<8x136xf32> to vector<8xf32>
    %137 = vector.shape_cast %136 : vector<8xf32> to vector<8x1xf32>
    %138 = vector.broadcast %137 : vector<8x1xf32> to vector<8x136xf32>
    %139 = arith.subf %135, %138 : vector<8x136xf32>
    %140 = math.exp %139 : vector<8x136xf32>
    %cst_102 = arith.constant dense<0.000000e+00> : vector<8xf32>
    %141 = vector.multi_reduction <add>, %140, %cst_102 [1] : vector<8x136xf32> to vector<8xf32>
    %142 = vector.shape_cast %141 : vector<8xf32> to vector<8x1xf32>
    %143 = tpu.reciprocal %142 {approx = true} : vector<8x1xf32> -> vector<8x1xf32>
    %144 = vector.broadcast %143 : vector<8x1xf32> to vector<8x136xf32>
    %145 = arith.mulf %140, %144 : vector<8x136xf32>
    %cst_103 = arith.constant dense<0.000000e+00> : vector<8x32xf32>
    %146 = tpu.matmul %145, %130, %cst_103 {dimension_numbers = #tpu.dot_dimension_numbers<[1], [0], [0], [1], [0, 0, 1, 1], [], []>} : vector<8x136xf32>, vector<136x32xf32>, vector<8x32xf32> -> vector<8x32xf32>
    %c2_104 = arith.constant 2 : index
    %c0_105 = arith.constant 0 : index
    %c0_106 = arith.constant 0 : index
    %147 = vector.load %arg14[%c2_104, %c0_105, %c0_106] : memref<4x32x128xf32, #tpu.memory_space<vmem>>, vector<1x32x128xf32>
    %148 = vector.shape_cast %147 : vector<1x32x128xf32> to vector<32x128xf32>
    %cst_107 = arith.constant dense<0.000000e+00> : vector<8x128xf32>
    %149 = tpu.matmul %146, %148, %cst_107 {dimension_numbers = #tpu.dot_dimension_numbers<[1], [0], [0], [1], [0, 0, 1, 1], [], []>} : vector<8x32xf32>, vector<32x128xf32>, vector<8x128xf32> -> vector<8x128xf32>
    %150 = arith.addf %109, %149 : vector<8x128xf32>
    %c3 = arith.constant 3 : index
    %c0_108 = arith.constant 0 : index
    %c0_109 = arith.constant 0 : index
    %151 = vector.load %arg8[%c3, %c0_108, %c0_109] : memref<4x128x32xf32, #tpu.memory_space<vmem>>, vector<1x128x32xf32>
    %152 = vector.shape_cast %151 : vector<1x128x32xf32> to vector<128x32xf32>
    %cst_110 = arith.constant dense<0.000000e+00> : vector<8x32xf32>
    %153 = tpu.matmul %18, %152, %cst_110 {dimension_numbers = #tpu.dot_dimension_numbers<[1], [0], [0], [1], [0, 0, 1, 1], [], []>} : vector<8x128xf32>, vector<128x32xf32>, vector<8x32xf32> -> vector<8x32xf32>
    %c3_111 = arith.constant 3 : index
    %c0_112 = arith.constant 0 : index
    %c0_113 = arith.constant 0 : index
    %154 = vector.load %arg9[%c3_111, %c0_112, %c0_113] : memref<4x1x32xf32, #tpu.memory_space<vmem>>, vector<1x1x32xf32>
    %155 = vector.shape_cast %154 : vector<1x1x32xf32> to vector<1x32xf32>
    %156 = vector.broadcast %155 : vector<1x32xf32> to vector<8x32xf32>
    %157 = arith.addf %153, %156 : vector<8x32xf32>
    %c3_114 = arith.constant 3 : index
    %c0_115 = arith.constant 0 : index
    %c0_116 = arith.constant 0 : index
    %158 = vector.load %arg10[%c3_114, %c0_115, %c0_116] : memref<4x128x32xf32, #tpu.memory_space<vmem>>, vector<1x128x32xf32>
    %159 = vector.shape_cast %158 : vector<1x128x32xf32> to vector<128x32xf32>
    %cst_117 = arith.constant dense<0.000000e+00> : vector<136x32xf32>
    %160 = tpu.matmul %20, %159, %cst_117 {dimension_numbers = #tpu.dot_dimension_numbers<[1], [0], [0], [1], [0, 0, 1, 1], [], []>} : vector<136x128xf32>, vector<128x32xf32>, vector<136x32xf32> -> vector<136x32xf32>
    %c3_118 = arith.constant 3 : index
    %c0_119 = arith.constant 0 : index
    %c0_120 = arith.constant 0 : index
    %161 = vector.load %arg11[%c3_118, %c0_119, %c0_120] : memref<4x1x32xf32, #tpu.memory_space<vmem>>, vector<1x1x32xf32>
    %162 = vector.shape_cast %161 : vector<1x1x32xf32> to vector<1x32xf32>
    %163 = vector.broadcast %162 : vector<1x32xf32> to vector<136x32xf32>
    %164 = arith.addf %160, %163 : vector<136x32xf32>
    %c3_121 = arith.constant 3 : index
    %c0_122 = arith.constant 0 : index
    %c0_123 = arith.constant 0 : index
    %165 = vector.load %arg12[%c3_121, %c0_122, %c0_123] : memref<4x128x32xf32, #tpu.memory_space<vmem>>, vector<1x128x32xf32>
    %166 = vector.shape_cast %165 : vector<1x128x32xf32> to vector<128x32xf32>
    %cst_124 = arith.constant dense<0.000000e+00> : vector<136x32xf32>
    %167 = tpu.matmul %20, %166, %cst_124 {dimension_numbers = #tpu.dot_dimension_numbers<[1], [0], [0], [1], [0, 0, 1, 1], [], []>} : vector<136x128xf32>, vector<128x32xf32>, vector<136x32xf32> -> vector<136x32xf32>
    %c3_125 = arith.constant 3 : index
    %c0_126 = arith.constant 0 : index
    %c0_127 = arith.constant 0 : index
    %168 = vector.load %arg13[%c3_125, %c0_126, %c0_127] : memref<4x1x32xf32, #tpu.memory_space<vmem>>, vector<1x1x32xf32>
    %169 = vector.shape_cast %168 : vector<1x1x32xf32> to vector<1x32xf32>
    %170 = vector.broadcast %169 : vector<1x32xf32> to vector<136x32xf32>
    %171 = arith.addf %167, %170 : vector<136x32xf32>
    %cst_128 = arith.constant dense<0.000000e+00> : vector<8x136xf32>
    %172 = tpu.matmul %157, %164, %cst_128 {dimension_numbers = #tpu.dot_dimension_numbers<[1], [1], [0], [0], [0, 0, 1, 0], [], []>} : vector<8x32xf32>, vector<136x32xf32>, vector<8x136xf32> -> vector<8x136xf32>
    %cst_129 = arith.constant 0.176776692 : f32
    %173 = vector.broadcast %cst_129 : f32 to vector<8x136xf32>
    %174 = arith.mulf %172, %173 : vector<8x136xf32>
    %175 = vector.broadcast %26 : vector<1x136xf32> to vector<8x136xf32>
    %176 = arith.addf %174, %175 : vector<8x136xf32>
    %cst_130 = arith.constant dense<0xFF800000> : vector<8xf32>
    %177 = vector.multi_reduction <maximumf>, %176, %cst_130 [1] : vector<8x136xf32> to vector<8xf32>
    %178 = vector.shape_cast %177 : vector<8xf32> to vector<8x1xf32>
    %179 = vector.broadcast %178 : vector<8x1xf32> to vector<8x136xf32>
    %180 = arith.subf %176, %179 : vector<8x136xf32>
    %181 = math.exp %180 : vector<8x136xf32>
    %cst_131 = arith.constant dense<0.000000e+00> : vector<8xf32>
    %182 = vector.multi_reduction <add>, %181, %cst_131 [1] : vector<8x136xf32> to vector<8xf32>
    %183 = vector.shape_cast %182 : vector<8xf32> to vector<8x1xf32>
    %184 = tpu.reciprocal %183 {approx = true} : vector<8x1xf32> -> vector<8x1xf32>
    %185 = vector.broadcast %184 : vector<8x1xf32> to vector<8x136xf32>
    %186 = arith.mulf %181, %185 : vector<8x136xf32>
    %cst_132 = arith.constant dense<0.000000e+00> : vector<8x32xf32>
    %187 = tpu.matmul %186, %171, %cst_132 {dimension_numbers = #tpu.dot_dimension_numbers<[1], [0], [0], [1], [0, 0, 1, 1], [], []>} : vector<8x136xf32>, vector<136x32xf32>, vector<8x32xf32> -> vector<8x32xf32>
    %c3_133 = arith.constant 3 : index
    %c0_134 = arith.constant 0 : index
    %c0_135 = arith.constant 0 : index
    %188 = vector.load %arg14[%c3_133, %c0_134, %c0_135] : memref<4x32x128xf32, #tpu.memory_space<vmem>>, vector<1x32x128xf32>
    %189 = vector.shape_cast %188 : vector<1x32x128xf32> to vector<32x128xf32>
    %cst_136 = arith.constant dense<0.000000e+00> : vector<8x128xf32>
    %190 = tpu.matmul %187, %189, %cst_136 {dimension_numbers = #tpu.dot_dimension_numbers<[1], [0], [0], [1], [0, 0, 1, 1], [], []>} : vector<8x32xf32>, vector<32x128xf32>, vector<8x128xf32> -> vector<8x128xf32>
    %191 = arith.addf %150, %190 : vector<8x128xf32>
    %c0_137 = arith.constant 0 : index
    %c0_138 = arith.constant 0 : index
    %192 = vector.load %arg15[%c0_137, %c0_138] : memref<1x128xf32, #tpu.memory_space<vmem>>, vector<1x128xf32>
    %193 = vector.broadcast %192 : vector<1x128xf32> to vector<8x128xf32>
    %194 = arith.addf %191, %193 : vector<8x128xf32>
    %195 = arith.addf %18, %194 : vector<8x128xf32>
    %c0_139 = arith.constant 0 : index
    %c0_140 = arith.constant 0 : index
    %196 = vector.load %arg16[%c0_139, %c0_140] : memref<1x128xf32, #tpu.memory_space<vmem>>, vector<1x128xf32>
    %c0_141 = arith.constant 0 : index
    %c0_142 = arith.constant 0 : index
    %197 = vector.load %arg17[%c0_141, %c0_142] : memref<1x128xf32, #tpu.memory_space<vmem>>, vector<1x128xf32>
    %cst_143 = arith.constant dense<0.000000e+00> : vector<8xf32>
    %198 = vector.multi_reduction <add>, %195, %cst_143 [1] : vector<8x128xf32> to vector<8xf32>
    %199 = vector.shape_cast %198 : vector<8xf32> to vector<8x1xf32>
    %cst_144 = arith.constant 1.280000e+02 : f32
    %200 = vector.broadcast %cst_144 : f32 to vector<8x1xf32>
    %201 = arith.divf %199, %200 : vector<8x1xf32>
    %202 = vector.broadcast %201 : vector<8x1xf32> to vector<8x128xf32>
    %203 = arith.subf %195, %202 : vector<8x128xf32>
    %204 = arith.mulf %203, %203 : vector<8x128xf32>
    %cst_145 = arith.constant dense<0.000000e+00> : vector<8xf32>
    %205 = vector.multi_reduction <add>, %204, %cst_145 [1] : vector<8x128xf32> to vector<8xf32>
    %206 = vector.shape_cast %205 : vector<8xf32> to vector<8x1xf32>
    %cst_146 = arith.constant 1.280000e+02 : f32
    %207 = vector.broadcast %cst_146 : f32 to vector<8x1xf32>
    %208 = arith.divf %206, %207 : vector<8x1xf32>
    %cst_147 = arith.constant 9.99999974E-6 : f32
    %209 = vector.broadcast %cst_147 : f32 to vector<8x1xf32>
    %210 = arith.addf %208, %209 : vector<8x1xf32>
    %211 = math.rsqrt %210 : vector<8x1xf32>
    %212 = vector.broadcast %211 : vector<8x1xf32> to vector<8x128xf32>
    %213 = arith.mulf %203, %212 : vector<8x128xf32>
    %214 = vector.broadcast %196 : vector<1x128xf32> to vector<8x128xf32>
    %215 = arith.mulf %213, %214 : vector<8x128xf32>
    %216 = vector.broadcast %197 : vector<1x128xf32> to vector<8x128xf32>
    %217 = arith.addf %215, %216 : vector<8x128xf32>
    %218 = arith.truncf %217 : vector<8x128xf32> to vector<8x128xbf16>
    %c0_148 = arith.constant 0 : index
    %c0_149 = arith.constant 0 : index
    %219 = vector.load %arg18[%c0_148, %c0_149] : memref<128x2048xbf16, #tpu.memory_space<vmem>>, vector<128x2048xbf16>
    %cst_150 = arith.constant dense<0.000000e+00> : vector<8x2048xf32>
    %220 = tpu.matmul %218, %219, %cst_150 {dimension_numbers = #tpu.dot_dimension_numbers<[1], [0], [0], [1], [0, 0, 1, 1], [], []>} : vector<8x128xbf16>, vector<128x2048xbf16>, vector<8x2048xf32> -> vector<8x2048xf32>
    %c0_151 = arith.constant 0 : index
    %c0_152 = arith.constant 0 : index
    %221 = vector.load %arg19[%c0_151, %c0_152] : memref<1x2048xf32, #tpu.memory_space<vmem>>, vector<1x2048xf32>
    %222 = vector.broadcast %221 : vector<1x2048xf32> to vector<8x2048xf32>
    %223 = arith.addf %220, %222 : vector<8x2048xf32>
    %cst_153 = arith.constant 5.000000e-01 : f32
    %224 = vector.broadcast %cst_153 : f32 to vector<8x2048xf32>
    %225 = arith.mulf %224, %223 : vector<8x2048xf32>
    %cst_154 = arith.constant 0.707106769 : f32
    %226 = vector.broadcast %cst_154 : f32 to vector<8x2048xf32>
    %227 = arith.mulf %223, %226 : vector<8x2048xf32>
    %228 = math.absf %227 : vector<8x2048xf32>
    %cst_155 = arith.constant 0.327591091 : f32
    %229 = vector.broadcast %cst_155 : f32 to vector<8x2048xf32>
    %230 = arith.mulf %229, %228 : vector<8x2048xf32>
    %cst_156 = arith.constant 1.000000e+00 : f32
    %231 = vector.broadcast %cst_156 : f32 to vector<8x2048xf32>
    %232 = arith.addf %231, %230 : vector<8x2048xf32>
    %cst_157 = arith.constant 1.000000e+00 : f32
    %233 = vector.broadcast %cst_157 : f32 to vector<8x2048xf32>
    %234 = arith.divf %233, %232 : vector<8x2048xf32>
    %cst_158 = arith.constant 1.06140542 : f32
    %235 = vector.broadcast %cst_158 : f32 to vector<8x2048xf32>
    %236 = arith.mulf %235, %234 : vector<8x2048xf32>
    %cst_159 = arith.constant -1.45315206 : f32
    %237 = vector.broadcast %cst_159 : f32 to vector<8x2048xf32>
    %238 = arith.addf %236, %237 : vector<8x2048xf32>
    %239 = arith.mulf %238, %234 : vector<8x2048xf32>
    %cst_160 = arith.constant 1.42141378 : f32
    %240 = vector.broadcast %cst_160 : f32 to vector<8x2048xf32>
    %241 = arith.addf %239, %240 : vector<8x2048xf32>
    %242 = arith.mulf %241, %234 : vector<8x2048xf32>
    %cst_161 = arith.constant -0.284496725 : f32
    %243 = vector.broadcast %cst_161 : f32 to vector<8x2048xf32>
    %244 = arith.addf %242, %243 : vector<8x2048xf32>
    %245 = arith.mulf %244, %234 : vector<8x2048xf32>
    %cst_162 = arith.constant 0.254829586 : f32
    %246 = vector.broadcast %cst_162 : f32 to vector<8x2048xf32>
    %247 = arith.addf %245, %246 : vector<8x2048xf32>
    %248 = arith.mulf %247, %234 : vector<8x2048xf32>
    %cst_163 = arith.constant 0.000000e+00 : f32
    %249 = vector.broadcast %cst_163 : f32 to vector<8x2048xf32>
    %250 = arith.subf %249, %228 : vector<8x2048xf32>
    %251 = arith.mulf %250, %228 : vector<8x2048xf32>
    %252 = math.exp %251 : vector<8x2048xf32>
    %253 = arith.mulf %248, %252 : vector<8x2048xf32>
    %cst_164 = arith.constant 1.000000e+00 : f32
    %254 = vector.broadcast %cst_164 : f32 to vector<8x2048xf32>
    %255 = arith.subf %254, %253 : vector<8x2048xf32>
    %cst_165 = arith.constant 0.000000e+00 : f32
    %256 = vector.broadcast %cst_165 : f32 to vector<8x2048xf32>
    %257 = arith.cmpf oge, %227, %256 : vector<8x2048xf32>
    %cst_166 = arith.constant 0.000000e+00 : f32
    %258 = vector.broadcast %cst_166 : f32 to vector<8x2048xf32>
    %259 = arith.subf %258, %255 : vector<8x2048xf32>
    %260 = arith.select %257, %255, %259 : vector<8x2048xi1>, vector<8x2048xf32>
    %cst_167 = arith.constant 1.000000e+00 : f32
    %261 = vector.broadcast %cst_167 : f32 to vector<8x2048xf32>
    %262 = arith.addf %261, %260 : vector<8x2048xf32>
    %263 = arith.mulf %225, %262 : vector<8x2048xf32>
    %264 = arith.truncf %263 : vector<8x2048xf32> to vector<8x2048xbf16>
    %c0_168 = arith.constant 0 : index
    %c0_169 = arith.constant 0 : index
    %265 = vector.load %arg20[%c0_168, %c0_169] : memref<2048x128xbf16, #tpu.memory_space<vmem>>, vector<2048x128xbf16>
    %cst_170 = arith.constant dense<0.000000e+00> : vector<8x128xf32>
    %266 = tpu.matmul %264, %265, %cst_170 {dimension_numbers = #tpu.dot_dimension_numbers<[1], [0], [0], [1], [0, 0, 1, 1], [], []>} : vector<8x2048xbf16>, vector<2048x128xbf16>, vector<8x128xf32> -> vector<8x128xf32>
    %c0_171 = arith.constant 0 : index
    %c0_172 = arith.constant 0 : index
    %267 = vector.load %arg21[%c0_171, %c0_172] : memref<1x128xf32, #tpu.memory_space<vmem>>, vector<1x128xf32>
    %268 = vector.broadcast %267 : vector<1x128xf32> to vector<8x128xf32>
    %269 = arith.addf %266, %268 : vector<8x128xf32>
    %270 = arith.addf %217, %269 : vector<8x128xf32>
    %c0_173 = arith.constant 0 : index
    %c0_174 = arith.constant 0 : index
    %271 = vector.load %arg22[%c0_173, %c0_174] : memref<1x128xf32, #tpu.memory_space<vmem>>, vector<1x128xf32>
    %c0_175 = arith.constant 0 : index
    %c0_176 = arith.constant 0 : index
    %272 = vector.load %arg23[%c0_175, %c0_176] : memref<1x128xf32, #tpu.memory_space<vmem>>, vector<1x128xf32>
    %cst_177 = arith.constant dense<0.000000e+00> : vector<8xf32>
    %273 = vector.multi_reduction <add>, %270, %cst_177 [1] : vector<8x128xf32> to vector<8xf32>
    %274 = vector.shape_cast %273 : vector<8xf32> to vector<8x1xf32>
    %cst_178 = arith.constant 1.280000e+02 : f32
    %275 = vector.broadcast %cst_178 : f32 to vector<8x1xf32>
    %276 = arith.divf %274, %275 : vector<8x1xf32>
    %277 = vector.broadcast %276 : vector<8x1xf32> to vector<8x128xf32>
    %278 = arith.subf %270, %277 : vector<8x128xf32>
    %279 = arith.mulf %278, %278 : vector<8x128xf32>
    %cst_179 = arith.constant dense<0.000000e+00> : vector<8xf32>
    %280 = vector.multi_reduction <add>, %279, %cst_179 [1] : vector<8x128xf32> to vector<8xf32>
    %281 = vector.shape_cast %280 : vector<8xf32> to vector<8x1xf32>
    %cst_180 = arith.constant 1.280000e+02 : f32
    %282 = vector.broadcast %cst_180 : f32 to vector<8x1xf32>
    %283 = arith.divf %281, %282 : vector<8x1xf32>
    %cst_181 = arith.constant 9.99999974E-6 : f32
    %284 = vector.broadcast %cst_181 : f32 to vector<8x1xf32>
    %285 = arith.addf %283, %284 : vector<8x1xf32>
    %286 = math.rsqrt %285 : vector<8x1xf32>
    %287 = vector.broadcast %286 : vector<8x1xf32> to vector<8x128xf32>
    %288 = arith.mulf %278, %287 : vector<8x128xf32>
    %289 = vector.broadcast %271 : vector<1x128xf32> to vector<8x128xf32>
    %290 = arith.mulf %288, %289 : vector<8x128xf32>
    %291 = vector.broadcast %272 : vector<1x128xf32> to vector<8x128xf32>
    %292 = arith.addf %290, %291 : vector<8x128xf32>
    %293 = arith.addf %292, %18 : vector<8x128xf32>
    %294 = arith.truncf %293 : vector<8x128xf32> to vector<8x128xbf16>
    %c0_182 = arith.constant 0 : index
    %c0_183 = arith.constant 0 : index
    %295 = vector.load %arg24[%c0_182, %c0_183] : memref<128x2048xbf16, #tpu.memory_space<vmem>>, vector<128x2048xbf16>
    %cst_184 = arith.constant dense<0.000000e+00> : vector<8x2048xf32>
    %296 = tpu.matmul %294, %295, %cst_184 {dimension_numbers = #tpu.dot_dimension_numbers<[1], [0], [0], [1], [0, 0, 1, 1], [], []>} : vector<8x128xbf16>, vector<128x2048xbf16>, vector<8x2048xf32> -> vector<8x2048xf32>
    %c0_185 = arith.constant 0 : index
    %c0_186 = arith.constant 0 : index
    %297 = vector.load %arg25[%c0_185, %c0_186] : memref<1x2048xf32, #tpu.memory_space<vmem>>, vector<1x2048xf32>
    %298 = vector.broadcast %297 : vector<1x2048xf32> to vector<8x2048xf32>
    %299 = arith.addf %296, %298 : vector<8x2048xf32>
    %c0_187 = arith.constant 0 : index
    %c0_188 = arith.constant 0 : index
    %300 = vector.load %arg28[%c0_187, %c0_188] : memref<8x2048xf32, #tpu.memory_space<vmem>>, vector<8x2048xf32>
    tpu.vector_store %arg28[%c0_187, %c0_188], %299 {strides = array<i32>} : memref<8x2048xf32, #tpu.memory_space<vmem>>, vector<8x2048xf32>,
    %c0_189 = arith.constant 0 : index
    %c0_190 = arith.constant 0 : index
    %301 = vector.load %arg26[%c0_189, %c0_190] : memref<128x32xf32, #tpu.memory_space<vmem>>, vector<128x32xf32>
    %cst_191 = arith.constant dense<0.000000e+00> : vector<8x32xf32>
    %302 = tpu.matmul %292, %301, %cst_191 {dimension_numbers = #tpu.dot_dimension_numbers<[1], [0], [0], [1], [0, 0, 1, 1], [], []>} : vector<8x128xf32>, vector<128x32xf32>, vector<8x32xf32> -> vector<8x32xf32>
    %c0_192 = arith.constant 0 : index
    %c0_193 = arith.constant 0 : index
    %303 = vector.load %arg27[%c0_192, %c0_193] : memref<1x32xf32, #tpu.memory_space<vmem>>, vector<1x32xf32>
    %304 = vector.broadcast %303 : vector<1x32xf32> to vector<8x32xf32>
    %305 = arith.addf %302, %304 : vector<8x32xf32>
    %c0_194 = arith.constant 0 : index
    %c0_195 = arith.constant 0 : index
    %306 = vector.load %arg29[%c0_194, %c0_195] : memref<8x32xf32, #tpu.memory_space<vmem>>, vector<8x32xf32>
    tpu.vector_store %arg29[%c0_194, %c0_195], %305 {strides = array<i32>} : memref<8x32xf32, #tpu.memory_space<vmem>>, vector<8x32xf32>,
    return
  }
  func.func @transform_0(%arg0: i32) -> (i32, i32) {
    %c0_i32 = arith.constant 0 : i32
    %c0_i32_0 = arith.constant 0 : i32
    %c0_i32_1 = arith.constant 0 : i32
    return %c0_i32, %c0_i32_0 : i32, i32
  }
  func.func @transform_1(%arg0: i32) -> (i32, i32) {
    %c0_i32 = arith.constant 0 : i32
    %c0_i32_0 = arith.constant 0 : i32
    %c0_i32_1 = arith.constant 0 : i32
    return %c0_i32, %c0_i32_0 : i32, i32
  }
  func.func @transform_2(%arg0: i32) -> (i32, i32) {
    %c0_i32 = arith.constant 0 : i32
    %c0_i32_0 = arith.constant 0 : i32
    %c0_i32_1 = arith.constant 0 : i32
    return %c0_i32, %c0_i32_0 : i32, i32
  }
  func.func @transform_3(%arg0: i32) -> (i32, i32) {
    %c0_i32 = arith.constant 0 : i32
    %c0_i32_0 = arith.constant 0 : i32
    %c0_i32_1 = arith.constant 0 : i32
    return %c0_i32, %c0_i32_0 : i32, i32
  }
  func.func @transform_4(%arg0: i32) -> (i32, i32) {
    %c0_i32 = arith.constant 0 : i32
    %c0_i32_0 = arith.constant 0 : i32
    %c0_i32_1 = arith.constant 0 : i32
    return %c0_i32, %c0_i32_0 : i32, i32
  }
  func.func @transform_5(%arg0: i32) -> (i32, i32) {
    %c0_i32 = arith.constant 0 : i32
    %c0_i32_0 = arith.constant 0 : i32
    %c0_i32_1 = arith.constant 0 : i32
    return %c0_i32, %c0_i32_0 : i32, i32
  }
  func.func @transform_6(%arg0: i32) -> (i32, i32) {
    %c0_i32 = arith.constant 0 : i32
    %c0_i32_0 = arith.constant 0 : i32
    %c0_i32_1 = arith.constant 0 : i32
    return %c0_i32, %c0_i32_0 : i32, i32
  }
  func.func @transform_7(%arg0: i32) -> (i32, i32, i32) {
    %c0_i32 = arith.constant 0 : i32
    %c0_i32_0 = arith.constant 0 : i32
    %c0_i32_1 = arith.constant 0 : i32
    %c0_i32_2 = arith.constant 0 : i32
    return %c0_i32, %c0_i32_0, %c0_i32_1 : i32, i32, i32
  }
  func.func @transform_8(%arg0: i32) -> (i32, i32, i32) {
    %c0_i32 = arith.constant 0 : i32
    %c0_i32_0 = arith.constant 0 : i32
    %c0_i32_1 = arith.constant 0 : i32
    %c0_i32_2 = arith.constant 0 : i32
    return %c0_i32, %c0_i32_0, %c0_i32_1 : i32, i32, i32
  }
  func.func @transform_9(%arg0: i32) -> (i32, i32, i32) {
    %c0_i32 = arith.constant 0 : i32
    %c0_i32_0 = arith.constant 0 : i32
    %c0_i32_1 = arith.constant 0 : i32
    %c0_i32_2 = arith.constant 0 : i32
    return %c0_i32, %c0_i32_0, %c0_i32_1 : i32, i32, i32
  }
  func.func @transform_10(%arg0: i32) -> (i32, i32, i32) {
    %c0_i32 = arith.constant 0 : i32
    %c0_i32_0 = arith.constant 0 : i32
    %c0_i32_1 = arith.constant 0 : i32
    %c0_i32_2 = arith.constant 0 : i32
    return %c0_i32, %c0_i32_0, %c0_i32_1 : i32, i32, i32
  }
  func.func @transform_11(%arg0: i32) -> (i32, i32, i32) {
    %c0_i32 = arith.constant 0 : i32
    %c0_i32_0 = arith.constant 0 : i32
    %c0_i32_1 = arith.constant 0 : i32
    %c0_i32_2 = arith.constant 0 : i32
    return %c0_i32, %c0_i32_0, %c0_i32_1 : i32, i32, i32
  }
  func.func @transform_12(%arg0: i32) -> (i32, i32, i32) {
    %c0_i32 = arith.constant 0 : i32
    %c0_i32_0 = arith.constant 0 : i32
    %c0_i32_1 = arith.constant 0 : i32
    %c0_i32_2 = arith.constant 0 : i32
    return %c0_i32, %c0_i32_0, %c0_i32_1 : i32, i32, i32
  }
  func.func @transform_13(%arg0: i32) -> (i32, i32, i32) {
    %c0_i32 = arith.constant 0 : i32
    %c0_i32_0 = arith.constant 0 : i32
    %c0_i32_1 = arith.constant 0 : i32
    %c0_i32_2 = arith.constant 0 : i32
    return %c0_i32, %c0_i32_0, %c0_i32_1 : i32, i32, i32
  }
  func.func @transform_14(%arg0: i32) -> (i32, i32) {
    %c0_i32 = arith.constant 0 : i32
    %c0_i32_0 = arith.constant 0 : i32
    %c0_i32_1 = arith.constant 0 : i32
    return %c0_i32, %c0_i32_0 : i32, i32
  }
  func.func @transform_15(%arg0: i32) -> (i32, i32) {
    %c0_i32 = arith.constant 0 : i32
    %c0_i32_0 = arith.constant 0 : i32
    %c0_i32_1 = arith.constant 0 : i32
    return %c0_i32, %c0_i32_0 : i32, i32
  }
  func.func @transform_16(%arg0: i32) -> (i32, i32) {
    %c0_i32 = arith.constant 0 : i32
    %c0_i32_0 = arith.constant 0 : i32
    %c0_i32_1 = arith.constant 0 : i32
    return %c0_i32, %c0_i32_0 : i32, i32
  }
  func.func @transform_17(%arg0: i32) -> (i32, i32) {
    %c0_i32 = arith.constant 0 : i32
    %c0_i32_0 = arith.constant 0 : i32
    %c0_i32_1 = arith.constant 0 : i32
    return %c0_i32, %c0_i32_0 : i32, i32
  }
  func.func @transform_18(%arg0: i32) -> (i32, i32) {
    %c0_i32 = arith.constant 0 : i32
    %c0_i32_0 = arith.constant 0 : i32
    %c0_i32_1 = arith.constant 0 : i32
    return %c0_i32, %c0_i32_0 : i32, i32
  }
  func.func @transform_19(%arg0: i32) -> (i32, i32) {
    %c0_i32 = arith.constant 0 : i32
    %c0_i32_0 = arith.constant 0 : i32
    %c0_i32_1 = arith.constant 0 : i32
    return %c0_i32, %c0_i32_0 : i32, i32
  }
  func.func @transform_20(%arg0: i32) -> (i32, i32) {
    %c0_i32 = arith.constant 0 : i32
    %c0_i32_0 = arith.constant 0 : i32
    %c0_i32_1 = arith.constant 0 : i32
    return %c0_i32, %c0_i32_0 : i32, i32
  }
  func.func @transform_21(%arg0: i32) -> (i32, i32) {
    %c0_i32 = arith.constant 0 : i32
    %c0_i32_0 = arith.constant 0 : i32
    %c0_i32_1 = arith.constant 0 : i32
    return %c0_i32, %c0_i32_0 : i32, i32
  }
  func.func @transform_22(%arg0: i32) -> (i32, i32) {
    %c0_i32 = arith.constant 0 : i32
    %c0_i32_0 = arith.constant 0 : i32
    %c0_i32_1 = arith.constant 0 : i32
    return %c0_i32, %c0_i32_0 : i32, i32
  }
  func.func @transform_23(%arg0: i32) -> (i32, i32) {
    %c0_i32 = arith.constant 0 : i32
    %c0_i32_0 = arith.constant 0 : i32
    %c0_i32_1 = arith.constant 0 : i32
    return %c0_i32, %c0_i32_0 : i32, i32
  }
  func.func @transform_24(%arg0: i32) -> (i32, i32) {
    %c0_i32 = arith.constant 0 : i32
    %c0_i32_0 = arith.constant 0 : i32
    %c0_i32_1 = arith.constant 0 : i32
    return %c0_i32, %c0_i32_0 : i32, i32
  }
  func.func @transform_25(%arg0: i32) -> (i32, i32) {
    %c0_i32 = arith.constant 0 : i32
    %c0_i32_0 = arith.constant 0 : i32
    %c0_i32_1 = arith.constant 0 : i32
    return %c0_i32, %c0_i32_0 : i32, i32
  }
  func.func @transform_26(%arg0: i32) -> (i32, i32) {
    %c0_i32 = arith.constant 0 : i32
    %c0_i32_0 = arith.constant 0 : i32
    %c0_i32_1 = arith.constant 0 : i32
    return %c0_i32, %c0_i32_0 : i32, i32
  }
  func.func @transform_27(%arg0: i32) -> (i32, i32) {
    %c0_i32 = arith.constant 0 : i32
    %c0_i32_0 = arith.constant 0 : i32
    %c0_i32_1 = arith.constant 0 : i32
    return %c0_i32, %c0_i32_0 : i32, i32
  }
  func.func @transform_28(%arg0: i32) -> (i32, i32) {
    %c0_i32 = arith.constant 0 : i32
    %c0_i32_0 = arith.constant 0 : i32
    %c0_i32_1 = arith.constant 0 : i32
    return %c0_i32, %c0_i32_0 : i32, i32
  }
}

module attributes {stable_mosaic.version = 11 : i64} {
  func.func @_trunk_kernel(%arg0: i32, %arg1: memref<1x4x256xf32, #tpu.memory_space<vmem>>, %arg2: memref<256x32xf32, #tpu.memory_space<vmem>>, %arg3: memref<1x32xf32, #tpu.memory_space<vmem>>, %arg4: memref<5x32xf32, #tpu.memory_space<vmem>>, %arg5: memref<1x32xf32, #tpu.memory_space<vmem>>, %arg6: memref<2x1x32xf32, #tpu.memory_space<vmem>>, %arg7: memref<2x1x32xf32, #tpu.memory_space<vmem>>, %arg8: memref<8x32x8xf32, #tpu.memory_space<vmem>>, %arg9: memref<8x1x8xf32, #tpu.memory_space<vmem>>, %arg10: memref<8x32x8xf32, #tpu.memory_space<vmem>>, %arg11: memref<8x1x8xf32, #tpu.memory_space<vmem>>, %arg12: memref<8x32x8xf32, #tpu.memory_space<vmem>>, %arg13: memref<8x1x8xf32, #tpu.memory_space<vmem>>, %arg14: memref<8x8x32xf32, #tpu.memory_space<vmem>>, %arg15: memref<2x1x32xf32, #tpu.memory_space<vmem>>, %arg16: memref<2x1x32xf32, #tpu.memory_space<vmem>>, %arg17: memref<2x1x32xf32, #tpu.memory_space<vmem>>, %arg18: memref<2x32x128xf32, #tpu.memory_space<vmem>>, %arg19: memref<2x1x128xf32, #tpu.memory_space<vmem>>, %arg20: memref<2x128x32xf32, #tpu.memory_space<vmem>>, %arg21: memref<2x1x32xf32, #tpu.memory_space<vmem>>, %arg22: memref<1x32xf32, #tpu.memory_space<vmem>>, %arg23: memref<1x32xf32, #tpu.memory_space<vmem>>, %arg24: memref<32x45xf32, #tpu.memory_space<vmem>>, %arg25: memref<1x45xf32, #tpu.memory_space<vmem>>, %arg26: memref<1x1x45xf32, #tpu.memory_space<vmem>>) attributes {dimension_semantics = [#tpu.dimension_semantics<parallel>], iteration_bounds = array<i64: 2>, scalar_prefetch = 0 : i64, scratch_operands = 0 : i64, tpu.core_type = #tpu.core_type<tc>, window_params = [{transform_indices = @transform_0, window_bounds = array<i64: 1, 4, 256>}, {pipeline_mode = #tpu.pipeline_mode<synchronous>, transform_indices = @transform_1, window_bounds = array<i64: 256, 32>}, {pipeline_mode = #tpu.pipeline_mode<synchronous>, transform_indices = @transform_2, window_bounds = array<i64: 1, 32>}, {pipeline_mode = #tpu.pipeline_mode<synchronous>, transform_indices = @transform_3, window_bounds = array<i64: 5, 32>}, {pipeline_mode = #tpu.pipeline_mode<synchronous>, transform_indices = @transform_4, window_bounds = array<i64: 1, 32>}, {pipeline_mode = #tpu.pipeline_mode<synchronous>, transform_indices = @transform_5, window_bounds = array<i64: 2, 1, 32>}, {pipeline_mode = #tpu.pipeline_mode<synchronous>, transform_indices = @transform_6, window_bounds = array<i64: 2, 1, 32>}, {pipeline_mode = #tpu.pipeline_mode<synchronous>, transform_indices = @transform_7, window_bounds = array<i64: 8, 32, 8>}, {pipeline_mode = #tpu.pipeline_mode<synchronous>, transform_indices = @transform_8, window_bounds = array<i64: 8, 1, 8>}, {pipeline_mode = #tpu.pipeline_mode<synchronous>, transform_indices = @transform_9, window_bounds = array<i64: 8, 32, 8>}, {pipeline_mode = #tpu.pipeline_mode<synchronous>, transform_indices = @transform_10, window_bounds = array<i64: 8, 1, 8>}, {pipeline_mode = #tpu.pipeline_mode<synchronous>, transform_indices = @transform_11, window_bounds = array<i64: 8, 32, 8>}, {pipeline_mode = #tpu.pipeline_mode<synchronous>, transform_indices = @transform_12, window_bounds = array<i64: 8, 1, 8>}, {pipeline_mode = #tpu.pipeline_mode<synchronous>, transform_indices = @transform_13, window_bounds = array<i64: 8, 8, 32>}, {pipeline_mode = #tpu.pipeline_mode<synchronous>, transform_indices = @transform_14, window_bounds = array<i64: 2, 1, 32>}, {pipeline_mode = #tpu.pipeline_mode<synchronous>, transform_indices = @transform_15, window_bounds = array<i64: 2, 1, 32>}, {pipeline_mode = #tpu.pipeline_mode<synchronous>, transform_indices = @transform_16, window_bounds = array<i64: 2, 1, 32>}, {pipeline_mode = #tpu.pipeline_mode<synchronous>, transform_indices = @transform_17, window_bounds = array<i64: 2, 32, 128>}, {pipeline_mode = #tpu.pipeline_mode<synchronous>, transform_indices = @transform_18, window_bounds = array<i64: 2, 1, 128>}, {pipeline_mode = #tpu.pipeline_mode<synchronous>, transform_indices = @transform_19, window_bounds = array<i64: 2, 128, 32>}, {pipeline_mode = #tpu.pipeline_mode<synchronous>, transform_indices = @transform_20, window_bounds = array<i64: 2, 1, 32>}, {pipeline_mode = #tpu.pipeline_mode<synchronous>, transform_indices = @transform_21, window_bounds = array<i64: 1, 32>}, {pipeline_mode = #tpu.pipeline_mode<synchronous>, transform_indices = @transform_22, window_bounds = array<i64: 1, 32>}, {pipeline_mode = #tpu.pipeline_mode<synchronous>, transform_indices = @transform_23, window_bounds = array<i64: 32, 45>}, {pipeline_mode = #tpu.pipeline_mode<synchronous>, transform_indices = @transform_24, window_bounds = array<i64: 1, 45>}, {transform_indices = @transform_25, window_bounds = array<i64: 1, 1, 45>}]} {
    %c0 = arith.constant 0 : index
    %c0_0 = arith.constant 0 : index
    %c0_1 = arith.constant 0 : index
    %0 = vector.load %arg1[%c0, %c0_0, %c0_1] : memref<1x4x256xf32, #tpu.memory_space<vmem>>, vector<1x4x256xf32>
    %1 = vector.shape_cast %0 : vector<1x4x256xf32> to vector<4x256xf32>
    %c0_2 = arith.constant 0 : index
    %c0_3 = arith.constant 0 : index
    %2 = vector.load %arg2[%c0_2, %c0_3] : memref<256x32xf32, #tpu.memory_space<vmem>>, vector<256x32xf32>
    %cst = arith.constant dense<0.000000e+00> : vector<4x32xf32>
    %3 = tpu.matmul %1, %2, %cst {dimension_numbers = #tpu.dot_dimension_numbers<[1], [0], [0], [1], [0, 0, 1, 1], [], []>} : vector<4x256xf32>, vector<256x32xf32>, vector<4x32xf32> -> vector<4x32xf32>
    %c0_4 = arith.constant 0 : index
    %c0_5 = arith.constant 0 : index
    %4 = vector.load %arg3[%c0_4, %c0_5] : memref<1x32xf32, #tpu.memory_space<vmem>>, vector<1x32xf32>
    %5 = vector.broadcast %4 : vector<1x32xf32> to vector<4x32xf32>
    %6 = arith.addf %3, %5 : vector<4x32xf32>
    %cst_6 = arith.constant 0.00999999977 : f32
    %7 = vector.broadcast %cst_6 : f32 to vector<4x32xf32>
    %8 = arith.mulf %6, %7 : vector<4x32xf32>
    %c1 = arith.constant 1 : index
    %c0_7 = arith.constant 0 : index
    %9 = vector.load %arg4[%c1, %c0_7] : memref<5x32xf32, #tpu.memory_space<vmem>>, vector<4x32xf32>
    %10 = arith.addf %8, %9 : vector<4x32xf32>
    %c0_8 = arith.constant 0 : index
    %c0_9 = arith.constant 0 : index
    %11 = vector.load %arg5[%c0_8, %c0_9] : memref<1x32xf32, #tpu.memory_space<vmem>>, vector<1x32xf32>
    %c0_10 = arith.constant 0 : index
    %c0_11 = arith.constant 0 : index
    %12 = vector.load %arg4[%c0_10, %c0_11] : memref<5x32xf32, #tpu.memory_space<vmem>>, vector<1x32xf32>
    %13 = arith.addf %11, %12 : vector<1x32xf32>
    %14 = tpu.concatenate %13, %10 in 0 : vector<1x32xf32>, vector<4x32xf32> -> vector<5x32xf32>
    %c0_12 = arith.constant 0 : index
    %c0_13 = arith.constant 0 : index
    %c0_14 = arith.constant 0 : index
    %15 = vector.load %arg6[%c0_12, %c0_13, %c0_14] : memref<2x1x32xf32, #tpu.memory_space<vmem>>, vector<1x1x32xf32>
    %16 = vector.shape_cast %15 : vector<1x1x32xf32> to vector<1x32xf32>
    %c0_15 = arith.constant 0 : index
    %c0_16 = arith.constant 0 : index
    %c0_17 = arith.constant 0 : index
    %17 = vector.load %arg7[%c0_15, %c0_16, %c0_17] : memref<2x1x32xf32, #tpu.memory_space<vmem>>, vector<1x1x32xf32>
    %18 = vector.shape_cast %17 : vector<1x1x32xf32> to vector<1x32xf32>
    %cst_18 = arith.constant dense<0.000000e+00> : vector<5xf32>
    %19 = vector.multi_reduction <add>, %14, %cst_18 [1] : vector<5x32xf32> to vector<5xf32>
    %20 = vector.shape_cast %19 : vector<5xf32> to vector<5x1xf32>
    %cst_19 = arith.constant 3.200000e+01 : f32
    %21 = vector.broadcast %cst_19 : f32 to vector<5x1xf32>
    %22 = arith.divf %20, %21 : vector<5x1xf32>
    %23 = vector.broadcast %22 : vector<5x1xf32> to vector<5x32xf32>
    %24 = arith.subf %14, %23 : vector<5x32xf32>
    %25 = arith.mulf %24, %24 : vector<5x32xf32>
    %cst_20 = arith.constant dense<0.000000e+00> : vector<5xf32>
    %26 = vector.multi_reduction <add>, %25, %cst_20 [1] : vector<5x32xf32> to vector<5xf32>
    %27 = vector.shape_cast %26 : vector<5xf32> to vector<5x1xf32>
    %cst_21 = arith.constant 3.200000e+01 : f32
    %28 = vector.broadcast %cst_21 : f32 to vector<5x1xf32>
    %29 = arith.divf %27, %28 : vector<5x1xf32>
    %cst_22 = arith.constant 9.99999997E-7 : f32
    %30 = vector.broadcast %cst_22 : f32 to vector<5x1xf32>
    %31 = arith.addf %29, %30 : vector<5x1xf32>
    %32 = math.rsqrt %31 : vector<5x1xf32>
    %33 = vector.broadcast %32 : vector<5x1xf32> to vector<5x32xf32>
    %34 = arith.mulf %24, %33 : vector<5x32xf32>
    %35 = vector.broadcast %16 : vector<1x32xf32> to vector<5x32xf32>
    %36 = arith.mulf %34, %35 : vector<5x32xf32>
    %37 = vector.broadcast %18 : vector<1x32xf32> to vector<5x32xf32>
    %38 = arith.addf %36, %37 : vector<5x32xf32>
    %cst_23 = arith.constant 0.000000e+00 : f32
    %39 = vector.broadcast %cst_23 : f32 to vector<5x32xf32>
    %c0_24 = arith.constant 0 : index
    %c0_25 = arith.constant 0 : index
    %c0_26 = arith.constant 0 : index
    %40 = vector.load %arg8[%c0_24, %c0_25, %c0_26] : memref<8x32x8xf32, #tpu.memory_space<vmem>>, vector<1x32x8xf32>
    %41 = vector.shape_cast %40 : vector<1x32x8xf32> to vector<32x8xf32>
    %cst_27 = arith.constant dense<0.000000e+00> : vector<5x8xf32>
    %42 = tpu.matmul %38, %41, %cst_27 {dimension_numbers = #tpu.dot_dimension_numbers<[1], [0], [0], [1], [0, 0, 1, 1], [], []>} : vector<5x32xf32>, vector<32x8xf32>, vector<5x8xf32> -> vector<5x8xf32>
    %c0_28 = arith.constant 0 : index
    %c0_29 = arith.constant 0 : index
    %c0_30 = arith.constant 0 : index
    %43 = vector.load %arg9[%c0_28, %c0_29, %c0_30] : memref<8x1x8xf32, #tpu.memory_space<vmem>>, vector<1x1x8xf32>
    %44 = vector.shape_cast %43 : vector<1x1x8xf32> to vector<1x8xf32>
    %45 = vector.broadcast %44 : vector<1x8xf32> to vector<5x8xf32>
    %46 = arith.addf %42, %45 : vector<5x8xf32>
    %c0_31 = arith.constant 0 : index
    %c0_32 = arith.constant 0 : index
    %c0_33 = arith.constant 0 : index
    %47 = vector.load %arg10[%c0_31, %c0_32, %c0_33] : memref<8x32x8xf32, #tpu.memory_space<vmem>>, vector<1x32x8xf32>
    %48 = vector.shape_cast %47 : vector<1x32x8xf32> to vector<32x8xf32>
    %cst_34 = arith.constant dense<0.000000e+00> : vector<5x8xf32>
    %49 = tpu.matmul %38, %48, %cst_34 {dimension_numbers = #tpu.dot_dimension_numbers<[1], [0], [0], [1], [0, 0, 1, 1], [], []>} : vector<5x32xf32>, vector<32x8xf32>, vector<5x8xf32> -> vector<5x8xf32>
    %c0_35 = arith.constant 0 : index
    %c0_36 = arith.constant 0 : index
    %c0_37 = arith.constant 0 : index
    %50 = vector.load %arg11[%c0_35, %c0_36, %c0_37] : memref<8x1x8xf32, #tpu.memory_space<vmem>>, vector<1x1x8xf32>
    %51 = vector.shape_cast %50 : vector<1x1x8xf32> to vector<1x8xf32>
    %52 = vector.broadcast %51 : vector<1x8xf32> to vector<5x8xf32>
    %53 = arith.addf %49, %52 : vector<5x8xf32>
    %c0_38 = arith.constant 0 : index
    %c0_39 = arith.constant 0 : index
    %c0_40 = arith.constant 0 : index
    %54 = vector.load %arg12[%c0_38, %c0_39, %c0_40] : memref<8x32x8xf32, #tpu.memory_space<vmem>>, vector<1x32x8xf32>
    %55 = vector.shape_cast %54 : vector<1x32x8xf32> to vector<32x8xf32>
    %cst_41 = arith.constant dense<0.000000e+00> : vector<5x8xf32>
    %56 = tpu.matmul %38, %55, %cst_41 {dimension_numbers = #tpu.dot_dimension_numbers<[1], [0], [0], [1], [0, 0, 1, 1], [], []>} : vector<5x32xf32>, vector<32x8xf32>, vector<5x8xf32> -> vector<5x8xf32>
    %c0_42 = arith.constant 0 : index
    %c0_43 = arith.constant 0 : index
    %c0_44 = arith.constant 0 : index
    %57 = vector.load %arg13[%c0_42, %c0_43, %c0_44] : memref<8x1x8xf32, #tpu.memory_space<vmem>>, vector<1x1x8xf32>
    %58 = vector.shape_cast %57 : vector<1x1x8xf32> to vector<1x8xf32>
    %59 = vector.broadcast %58 : vector<1x8xf32> to vector<5x8xf32>
    %60 = arith.addf %56, %59 : vector<5x8xf32>
    %cst_45 = arith.constant dense<0.000000e+00> : vector<5x5xf32>
    %61 = tpu.matmul %46, %53, %cst_45 {dimension_numbers = #tpu.dot_dimension_numbers<[1], [1], [0], [0], [0, 0, 1, 0], [], []>} : vector<5x8xf32>, vector<5x8xf32>, vector<5x5xf32> -> vector<5x5xf32>
    %cst_46 = arith.constant 0.353553385 : f32
    %62 = vector.broadcast %cst_46 : f32 to vector<5x5xf32>
    %63 = arith.mulf %61, %62 : vector<5x5xf32>
    %cst_47 = arith.constant dense<0xFF800000> : vector<5xf32>
    %64 = vector.multi_reduction <maximumf>, %63, %cst_47 [1] : vector<5x5xf32> to vector<5xf32>
    %65 = vector.shape_cast %64 : vector<5xf32> to vector<5x1xf32>
    %66 = vector.broadcast %65 : vector<5x1xf32> to vector<5x5xf32>
    %67 = arith.subf %63, %66 : vector<5x5xf32>
    %68 = math.exp %67 : vector<5x5xf32>
    %cst_48 = arith.constant dense<0.000000e+00> : vector<5xf32>
    %69 = vector.multi_reduction <add>, %68, %cst_48 [1] : vector<5x5xf32> to vector<5xf32>
    %70 = vector.shape_cast %69 : vector<5xf32> to vector<5x1xf32>
    %71 = tpu.reciprocal %70 {approx = true} : vector<5x1xf32> -> vector<5x1xf32>
    %72 = vector.broadcast %71 : vector<5x1xf32> to vector<5x5xf32>
    %73 = arith.mulf %68, %72 : vector<5x5xf32>
    %cst_49 = arith.constant dense<0.000000e+00> : vector<5x8xf32>
    %74 = tpu.matmul %73, %60, %cst_49 {dimension_numbers = #tpu.dot_dimension_numbers<[1], [0], [0], [1], [0, 0, 1, 1], [], []>} : vector<5x5xf32>, vector<5x8xf32>, vector<5x8xf32> -> vector<5x8xf32>
    %c0_50 = arith.constant 0 : index
    %c0_51 = arith.constant 0 : index
    %c0_52 = arith.constant 0 : index
    %75 = vector.load %arg14[%c0_50, %c0_51, %c0_52] : memref<8x8x32xf32, #tpu.memory_space<vmem>>, vector<1x8x32xf32>
    %76 = vector.shape_cast %75 : vector<1x8x32xf32> to vector<8x32xf32>
    %cst_53 = arith.constant dense<0.000000e+00> : vector<5x32xf32>
    %77 = tpu.matmul %74, %76, %cst_53 {dimension_numbers = #tpu.dot_dimension_numbers<[1], [0], [0], [1], [0, 0, 1, 1], [], []>} : vector<5x8xf32>, vector<8x32xf32>, vector<5x32xf32> -> vector<5x32xf32>
    %78 = arith.addf %39, %77 : vector<5x32xf32>
    %c1_54 = arith.constant 1 : index
    %c0_55 = arith.constant 0 : index
    %c0_56 = arith.constant 0 : index
    %79 = vector.load %arg8[%c1_54, %c0_55, %c0_56] : memref<8x32x8xf32, #tpu.memory_space<vmem>>, vector<1x32x8xf32>
    %80 = vector.shape_cast %79 : vector<1x32x8xf32> to vector<32x8xf32>
    %cst_57 = arith.constant dense<0.000000e+00> : vector<5x8xf32>
    %81 = tpu.matmul %38, %80, %cst_57 {dimension_numbers = #tpu.dot_dimension_numbers<[1], [0], [0], [1], [0, 0, 1, 1], [], []>} : vector<5x32xf32>, vector<32x8xf32>, vector<5x8xf32> -> vector<5x8xf32>
    %c1_58 = arith.constant 1 : index
    %c0_59 = arith.constant 0 : index
    %c0_60 = arith.constant 0 : index
    %82 = vector.load %arg9[%c1_58, %c0_59, %c0_60] : memref<8x1x8xf32, #tpu.memory_space<vmem>>, vector<1x1x8xf32>
    %83 = vector.shape_cast %82 : vector<1x1x8xf32> to vector<1x8xf32>
    %84 = vector.broadcast %83 : vector<1x8xf32> to vector<5x8xf32>
    %85 = arith.addf %81, %84 : vector<5x8xf32>
    %c1_61 = arith.constant 1 : index
    %c0_62 = arith.constant 0 : index
    %c0_63 = arith.constant 0 : index
    %86 = vector.load %arg10[%c1_61, %c0_62, %c0_63] : memref<8x32x8xf32, #tpu.memory_space<vmem>>, vector<1x32x8xf32>
    %87 = vector.shape_cast %86 : vector<1x32x8xf32> to vector<32x8xf32>
    %cst_64 = arith.constant dense<0.000000e+00> : vector<5x8xf32>
    %88 = tpu.matmul %38, %87, %cst_64 {dimension_numbers = #tpu.dot_dimension_numbers<[1], [0], [0], [1], [0, 0, 1, 1], [], []>} : vector<5x32xf32>, vector<32x8xf32>, vector<5x8xf32> -> vector<5x8xf32>
    %c1_65 = arith.constant 1 : index
    %c0_66 = arith.constant 0 : index
    %c0_67 = arith.constant 0 : index
    %89 = vector.load %arg11[%c1_65, %c0_66, %c0_67] : memref<8x1x8xf32, #tpu.memory_space<vmem>>, vector<1x1x8xf32>
    %90 = vector.shape_cast %89 : vector<1x1x8xf32> to vector<1x8xf32>
    %91 = vector.broadcast %90 : vector<1x8xf32> to vector<5x8xf32>
    %92 = arith.addf %88, %91 : vector<5x8xf32>
    %c1_68 = arith.constant 1 : index
    %c0_69 = arith.constant 0 : index
    %c0_70 = arith.constant 0 : index
    %93 = vector.load %arg12[%c1_68, %c0_69, %c0_70] : memref<8x32x8xf32, #tpu.memory_space<vmem>>, vector<1x32x8xf32>
    %94 = vector.shape_cast %93 : vector<1x32x8xf32> to vector<32x8xf32>
    %cst_71 = arith.constant dense<0.000000e+00> : vector<5x8xf32>
    %95 = tpu.matmul %38, %94, %cst_71 {dimension_numbers = #tpu.dot_dimension_numbers<[1], [0], [0], [1], [0, 0, 1, 1], [], []>} : vector<5x32xf32>, vector<32x8xf32>, vector<5x8xf32> -> vector<5x8xf32>
    %c1_72 = arith.constant 1 : index
    %c0_73 = arith.constant 0 : index
    %c0_74 = arith.constant 0 : index
    %96 = vector.load %arg13[%c1_72, %c0_73, %c0_74] : memref<8x1x8xf32, #tpu.memory_space<vmem>>, vector<1x1x8xf32>
    %97 = vector.shape_cast %96 : vector<1x1x8xf32> to vector<1x8xf32>
    %98 = vector.broadcast %97 : vector<1x8xf32> to vector<5x8xf32>
    %99 = arith.addf %95, %98 : vector<5x8xf32>
    %cst_75 = arith.constant dense<0.000000e+00> : vector<5x5xf32>
    %100 = tpu.matmul %85, %92, %cst_75 {dimension_numbers = #tpu.dot_dimension_numbers<[1], [1], [0], [0], [0, 0, 1, 0], [], []>} : vector<5x8xf32>, vector<5x8xf32>, vector<5x5xf32> -> vector<5x5xf32>
    %cst_76 = arith.constant 0.353553385 : f32
    %101 = vector.broadcast %cst_76 : f32 to vector<5x5xf32>
    %102 = arith.mulf %100, %101 : vector<5x5xf32>
    %cst_77 = arith.constant dense<0xFF800000> : vector<5xf32>
    %103 = vector.multi_reduction <maximumf>, %102, %cst_77 [1] : vector<5x5xf32> to vector<5xf32>
    %104 = vector.shape_cast %103 : vector<5xf32> to vector<5x1xf32>
    %105 = vector.broadcast %104 : vector<5x1xf32> to vector<5x5xf32>
    %106 = arith.subf %102, %105 : vector<5x5xf32>
    %107 = math.exp %106 : vector<5x5xf32>
    %cst_78 = arith.constant dense<0.000000e+00> : vector<5xf32>
    %108 = vector.multi_reduction <add>, %107, %cst_78 [1] : vector<5x5xf32> to vector<5xf32>
    %109 = vector.shape_cast %108 : vector<5xf32> to vector<5x1xf32>
    %110 = tpu.reciprocal %109 {approx = true} : vector<5x1xf32> -> vector<5x1xf32>
    %111 = vector.broadcast %110 : vector<5x1xf32> to vector<5x5xf32>
    %112 = arith.mulf %107, %111 : vector<5x5xf32>
    %cst_79 = arith.constant dense<0.000000e+00> : vector<5x8xf32>
    %113 = tpu.matmul %112, %99, %cst_79 {dimension_numbers = #tpu.dot_dimension_numbers<[1], [0], [0], [1], [0, 0, 1, 1], [], []>} : vector<5x5xf32>, vector<5x8xf32>, vector<5x8xf32> -> vector<5x8xf32>
    %c1_80 = arith.constant 1 : index
    %c0_81 = arith.constant 0 : index
    %c0_82 = arith.constant 0 : index
    %114 = vector.load %arg14[%c1_80, %c0_81, %c0_82] : memref<8x8x32xf32, #tpu.memory_space<vmem>>, vector<1x8x32xf32>
    %115 = vector.shape_cast %114 : vector<1x8x32xf32> to vector<8x32xf32>
    %cst_83 = arith.constant dense<0.000000e+00> : vector<5x32xf32>
    %116 = tpu.matmul %113, %115, %cst_83 {dimension_numbers = #tpu.dot_dimension_numbers<[1], [0], [0], [1], [0, 0, 1, 1], [], []>} : vector<5x8xf32>, vector<8x32xf32>, vector<5x32xf32> -> vector<5x32xf32>
    %117 = arith.addf %78, %116 : vector<5x32xf32>
    %c2 = arith.constant 2 : index
    %c0_84 = arith.constant 0 : index
    %c0_85 = arith.constant 0 : index
    %118 = vector.load %arg8[%c2, %c0_84, %c0_85] : memref<8x32x8xf32, #tpu.memory_space<vmem>>, vector<1x32x8xf32>
    %119 = vector.shape_cast %118 : vector<1x32x8xf32> to vector<32x8xf32>
    %cst_86 = arith.constant dense<0.000000e+00> : vector<5x8xf32>
    %120 = tpu.matmul %38, %119, %cst_86 {dimension_numbers = #tpu.dot_dimension_numbers<[1], [0], [0], [1], [0, 0, 1, 1], [], []>} : vector<5x32xf32>, vector<32x8xf32>, vector<5x8xf32> -> vector<5x8xf32>
    %c2_87 = arith.constant 2 : index
    %c0_88 = arith.constant 0 : index
    %c0_89 = arith.constant 0 : index
    %121 = vector.load %arg9[%c2_87, %c0_88, %c0_89] : memref<8x1x8xf32, #tpu.memory_space<vmem>>, vector<1x1x8xf32>
    %122 = vector.shape_cast %121 : vector<1x1x8xf32> to vector<1x8xf32>
    %123 = vector.broadcast %122 : vector<1x8xf32> to vector<5x8xf32>
    %124 = arith.addf %120, %123 : vector<5x8xf32>
    %c2_90 = arith.constant 2 : index
    %c0_91 = arith.constant 0 : index
    %c0_92 = arith.constant 0 : index
    %125 = vector.load %arg10[%c2_90, %c0_91, %c0_92] : memref<8x32x8xf32, #tpu.memory_space<vmem>>, vector<1x32x8xf32>
    %126 = vector.shape_cast %125 : vector<1x32x8xf32> to vector<32x8xf32>
    %cst_93 = arith.constant dense<0.000000e+00> : vector<5x8xf32>
    %127 = tpu.matmul %38, %126, %cst_93 {dimension_numbers = #tpu.dot_dimension_numbers<[1], [0], [0], [1], [0, 0, 1, 1], [], []>} : vector<5x32xf32>, vector<32x8xf32>, vector<5x8xf32> -> vector<5x8xf32>
    %c2_94 = arith.constant 2 : index
    %c0_95 = arith.constant 0 : index
    %c0_96 = arith.constant 0 : index
    %128 = vector.load %arg11[%c2_94, %c0_95, %c0_96] : memref<8x1x8xf32, #tpu.memory_space<vmem>>, vector<1x1x8xf32>
    %129 = vector.shape_cast %128 : vector<1x1x8xf32> to vector<1x8xf32>
    %130 = vector.broadcast %129 : vector<1x8xf32> to vector<5x8xf32>
    %131 = arith.addf %127, %130 : vector<5x8xf32>
    %c2_97 = arith.constant 2 : index
    %c0_98 = arith.constant 0 : index
    %c0_99 = arith.constant 0 : index
    %132 = vector.load %arg12[%c2_97, %c0_98, %c0_99] : memref<8x32x8xf32, #tpu.memory_space<vmem>>, vector<1x32x8xf32>
    %133 = vector.shape_cast %132 : vector<1x32x8xf32> to vector<32x8xf32>
    %cst_100 = arith.constant dense<0.000000e+00> : vector<5x8xf32>
    %134 = tpu.matmul %38, %133, %cst_100 {dimension_numbers = #tpu.dot_dimension_numbers<[1], [0], [0], [1], [0, 0, 1, 1], [], []>} : vector<5x32xf32>, vector<32x8xf32>, vector<5x8xf32> -> vector<5x8xf32>
    %c2_101 = arith.constant 2 : index
    %c0_102 = arith.constant 0 : index
    %c0_103 = arith.constant 0 : index
    %135 = vector.load %arg13[%c2_101, %c0_102, %c0_103] : memref<8x1x8xf32, #tpu.memory_space<vmem>>, vector<1x1x8xf32>
    %136 = vector.shape_cast %135 : vector<1x1x8xf32> to vector<1x8xf32>
    %137 = vector.broadcast %136 : vector<1x8xf32> to vector<5x8xf32>
    %138 = arith.addf %134, %137 : vector<5x8xf32>
    %cst_104 = arith.constant dense<0.000000e+00> : vector<5x5xf32>
    %139 = tpu.matmul %124, %131, %cst_104 {dimension_numbers = #tpu.dot_dimension_numbers<[1], [1], [0], [0], [0, 0, 1, 0], [], []>} : vector<5x8xf32>, vector<5x8xf32>, vector<5x5xf32> -> vector<5x5xf32>
    %cst_105 = arith.constant 0.353553385 : f32
    %140 = vector.broadcast %cst_105 : f32 to vector<5x5xf32>
    %141 = arith.mulf %139, %140 : vector<5x5xf32>
    %cst_106 = arith.constant dense<0xFF800000> : vector<5xf32>
    %142 = vector.multi_reduction <maximumf>, %141, %cst_106 [1] : vector<5x5xf32> to vector<5xf32>
    %143 = vector.shape_cast %142 : vector<5xf32> to vector<5x1xf32>
    %144 = vector.broadcast %143 : vector<5x1xf32> to vector<5x5xf32>
    %145 = arith.subf %141, %144 : vector<5x5xf32>
    %146 = math.exp %145 : vector<5x5xf32>
    %cst_107 = arith.constant dense<0.000000e+00> : vector<5xf32>
    %147 = vector.multi_reduction <add>, %146, %cst_107 [1] : vector<5x5xf32> to vector<5xf32>
    %148 = vector.shape_cast %147 : vector<5xf32> to vector<5x1xf32>
    %149 = tpu.reciprocal %148 {approx = true} : vector<5x1xf32> -> vector<5x1xf32>
    %150 = vector.broadcast %149 : vector<5x1xf32> to vector<5x5xf32>
    %151 = arith.mulf %146, %150 : vector<5x5xf32>
    %cst_108 = arith.constant dense<0.000000e+00> : vector<5x8xf32>
    %152 = tpu.matmul %151, %138, %cst_108 {dimension_numbers = #tpu.dot_dimension_numbers<[1], [0], [0], [1], [0, 0, 1, 1], [], []>} : vector<5x5xf32>, vector<5x8xf32>, vector<5x8xf32> -> vector<5x8xf32>
    %c2_109 = arith.constant 2 : index
    %c0_110 = arith.constant 0 : index
    %c0_111 = arith.constant 0 : index
    %153 = vector.load %arg14[%c2_109, %c0_110, %c0_111] : memref<8x8x32xf32, #tpu.memory_space<vmem>>, vector<1x8x32xf32>
    %154 = vector.shape_cast %153 : vector<1x8x32xf32> to vector<8x32xf32>
    %cst_112 = arith.constant dense<0.000000e+00> : vector<5x32xf32>
    %155 = tpu.matmul %152, %154, %cst_112 {dimension_numbers = #tpu.dot_dimension_numbers<[1], [0], [0], [1], [0, 0, 1, 1], [], []>} : vector<5x8xf32>, vector<8x32xf32>, vector<5x32xf32> -> vector<5x32xf32>
    %156 = arith.addf %117, %155 : vector<5x32xf32>
    %c3 = arith.constant 3 : index
    %c0_113 = arith.constant 0 : index
    %c0_114 = arith.constant 0 : index
    %157 = vector.load %arg8[%c3, %c0_113, %c0_114] : memref<8x32x8xf32, #tpu.memory_space<vmem>>, vector<1x32x8xf32>
    %158 = vector.shape_cast %157 : vector<1x32x8xf32> to vector<32x8xf32>
    %cst_115 = arith.constant dense<0.000000e+00> : vector<5x8xf32>
    %159 = tpu.matmul %38, %158, %cst_115 {dimension_numbers = #tpu.dot_dimension_numbers<[1], [0], [0], [1], [0, 0, 1, 1], [], []>} : vector<5x32xf32>, vector<32x8xf32>, vector<5x8xf32> -> vector<5x8xf32>
    %c3_116 = arith.constant 3 : index
    %c0_117 = arith.constant 0 : index
    %c0_118 = arith.constant 0 : index
    %160 = vector.load %arg9[%c3_116, %c0_117, %c0_118] : memref<8x1x8xf32, #tpu.memory_space<vmem>>, vector<1x1x8xf32>
    %161 = vector.shape_cast %160 : vector<1x1x8xf32> to vector<1x8xf32>
    %162 = vector.broadcast %161 : vector<1x8xf32> to vector<5x8xf32>
    %163 = arith.addf %159, %162 : vector<5x8xf32>
    %c3_119 = arith.constant 3 : index
    %c0_120 = arith.constant 0 : index
    %c0_121 = arith.constant 0 : index
    %164 = vector.load %arg10[%c3_119, %c0_120, %c0_121] : memref<8x32x8xf32, #tpu.memory_space<vmem>>, vector<1x32x8xf32>
    %165 = vector.shape_cast %164 : vector<1x32x8xf32> to vector<32x8xf32>
    %cst_122 = arith.constant dense<0.000000e+00> : vector<5x8xf32>
    %166 = tpu.matmul %38, %165, %cst_122 {dimension_numbers = #tpu.dot_dimension_numbers<[1], [0], [0], [1], [0, 0, 1, 1], [], []>} : vector<5x32xf32>, vector<32x8xf32>, vector<5x8xf32> -> vector<5x8xf32>
    %c3_123 = arith.constant 3 : index
    %c0_124 = arith.constant 0 : index
    %c0_125 = arith.constant 0 : index
    %167 = vector.load %arg11[%c3_123, %c0_124, %c0_125] : memref<8x1x8xf32, #tpu.memory_space<vmem>>, vector<1x1x8xf32>
    %168 = vector.shape_cast %167 : vector<1x1x8xf32> to vector<1x8xf32>
    %169 = vector.broadcast %168 : vector<1x8xf32> to vector<5x8xf32>
    %170 = arith.addf %166, %169 : vector<5x8xf32>
    %c3_126 = arith.constant 3 : index
    %c0_127 = arith.constant 0 : index
    %c0_128 = arith.constant 0 : index
    %171 = vector.load %arg12[%c3_126, %c0_127, %c0_128] : memref<8x32x8xf32, #tpu.memory_space<vmem>>, vector<1x32x8xf32>
    %172 = vector.shape_cast %171 : vector<1x32x8xf32> to vector<32x8xf32>
    %cst_129 = arith.constant dense<0.000000e+00> : vector<5x8xf32>
    %173 = tpu.matmul %38, %172, %cst_129 {dimension_numbers = #tpu.dot_dimension_numbers<[1], [0], [0], [1], [0, 0, 1, 1], [], []>} : vector<5x32xf32>, vector<32x8xf32>, vector<5x8xf32> -> vector<5x8xf32>
    %c3_130 = arith.constant 3 : index
    %c0_131 = arith.constant 0 : index
    %c0_132 = arith.constant 0 : index
    %174 = vector.load %arg13[%c3_130, %c0_131, %c0_132] : memref<8x1x8xf32, #tpu.memory_space<vmem>>, vector<1x1x8xf32>
    %175 = vector.shape_cast %174 : vector<1x1x8xf32> to vector<1x8xf32>
    %176 = vector.broadcast %175 : vector<1x8xf32> to vector<5x8xf32>
    %177 = arith.addf %173, %176 : vector<5x8xf32>
    %cst_133 = arith.constant dense<0.000000e+00> : vector<5x5xf32>
    %178 = tpu.matmul %163, %170, %cst_133 {dimension_numbers = #tpu.dot_dimension_numbers<[1], [1], [0], [0], [0, 0, 1, 0], [], []>} : vector<5x8xf32>, vector<5x8xf32>, vector<5x5xf32> -> vector<5x5xf32>
    %cst_134 = arith.constant 0.353553385 : f32
    %179 = vector.broadcast %cst_134 : f32 to vector<5x5xf32>
    %180 = arith.mulf %178, %179 : vector<5x5xf32>
    %cst_135 = arith.constant dense<0xFF800000> : vector<5xf32>
    %181 = vector.multi_reduction <maximumf>, %180, %cst_135 [1] : vector<5x5xf32> to vector<5xf32>
    %182 = vector.shape_cast %181 : vector<5xf32> to vector<5x1xf32>
    %183 = vector.broadcast %182 : vector<5x1xf32> to vector<5x5xf32>
    %184 = arith.subf %180, %183 : vector<5x5xf32>
    %185 = math.exp %184 : vector<5x5xf32>
    %cst_136 = arith.constant dense<0.000000e+00> : vector<5xf32>
    %186 = vector.multi_reduction <add>, %185, %cst_136 [1] : vector<5x5xf32> to vector<5xf32>
    %187 = vector.shape_cast %186 : vector<5xf32> to vector<5x1xf32>
    %188 = tpu.reciprocal %187 {approx = true} : vector<5x1xf32> -> vector<5x1xf32>
    %189 = vector.broadcast %188 : vector<5x1xf32> to vector<5x5xf32>
    %190 = arith.mulf %185, %189 : vector<5x5xf32>
    %cst_137 = arith.constant dense<0.000000e+00> : vector<5x8xf32>
    %191 = tpu.matmul %190, %177, %cst_137 {dimension_numbers = #tpu.dot_dimension_numbers<[1], [0], [0], [1], [0, 0, 1, 1], [], []>} : vector<5x5xf32>, vector<5x8xf32>, vector<5x8xf32> -> vector<5x8xf32>
    %c3_138 = arith.constant 3 : index
    %c0_139 = arith.constant 0 : index
    %c0_140 = arith.constant 0 : index
    %192 = vector.load %arg14[%c3_138, %c0_139, %c0_140] : memref<8x8x32xf32, #tpu.memory_space<vmem>>, vector<1x8x32xf32>
    %193 = vector.shape_cast %192 : vector<1x8x32xf32> to vector<8x32xf32>
    %cst_141 = arith.constant dense<0.000000e+00> : vector<5x32xf32>
    %194 = tpu.matmul %191, %193, %cst_141 {dimension_numbers = #tpu.dot_dimension_numbers<[1], [0], [0], [1], [0, 0, 1, 1], [], []>} : vector<5x8xf32>, vector<8x32xf32>, vector<5x32xf32> -> vector<5x32xf32>
    %195 = arith.addf %156, %194 : vector<5x32xf32>
    %196 = arith.addf %14, %195 : vector<5x32xf32>
    %c0_142 = arith.constant 0 : index
    %c0_143 = arith.constant 0 : index
    %c0_144 = arith.constant 0 : index
    %197 = vector.load %arg15[%c0_142, %c0_143, %c0_144] : memref<2x1x32xf32, #tpu.memory_space<vmem>>, vector<1x1x32xf32>
    %198 = vector.shape_cast %197 : vector<1x1x32xf32> to vector<1x32xf32>
    %199 = vector.broadcast %198 : vector<1x32xf32> to vector<5x32xf32>
    %200 = arith.addf %196, %199 : vector<5x32xf32>
    %c0_145 = arith.constant 0 : index
    %c0_146 = arith.constant 0 : index
    %c0_147 = arith.constant 0 : index
    %201 = vector.load %arg16[%c0_145, %c0_146, %c0_147] : memref<2x1x32xf32, #tpu.memory_space<vmem>>, vector<1x1x32xf32>
    %202 = vector.shape_cast %201 : vector<1x1x32xf32> to vector<1x32xf32>
    %c0_148 = arith.constant 0 : index
    %c0_149 = arith.constant 0 : index
    %c0_150 = arith.constant 0 : index
    %203 = vector.load %arg17[%c0_148, %c0_149, %c0_150] : memref<2x1x32xf32, #tpu.memory_space<vmem>>, vector<1x1x32xf32>
    %204 = vector.shape_cast %203 : vector<1x1x32xf32> to vector<1x32xf32>
    %cst_151 = arith.constant dense<0.000000e+00> : vector<5xf32>
    %205 = vector.multi_reduction <add>, %200, %cst_151 [1] : vector<5x32xf32> to vector<5xf32>
    %206 = vector.shape_cast %205 : vector<5xf32> to vector<5x1xf32>
    %cst_152 = arith.constant 3.200000e+01 : f32
    %207 = vector.broadcast %cst_152 : f32 to vector<5x1xf32>
    %208 = arith.divf %206, %207 : vector<5x1xf32>
    %209 = vector.broadcast %208 : vector<5x1xf32> to vector<5x32xf32>
    %210 = arith.subf %200, %209 : vector<5x32xf32>
    %211 = arith.mulf %210, %210 : vector<5x32xf32>
    %cst_153 = arith.constant dense<0.000000e+00> : vector<5xf32>
    %212 = vector.multi_reduction <add>, %211, %cst_153 [1] : vector<5x32xf32> to vector<5xf32>
    %213 = vector.shape_cast %212 : vector<5xf32> to vector<5x1xf32>
    %cst_154 = arith.constant 3.200000e+01 : f32
    %214 = vector.broadcast %cst_154 : f32 to vector<5x1xf32>
    %215 = arith.divf %213, %214 : vector<5x1xf32>
    %cst_155 = arith.constant 9.99999997E-7 : f32
    %216 = vector.broadcast %cst_155 : f32 to vector<5x1xf32>
    %217 = arith.addf %215, %216 : vector<5x1xf32>
    %218 = math.rsqrt %217 : vector<5x1xf32>
    %219 = vector.broadcast %218 : vector<5x1xf32> to vector<5x32xf32>
    %220 = arith.mulf %210, %219 : vector<5x32xf32>
    %221 = vector.broadcast %202 : vector<1x32xf32> to vector<5x32xf32>
    %222 = arith.mulf %220, %221 : vector<5x32xf32>
    %223 = vector.broadcast %204 : vector<1x32xf32> to vector<5x32xf32>
    %224 = arith.addf %222, %223 : vector<5x32xf32>
    %c0_156 = arith.constant 0 : index
    %c0_157 = arith.constant 0 : index
    %c0_158 = arith.constant 0 : index
    %225 = vector.load %arg18[%c0_156, %c0_157, %c0_158] : memref<2x32x128xf32, #tpu.memory_space<vmem>>, vector<1x32x128xf32>
    %226 = vector.shape_cast %225 : vector<1x32x128xf32> to vector<32x128xf32>
    %cst_159 = arith.constant dense<0.000000e+00> : vector<5x128xf32>
    %227 = tpu.matmul %224, %226, %cst_159 {dimension_numbers = #tpu.dot_dimension_numbers<[1], [0], [0], [1], [0, 0, 1, 1], [], []>} : vector<5x32xf32>, vector<32x128xf32>, vector<5x128xf32> -> vector<5x128xf32>
    %c0_160 = arith.constant 0 : index
    %c0_161 = arith.constant 0 : index
    %c0_162 = arith.constant 0 : index
    %228 = vector.load %arg19[%c0_160, %c0_161, %c0_162] : memref<2x1x128xf32, #tpu.memory_space<vmem>>, vector<1x1x128xf32>
    %229 = vector.shape_cast %228 : vector<1x1x128xf32> to vector<1x128xf32>
    %230 = vector.broadcast %229 : vector<1x128xf32> to vector<5x128xf32>
    %231 = arith.addf %227, %230 : vector<5x128xf32>
    %cst_163 = arith.constant 5.000000e-01 : f32
    %232 = vector.broadcast %cst_163 : f32 to vector<5x128xf32>
    %233 = arith.mulf %232, %231 : vector<5x128xf32>
    %cst_164 = arith.constant 0.707106769 : f32
    %234 = vector.broadcast %cst_164 : f32 to vector<5x128xf32>
    %235 = arith.mulf %231, %234 : vector<5x128xf32>
    %236 = math.absf %235 : vector<5x128xf32>
    %cst_165 = arith.constant 0.327591091 : f32
    %237 = vector.broadcast %cst_165 : f32 to vector<5x128xf32>
    %238 = arith.mulf %237, %236 : vector<5x128xf32>
    %cst_166 = arith.constant 1.000000e+00 : f32
    %239 = vector.broadcast %cst_166 : f32 to vector<5x128xf32>
    %240 = arith.addf %239, %238 : vector<5x128xf32>
    %cst_167 = arith.constant 1.000000e+00 : f32
    %241 = vector.broadcast %cst_167 : f32 to vector<5x128xf32>
    %242 = arith.divf %241, %240 : vector<5x128xf32>
    %cst_168 = arith.constant 1.06140542 : f32
    %243 = vector.broadcast %cst_168 : f32 to vector<5x128xf32>
    %244 = arith.mulf %243, %242 : vector<5x128xf32>
    %cst_169 = arith.constant -1.45315206 : f32
    %245 = vector.broadcast %cst_169 : f32 to vector<5x128xf32>
    %246 = arith.addf %244, %245 : vector<5x128xf32>
    %247 = arith.mulf %246, %242 : vector<5x128xf32>
    %cst_170 = arith.constant 1.42141378 : f32
    %248 = vector.broadcast %cst_170 : f32 to vector<5x128xf32>
    %249 = arith.addf %247, %248 : vector<5x128xf32>
    %250 = arith.mulf %249, %242 : vector<5x128xf32>
    %cst_171 = arith.constant -0.284496725 : f32
    %251 = vector.broadcast %cst_171 : f32 to vector<5x128xf32>
    %252 = arith.addf %250, %251 : vector<5x128xf32>
    %253 = arith.mulf %252, %242 : vector<5x128xf32>
    %cst_172 = arith.constant 0.254829586 : f32
    %254 = vector.broadcast %cst_172 : f32 to vector<5x128xf32>
    %255 = arith.addf %253, %254 : vector<5x128xf32>
    %256 = arith.mulf %255, %242 : vector<5x128xf32>
    %cst_173 = arith.constant 0.000000e+00 : f32
    %257 = vector.broadcast %cst_173 : f32 to vector<5x128xf32>
    %258 = arith.subf %257, %236 : vector<5x128xf32>
    %259 = arith.mulf %258, %236 : vector<5x128xf32>
    %260 = math.exp %259 : vector<5x128xf32>
    %261 = arith.mulf %256, %260 : vector<5x128xf32>
    %cst_174 = arith.constant 1.000000e+00 : f32
    %262 = vector.broadcast %cst_174 : f32 to vector<5x128xf32>
    %263 = arith.subf %262, %261 : vector<5x128xf32>
    %cst_175 = arith.constant 0.000000e+00 : f32
    %264 = vector.broadcast %cst_175 : f32 to vector<5x128xf32>
    %265 = arith.cmpf oge, %235, %264 : vector<5x128xf32>
    %cst_176 = arith.constant 0.000000e+00 : f32
    %266 = vector.broadcast %cst_176 : f32 to vector<5x128xf32>
    %267 = arith.subf %266, %263 : vector<5x128xf32>
    %268 = arith.select %265, %263, %267 : vector<5x128xi1>, vector<5x128xf32>
    %cst_177 = arith.constant 1.000000e+00 : f32
    %269 = vector.broadcast %cst_177 : f32 to vector<5x128xf32>
    %270 = arith.addf %269, %268 : vector<5x128xf32>
    %271 = arith.mulf %233, %270 : vector<5x128xf32>
    %c0_178 = arith.constant 0 : index
    %c0_179 = arith.constant 0 : index
    %c0_180 = arith.constant 0 : index
    %272 = vector.load %arg20[%c0_178, %c0_179, %c0_180] : memref<2x128x32xf32, #tpu.memory_space<vmem>>, vector<1x128x32xf32>
    %273 = vector.shape_cast %272 : vector<1x128x32xf32> to vector<128x32xf32>
    %cst_181 = arith.constant dense<0.000000e+00> : vector<5x32xf32>
    %274 = tpu.matmul %271, %273, %cst_181 {dimension_numbers = #tpu.dot_dimension_numbers<[1], [0], [0], [1], [0, 0, 1, 1], [], []>} : vector<5x128xf32>, vector<128x32xf32>, vector<5x32xf32> -> vector<5x32xf32>
    %c0_182 = arith.constant 0 : index
    %c0_183 = arith.constant 0 : index
    %c0_184 = arith.constant 0 : index
    %275 = vector.load %arg21[%c0_182, %c0_183, %c0_184] : memref<2x1x32xf32, #tpu.memory_space<vmem>>, vector<1x1x32xf32>
    %276 = vector.shape_cast %275 : vector<1x1x32xf32> to vector<1x32xf32>
    %277 = vector.broadcast %276 : vector<1x32xf32> to vector<5x32xf32>
    %278 = arith.addf %274, %277 : vector<5x32xf32>
    %279 = arith.addf %200, %278 : vector<5x32xf32>
    %c1_185 = arith.constant 1 : index
    %c0_186 = arith.constant 0 : index
    %c0_187 = arith.constant 0 : index
    %280 = vector.load %arg6[%c1_185, %c0_186, %c0_187] : memref<2x1x32xf32, #tpu.memory_space<vmem>>, vector<1x1x32xf32>
    %281 = vector.shape_cast %280 : vector<1x1x32xf32> to vector<1x32xf32>
    %c1_188 = arith.constant 1 : index
    %c0_189 = arith.constant 0 : index
    %c0_190 = arith.constant 0 : index
    %282 = vector.load %arg7[%c1_188, %c0_189, %c0_190] : memref<2x1x32xf32, #tpu.memory_space<vmem>>, vector<1x1x32xf32>
    %283 = vector.shape_cast %282 : vector<1x1x32xf32> to vector<1x32xf32>
    %cst_191 = arith.constant dense<0.000000e+00> : vector<5xf32>
    %284 = vector.multi_reduction <add>, %279, %cst_191 [1] : vector<5x32xf32> to vector<5xf32>
    %285 = vector.shape_cast %284 : vector<5xf32> to vector<5x1xf32>
    %cst_192 = arith.constant 3.200000e+01 : f32
    %286 = vector.broadcast %cst_192 : f32 to vector<5x1xf32>
    %287 = arith.divf %285, %286 : vector<5x1xf32>
    %288 = vector.broadcast %287 : vector<5x1xf32> to vector<5x32xf32>
    %289 = arith.subf %279, %288 : vector<5x32xf32>
    %290 = arith.mulf %289, %289 : vector<5x32xf32>
    %cst_193 = arith.constant dense<0.000000e+00> : vector<5xf32>
    %291 = vector.multi_reduction <add>, %290, %cst_193 [1] : vector<5x32xf32> to vector<5xf32>
    %292 = vector.shape_cast %291 : vector<5xf32> to vector<5x1xf32>
    %cst_194 = arith.constant 3.200000e+01 : f32
    %293 = vector.broadcast %cst_194 : f32 to vector<5x1xf32>
    %294 = arith.divf %292, %293 : vector<5x1xf32>
    %cst_195 = arith.constant 9.99999997E-7 : f32
    %295 = vector.broadcast %cst_195 : f32 to vector<5x1xf32>
    %296 = arith.addf %294, %295 : vector<5x1xf32>
    %297 = math.rsqrt %296 : vector<5x1xf32>
    %298 = vector.broadcast %297 : vector<5x1xf32> to vector<5x32xf32>
    %299 = arith.mulf %289, %298 : vector<5x32xf32>
    %300 = vector.broadcast %281 : vector<1x32xf32> to vector<5x32xf32>
    %301 = arith.mulf %299, %300 : vector<5x32xf32>
    %302 = vector.broadcast %283 : vector<1x32xf32> to vector<5x32xf32>
    %303 = arith.addf %301, %302 : vector<5x32xf32>
    %cst_196 = arith.constant 0.000000e+00 : f32
    %304 = vector.broadcast %cst_196 : f32 to vector<5x32xf32>
    %c4 = arith.constant 4 : index
    %c0_197 = arith.constant 0 : index
    %c0_198 = arith.constant 0 : index
    %305 = vector.load %arg8[%c4, %c0_197, %c0_198] : memref<8x32x8xf32, #tpu.memory_space<vmem>>, vector<1x32x8xf32>
    %306 = vector.shape_cast %305 : vector<1x32x8xf32> to vector<32x8xf32>
    %cst_199 = arith.constant dense<0.000000e+00> : vector<5x8xf32>
    %307 = tpu.matmul %303, %306, %cst_199 {dimension_numbers = #tpu.dot_dimension_numbers<[1], [0], [0], [1], [0, 0, 1, 1], [], []>} : vector<5x32xf32>, vector<32x8xf32>, vector<5x8xf32> -> vector<5x8xf32>
    %c4_200 = arith.constant 4 : index
    %c0_201 = arith.constant 0 : index
    %c0_202 = arith.constant 0 : index
    %308 = vector.load %arg9[%c4_200, %c0_201, %c0_202] : memref<8x1x8xf32, #tpu.memory_space<vmem>>, vector<1x1x8xf32>
    %309 = vector.shape_cast %308 : vector<1x1x8xf32> to vector<1x8xf32>
    %310 = vector.broadcast %309 : vector<1x8xf32> to vector<5x8xf32>
    %311 = arith.addf %307, %310 : vector<5x8xf32>
    %c4_203 = arith.constant 4 : index
    %c0_204 = arith.constant 0 : index
    %c0_205 = arith.constant 0 : index
    %312 = vector.load %arg10[%c4_203, %c0_204, %c0_205] : memref<8x32x8xf32, #tpu.memory_space<vmem>>, vector<1x32x8xf32>
    %313 = vector.shape_cast %312 : vector<1x32x8xf32> to vector<32x8xf32>
    %cst_206 = arith.constant dense<0.000000e+00> : vector<5x8xf32>
    %314 = tpu.matmul %303, %313, %cst_206 {dimension_numbers = #tpu.dot_dimension_numbers<[1], [0], [0], [1], [0, 0, 1, 1], [], []>} : vector<5x32xf32>, vector<32x8xf32>, vector<5x8xf32> -> vector<5x8xf32>
    %c4_207 = arith.constant 4 : index
    %c0_208 = arith.constant 0 : index
    %c0_209 = arith.constant 0 : index
    %315 = vector.load %arg11[%c4_207, %c0_208, %c0_209] : memref<8x1x8xf32, #tpu.memory_space<vmem>>, vector<1x1x8xf32>
    %316 = vector.shape_cast %315 : vector<1x1x8xf32> to vector<1x8xf32>
    %317 = vector.broadcast %316 : vector<1x8xf32> to vector<5x8xf32>
    %318 = arith.addf %314, %317 : vector<5x8xf32>
    %c4_210 = arith.constant 4 : index
    %c0_211 = arith.constant 0 : index
    %c0_212 = arith.constant 0 : index
    %319 = vector.load %arg12[%c4_210, %c0_211, %c0_212] : memref<8x32x8xf32, #tpu.memory_space<vmem>>, vector<1x32x8xf32>
    %320 = vector.shape_cast %319 : vector<1x32x8xf32> to vector<32x8xf32>
    %cst_213 = arith.constant dense<0.000000e+00> : vector<5x8xf32>
    %321 = tpu.matmul %303, %320, %cst_213 {dimension_numbers = #tpu.dot_dimension_numbers<[1], [0], [0], [1], [0, 0, 1, 1], [], []>} : vector<5x32xf32>, vector<32x8xf32>, vector<5x8xf32> -> vector<5x8xf32>
    %c4_214 = arith.constant 4 : index
    %c0_215 = arith.constant 0 : index
    %c0_216 = arith.constant 0 : index
    %322 = vector.load %arg13[%c4_214, %c0_215, %c0_216] : memref<8x1x8xf32, #tpu.memory_space<vmem>>, vector<1x1x8xf32>
    %323 = vector.shape_cast %322 : vector<1x1x8xf32> to vector<1x8xf32>
    %324 = vector.broadcast %323 : vector<1x8xf32> to vector<5x8xf32>
    %325 = arith.addf %321, %324 : vector<5x8xf32>
    %cst_217 = arith.constant dense<0.000000e+00> : vector<5x5xf32>
    %326 = tpu.matmul %311, %318, %cst_217 {dimension_numbers = #tpu.dot_dimension_numbers<[1], [1], [0], [0], [0, 0, 1, 0], [], []>} : vector<5x8xf32>, vector<5x8xf32>, vector<5x5xf32> -> vector<5x5xf32>
    %cst_218 = arith.constant 0.353553385 : f32
    %327 = vector.broadcast %cst_218 : f32 to vector<5x5xf32>
    %328 = arith.mulf %326, %327 : vector<5x5xf32>
    %cst_219 = arith.constant dense<0xFF800000> : vector<5xf32>
    %329 = vector.multi_reduction <maximumf>, %328, %cst_219 [1] : vector<5x5xf32> to vector<5xf32>
    %330 = vector.shape_cast %329 : vector<5xf32> to vector<5x1xf32>
    %331 = vector.broadcast %330 : vector<5x1xf32> to vector<5x5xf32>
    %332 = arith.subf %328, %331 : vector<5x5xf32>
    %333 = math.exp %332 : vector<5x5xf32>
    %cst_220 = arith.constant dense<0.000000e+00> : vector<5xf32>
    %334 = vector.multi_reduction <add>, %333, %cst_220 [1] : vector<5x5xf32> to vector<5xf32>
    %335 = vector.shape_cast %334 : vector<5xf32> to vector<5x1xf32>
    %336 = tpu.reciprocal %335 {approx = true} : vector<5x1xf32> -> vector<5x1xf32>
    %337 = vector.broadcast %336 : vector<5x1xf32> to vector<5x5xf32>
    %338 = arith.mulf %333, %337 : vector<5x5xf32>
    %cst_221 = arith.constant dense<0.000000e+00> : vector<5x8xf32>
    %339 = tpu.matmul %338, %325, %cst_221 {dimension_numbers = #tpu.dot_dimension_numbers<[1], [0], [0], [1], [0, 0, 1, 1], [], []>} : vector<5x5xf32>, vector<5x8xf32>, vector<5x8xf32> -> vector<5x8xf32>
    %c4_222 = arith.constant 4 : index
    %c0_223 = arith.constant 0 : index
    %c0_224 = arith.constant 0 : index
    %340 = vector.load %arg14[%c4_222, %c0_223, %c0_224] : memref<8x8x32xf32, #tpu.memory_space<vmem>>, vector<1x8x32xf32>
    %341 = vector.shape_cast %340 : vector<1x8x32xf32> to vector<8x32xf32>
    %cst_225 = arith.constant dense<0.000000e+00> : vector<5x32xf32>
    %342 = tpu.matmul %339, %341, %cst_225 {dimension_numbers = #tpu.dot_dimension_numbers<[1], [0], [0], [1], [0, 0, 1, 1], [], []>} : vector<5x8xf32>, vector<8x32xf32>, vector<5x32xf32> -> vector<5x32xf32>
    %343 = arith.addf %304, %342 : vector<5x32xf32>
    %c5 = arith.constant 5 : index
    %c0_226 = arith.constant 0 : index
    %c0_227 = arith.constant 0 : index
    %344 = vector.load %arg8[%c5, %c0_226, %c0_227] : memref<8x32x8xf32, #tpu.memory_space<vmem>>, vector<1x32x8xf32>
    %345 = vector.shape_cast %344 : vector<1x32x8xf32> to vector<32x8xf32>
    %cst_228 = arith.constant dense<0.000000e+00> : vector<5x8xf32>
    %346 = tpu.matmul %303, %345, %cst_228 {dimension_numbers = #tpu.dot_dimension_numbers<[1], [0], [0], [1], [0, 0, 1, 1], [], []>} : vector<5x32xf32>, vector<32x8xf32>, vector<5x8xf32> -> vector<5x8xf32>
    %c5_229 = arith.constant 5 : index
    %c0_230 = arith.constant 0 : index
    %c0_231 = arith.constant 0 : index
    %347 = vector.load %arg9[%c5_229, %c0_230, %c0_231] : memref<8x1x8xf32, #tpu.memory_space<vmem>>, vector<1x1x8xf32>
    %348 = vector.shape_cast %347 : vector<1x1x8xf32> to vector<1x8xf32>
    %349 = vector.broadcast %348 : vector<1x8xf32> to vector<5x8xf32>
    %350 = arith.addf %346, %349 : vector<5x8xf32>
    %c5_232 = arith.constant 5 : index
    %c0_233 = arith.constant 0 : index
    %c0_234 = arith.constant 0 : index
    %351 = vector.load %arg10[%c5_232, %c0_233, %c0_234] : memref<8x32x8xf32, #tpu.memory_space<vmem>>, vector<1x32x8xf32>
    %352 = vector.shape_cast %351 : vector<1x32x8xf32> to vector<32x8xf32>
    %cst_235 = arith.constant dense<0.000000e+00> : vector<5x8xf32>
    %353 = tpu.matmul %303, %352, %cst_235 {dimension_numbers = #tpu.dot_dimension_numbers<[1], [0], [0], [1], [0, 0, 1, 1], [], []>} : vector<5x32xf32>, vector<32x8xf32>, vector<5x8xf32> -> vector<5x8xf32>
    %c5_236 = arith.constant 5 : index
    %c0_237 = arith.constant 0 : index
    %c0_238 = arith.constant 0 : index
    %354 = vector.load %arg11[%c5_236, %c0_237, %c0_238] : memref<8x1x8xf32, #tpu.memory_space<vmem>>, vector<1x1x8xf32>
    %355 = vector.shape_cast %354 : vector<1x1x8xf32> to vector<1x8xf32>
    %356 = vector.broadcast %355 : vector<1x8xf32> to vector<5x8xf32>
    %357 = arith.addf %353, %356 : vector<5x8xf32>
    %c5_239 = arith.constant 5 : index
    %c0_240 = arith.constant 0 : index
    %c0_241 = arith.constant 0 : index
    %358 = vector.load %arg12[%c5_239, %c0_240, %c0_241] : memref<8x32x8xf32, #tpu.memory_space<vmem>>, vector<1x32x8xf32>
    %359 = vector.shape_cast %358 : vector<1x32x8xf32> to vector<32x8xf32>
    %cst_242 = arith.constant dense<0.000000e+00> : vector<5x8xf32>
    %360 = tpu.matmul %303, %359, %cst_242 {dimension_numbers = #tpu.dot_dimension_numbers<[1], [0], [0], [1], [0, 0, 1, 1], [], []>} : vector<5x32xf32>, vector<32x8xf32>, vector<5x8xf32> -> vector<5x8xf32>
    %c5_243 = arith.constant 5 : index
    %c0_244 = arith.constant 0 : index
    %c0_245 = arith.constant 0 : index
    %361 = vector.load %arg13[%c5_243, %c0_244, %c0_245] : memref<8x1x8xf32, #tpu.memory_space<vmem>>, vector<1x1x8xf32>
    %362 = vector.shape_cast %361 : vector<1x1x8xf32> to vector<1x8xf32>
    %363 = vector.broadcast %362 : vector<1x8xf32> to vector<5x8xf32>
    %364 = arith.addf %360, %363 : vector<5x8xf32>
    %cst_246 = arith.constant dense<0.000000e+00> : vector<5x5xf32>
    %365 = tpu.matmul %350, %357, %cst_246 {dimension_numbers = #tpu.dot_dimension_numbers<[1], [1], [0], [0], [0, 0, 1, 0], [], []>} : vector<5x8xf32>, vector<5x8xf32>, vector<5x5xf32> -> vector<5x5xf32>
    %cst_247 = arith.constant 0.353553385 : f32
    %366 = vector.broadcast %cst_247 : f32 to vector<5x5xf32>
    %367 = arith.mulf %365, %366 : vector<5x5xf32>
    %cst_248 = arith.constant dense<0xFF800000> : vector<5xf32>
    %368 = vector.multi_reduction <maximumf>, %367, %cst_248 [1] : vector<5x5xf32> to vector<5xf32>
    %369 = vector.shape_cast %368 : vector<5xf32> to vector<5x1xf32>
    %370 = vector.broadcast %369 : vector<5x1xf32> to vector<5x5xf32>
    %371 = arith.subf %367, %370 : vector<5x5xf32>
    %372 = math.exp %371 : vector<5x5xf32>
    %cst_249 = arith.constant dense<0.000000e+00> : vector<5xf32>
    %373 = vector.multi_reduction <add>, %372, %cst_249 [1] : vector<5x5xf32> to vector<5xf32>
    %374 = vector.shape_cast %373 : vector<5xf32> to vector<5x1xf32>
    %375 = tpu.reciprocal %374 {approx = true} : vector<5x1xf32> -> vector<5x1xf32>
    %376 = vector.broadcast %375 : vector<5x1xf32> to vector<5x5xf32>
    %377 = arith.mulf %372, %376 : vector<5x5xf32>
    %cst_250 = arith.constant dense<0.000000e+00> : vector<5x8xf32>
    %378 = tpu.matmul %377, %364, %cst_250 {dimension_numbers = #tpu.dot_dimension_numbers<[1], [0], [0], [1], [0, 0, 1, 1], [], []>} : vector<5x5xf32>, vector<5x8xf32>, vector<5x8xf32> -> vector<5x8xf32>
    %c5_251 = arith.constant 5 : index
    %c0_252 = arith.constant 0 : index
    %c0_253 = arith.constant 0 : index
    %379 = vector.load %arg14[%c5_251, %c0_252, %c0_253] : memref<8x8x32xf32, #tpu.memory_space<vmem>>, vector<1x8x32xf32>
    %380 = vector.shape_cast %379 : vector<1x8x32xf32> to vector<8x32xf32>
    %cst_254 = arith.constant dense<0.000000e+00> : vector<5x32xf32>
    %381 = tpu.matmul %378, %380, %cst_254 {dimension_numbers = #tpu.dot_dimension_numbers<[1], [0], [0], [1], [0, 0, 1, 1], [], []>} : vector<5x8xf32>, vector<8x32xf32>, vector<5x32xf32> -> vector<5x32xf32>
    %382 = arith.addf %343, %381 : vector<5x32xf32>
    %c6 = arith.constant 6 : index
    %c0_255 = arith.constant 0 : index
    %c0_256 = arith.constant 0 : index
    %383 = vector.load %arg8[%c6, %c0_255, %c0_256] : memref<8x32x8xf32, #tpu.memory_space<vmem>>, vector<1x32x8xf32>
    %384 = vector.shape_cast %383 : vector<1x32x8xf32> to vector<32x8xf32>
    %cst_257 = arith.constant dense<0.000000e+00> : vector<5x8xf32>
    %385 = tpu.matmul %303, %384, %cst_257 {dimension_numbers = #tpu.dot_dimension_numbers<[1], [0], [0], [1], [0, 0, 1, 1], [], []>} : vector<5x32xf32>, vector<32x8xf32>, vector<5x8xf32> -> vector<5x8xf32>
    %c6_258 = arith.constant 6 : index
    %c0_259 = arith.constant 0 : index
    %c0_260 = arith.constant 0 : index
    %386 = vector.load %arg9[%c6_258, %c0_259, %c0_260] : memref<8x1x8xf32, #tpu.memory_space<vmem>>, vector<1x1x8xf32>
    %387 = vector.shape_cast %386 : vector<1x1x8xf32> to vector<1x8xf32>
    %388 = vector.broadcast %387 : vector<1x8xf32> to vector<5x8xf32>
    %389 = arith.addf %385, %388 : vector<5x8xf32>
    %c6_261 = arith.constant 6 : index
    %c0_262 = arith.constant 0 : index
    %c0_263 = arith.constant 0 : index
    %390 = vector.load %arg10[%c6_261, %c0_262, %c0_263] : memref<8x32x8xf32, #tpu.memory_space<vmem>>, vector<1x32x8xf32>
    %391 = vector.shape_cast %390 : vector<1x32x8xf32> to vector<32x8xf32>
    %cst_264 = arith.constant dense<0.000000e+00> : vector<5x8xf32>
    %392 = tpu.matmul %303, %391, %cst_264 {dimension_numbers = #tpu.dot_dimension_numbers<[1], [0], [0], [1], [0, 0, 1, 1], [], []>} : vector<5x32xf32>, vector<32x8xf32>, vector<5x8xf32> -> vector<5x8xf32>
    %c6_265 = arith.constant 6 : index
    %c0_266 = arith.constant 0 : index
    %c0_267 = arith.constant 0 : index
    %393 = vector.load %arg11[%c6_265, %c0_266, %c0_267] : memref<8x1x8xf32, #tpu.memory_space<vmem>>, vector<1x1x8xf32>
    %394 = vector.shape_cast %393 : vector<1x1x8xf32> to vector<1x8xf32>
    %395 = vector.broadcast %394 : vector<1x8xf32> to vector<5x8xf32>
    %396 = arith.addf %392, %395 : vector<5x8xf32>
    %c6_268 = arith.constant 6 : index
    %c0_269 = arith.constant 0 : index
    %c0_270 = arith.constant 0 : index
    %397 = vector.load %arg12[%c6_268, %c0_269, %c0_270] : memref<8x32x8xf32, #tpu.memory_space<vmem>>, vector<1x32x8xf32>
    %398 = vector.shape_cast %397 : vector<1x32x8xf32> to vector<32x8xf32>
    %cst_271 = arith.constant dense<0.000000e+00> : vector<5x8xf32>
    %399 = tpu.matmul %303, %398, %cst_271 {dimension_numbers = #tpu.dot_dimension_numbers<[1], [0], [0], [1], [0, 0, 1, 1], [], []>} : vector<5x32xf32>, vector<32x8xf32>, vector<5x8xf32> -> vector<5x8xf32>
    %c6_272 = arith.constant 6 : index
    %c0_273 = arith.constant 0 : index
    %c0_274 = arith.constant 0 : index
    %400 = vector.load %arg13[%c6_272, %c0_273, %c0_274] : memref<8x1x8xf32, #tpu.memory_space<vmem>>, vector<1x1x8xf32>
    %401 = vector.shape_cast %400 : vector<1x1x8xf32> to vector<1x8xf32>
    %402 = vector.broadcast %401 : vector<1x8xf32> to vector<5x8xf32>
    %403 = arith.addf %399, %402 : vector<5x8xf32>
    %cst_275 = arith.constant dense<0.000000e+00> : vector<5x5xf32>
    %404 = tpu.matmul %389, %396, %cst_275 {dimension_numbers = #tpu.dot_dimension_numbers<[1], [1], [0], [0], [0, 0, 1, 0], [], []>} : vector<5x8xf32>, vector<5x8xf32>, vector<5x5xf32> -> vector<5x5xf32>
    %cst_276 = arith.constant 0.353553385 : f32
    %405 = vector.broadcast %cst_276 : f32 to vector<5x5xf32>
    %406 = arith.mulf %404, %405 : vector<5x5xf32>
    %cst_277 = arith.constant dense<0xFF800000> : vector<5xf32>
    %407 = vector.multi_reduction <maximumf>, %406, %cst_277 [1] : vector<5x5xf32> to vector<5xf32>
    %408 = vector.shape_cast %407 : vector<5xf32> to vector<5x1xf32>
    %409 = vector.broadcast %408 : vector<5x1xf32> to vector<5x5xf32>
    %410 = arith.subf %406, %409 : vector<5x5xf32>
    %411 = math.exp %410 : vector<5x5xf32>
    %cst_278 = arith.constant dense<0.000000e+00> : vector<5xf32>
    %412 = vector.multi_reduction <add>, %411, %cst_278 [1] : vector<5x5xf32> to vector<5xf32>
    %413 = vector.shape_cast %412 : vector<5xf32> to vector<5x1xf32>
    %414 = tpu.reciprocal %413 {approx = true} : vector<5x1xf32> -> vector<5x1xf32>
    %415 = vector.broadcast %414 : vector<5x1xf32> to vector<5x5xf32>
    %416 = arith.mulf %411, %415 : vector<5x5xf32>
    %cst_279 = arith.constant dense<0.000000e+00> : vector<5x8xf32>
    %417 = tpu.matmul %416, %403, %cst_279 {dimension_numbers = #tpu.dot_dimension_numbers<[1], [0], [0], [1], [0, 0, 1, 1], [], []>} : vector<5x5xf32>, vector<5x8xf32>, vector<5x8xf32> -> vector<5x8xf32>
    %c6_280 = arith.constant 6 : index
    %c0_281 = arith.constant 0 : index
    %c0_282 = arith.constant 0 : index
    %418 = vector.load %arg14[%c6_280, %c0_281, %c0_282] : memref<8x8x32xf32, #tpu.memory_space<vmem>>, vector<1x8x32xf32>
    %419 = vector.shape_cast %418 : vector<1x8x32xf32> to vector<8x32xf32>
    %cst_283 = arith.constant dense<0.000000e+00> : vector<5x32xf32>
    %420 = tpu.matmul %417, %419, %cst_283 {dimension_numbers = #tpu.dot_dimension_numbers<[1], [0], [0], [1], [0, 0, 1, 1], [], []>} : vector<5x8xf32>, vector<8x32xf32>, vector<5x32xf32> -> vector<5x32xf32>
    %421 = arith.addf %382, %420 : vector<5x32xf32>
    %c7 = arith.constant 7 : index
    %c0_284 = arith.constant 0 : index
    %c0_285 = arith.constant 0 : index
    %422 = vector.load %arg8[%c7, %c0_284, %c0_285] : memref<8x32x8xf32, #tpu.memory_space<vmem>>, vector<1x32x8xf32>
    %423 = vector.shape_cast %422 : vector<1x32x8xf32> to vector<32x8xf32>
    %cst_286 = arith.constant dense<0.000000e+00> : vector<5x8xf32>
    %424 = tpu.matmul %303, %423, %cst_286 {dimension_numbers = #tpu.dot_dimension_numbers<[1], [0], [0], [1], [0, 0, 1, 1], [], []>} : vector<5x32xf32>, vector<32x8xf32>, vector<5x8xf32> -> vector<5x8xf32>
    %c7_287 = arith.constant 7 : index
    %c0_288 = arith.constant 0 : index
    %c0_289 = arith.constant 0 : index
    %425 = vector.load %arg9[%c7_287, %c0_288, %c0_289] : memref<8x1x8xf32, #tpu.memory_space<vmem>>, vector<1x1x8xf32>
    %426 = vector.shape_cast %425 : vector<1x1x8xf32> to vector<1x8xf32>
    %427 = vector.broadcast %426 : vector<1x8xf32> to vector<5x8xf32>
    %428 = arith.addf %424, %427 : vector<5x8xf32>
    %c7_290 = arith.constant 7 : index
    %c0_291 = arith.constant 0 : index
    %c0_292 = arith.constant 0 : index
    %429 = vector.load %arg10[%c7_290, %c0_291, %c0_292] : memref<8x32x8xf32, #tpu.memory_space<vmem>>, vector<1x32x8xf32>
    %430 = vector.shape_cast %429 : vector<1x32x8xf32> to vector<32x8xf32>
    %cst_293 = arith.constant dense<0.000000e+00> : vector<5x8xf32>
    %431 = tpu.matmul %303, %430, %cst_293 {dimension_numbers = #tpu.dot_dimension_numbers<[1], [0], [0], [1], [0, 0, 1, 1], [], []>} : vector<5x32xf32>, vector<32x8xf32>, vector<5x8xf32> -> vector<5x8xf32>
    %c7_294 = arith.constant 7 : index
    %c0_295 = arith.constant 0 : index
    %c0_296 = arith.constant 0 : index
    %432 = vector.load %arg11[%c7_294, %c0_295, %c0_296] : memref<8x1x8xf32, #tpu.memory_space<vmem>>, vector<1x1x8xf32>
    %433 = vector.shape_cast %432 : vector<1x1x8xf32> to vector<1x8xf32>
    %434 = vector.broadcast %433 : vector<1x8xf32> to vector<5x8xf32>
    %435 = arith.addf %431, %434 : vector<5x8xf32>
    %c7_297 = arith.constant 7 : index
    %c0_298 = arith.constant 0 : index
    %c0_299 = arith.constant 0 : index
    %436 = vector.load %arg12[%c7_297, %c0_298, %c0_299] : memref<8x32x8xf32, #tpu.memory_space<vmem>>, vector<1x32x8xf32>
    %437 = vector.shape_cast %436 : vector<1x32x8xf32> to vector<32x8xf32>
    %cst_300 = arith.constant dense<0.000000e+00> : vector<5x8xf32>
    %438 = tpu.matmul %303, %437, %cst_300 {dimension_numbers = #tpu.dot_dimension_numbers<[1], [0], [0], [1], [0, 0, 1, 1], [], []>} : vector<5x32xf32>, vector<32x8xf32>, vector<5x8xf32> -> vector<5x8xf32>
    %c7_301 = arith.constant 7 : index
    %c0_302 = arith.constant 0 : index
    %c0_303 = arith.constant 0 : index
    %439 = vector.load %arg13[%c7_301, %c0_302, %c0_303] : memref<8x1x8xf32, #tpu.memory_space<vmem>>, vector<1x1x8xf32>
    %440 = vector.shape_cast %439 : vector<1x1x8xf32> to vector<1x8xf32>
    %441 = vector.broadcast %440 : vector<1x8xf32> to vector<5x8xf32>
    %442 = arith.addf %438, %441 : vector<5x8xf32>
    %cst_304 = arith.constant dense<0.000000e+00> : vector<5x5xf32>
    %443 = tpu.matmul %428, %435, %cst_304 {dimension_numbers = #tpu.dot_dimension_numbers<[1], [1], [0], [0], [0, 0, 1, 0], [], []>} : vector<5x8xf32>, vector<5x8xf32>, vector<5x5xf32> -> vector<5x5xf32>
    %cst_305 = arith.constant 0.353553385 : f32
    %444 = vector.broadcast %cst_305 : f32 to vector<5x5xf32>
    %445 = arith.mulf %443, %444 : vector<5x5xf32>
    %cst_306 = arith.constant dense<0xFF800000> : vector<5xf32>
    %446 = vector.multi_reduction <maximumf>, %445, %cst_306 [1] : vector<5x5xf32> to vector<5xf32>
    %447 = vector.shape_cast %446 : vector<5xf32> to vector<5x1xf32>
    %448 = vector.broadcast %447 : vector<5x1xf32> to vector<5x5xf32>
    %449 = arith.subf %445, %448 : vector<5x5xf32>
    %450 = math.exp %449 : vector<5x5xf32>
    %cst_307 = arith.constant dense<0.000000e+00> : vector<5xf32>
    %451 = vector.multi_reduction <add>, %450, %cst_307 [1] : vector<5x5xf32> to vector<5xf32>
    %452 = vector.shape_cast %451 : vector<5xf32> to vector<5x1xf32>
    %453 = tpu.reciprocal %452 {approx = true} : vector<5x1xf32> -> vector<5x1xf32>
    %454 = vector.broadcast %453 : vector<5x1xf32> to vector<5x5xf32>
    %455 = arith.mulf %450, %454 : vector<5x5xf32>
    %cst_308 = arith.constant dense<0.000000e+00> : vector<5x8xf32>
    %456 = tpu.matmul %455, %442, %cst_308 {dimension_numbers = #tpu.dot_dimension_numbers<[1], [0], [0], [1], [0, 0, 1, 1], [], []>} : vector<5x5xf32>, vector<5x8xf32>, vector<5x8xf32> -> vector<5x8xf32>
    %c7_309 = arith.constant 7 : index
    %c0_310 = arith.constant 0 : index
    %c0_311 = arith.constant 0 : index
    %457 = vector.load %arg14[%c7_309, %c0_310, %c0_311] : memref<8x8x32xf32, #tpu.memory_space<vmem>>, vector<1x8x32xf32>
    %458 = vector.shape_cast %457 : vector<1x8x32xf32> to vector<8x32xf32>
    %cst_312 = arith.constant dense<0.000000e+00> : vector<5x32xf32>
    %459 = tpu.matmul %456, %458, %cst_312 {dimension_numbers = #tpu.dot_dimension_numbers<[1], [0], [0], [1], [0, 0, 1, 1], [], []>} : vector<5x8xf32>, vector<8x32xf32>, vector<5x32xf32> -> vector<5x32xf32>
    %460 = arith.addf %421, %459 : vector<5x32xf32>
    %461 = arith.addf %279, %460 : vector<5x32xf32>
    %c1_313 = arith.constant 1 : index
    %c0_314 = arith.constant 0 : index
    %c0_315 = arith.constant 0 : index
    %462 = vector.load %arg15[%c1_313, %c0_314, %c0_315] : memref<2x1x32xf32, #tpu.memory_space<vmem>>, vector<1x1x32xf32>
    %463 = vector.shape_cast %462 : vector<1x1x32xf32> to vector<1x32xf32>
    %464 = vector.broadcast %463 : vector<1x32xf32> to vector<5x32xf32>
    %465 = arith.addf %461, %464 : vector<5x32xf32>
    %c1_316 = arith.constant 1 : index
    %c0_317 = arith.constant 0 : index
    %c0_318 = arith.constant 0 : index
    %466 = vector.load %arg16[%c1_316, %c0_317, %c0_318] : memref<2x1x32xf32, #tpu.memory_space<vmem>>, vector<1x1x32xf32>
    %467 = vector.shape_cast %466 : vector<1x1x32xf32> to vector<1x32xf32>
    %c1_319 = arith.constant 1 : index
    %c0_320 = arith.constant 0 : index
    %c0_321 = arith.constant 0 : index
    %468 = vector.load %arg17[%c1_319, %c0_320, %c0_321] : memref<2x1x32xf32, #tpu.memory_space<vmem>>, vector<1x1x32xf32>
    %469 = vector.shape_cast %468 : vector<1x1x32xf32> to vector<1x32xf32>
    %cst_322 = arith.constant dense<0.000000e+00> : vector<5xf32>
    %470 = vector.multi_reduction <add>, %465, %cst_322 [1] : vector<5x32xf32> to vector<5xf32>
    %471 = vector.shape_cast %470 : vector<5xf32> to vector<5x1xf32>
    %cst_323 = arith.constant 3.200000e+01 : f32
    %472 = vector.broadcast %cst_323 : f32 to vector<5x1xf32>
    %473 = arith.divf %471, %472 : vector<5x1xf32>
    %474 = vector.broadcast %473 : vector<5x1xf32> to vector<5x32xf32>
    %475 = arith.subf %465, %474 : vector<5x32xf32>
    %476 = arith.mulf %475, %475 : vector<5x32xf32>
    %cst_324 = arith.constant dense<0.000000e+00> : vector<5xf32>
    %477 = vector.multi_reduction <add>, %476, %cst_324 [1] : vector<5x32xf32> to vector<5xf32>
    %478 = vector.shape_cast %477 : vector<5xf32> to vector<5x1xf32>
    %cst_325 = arith.constant 3.200000e+01 : f32
    %479 = vector.broadcast %cst_325 : f32 to vector<5x1xf32>
    %480 = arith.divf %478, %479 : vector<5x1xf32>
    %cst_326 = arith.constant 9.99999997E-7 : f32
    %481 = vector.broadcast %cst_326 : f32 to vector<5x1xf32>
    %482 = arith.addf %480, %481 : vector<5x1xf32>
    %483 = math.rsqrt %482 : vector<5x1xf32>
    %484 = vector.broadcast %483 : vector<5x1xf32> to vector<5x32xf32>
    %485 = arith.mulf %475, %484 : vector<5x32xf32>
    %486 = vector.broadcast %467 : vector<1x32xf32> to vector<5x32xf32>
    %487 = arith.mulf %485, %486 : vector<5x32xf32>
    %488 = vector.broadcast %469 : vector<1x32xf32> to vector<5x32xf32>
    %489 = arith.addf %487, %488 : vector<5x32xf32>
    %c1_327 = arith.constant 1 : index
    %c0_328 = arith.constant 0 : index
    %c0_329 = arith.constant 0 : index
    %490 = vector.load %arg18[%c1_327, %c0_328, %c0_329] : memref<2x32x128xf32, #tpu.memory_space<vmem>>, vector<1x32x128xf32>
    %491 = vector.shape_cast %490 : vector<1x32x128xf32> to vector<32x128xf32>
    %cst_330 = arith.constant dense<0.000000e+00> : vector<5x128xf32>
    %492 = tpu.matmul %489, %491, %cst_330 {dimension_numbers = #tpu.dot_dimension_numbers<[1], [0], [0], [1], [0, 0, 1, 1], [], []>} : vector<5x32xf32>, vector<32x128xf32>, vector<5x128xf32> -> vector<5x128xf32>
    %c1_331 = arith.constant 1 : index
    %c0_332 = arith.constant 0 : index
    %c0_333 = arith.constant 0 : index
    %493 = vector.load %arg19[%c1_331, %c0_332, %c0_333] : memref<2x1x128xf32, #tpu.memory_space<vmem>>, vector<1x1x128xf32>
    %494 = vector.shape_cast %493 : vector<1x1x128xf32> to vector<1x128xf32>
    %495 = vector.broadcast %494 : vector<1x128xf32> to vector<5x128xf32>
    %496 = arith.addf %492, %495 : vector<5x128xf32>
    %cst_334 = arith.constant 5.000000e-01 : f32
    %497 = vector.broadcast %cst_334 : f32 to vector<5x128xf32>
    %498 = arith.mulf %497, %496 : vector<5x128xf32>
    %cst_335 = arith.constant 0.707106769 : f32
    %499 = vector.broadcast %cst_335 : f32 to vector<5x128xf32>
    %500 = arith.mulf %496, %499 : vector<5x128xf32>
    %501 = math.absf %500 : vector<5x128xf32>
    %cst_336 = arith.constant 0.327591091 : f32
    %502 = vector.broadcast %cst_336 : f32 to vector<5x128xf32>
    %503 = arith.mulf %502, %501 : vector<5x128xf32>
    %cst_337 = arith.constant 1.000000e+00 : f32
    %504 = vector.broadcast %cst_337 : f32 to vector<5x128xf32>
    %505 = arith.addf %504, %503 : vector<5x128xf32>
    %cst_338 = arith.constant 1.000000e+00 : f32
    %506 = vector.broadcast %cst_338 : f32 to vector<5x128xf32>
    %507 = arith.divf %506, %505 : vector<5x128xf32>
    %cst_339 = arith.constant 1.06140542 : f32
    %508 = vector.broadcast %cst_339 : f32 to vector<5x128xf32>
    %509 = arith.mulf %508, %507 : vector<5x128xf32>
    %cst_340 = arith.constant -1.45315206 : f32
    %510 = vector.broadcast %cst_340 : f32 to vector<5x128xf32>
    %511 = arith.addf %509, %510 : vector<5x128xf32>
    %512 = arith.mulf %511, %507 : vector<5x128xf32>
    %cst_341 = arith.constant 1.42141378 : f32
    %513 = vector.broadcast %cst_341 : f32 to vector<5x128xf32>
    %514 = arith.addf %512, %513 : vector<5x128xf32>
    %515 = arith.mulf %514, %507 : vector<5x128xf32>
    %cst_342 = arith.constant -0.284496725 : f32
    %516 = vector.broadcast %cst_342 : f32 to vector<5x128xf32>
    %517 = arith.addf %515, %516 : vector<5x128xf32>
    %518 = arith.mulf %517, %507 : vector<5x128xf32>
    %cst_343 = arith.constant 0.254829586 : f32
    %519 = vector.broadcast %cst_343 : f32 to vector<5x128xf32>
    %520 = arith.addf %518, %519 : vector<5x128xf32>
    %521 = arith.mulf %520, %507 : vector<5x128xf32>
    %cst_344 = arith.constant 0.000000e+00 : f32
    %522 = vector.broadcast %cst_344 : f32 to vector<5x128xf32>
    %523 = arith.subf %522, %501 : vector<5x128xf32>
    %524 = arith.mulf %523, %501 : vector<5x128xf32>
    %525 = math.exp %524 : vector<5x128xf32>
    %526 = arith.mulf %521, %525 : vector<5x128xf32>
    %cst_345 = arith.constant 1.000000e+00 : f32
    %527 = vector.broadcast %cst_345 : f32 to vector<5x128xf32>
    %528 = arith.subf %527, %526 : vector<5x128xf32>
    %cst_346 = arith.constant 0.000000e+00 : f32
    %529 = vector.broadcast %cst_346 : f32 to vector<5x128xf32>
    %530 = arith.cmpf oge, %500, %529 : vector<5x128xf32>
    %cst_347 = arith.constant 0.000000e+00 : f32
    %531 = vector.broadcast %cst_347 : f32 to vector<5x128xf32>
    %532 = arith.subf %531, %528 : vector<5x128xf32>
    %533 = arith.select %530, %528, %532 : vector<5x128xi1>, vector<5x128xf32>
    %cst_348 = arith.constant 1.000000e+00 : f32
    %534 = vector.broadcast %cst_348 : f32 to vector<5x128xf32>
    %535 = arith.addf %534, %533 : vector<5x128xf32>
    %536 = arith.mulf %498, %535 : vector<5x128xf32>
    %c1_349 = arith.constant 1 : index
    %c0_350 = arith.constant 0 : index
    %c0_351 = arith.constant 0 : index
    %537 = vector.load %arg20[%c1_349, %c0_350, %c0_351] : memref<2x128x32xf32, #tpu.memory_space<vmem>>, vector<1x128x32xf32>
    %538 = vector.shape_cast %537 : vector<1x128x32xf32> to vector<128x32xf32>
    %cst_352 = arith.constant dense<0.000000e+00> : vector<5x32xf32>
    %539 = tpu.matmul %536, %538, %cst_352 {dimension_numbers = #tpu.dot_dimension_numbers<[1], [0], [0], [1], [0, 0, 1, 1], [], []>} : vector<5x128xf32>, vector<128x32xf32>, vector<5x32xf32> -> vector<5x32xf32>
    %c1_353 = arith.constant 1 : index
    %c0_354 = arith.constant 0 : index
    %c0_355 = arith.constant 0 : index
    %540 = vector.load %arg21[%c1_353, %c0_354, %c0_355] : memref<2x1x32xf32, #tpu.memory_space<vmem>>, vector<1x1x32xf32>
    %541 = vector.shape_cast %540 : vector<1x1x32xf32> to vector<1x32xf32>
    %542 = vector.broadcast %541 : vector<1x32xf32> to vector<5x32xf32>
    %543 = arith.addf %539, %542 : vector<5x32xf32>
    %544 = arith.addf %465, %543 : vector<5x32xf32>
    %545 = vector.extract_strided_slice %544 {offsets = [1, 0], sizes = [4, 32], strides = [1, 1]} : vector<5x32xf32> to vector<4x32xf32>
    %cst_356 = arith.constant dense<0.000000e+00> : vector<32xf32>
    %546 = vector.multi_reduction <add>, %545, %cst_356 [0] : vector<4x32xf32> to vector<32xf32>
    %547 = vector.shape_cast %546 : vector<32xf32> to vector<1x32xf32>
    %cst_357 = arith.constant 4.000000e+00 : f32
    %548 = vector.broadcast %cst_357 : f32 to vector<1x32xf32>
    %549 = arith.divf %547, %548 : vector<1x32xf32>
    %c0_358 = arith.constant 0 : index
    %c0_359 = arith.constant 0 : index
    %550 = vector.load %arg22[%c0_358, %c0_359] : memref<1x32xf32, #tpu.memory_space<vmem>>, vector<1x32xf32>
    %c0_360 = arith.constant 0 : index
    %c0_361 = arith.constant 0 : index
    %551 = vector.load %arg23[%c0_360, %c0_361] : memref<1x32xf32, #tpu.memory_space<vmem>>, vector<1x32xf32>
    %cst_362 = arith.constant dense<0.000000e+00> : vector<1xf32>
    %552 = vector.multi_reduction <add>, %549, %cst_362 [1] : vector<1x32xf32> to vector<1xf32>
    %553 = vector.shape_cast %552 : vector<1xf32> to vector<1x1xf32>
    %cst_363 = arith.constant 3.200000e+01 : f32
    %554 = vector.broadcast %cst_363 : f32 to vector<1x1xf32>
    %555 = arith.divf %553, %554 : vector<1x1xf32>
    %556 = vector.broadcast %555 : vector<1x1xf32> to vector<1x32xf32>
    %557 = arith.subf %549, %556 : vector<1x32xf32>
    %558 = arith.mulf %557, %557 : vector<1x32xf32>
    %cst_364 = arith.constant dense<0.000000e+00> : vector<1xf32>
    %559 = vector.multi_reduction <add>, %558, %cst_364 [1] : vector<1x32xf32> to vector<1xf32>
    %560 = vector.shape_cast %559 : vector<1xf32> to vector<1x1xf32>
    %cst_365 = arith.constant 3.200000e+01 : f32
    %561 = vector.broadcast %cst_365 : f32 to vector<1x1xf32>
    %562 = arith.divf %560, %561 : vector<1x1xf32>
    %cst_366 = arith.constant 9.99999997E-7 : f32
    %563 = vector.broadcast %cst_366 : f32 to vector<1x1xf32>
    %564 = arith.addf %562, %563 : vector<1x1xf32>
    %565 = math.rsqrt %564 : vector<1x1xf32>
    %566 = vector.broadcast %565 : vector<1x1xf32> to vector<1x32xf32>
    %567 = arith.mulf %557, %566 : vector<1x32xf32>
    %568 = arith.mulf %567, %550 : vector<1x32xf32>
    %569 = arith.addf %568, %551 : vector<1x32xf32>
    %c0_367 = arith.constant 0 : index
    %c0_368 = arith.constant 0 : index
    %570 = vector.load %arg24[%c0_367, %c0_368] : memref<32x45xf32, #tpu.memory_space<vmem>>, vector<32x45xf32>
    %cst_369 = arith.constant dense<0.000000e+00> : vector<1x45xf32>
    %571 = tpu.matmul %569, %570, %cst_369 {dimension_numbers = #tpu.dot_dimension_numbers<[1], [0], [0], [1], [0, 0, 1, 1], [], []>} : vector<1x32xf32>, vector<32x45xf32>, vector<1x45xf32> -> vector<1x45xf32>
    %c0_370 = arith.constant 0 : index
    %c0_371 = arith.constant 0 : index
    %572 = vector.load %arg25[%c0_370, %c0_371] : memref<1x45xf32, #tpu.memory_space<vmem>>, vector<1x45xf32>
    %573 = arith.addf %571, %572 : vector<1x45xf32>
    %c0_372 = arith.constant 0 : index
    %c0_373 = arith.constant 0 : index
    %c0_374 = arith.constant 0 : index
    %574 = vector.load %arg26[%c0_372, %c0_373, %c0_374] : memref<1x1x45xf32, #tpu.memory_space<vmem>>, vector<1x1x45xf32>
    %575 = vector.shape_cast %574 : vector<1x1x45xf32> to vector<1x45xf32>
    %576 = vector.shape_cast %573 : vector<1x45xf32> to vector<1x1x45xf32>
    tpu.vector_store %arg26[%c0_372, %c0_373, %c0_374], %576 {strides = array<i32>} : memref<1x1x45xf32, #tpu.memory_space<vmem>>, vector<1x1x45xf32>,
    return
  }
  func.func @transform_0(%arg0: i32) -> (i32, i32, i32) {
    %c0_i32 = arith.constant 0 : i32
    %c0_i32_0 = arith.constant 0 : i32
    %c0_i32_1 = arith.constant 0 : i32
    return %arg0, %c0_i32, %c0_i32_0 : i32, i32, i32
  }
  func.func @transform_1(%arg0: i32) -> (i32, i32) {
    %c0_i32 = arith.constant 0 : i32
    %c0_i32_0 = arith.constant 0 : i32
    %c0_i32_1 = arith.constant 0 : i32
    return %c0_i32, %c0_i32_0 : i32, i32
  }
  func.func @transform_2(%arg0: i32) -> (i32, i32) {
    %c0_i32 = arith.constant 0 : i32
    %c0_i32_0 = arith.constant 0 : i32
    %c0_i32_1 = arith.constant 0 : i32
    return %c0_i32, %c0_i32_0 : i32, i32
  }
  func.func @transform_3(%arg0: i32) -> (i32, i32) {
    %c0_i32 = arith.constant 0 : i32
    %c0_i32_0 = arith.constant 0 : i32
    %c0_i32_1 = arith.constant 0 : i32
    return %c0_i32, %c0_i32_0 : i32, i32
  }
  func.func @transform_4(%arg0: i32) -> (i32, i32) {
    %c0_i32 = arith.constant 0 : i32
    %c0_i32_0 = arith.constant 0 : i32
    %c0_i32_1 = arith.constant 0 : i32
    return %c0_i32, %c0_i32_0 : i32, i32
  }
  func.func @transform_5(%arg0: i32) -> (i32, i32, i32) {
    %c0_i32 = arith.constant 0 : i32
    %c0_i32_0 = arith.constant 0 : i32
    %c0_i32_1 = arith.constant 0 : i32
    %c0_i32_2 = arith.constant 0 : i32
    return %c0_i32, %c0_i32_0, %c0_i32_1 : i32, i32, i32
  }
  func.func @transform_6(%arg0: i32) -> (i32, i32, i32) {
    %c0_i32 = arith.constant 0 : i32
    %c0_i32_0 = arith.constant 0 : i32
    %c0_i32_1 = arith.constant 0 : i32
    %c0_i32_2 = arith.constant 0 : i32
    return %c0_i32, %c0_i32_0, %c0_i32_1 : i32, i32, i32
  }
  func.func @transform_7(%arg0: i32) -> (i32, i32, i32) {
    %c0_i32 = arith.constant 0 : i32
    %c0_i32_0 = arith.constant 0 : i32
    %c0_i32_1 = arith.constant 0 : i32
    %c0_i32_2 = arith.constant 0 : i32
    return %c0_i32, %c0_i32_0, %c0_i32_1 : i32, i32, i32
  }
  func.func @transform_8(%arg0: i32) -> (i32, i32, i32) {
    %c0_i32 = arith.constant 0 : i32
    %c0_i32_0 = arith.constant 0 : i32
    %c0_i32_1 = arith.constant 0 : i32
    %c0_i32_2 = arith.constant 0 : i32
    return %c0_i32, %c0_i32_0, %c0_i32_1 : i32, i32, i32
  }
  func.func @transform_9(%arg0: i32) -> (i32, i32, i32) {
    %c0_i32 = arith.constant 0 : i32
    %c0_i32_0 = arith.constant 0 : i32
    %c0_i32_1 = arith.constant 0 : i32
    %c0_i32_2 = arith.constant 0 : i32
    return %c0_i32, %c0_i32_0, %c0_i32_1 : i32, i32, i32
  }
  func.func @transform_10(%arg0: i32) -> (i32, i32, i32) {
    %c0_i32 = arith.constant 0 : i32
    %c0_i32_0 = arith.constant 0 : i32
    %c0_i32_1 = arith.constant 0 : i32
    %c0_i32_2 = arith.constant 0 : i32
    return %c0_i32, %c0_i32_0, %c0_i32_1 : i32, i32, i32
  }
  func.func @transform_11(%arg0: i32) -> (i32, i32, i32) {
    %c0_i32 = arith.constant 0 : i32
    %c0_i32_0 = arith.constant 0 : i32
    %c0_i32_1 = arith.constant 0 : i32
    %c0_i32_2 = arith.constant 0 : i32
    return %c0_i32, %c0_i32_0, %c0_i32_1 : i32, i32, i32
  }
  func.func @transform_12(%arg0: i32) -> (i32, i32, i32) {
    %c0_i32 = arith.constant 0 : i32
    %c0_i32_0 = arith.constant 0 : i32
    %c0_i32_1 = arith.constant 0 : i32
    %c0_i32_2 = arith.constant 0 : i32
    return %c0_i32, %c0_i32_0, %c0_i32_1 : i32, i32, i32
  }
  func.func @transform_13(%arg0: i32) -> (i32, i32, i32) {
    %c0_i32 = arith.constant 0 : i32
    %c0_i32_0 = arith.constant 0 : i32
    %c0_i32_1 = arith.constant 0 : i32
    %c0_i32_2 = arith.constant 0 : i32
    return %c0_i32, %c0_i32_0, %c0_i32_1 : i32, i32, i32
  }
  func.func @transform_14(%arg0: i32) -> (i32, i32, i32) {
    %c0_i32 = arith.constant 0 : i32
    %c0_i32_0 = arith.constant 0 : i32
    %c0_i32_1 = arith.constant 0 : i32
    %c0_i32_2 = arith.constant 0 : i32
    return %c0_i32, %c0_i32_0, %c0_i32_1 : i32, i32, i32
  }
  func.func @transform_15(%arg0: i32) -> (i32, i32, i32) {
    %c0_i32 = arith.constant 0 : i32
    %c0_i32_0 = arith.constant 0 : i32
    %c0_i32_1 = arith.constant 0 : i32
    %c0_i32_2 = arith.constant 0 : i32
    return %c0_i32, %c0_i32_0, %c0_i32_1 : i32, i32, i32
  }
  func.func @transform_16(%arg0: i32) -> (i32, i32, i32) {
    %c0_i32 = arith.constant 0 : i32
    %c0_i32_0 = arith.constant 0 : i32
    %c0_i32_1 = arith.constant 0 : i32
    %c0_i32_2 = arith.constant 0 : i32
    return %c0_i32, %c0_i32_0, %c0_i32_1 : i32, i32, i32
  }
  func.func @transform_17(%arg0: i32) -> (i32, i32, i32) {
    %c0_i32 = arith.constant 0 : i32
    %c0_i32_0 = arith.constant 0 : i32
    %c0_i32_1 = arith.constant 0 : i32
    %c0_i32_2 = arith.constant 0 : i32
    return %c0_i32, %c0_i32_0, %c0_i32_1 : i32, i32, i32
  }
  func.func @transform_18(%arg0: i32) -> (i32, i32, i32) {
    %c0_i32 = arith.constant 0 : i32
    %c0_i32_0 = arith.constant 0 : i32
    %c0_i32_1 = arith.constant 0 : i32
    %c0_i32_2 = arith.constant 0 : i32
    return %c0_i32, %c0_i32_0, %c0_i32_1 : i32, i32, i32
  }
  func.func @transform_19(%arg0: i32) -> (i32, i32, i32) {
    %c0_i32 = arith.constant 0 : i32
    %c0_i32_0 = arith.constant 0 : i32
    %c0_i32_1 = arith.constant 0 : i32
    %c0_i32_2 = arith.constant 0 : i32
    return %c0_i32, %c0_i32_0, %c0_i32_1 : i32, i32, i32
  }
  func.func @transform_20(%arg0: i32) -> (i32, i32, i32) {
    %c0_i32 = arith.constant 0 : i32
    %c0_i32_0 = arith.constant 0 : i32
    %c0_i32_1 = arith.constant 0 : i32
    %c0_i32_2 = arith.constant 0 : i32
    return %c0_i32, %c0_i32_0, %c0_i32_1 : i32, i32, i32
  }
  func.func @transform_21(%arg0: i32) -> (i32, i32) {
    %c0_i32 = arith.constant 0 : i32
    %c0_i32_0 = arith.constant 0 : i32
    %c0_i32_1 = arith.constant 0 : i32
    return %c0_i32, %c0_i32_0 : i32, i32
  }
  func.func @transform_22(%arg0: i32) -> (i32, i32) {
    %c0_i32 = arith.constant 0 : i32
    %c0_i32_0 = arith.constant 0 : i32
    %c0_i32_1 = arith.constant 0 : i32
    return %c0_i32, %c0_i32_0 : i32, i32
  }
  func.func @transform_23(%arg0: i32) -> (i32, i32) {
    %c0_i32 = arith.constant 0 : i32
    %c0_i32_0 = arith.constant 0 : i32
    %c0_i32_1 = arith.constant 0 : i32
    return %c0_i32, %c0_i32_0 : i32, i32
  }
  func.func @transform_24(%arg0: i32) -> (i32, i32) {
    %c0_i32 = arith.constant 0 : i32
    %c0_i32_0 = arith.constant 0 : i32
    %c0_i32_1 = arith.constant 0 : i32
    return %c0_i32, %c0_i32_0 : i32, i32
  }
  func.func @transform_25(%arg0: i32) -> (i32, i32, i32) {
    %c0_i32 = arith.constant 0 : i32
    %c0_i32_0 = arith.constant 0 : i32
    %c0_i32_1 = arith.constant 0 : i32
    return %arg0, %c0_i32, %c0_i32_0 : i32, i32, i32
  }
}

</mosaic_0001>

<bundles_post_ra>
// kernel: dofa_forward.3
= control target key start
LH: loop header
LB: loop body
LE: loop exit
PB: predicated region body
PF: predicated region fallthrough
CT: control target
= control target key end

     0   :  { %s8180_s0 = inlined_call_operand.vmem [shape: f32[2,4,256], index: 0, kind: input, shape index: {}]   ;;  %s8181_s1 = inlined_call_operand.vmem [shape: f32[256,32], index: 1, kind: input, shape index: {}]   ;;  %s8182_s2 = inlined_call_operand.vmem [shape: f32[1,32], index: 2, kind: input, shape index: {}]   ;;  %s8183_s3 = inlined_call_operand.vmem [shape: f32[5,32], index: 3, kind: input, shape index: {}]   ;;  %s8184_s4 = inlined_call_operand.vmem [shape: f32[1,32], index: 4, kind: input, shape index: {}]   ;;  %s8185_s5 = inlined_call_operand.vmem [shape: f32[2,1,32], index: 5, kind: input, shape index: {}]   ;;  %s8186_s6 = inlined_call_operand.vmem [shape: f32[2,1,32], index: 6, kind: input, shape index: {}]   ;;  %s8187_s7 = inlined_call_operand.vmem [shape: f32[8,32,8], index: 7, kind: input, shape index: {}]   ;;  %s8188_s8 = inlined_call_operand.vmem [shape: f32[8,1,8], index: 8, kind: input, shape index: {}]   ;;  %s8189_s9 = inlined_call_operand.vmem [shape: f32[8,32,8], index: 9, kind: input, shape index: {}]   ;;  %s8190_s10 = inlined_call_operand.vmem [shape: f32[8,1,8], index: 10, kind: input, shape index: {}]   ;;  %s8191_s11 = inlined_call_operand.vmem [shape: f32[8,32,8], index: 11, kind: input, shape index: {}]   ;;  %s8192_s12 = inlined_call_operand.vmem [shape: f32[8,1,8], index: 12, kind: input, shape index: {}]   ;;  %s8193_s13 = inlined_call_operand.vmem [shape: f32[8,8,32], index: 13, kind: input, shape index: {}]   ;;  %s8194_s14 = inlined_call_operand.vmem [shape: f32[2,1,32], index: 14, kind: input, shape index: {}]   ;;  %s8195_s15 = inlined_call_operand.vmem [shape: f32[2,1,32], index: 15, kind: input, shape index: {}]   ;;  %s8196_s16 = inlined_call_operand.vmem [shape: f32[2,1,32], index: 16, kind: input, shape index: {}]   ;;  %s8197_s17 = inlined_call_operand.vmem [shape: f32[2,32,128], index: 17, kind: input, shape index: {}]   ;;  %s8198_s18 = inlined_call_operand.vmem [shape: f32[2,1,128], index: 18, kind: input, shape index: {}]   ;;  %s8199_s19 = inlined_call_operand.vmem [shape: f32[2,128,32], index: 19, kind: input, shape index: {}]   ;;  %s8200_s20 = inlined_call_operand.vmem [shape: f32[2,1,32], index: 20, kind: input, shape index: {}]   ;;  %s8201_s21 = inlined_call_operand.vmem [shape: f32[1,32], index: 21, kind: input, shape index: {}]   ;;  %s8202_s22 = inlined_call_operand.vmem [shape: f32[1,32], index: 22, kind: input, shape index: {}]   ;;  %s8203_s23 = inlined_call_operand.vmem [shape: f32[32,45], index: 23, kind: input, shape index: {}]   ;;  %s8204_s24 = inlined_call_operand.vmem [shape: f32[1,45], index: 24, kind: input, shape index: {}]   ;;  %s8205_s25 = inlined_call_operand.hbm [shape: f32[2,1,45], index: 25, kind: output, shape index: {}]  }
   0x1   :  { %8226 = sst [smem:[#allocation12_spill]] %s8180_s0 }
   0x2   :  { %8227 = sst [smem:[#allocation13_spill]] %s8181_s1 }
   0x3   :  { %8228 = sst [smem:[#allocation14_spill]] %s8182_s2 }
   0x4   :  { %8229 = sst [smem:[#allocation15_spill]] %s8183_s3 }
   0x5   :  { %8230 = sst [smem:[#allocation16_spill]] %s8184_s4 }
   0x6   :  { %8231 = sst [smem:[#allocation17_spill]] %s8185_s5 }
   0x7   :  { %8232 = sst [smem:[#allocation18_spill]] %s8186_s6 }
   0x8   :  { %8233 = sst [smem:[#allocation19_spill]] %s8187_s7 }
   0x9   :  { %8234 = sst [smem:[#allocation20_spill]] %s8188_s8 }
   0xa   :  { %8235 = sst [smem:[#allocation21_spill]] %s8189_s9 }
   0xb   :  { %8236 = sst [smem:[#allocation22_spill]] %s8190_s10 }
   0xc   :  { %8237 = sst [smem:[#allocation23_spill]] %s8204_s24 }
   0xd   :  { %8238 = sst [smem:[#allocation24_spill]] %s8205_s25 }
   0xe   :  { %30 = vsyncpa [#allocation3], 0 }
   0xf   :  { %32 = vsyncpa [#allocation3 + $0x1], 0  ;;  %s7058_s29 = smov 0   ;;  %s7060_s2 = smov 0  }
  0x10   :  { %s7062_s6 = smov 0   ;;  %s7064_s30 = smov 0  }
  0x11 LB: > { %8239 = sst [smem:[#allocation5_spill]] %s6910_s29  ;;  %s7079_s7 = sadd.s32 4294967295, %s6922_s30   ;;  %s6922_s30 = sphi %s7064_s30, %s8266_s30   ;;  %s6918_s6 = sphi %s7062_s6, %s8268_s6   ;;  %s6914_s2 = sphi %s7060_s2, %s8270_s2   ;;  %s6910_s29 = sphi %s7058_s29, %s8269_s29  }
  0x12   : > { %8240 = sst [smem:[#allocation6_spill]] %s6918_s6  ;;  %s5531_s3 = sadd.s32 4294967294, %s6922_s30  }
  0x13   : > { %8241 = sst [smem:[#allocation7_spill]] %s6922_s30  ;;  %s7083_s26 = sadd.s32 1, %s6922_s30  }
  0x14   : > { %8242 = sst [smem:[#allocation8_spill]] %s7083_s26  ;;  %s575_s1 = sadd.s32 1, %s6918_s6 }
  0x15   : > { %s572_s8 = ssub.s32 %s6922_s30, %s7083_s26  ;;  %p585_p0 = scmp.ne.s32.totalorder %s6918_s6, %s6914_s2 }
  0x16   : > { %p573_p1 = scmp.eq.s32.totalorder %s572_s8, 0  ;;  %p586_p2 = scmp.eq.s32.totalorder %s7079_s7, 1 }
  0x17   : > { %p591_p3 = scmp.ne.s32.totalorder %s6914_s2, %s6910_s29  ;;  %p592_p4 = scmp.eq.s32.totalorder %s5531_s3, 1 }
  0x18   : > { %s7094_s27 = scalar_select %p573_p1, %s6918_s6, %s575_s1  }
  0x19   : > { %p7096_p5 = por %p586_p2, %p585_p0  ;;  %p7100_p6 = por %p592_p4, %p591_p3 }
  0x1a   : > { %8243 = sst [smem:[#allocation9_spill]] %s7094_s27  ;;  %p5534_p7 = scmp.ge.s32.totalorder %s6922_s30, 1 }
  0x1b   : > { %s8244_s4 = scalar_select %p7096_p5, 1, 0 }
  0x1c   : > { %s8246_s28 = scalar_select %p7100_p6, 1, 0 }
  0x1d   : > { %8245 = sst [smem:[#allocation10_spill]] %s8244_s4  ;;  %p690_p8 = scmp.lt.s32.totalorder %s6922_s30, 3 }
  0x1e   : > { %8247 = sst [smem:[#allocation11_spill]] %s8246_s28 }
  0x1f   : > { %p691_p9 = pnand %p5534_p7, %p690_p8 }
  0x20   : > { %s8248_s0 = sld [smem:[#allocation13_spill]] (!%p691_p9)  ;;  %p757_p10 = scmp.lt.s32.totalorder (!%p691_p9), %s7079_s7, 1  ;;  %vm884_vm0 = vcmask (!%p691_p9), 1040384   ;;  %vm888_vm1 = vcmask (!%p691_p9), 258048   ;;  %vm6925_vm2 = vmmov (!%p691_p9), 0   ;;  %vm928_vm3 = vcmask (!%p691_p9), 261120  }
  0x21   : > { %694 = sbr.rel (%p691_p9) target bundleno = 10781 (0x2a1d), region = 120  ;;  %s8249_s25 = sld [smem:[#allocation12_spill]] (!%p691_p9)  ;;  %vm1164_vm4 = vcmask (!%p691_p9), 64512   ;;  %vm1258_vm5 = vcmask (!%p691_p9), 1044480   ;;  %vm1242_vm6 = vcmask (!%p691_p9), 36864   ;;  %vm1254_vm7 = vcmask (!%p691_p9), 39936  }
  0x22   : > { %s8250_s5 = sld [smem:[#allocation14_spill]] (!%p691_p9)  ;;  %s8252_s6 = sld [smem:[#allocation16_spill]] (!%p691_p9)  ;;  %vm5356_vm10 = vcmask (!%p691_p9), 257024   ;;  %vm5461_vm11 = vcmask (!%p691_p9), 360448  }
  0x23   : > { %s8253_s28 = sld [smem:[#allocation19_spill]] (!%p691_p9)  ;;  %s8254_s27 = sld [smem:[#allocation21_spill]] (!%p691_p9) }
  0x24   : > { %s8255_s26 = sld [smem:[#allocation17_spill]] (!%p691_p9)  ;;  %s8258_s10 = sld [smem:[#allocation22_spill]] (!%p691_p9) }
  0x25   : > { %s8259_s8 = sld [smem:[#allocation20_spill]] (!%p691_p9)  ;;  %s755_s1 = sand.u32 (!%p691_p9), 1, %s6914_s2  }
  0x26   : > { %v779_v0 = vld [vmem:[%s8248_s0 + $0x80] sm:$0xff] (!%p691_p9)  ;;  %v780_v1 = vld [vmem:[%s8248_s0 + $0x88] sm:$0xff] (!%p691_p9)  ;;  %v781_v5 = vld [vmem:[%s8248_s0 + $0x90] sm:$0xff] (!%p691_p9) }
  0x27   : > { %v763_v2 = vld [vmem:[%s8248_s0] sm:$0xff] (!%p691_p9)  ;;  %v6525_v3 = vpack.c.bf16 (!%p691_p9), %v780_v1, %v779_v0  ;;  %v764_v4 = vld [vmem:[%s8248_s0 + $0x8] sm:$0xff] (!%p691_p9)  ;;  %v782_v6 = vld [vmem:[%s8248_s0 + $0x98] sm:$0xff] (!%p691_p9) }
  0x28   : > { %v6527_v7 = vpack.c.bf16 %v764_v4, %v763_v2  ;;  %v6529_v8 = vpack.c.bf16 %v782_v6, %v781_v5  ;;  %v765_v9 = vld [vmem:[%s8248_s0 + $0x10] sm:$0xff]  ;;  %v766_v10 = vld [vmem:[%s8248_s0 + $0x18] sm:$0xff]  ;;  %v783_v11 = vld [vmem:[%s8248_s0 + $0xa0] sm:$0xff]  ;;  %s758_s29 = scalar_select %p757_p10, %s7079_s7, 1 }
  0x29   : > { %6526 = vmatprep.subr.bf16.mxu0 %v6525_v3  ;;  %v784_v12 = vld [vmem:[%s8248_s0 + $0xa8] sm:$0xff]  ;;  %v6531_v13 = vpack.c.bf16 %v766_v10, %v765_v9  ;;  %v767_v15 = vld [vmem:[%s8248_s0 + $0x20] sm:$0xff]  ;;  %v785_v17 = vld [vmem:[%s8248_s0 + $0xb0] sm:$0xff]  ;;  %v6924_v10 = vmov 0.0|0.0  }
  0x2a   : > { %6528 = vmatpush3.bf16.msra.mxu0 %v6527_v7  ;;  %s5785_s9 = sshll.u32 %s758_s29, 3  ;;  %v6533_v14 = vpack.c.bf16 %v784_v12, %v783_v11  ;;  %v768_v16 = vld [vmem:[%s8248_s0 + $0x28] sm:$0xff]  ;;  %v786_v18 = vld [vmem:[%s8248_s0 + $0xb8] sm:$0xff]  ;;  %v769_v21 = vld [vmem:[%s8248_s0 + $0x30] sm:$0xff]  ;;  %6563 = vmatprep.subr.bf16.mxu1 %v6924_v10 }
  0x2b   : > { %6530 = vmatprep.subr.bf16.mxu0 %v6529_v8  ;;  %s761_s24 = scalar_lea.vmem %s8249_s25, %s5785_s9  ;;  %v6535_v19 = vpack.c.bf16 %v768_v16, %v767_v15  ;;  %v6537_v20 = vpack.c.bf16 %v786_v18, %v785_v17  ;;  %v770_v22 = vld [vmem:[%s8248_s0 + $0x38] sm:$0xff]  ;;  %v787_v23 = vld [vmem:[%s8248_s0 + $0xc0] sm:$0xff]  ;;  %v788_v24 = vld [vmem:[%s8248_s0 + $0xc8] sm:$0xff]  ;;  %v6926_v18 = vmov 0.0   ;;  %s8261_s25 = sld [smem:[#allocation23_spill]] }
  0x2c   : > { %v762_v25 = vld [vmem:[%s761_s24] sm:$0xff]  ;;  %v6539_v27 = vpack.c.bf16 %v770_v22, %v769_v21  ;;  %v6541_v28 = vpack.c.bf16 %v788_v24, %v787_v23  ;;  %v772_v30 = vld [vmem:[%s8248_s0 + $0x48] sm:$0xff]  ;;  %v789_v31 = vld [vmem:[%s8248_s0 + $0xd0] sm:$0xff]  ;;  %s8251_s24 = sld [smem:[#allocation15_spill]]  ;;  %6057 = vmatprep.mubr.msk.f32.mxu1 %vm6925_vm2, %v6926_v18  ;;  %s5782_s9 = sshll.u32 %s7079_s7, 4 }
  0x2d   : > { %v803_v26 = vcombine.high %v762_v25, %v762_v25  ;;  %v771_v29 = vld [vmem:[%s8248_s0 + $0x40] sm:$0xff]  ;;  %v790_v32 = vld [vmem:[%s8248_s0 + $0xd8] sm:$0xff]  ;;  %v773_v35 = vld [vmem:[%s8248_s0 + $0x50] sm:$0xff]  ;;  %s6927_s7 = smov [#allocation2]  }
  0x2e   : > { %6532 = vmatpush3.bf16.msra.mxu0 %v6531_v13  ;;  %v6543_v33 = vpack.c.bf16 %v772_v30, %v771_v29  ;;  %v6545_v34 = vpack.c.bf16 %v790_v32, %v789_v31  ;;  %v774_v36 = vld [vmem:[%s8248_s0 + $0x58] sm:$0xff]  ;;  %v791_v37 = vld [vmem:[%s8248_s0 + $0xe0] sm:$0xff]  ;;  %v792_v38 = vld [vmem:[%s8248_s0 + $0xe8] sm:$0xff] }
  0x2f   : > { %6534 = vmatprep.subr.bf16.mxu0 %v6533_v14  ;;  %869 = vmatprep.mubr.f32.mxu0 %v803_v26  ;;  %v6547_v39 = vpack.c.bf16 %v774_v36, %v773_v35  ;;  %v6549_v40 = vpack.c.bf16 %v792_v38, %v791_v37  ;;  %v775_v41 = vld [vmem:[%s8248_s0 + $0x60] sm:$0xff]  ;;  %v776_v42 = vld [vmem:[%s8248_s0 + $0x68] sm:$0xff]  ;;  %v793_v43 = vld [vmem:[%s8248_s0 + $0xf0] sm:$0xff] }
  0x30   : > { %v794_v44 = vld [vmem:[%s8248_s0 + $0xf8] sm:$0xff]  ;;  %v6551_v45 = vpack.c.bf16 %v776_v42, %v775_v41  ;;  %v777_v47 = vld [vmem:[%s8248_s0 + $0x70] sm:$0xff]  ;;  %v5537_v51 = vld [vmem:[%s8250_s5] ss:$0 sm:$0xff]  ;;  %s8262_s5 = sld [smem:[#allocation24_spill]] }
  0x31   : > { %v6553_v46 = vpack.c.bf16 %v794_v44, %v793_v43  ;;  %v778_v48 = vld [vmem:[%s8248_s0 + $0x78] sm:$0xff]  ;;  %v878_v56 = vld [vmem:[%s8252_s6] sm:$0x1]  ;;  %v918_v6 = vld [vmem:[%s8253_s28 + $0x8] sm:$0xff]  ;;  %s8256_s6 = sld [smem:[#allocation18_spill]] }
  0x32   : > { %6536 = vmatpush3.bf16.msra.mxu0 %v6535_v19  ;;  %v6555_v49 = vpack.c.bf16 %v778_v48, %v777_v47  ;;  %v876_v55 = vld [vmem:[%s8251_s24 + $0x1] sm:$0xf]  ;;  %v879_v57 = vld [vmem:[%s8251_s24] sm:$0x1]  ;;  %v1003_v9 = vld [vmem:[%s8254_s27 + $0x8] sm:$0xff] }
  0x33   : > { %6538 = vmatprep.subr.bf16.mxu0 %v6537_v20  ;;  %v880_v60 = vadd.f32 %v879_v57, %v878_v56  ;;  %v917_v5 = vld [vmem:[%s8253_s28] sm:$0xff]  ;;  %v919_v12 = vld [vmem:[%s8253_s28 + $0x10] sm:$0xff]  ;;  %v920_v13 = vld [vmem:[%s8253_s28 + $0x18] sm:$0xff] }
  0x34   : > { %v1002_v7 = vld [vmem:[%s8254_s27] sm:$0xff]  ;;  %v6558_v8 = vpack.c.bf16 %v918_v6, %v917_v5  ;;  %v1004_v14 = vld [vmem:[%s8254_s27 + $0x10] sm:$0xff]  ;;  %v6561_v15 = vpack.c.bf16 %v920_v13, %v919_v12  ;;  %v1005_v16 = vld [vmem:[%s8254_s27 + $0x18] sm:$0xff] }
  0x35   : > { %v6564_v11 = vpack.c.bf16 %v1003_v9, %v1002_v7  ;;  %v6567_v17 = vpack.c.bf16 %v1005_v16, %v1004_v14  ;;  %v5538_v23 = vld [vmem:[%s8255_s26] ss:$0 sm:$0xff]  ;;  %v1084_v26 = vld [vmem:[%s8191_s11 + $0x8] sm:$0xff]  ;;  %v1086_v35 = vld [vmem:[%s8191_s11 + $0x18] sm:$0xff] }
  0x36   : > { %6540 = vmatpush3.bf16.msra.mxu0 %v6539_v27  ;;  %v1083_v24 = vld [vmem:[%s8191_s11] sm:$0xff]  ;;  %v5552_v36 = vld [vmem:[%s8253_s28 + $0x30] sm:$0xff]  ;;  %v5553_v37 = vld [vmem:[%s8253_s28 + $0x38] sm:$0xff]  ;;  %s8138_s24 = scalar_lea.hbm %s8262_s5, %s5782_s9 }
  0x37   : > { %6542 = vmatprep.subr.bf16.mxu0 %v6541_v28  ;;  %6565 = vmatpush3.bf16.msra.mxu1 %v6564_v11  ;;  %v5550_v27 = vld [vmem:[%s8253_s28 + $0x20] sm:$0xff]  ;;  %v5551_v28 = vld [vmem:[%s8253_s28 + $0x28] sm:$0xff]  ;;  %s8257_s4 = smov %s8256_s6  ;;  %v6570_v31 = vpack.c.bf16 %v1084_v26, %v1083_v24  ;;  %v5566_v43 = vld [vmem:[%s8191_s11 + $0x30] sm:$0xff] }
  0x38   : > { %6566 = vmatprep.subr.bf16.mxu1 %v6924_v10  ;;  %v5539_v29 = vld [vmem:[%s8256_s6] ss:$0 sm:$0xff]  ;;  %v6576_v32 = vpack.c.bf16 %v5551_v28, %v5550_v27  ;;  %v5565_v41 = vld [vmem:[%s8191_s11 + $0x28] sm:$0xff]  ;;  %v5567_v44 = vld [vmem:[%s8191_s11 + $0x38] sm:$0xff]  ;;  %s5464_s6 = scalar_lea.sflag [#allocation3], %s755_s1 }
  0x39   : > { %v5557_v9 = vld [vmem:[%s8254_s27 + $0x20] sm:$0xff]  ;;  %v5558_v11 = vld [vmem:[%s8254_s27 + $0x28] sm:$0xff]  ;;  %v5560_v16 = vld [vmem:[%s8254_s27 + $0x38] sm:$0xff] }
  0x3a   : > { %6544 = vmatpush3.bf16.msra.mxu0 %v6543_v33  ;;  %v1085_v33 = vld [vmem:[%s8191_s11 + $0x10] sm:$0xff]  ;;  %v6582_v13 = vpack.c.bf16 %v5558_v11, %v5557_v9  ;;  %v5569_v26 = vld [vmem:[%s8192_s12 + $0x1] ss:$0 sm:$0xff]  ;;  %v5583_v11 = vld [vmem:[%s8259_s8 + $0x2] ss:$0 sm:$0xff] }
  0x3b   : > { %6546 = vmatprep.subr.bf16.mxu0 %v6545_v34  ;;  %6568 = vmatpush3.bf16.msra.mxu1 %v6567_v17  ;;  %v6573_v38 = vpack.c.bf16 %v1086_v35, %v1085_v33 }
  0x3c   : > { %6569 = vmatprep.subr.bf16.mxu1 %v6924_v10 }
  0x3e   : > { %6548 = vmatpush3.bf16.msra.mxu0 %v6547_v39  ;;  %v6579_v39 = vpack.c.bf16 %v5553_v37, %v5552_v36 }
  0x3f   : > { %6550 = vmatprep.subr.bf16.mxu0 %v6549_v40  ;;  %v5564_v40 = vld [vmem:[%s8191_s11 + $0x20] sm:$0xff] }
  0x40   : > { %v6588_v42 = vpack.c.bf16 %v5565_v41, %v5564_v40 }
  0x42   : > { %6552 = vmatpush3.bf16.msra.mxu0 %v6551_v45  ;;  %v6591_v45 = vpack.c.bf16 %v5567_v44, %v5566_v43  ;;  %v1332_v43 = vld [vmem:[%s8193_s13] sm:$0xff] }
  0x43   : > { %6554 = vmatprep.subr.bf16.mxu0 %v6553_v46  ;;  %v5542_v46 = vld [vmem:[%s8258_s10] ss:$0 sm:$0xff] }
  0x44   : > { %v5585_v44 = vld [vmem:[%s8254_s27 + $0x40] sm:$0xff] }
  0x46   : > { %6556 = vmatpush3.bf16.msra.mxu0 %v6555_v49  ;;  %v5540_v49 = vld [vmem:[%s8259_s8] ss:$0 sm:$0xff] }
  0x47   : > { %6557 = vmatprep.subr.bf16.mxu0 %v6924_v10 }
  0x49   : > { %870 = vmatmul.mubr.f32.vlgmr.msra.gmra.mrb[0].mxu0 %v762_v25 }
  0x4a   : > { %6559 = vmatpush3.bf16.msra.mxu0 %v6558_v8  ;;  %6046 = vmatprep.mubr.msk.f32.mxu0 %vm6925_vm2, %v6926_v18 }
  0x4b   : > { %6560 = vmatprep.subr.bf16.mxu0 %v6924_v10 }
  0x4e   : > { %6562 = vmatpush3.bf16.msra.mxu0 %v6561_v15  ;;  %v5559_v15 = vld [vmem:[%s8254_s27 + $0x30] sm:$0xff] }
  0x4f   : > { %6575 = vmatprep.subr.bf16.mxu0 %v6924_v10  ;;  %v6585_v17 = vpack.c.bf16 %v5560_v16, %v5559_v15  ;;  %v5597_v15 = vld [vmem:[%s8192_s12 + $0x2] ss:$0 sm:$0xff] }
 0x11c   : > { %v5818_v50 = vpop.f32.mrb[0].mxu0 }
 0x11d   : > { %v5819_v52 = vpop.f32.mrb[1].mxu0 }
 0x11e   : > { %v5820_v53 = vadd.f32 %v5819_v52, %v5818_v50 }
 0x120   : > { %v872_v54 = vadd.f32 %v5820_v53, %v5537_v51 }
 0x122   : > { %v875_v58 = vmul.f32 0.01, %v872_v54  ;;  %v5544_v54 = vld [vmem:[%s8192_s12] ss:$0 sm:$0xff] }
 0x124   : > { %v877_v59 = vadd.f32 %v876_v55, %v875_v58 }
 0x126   : > { %v882_v61 = vrot.slane %v877_v59, 7 }
 0x128   : > { %v7219_v62 = vsel %vm884_vm0, %v880_v60, %v882_v61 }
 0x129   : > { %v889_v63 = vsel %vm888_vm1, %v7219_v62, 0.0 }
 0x12a   : > { %890 = vadd.xlane.f32.xlu0 %v889_v63 }
 0x1b7   : > { %v891_v0 = vpop.xlane.xlu0 %890 }
 0x1b8   : > { %v893_v1 = vmul.f32 0.03125, %v891_v0 }
 0x1ba   : > { %v894_v2 = vsub.f32 %v7219_v62, %v893_v1 }
 0x1bc   : > { %v895_v3 = vmul.f32 %v894_v2, %v894_v2 }
 0x1be   : > { %v896_v4 = vsel %vm888_vm1, %v895_v3, 0.0 }
 0x1bf   : > { %897 = vadd.xlane.f32.xlu0 %v896_v4 }
 0x24c   : > { %v898_v19 = vpop.xlane.xlu0 %897 }
 0x24d   : > { %v899_v20 = vmul.f32 0.03125, %v898_v19 }
 0x24f   : > { %v900_v21 = vadd.f32 1e-06, %v899_v20 }
 0x251   : > { %6810 = vrsqrt.f32 %v900_v21  ;;  %v5562_v21 = vld [vmem:[%s8258_s10 + $0x1] ss:$0 sm:$0xff] }
 0x25b   : > { %v6811_v22 = vpop.eup %6810 }
 0x25c   : > { %v902_v25 = vmul.f32 %v6811_v22, %v894_v2 }
 0x25e   : > { %v909_v30 = vmul.f32 %v5538_v23, %v902_v25  ;;  %v5555_v23 = vld [vmem:[%s8259_s8 + $0x1] ss:$0 sm:$0xff] }
 0x260   : > { %v7280_v34 = vadd.f32 %v5539_v29, %v909_v30 }
 0x262   : > { %6047 = vmatmul.mubr.msk.f32.vlgmr.msra.gmra.mrb[2].mxu0 %vm928_vm3, %v7280_v34  ;;  %6058 = vmatmul.mubr.msk.f32.vlgmr.msra.gmra.mrb[0].mxu1 %vm928_vm3, %v7280_v34 }
 0x263   : > { %6571 = vmatpush3.bf16.msra.mxu1 %v6570_v31  ;;  %6577 = vmatpush3.bf16.msra.mxu0 %v6576_v32 }
 0x264   : > { %6572 = vmatprep.subr.bf16.mxu1 %v6924_v10  ;;  %6578 = vmatprep.subr.bf16.mxu0 %v6924_v10 }
 0x265   : > { %6068 = vmatprep.mubr.msk.f32.mxu1 %vm6925_vm2, %v6926_v18  ;;  %6089 = vmatprep.mubr.msk.f32.mxu0 %vm6925_vm2, %v6926_v18 }
 0x267   : > { %6574 = vmatpush3.bf16.msra.mxu1 %v6573_v38  ;;  %6580 = vmatpush3.bf16.msra.mxu0 %v6579_v39  ;;  %v5575_v39 = vld [vmem:[%s8193_s13 + $0x8] sm:$0xff] }
 0x268   : > { %6587 = vmatprep.subr.bf16.mxu0 %v6924_v10  ;;  %6071 = vmatprep.subr.mxu1 %v6926_v18 }
 0x26a   : > { %6069 = vmatmul.mubr.msk.f32.vlgmr.msra.gmra.mrb[2].mxu1 %vm928_vm3, %v7280_v34  ;;  %6090 = vmatmul.mubr.msk.f32.vlgmr.msra.gmra.mrb[4].mxu0 %vm928_vm3, %v7280_v34 }
 0x26b   : > { %6589 = vmatpush3.bf16.msra.mxu0 %v6588_v42  ;;  %6111 = vmatprep.mubr.msk.f32.mxu0 %vm6925_vm2, %v6926_v18 }
 0x26c   : > { %6590 = vmatprep.subr.bf16.mxu0 %v6924_v10  ;;  %6073 = vmatprep.mubr.msk.f32.mxu1 %vm6925_vm2, %v6926_v18 }
 0x26f   : > { %6592 = vmatpush3.bf16.msra.mxu0 %v6591_v45  ;;  %v5586_v45 = vld [vmem:[%s8254_s27 + $0x48] sm:$0xff] }
 0x270   : > { %6124 = vmatprep.subr.mxu0 %v6926_v18 }
 0x272   : > { %6112 = vmatmul.mubr.msk.f32.vlgmr.msra.gmra.mrb[6].mxu0 %vm928_vm3, %v7280_v34 }
 0x273   : > { %6126 = vmatprep.mubr.msk.f32.mxu0 %vm6925_vm2, %v6926_v18  ;;  %6125 = vmatpush3.msra.mxu0 %v5575_v39 }
 0x274   : > { %6593 = vmatprep.subr.bf16.mxu0 %v6924_v10 }
 0x335   : > { %v998_v47 = vpop.f32.mrb[2].mxu0  ;;  %v1079_v48 = vpop.f32.mrb[0].mxu1 }
 0x336   : > { %v1080_v50 = vadd.f32 %v5542_v46, %v1079_v48  ;;  %v6048_v51 = vpop.f32.mrb[3].mxu0  ;;  %v6059_v52 = vpop.f32.mrb[1].mxu1  ;;  %v999_v53 = vadd.f32 %v5540_v49, %v998_v47  ;;  %v6600_v46 = vpack.c.bf16 %v5586_v45, %v5585_v44  ;;  %v5587_v47 = vld [vmem:[%s8254_s27 + $0x50] sm:$0xff]  ;;  %v5588_v48 = vld [vmem:[%s8254_s27 + $0x58] sm:$0xff] }
 0x337   : > { %v6603_v49 = vpack.c.bf16 %v5588_v48, %v5587_v47  ;;  %v5579_v51 = vld [vmem:[%s8253_s28 + $0x48] sm:$0xff]  ;;  %v5622_v44 = vld [vmem:[%s8191_s11 + $0x78] sm:$0xff] }
 0x338   : > { %6072 = vmatpush3.xpose.msk.msra.mxu1 %vm1164_vm4, %v1080_v50  ;;  %v5578_v50 = vld [vmem:[%s8253_s28 + $0x40] sm:$0xff]  ;;  %v5613_v47 = vld [vmem:[%s8254_s27 + $0x68] sm:$0xff] }
 0x339   : > { %6076 = vmatprep.subr.mxu1 %v6926_v18  ;;  %v6594_v52 = vpack.c.bf16 %v5579_v51, %v5578_v50  ;;  %v5615_v50 = vld [vmem:[%s8254_s27 + $0x78] sm:$0xff] }
 0x33b   : > { %6074 = vmatmul.mubr.msk.f32.vlgmr.msra.gmra.mrb[4].mxu1 %vm1164_vm4, %v999_v53  ;;  %v5580_v53 = vld [vmem:[%s8253_s28 + $0x50] sm:$0xff] }
 0x33c   : > { %6078 = vmatprep.mubr.msk.f32.mxu1 %vm6925_vm2, %v6926_v18 }
 0x33d   : > { %v1160_v55 = vpop.f32.mrb[2].mxu1  ;;  %v1412_v56 = vpop.f32.mrb[4].mxu0 }
 0x33e   : > { %v1161_v57 = vadd.f32 %v5544_v54, %v1160_v55  ;;  %v6070_v58 = vpop.f32.mrb[3].mxu1  ;;  %v6091_v59 = vpop.f32.mrb[5].mxu0  ;;  %v1413_v27 = vadd.f32 %v5555_v23, %v1412_v56  ;;  %v5581_v54 = vld [vmem:[%s8253_s28 + $0x58] sm:$0xff] }
 0x33f   : > { %v5592_v58 = vld [vmem:[%s8191_s11 + $0x40] sm:$0xff]  ;;  %v5593_v59 = vld [vmem:[%s8191_s11 + $0x48] sm:$0xff] }
 0x340   : > { %6077 = vmatpush3.msk.msra.mxu1 %vm1258_vm5, %v1161_v57  ;;  %v6597_v57 = vpack.c.bf16 %v5581_v54, %v5580_v53 }
 0x341   : > { %6581 = vmatprep.subr.bf16.mxu1 %v6924_v10 }
 0x345   : > { %v1578_v60 = vpop.f32.mrb[6].mxu0 }
 0x346   : > { %v6113_v61 = vpop.f32.mrb[7].mxu0  ;;  %v1579_v28 = vadd.f32 %v5569_v26, %v1578_v60 }
 0x40e   : > { %v1237_v63 = vpop.f32.mrb[4].mxu1 }
 0x40f   : > { %v1241_v0 = vmul.f32 0.35355338, %v1237_v63  ;;  %v6075_v1 = vpop.f32.mrb[5].mxu1  ;;  %v6606_v63 = vpack.c.bf16 %v5593_v59, %v5592_v58 }
 0x410   : > { %v5595_v1 = vld [vmem:[%s8191_s11 + $0x58] sm:$0xff] }
 0x411   : > { %v1243_v2 = vsel %vm1242_vm6, %v1241_v0, -inf }
 0x412   : > { %1244 = vmax.xlane.f32.xlu1 %v1243_v2  ;;  %v5590_v2 = vld [vmem:[%s8258_s10 + $0x2] ss:$0 sm:$0xff] }
 0x49f   : > { %v1245_v3 = vpop.xlane.xlu1 %1244 }
 0x4a0   : > { %v1246_v4 = vsub.f32 %v1241_v0, %v1245_v3  ;;  %v5594_v0 = vld [vmem:[%s8191_s11 + $0x50] sm:$0xff] }
 0x4a1   : > { %v6609_v3 = vpack.c.bf16 %v5595_v1, %v5594_v0  ;;  %v5610_v0 = vld [vmem:[%s8259_s8 + $0x3] ss:$0 sm:$0xff] }
 0x4a2   : > { %v1247_v5 = vmul.f32 1.442695, %v1246_v4 }
 0x4a4   : > { %6812 = vpow2.f32 %v1247_v5 }
 0x4ae   : > { %v6813_v6 = vpop.eup %6812 }
 0x4af   : > { %v1249_v7 = vsel %vm1242_vm6, %v6813_v6, 0.0 }
 0x4b0   : > { %1250 = vadd.xlane.f32.xlu1 %v1249_v7 }
 0x53d   : > { %v1251_v8 = vpop.xlane.xlu1 %1250 }
 0x53e   : > { %6814 = vrcp.f32 %v1251_v8 }
 0x548   : > { %v6815_v12 = vpop.eup %6814 }
 0x549   : > { %v1253_v14 = vmul.f32 %v6815_v12, %v6813_v6 }
 0x54b   : > { %6079 = vmatmul.mubr.msk.f32.vlgmr.msra.gmra.mrb[6].mxu1 %vm1254_vm7, %v1253_v14 }
 0x54c   : > { %6583 = vmatpush3.bf16.msra.mxu1 %v6582_v13  ;;  %6100 = vmatprep.mubr.msk.f32.mxu1 %vm6925_vm2, %v6926_v18 }
 0x54d   : > { %6584 = vmatprep.subr.bf16.mxu1 %v6924_v10 }
 0x550   : > { %6586 = vmatpush3.bf16.msra.mxu1 %v6585_v17 }
 0x551   : > { %6114 = vmatprep.subr.mxu1 %v6926_v18 }
 0x553   : > { %6101 = vmatmul.mubr.msk.f32.vlgmr.msra.gmra.mrb[8].mxu1 %vm928_vm3, %v7280_v34 }
 0x554   : > { %6116 = vmatprep.mubr.msk.f32.mxu1 %vm6925_vm2, %v6926_v18 }
 0x61e   : > { %v1328_v19 = vpop.f32.mrb[6].mxu1 }
 0x61f   : > { %v6080_v20 = vpop.f32.mrb[7].mxu1 }
 0x626   : > { %v1495_v22 = vpop.f32.mrb[8].mxu1 }
 0x627   : > { %v1496_v24 = vadd.f32 %v5562_v21, %v1495_v22  ;;  %v6102_v25 = vpop.f32.mrb[9].mxu1 }
 0x629   : > { %6115 = vmatpush3.xpose.msk.msra.mxu1 %vm1164_vm4, %v1496_v24 }
 0x62a   : > { %6119 = vmatprep.subr.mxu1 %v6926_v18 }
 0x62c   : > { %6117 = vmatmul.mubr.msk.f32.vlgmr.msra.gmra.mrb[10].mxu1 %vm1164_vm4, %v1413_v27 }
 0x62d   : > { %6120 = vmatpush3.msk.msra.mxu1 %vm1258_vm5, %v1579_v28  ;;  %6121 = vmatprep.mubr.msk.f32.mxu1 %vm6925_vm2, %v6926_v18 }
 0x62e   : > { %6129 = vmatprep.subr.mxu1 %v6926_v18 }
 0x6ff   : > { %v1654_v29 = vpop.f32.mrb[10].mxu1 }
 0x700   : > { %v1658_v30 = vmul.f32 0.35355338, %v1654_v29  ;;  %v6118_v31 = vpop.f32.mrb[11].mxu1  ;;  %v5603_v29 = vld [vmem:[%s8193_s13 + $0x10] sm:$0xff] }
 0x701   : > { %v5605_v31 = vld [vmem:[%s8253_s28 + $0x60] sm:$0xff] }
 0x702   : > { %v1659_v32 = vsel %vm1242_vm6, %v1658_v30, -inf }
 0x703   : > { %1660 = vmax.xlane.f32.xlu0 %v1659_v32  ;;  %v5606_v32 = vld [vmem:[%s8253_s28 + $0x68] sm:$0xff] }
 0x790   : > { %v1661_v33 = vpop.xlane.xlu0 %1660 }
 0x791   : > { %v1662_v35 = vsub.f32 %v1658_v30, %v1661_v33 }
 0x793   : > { %v1663_v36 = vmul.f32 1.442695, %v1662_v35  ;;  %v6612_v35 = vpack.c.bf16 %v5606_v32, %v5605_v31 }
 0x795   : > { %6816 = vpow2.f32 %v1663_v36 }
 0x79f   : > { %v6817_v37 = vpop.eup %6816 }
 0x7a0   : > { %v1665_v38 = vsel %vm1242_vm6, %v6817_v37, 0.0 }
 0x7a1   : > { %1666 = vadd.xlane.f32.xlu1 %v1665_v38  ;;  %v5608_v38 = vld [vmem:[%s8253_s28 + $0x78] sm:$0xff] }
 0x82e   : > { %v1667_v40 = vpop.xlane.xlu1 %1666 }
 0x82f   : > { %6818 = vrcp.f32 %v1667_v40  ;;  %v5619_v40 = vld [vmem:[%s8191_s11 + $0x60] sm:$0xff] }
 0x839   : > { %v6819_v41 = vpop.eup %6818 }
 0x83a   : > { %v1669_v42 = vmul.f32 %v6819_v41, %v6817_v37  ;;  %v5607_v37 = vld [vmem:[%s8253_s28 + $0x70] sm:$0xff]  ;;  %v5620_v41 = vld [vmem:[%s8191_s11 + $0x68] sm:$0xff] }
 0x83b   : > { %v6615_v39 = vpack.c.bf16 %v5608_v38, %v5607_v37  ;;  %v2912_v37 = vld [vmem:[%s8197_s17 + $0x10] sm:$0xff]  ;;  %v2913_v38 = vld [vmem:[%s8197_s17 + $0x18] sm:$0xff] }
 0x83c   : > { %6122 = vmatmul.mubr.msk.f32.vlgmr.msra.gmra.mrb[12].mxu1 %vm1254_vm7, %v1669_v42  ;;  %v6624_v42 = vpack.c.bf16 %v5620_v41, %v5619_v40 }
 0x83d   : > { %6130 = vmatpush3.msra.mxu1 %v1332_v43  ;;  %6131 = vmatprep.mubr.msk.f32.mxu1 %vm6925_vm2, %v6926_v18  ;;  %v5621_v43 = vld [vmem:[%s8191_s11 + $0x70] sm:$0xff] }
 0x83e   : > { %6599 = vmatprep.subr.bf16.mxu1 %v6924_v10  ;;  %v6627_v45 = vpack.c.bf16 %v5622_v44, %v5621_v43  ;;  %v5633_v44 = vld [vmem:[%s8195_s15] ss:$0 sm:$0xff] }
 0x840   : > { %6132 = vmatmul.mubr.msk.f32.vlgmr.msra.gmra.mrb[14].mxu1 %vm1164_vm4, %v1328_v19 }
 0x841   : > { %6601 = vmatpush3.bf16.msra.mxu1 %v6600_v46  ;;  %6153 = vmatprep.mubr.msk.f32.mxu1 %vm6925_vm2, %v6926_v18  ;;  %v5612_v46 = vld [vmem:[%s8254_s27 + $0x60] sm:$0xff] }
 0x842   : > { %6602 = vmatprep.subr.bf16.mxu1 %v6924_v10  ;;  %v6618_v48 = vpack.c.bf16 %v5613_v47, %v5612_v46  ;;  %v5634_v46 = vld [vmem:[%s8196_s16] ss:$0 sm:$0xff] }
 0x845   : > { %6604 = vmatpush3.bf16.msra.mxu1 %v6603_v49  ;;  %v5614_v49 = vld [vmem:[%s8254_s27 + $0x70] sm:$0xff] }
 0x846   : > { %6167 = vmatprep.subr.mxu1 %v6926_v18  ;;  %v6621_v53 = vpack.c.bf16 %v5615_v50, %v5614_v49  ;;  %v3021_v49 = vld [vmem:[%s8199_s19] sm:$0xff]  ;;  %v3022_v50 = vld [vmem:[%s8199_s19 + $0x8] sm:$0xff] }
 0x848   : > { %6154 = vmatmul.mubr.msk.f32.vlgmr.msra.gmra.mrb[16].mxu1 %vm928_vm3, %v7280_v34 }
 0x849   : > { %6169 = vmatprep.mubr.msk.f32.mxu1 %vm6925_vm2, %v6926_v18 }
 0x90f   : > { %v1742_v55 = vpop.f32.mrb[12].mxu1 }
 0x910   : > { %v6123_v56 = vpop.f32.mrb[13].mxu1  ;;  %6127 = vmatmul.mubr.msk.f32.vlgmr.msra.gmra.mrb[8].mxu0 %vm1164_vm4, %v1742_v55 }
 0x911   : > { %6595 = vmatpush3.bf16.msra.mxu0 %v6594_v52  ;;  %6142 = vmatprep.mubr.msk.f32.mxu0 %vm6925_vm2, %v6926_v18 }
 0x912   : > { %6596 = vmatprep.subr.bf16.mxu0 %v6924_v10 }
 0x913   : > { %v1890_v60 = vpop.f32.mrb[14].mxu1 }
 0x914   : > { %v6133_v61 = vpop.f32.mrb[15].mxu1 }
 0x915   : > { %6598 = vmatpush3.bf16.msra.mxu0 %v6597_v57  ;;  %v5617_v61 = vld [vmem:[%s8258_s10 + $0x3] ss:$0 sm:$0xff] }
 0x916   : > { %6605 = vmatprep.subr.bf16.mxu0 %v6924_v10 }
 0x918   : > { %6143 = vmatmul.mubr.msk.f32.vlgmr.msra.gmra.mrb[10].mxu0 %vm928_vm3, %v7280_v34 }
 0x919   : > { %6607 = vmatpush3.bf16.msra.mxu0 %v6606_v63  ;;  %6164 = vmatprep.mubr.msk.f32.mxu0 %vm6925_vm2, %v6926_v18 }
 0x91a   : > { %6608 = vmatprep.subr.bf16.mxu0 %v6924_v10 }
 0x91b   : > { %v2056_v4 = vpop.f32.mrb[16].mxu1 }
 0x91c   : > { %v2057_v5 = vadd.f32 %v5590_v2, %v2056_v4  ;;  %v6155_v6 = vpop.f32.mrb[17].mxu1  ;;  %v5624_v2 = vld [vmem:[%s8192_s12 + $0x3] ss:$0 sm:$0xff] }
 0x91d   : > { %6610 = vmatpush3.bf16.msra.mxu0 %v6609_v3 }
 0x91e   : > { %6168 = vmatpush3.xpose.msk.msra.mxu1 %vm1164_vm4, %v2057_v5  ;;  %6177 = vmatprep.subr.mxu0 %v6926_v18 }
 0x91f   : > { %6172 = vmatprep.subr.mxu1 %v6926_v18 }
 0x920   : > { %6165 = vmatmul.mubr.msk.f32.vlgmr.msra.gmra.mrb[12].mxu0 %vm928_vm3, %v7280_v34 }
 0x921   : > { %6179 = vmatprep.mubr.msk.f32.mxu0 %vm6925_vm2, %v6926_v18  ;;  %6178 = vmatpush3.msra.mxu0 %v5603_v29 }
 0x922   : > { %6617 = vmatprep.subr.bf16.mxu0 %v6924_v10 }
 0x9e3   : > { %v1817_v7 = vpop.f32.mrb[8].mxu0 }
 0x9e4   : > { %v7462_v8 = vadd.f32 %v1890_v60, %v1817_v7  ;;  %v6128_v9 = vpop.f32.mrb[9].mxu0 }
 0x9eb   : > { %v1973_v12 = vpop.f32.mrb[10].mxu0 }
 0x9ec   : > { %v1974_v13 = vadd.f32 %v5583_v11, %v1973_v12  ;;  %v6144_v14 = vpop.f32.mrb[11].mxu0 }
 0x9ee   : > { %6170 = vmatmul.mubr.msk.f32.vlgmr.msra.gmra.mrb[18].mxu1 %vm1164_vm4, %v1974_v13 }
 0x9ef   : > { %6174 = vmatprep.mubr.msk.f32.mxu1 %vm6925_vm2, %v6926_v18 }
 0x9f3   : > { %v2139_v16 = vpop.f32.mrb[12].mxu0 }
 0x9f4   : > { %v2140_v17 = vadd.f32 %v5597_v15, %v2139_v16  ;;  %v6166_v19 = vpop.f32.mrb[13].mxu0  ;;  %v5630_v15 = vld [vmem:[%s8193_s13 + $0x18] sm:$0xff] }
 0x9f6   : > { %6173 = vmatpush3.msk.msra.mxu1 %vm1258_vm5, %v2140_v17 }
 0x9f7   : > { %6611 = vmatprep.subr.bf16.mxu1 %v6924_v10 }
 0xac1   : > { %v2215_v20 = vpop.f32.mrb[18].mxu1 }
 0xac2   : > { %v2219_v21 = vmul.f32 0.35355338, %v2215_v20  ;;  %v6171_v22 = vpop.f32.mrb[19].mxu1 }
 0xac4   : > { %v2220_v23 = vsel %vm1242_vm6, %v2219_v21, -inf }
 0xac5   : > { %2221 = vmax.xlane.f32.xlu0 %v2220_v23 }
 0xb52   : > { %v2222_v24 = vpop.xlane.xlu0 %2221 }
 0xb53   : > { %v2223_v25 = vsub.f32 %v2219_v21, %v2222_v24 }
 0xb55   : > { %v2224_v26 = vmul.f32 1.442695, %v2223_v25  ;;  %v5632_v25 = vld [vmem:[%s8194_s14] ss:$0 sm:$0xff] }
 0xb57   : > { %6820 = vpow2.f32 %v2224_v26 }
 0xb61   : > { %v6821_v27 = vpop.eup %6820 }
 0xb62   : > { %v2226_v28 = vsel %vm1242_vm6, %v6821_v27, 0.0 }
 0xb63   : > { %2227 = vadd.xlane.f32.xlu1 %v2226_v28 }
 0xbf0   : > { %v2228_v30 = vpop.xlane.xlu1 %2227 }
 0xbf1   : > { %6822 = vrcp.f32 %v2228_v30 }
 0xbfb   : > { %v6823_v33 = vpop.eup %6822 }
 0xbfc   : > { %v2230_v36 = vmul.f32 %v6823_v33, %v6821_v27 }
 0xbfe   : > { %6175 = vmatmul.mubr.msk.f32.vlgmr.msra.gmra.mrb[20].mxu1 %vm1254_vm7, %v2230_v36 }
 0xbff   : > { %6613 = vmatpush3.bf16.msra.mxu1 %v6612_v35  ;;  %6190 = vmatprep.mubr.msk.f32.mxu1 %vm6925_vm2, %v6926_v18  ;;  %v2910_v35 = vld [vmem:[%s8197_s17] sm:$0xff] }
 0xc00   : > { %6614 = vmatprep.subr.bf16.mxu1 %v6924_v10 }
 0xc03   : > { %6616 = vmatpush3.bf16.msra.mxu1 %v6615_v39  ;;  %v6633_v39 = vpack.c.bf16 %v2913_v38, %v2912_v37 }
 0xc04   : > { %6623 = vmatprep.subr.bf16.mxu1 %v6924_v10 }
 0xc06   : > { %6191 = vmatmul.mubr.msk.f32.vlgmr.msra.gmra.mrb[22].mxu1 %vm928_vm3, %v7280_v34 }
 0xc07   : > { %6625 = vmatpush3.bf16.msra.mxu1 %v6624_v42  ;;  %6212 = vmatprep.mubr.msk.f32.mxu1 %vm6925_vm2, %v6926_v18 }
 0xc08   : > { %6626 = vmatprep.subr.bf16.mxu1 %v6924_v10 }
 0xc0b   : > { %6628 = vmatpush3.bf16.msra.mxu1 %v6627_v45 }
 0xc0c   : > { %6225 = vmatprep.subr.mxu1 %v6926_v18 }
 0xc0e   : > { %6213 = vmatmul.mubr.msk.f32.vlgmr.msra.gmra.mrb[24].mxu1 %vm928_vm3, %v7280_v34 }
 0xc0f   : > { %6227 = vmatprep.mubr.msk.f32.mxu1 %vm6925_vm2, %v6926_v18  ;;  %6226 = vmatpush3.msra.mxu1 %v5630_v15 }
 0xc10   : > { %6635 = vmatprep.subr.bf16.mxu1 %v6924_v10 }
 0xcd1   : > { %v2303_v51 = vpop.f32.mrb[20].mxu1 }
 0xcd2   : > { %v6176_v52 = vpop.f32.mrb[21].mxu1  ;;  %6180 = vmatmul.mubr.msk.f32.vlgmr.msra.gmra.mrb[14].mxu0 %vm1164_vm4, %v2303_v51  ;;  %v6636_v51 = vpack.c.bf16 %v3022_v50, %v3021_v49 }
 0xcd3   : > { %6619 = vmatpush3.bf16.msra.mxu0 %v6618_v48  ;;  %6201 = vmatprep.mubr.msk.f32.mxu0 %vm6925_vm2, %v6926_v18  ;;  %v3023_v52 = vld [vmem:[%s8199_s19 + $0x10] sm:$0xff] }
 0xcd4   : > { %6620 = vmatprep.subr.bf16.mxu0 %v6924_v10 }
 0xcd7   : > { %6622 = vmatpush3.bf16.msra.mxu0 %v6621_v53  ;;  %v3024_v53 = vld [vmem:[%s8199_s19 + $0x18] sm:$0xff] }
 0xcd8   : > { %6215 = vmatprep.subr.mxu0 %v6926_v18 }
 0xcd9   : > { %v2462_v54 = vpop.f32.mrb[22].mxu1 }
 0xcda   : > { %v6192_v55 = vpop.f32.mrb[23].mxu1  ;;  %6202 = vmatmul.mubr.msk.f32.vlgmr.msra.gmra.mrb[16].mxu0 %vm928_vm3, %v7280_v34  ;;  %v2463_v3 = vadd.f32 %v5610_v0, %v2462_v54  ;;  %v6639_v54 = vpack.c.bf16 %v3024_v53, %v3023_v52  ;;  %v5642_v52 = vld [vmem:[%s8253_s28 + $0x80] sm:$0xff] }
 0xcdb   : > { %6217 = vmatprep.mubr.msk.f32.mxu0 %vm6925_vm2, %v6926_v18  ;;  %v3025_v55 = vld [vmem:[%s8199_s19 + $0x20] sm:$0xff] }
 0xce1   : > { %v2628_v56 = vpop.f32.mrb[24].mxu1 }
 0xce2   : > { %v6214_v57 = vpop.f32.mrb[25].mxu1  ;;  %v2629_v4 = vadd.f32 %v5624_v2, %v2628_v56  ;;  %v3026_v56 = vld [vmem:[%s8199_s19 + $0x28] sm:$0xff] }
 0xce3   : > { %v6642_v57 = vpack.c.bf16 %v3026_v56, %v3025_v55  ;;  %v5645_v55 = vld [vmem:[%s8253_s28 + $0x98] sm:$0xff] }
 0xda5   : > { %v2378_v58 = vpop.f32.mrb[14].mxu0 }
 0xda6   : > { %v2382_v59 = vadd.f32 %v2378_v58, %v7462_v8  ;;  %v6181_v60 = vpop.f32.mrb[15].mxu0  ;;  %v3027_v58 = vld [vmem:[%s8199_s19 + $0x30] sm:$0xff] }
 0xdad   : > { %v2545_v63 = vpop.f32.mrb[16].mxu0 }
 0xdae   : > { %v2546_v1 = vadd.f32 %v5617_v61, %v2545_v63  ;;  %v6203_v34 = vpop.f32.mrb[17].mxu0  ;;  %v3029_v61 = vld [vmem:[%s8199_s19 + $0x40] sm:$0xff]  ;;  %v3030_v63 = vld [vmem:[%s8199_s19 + $0x48] sm:$0xff] }
 0xdaf   : > { %v6648_v0 = vpack.c.bf16 %v3030_v63, %v3029_v61  ;;  %v3032_v34 = vld [vmem:[%s8199_s19 + $0x58] sm:$0xff]  ;;  %v5640_v61 = vld [vmem:[%s8255_s26 + $0x1] ss:$0 sm:$0xff] }
 0xdb0   : > { %6216 = vmatpush3.xpose.msk.msra.mxu0 %vm1164_vm4, %v2546_v1  ;;  %v3031_v1 = vld [vmem:[%s8199_s19 + $0x50] sm:$0xff] }
 0xdb1   : > { %6220 = vmatprep.subr.mxu0 %v6926_v18  ;;  %v6651_v2 = vpack.c.bf16 %v3032_v34, %v3031_v1  ;;  %v5650_v1 = vld [vmem:[%s8254_s27 + $0x88] sm:$0xff]  ;;  %v5641_v34 = vld [vmem:[%s8257_s4 + $0x1] ss:$0 sm:$0xff]  ;;  %s756_s4 = scalar_lea.vmem [#allocation2], %s755_s1 }
 0xdb3   : > { %6218 = vmatmul.mubr.msk.f32.vlgmr.msra.gmra.mrb[18].mxu0 %vm1164_vm4, %v2463_v3  ;;  %v3033_v3 = vld [vmem:[%s8199_s19 + $0x60] sm:$0xff] }
 0xdb4   : > { %6221 = vmatpush3.msk.msra.mxu0 %vm1258_vm5, %v2629_v4  ;;  %6222 = vmatprep.mubr.msk.f32.mxu0 %vm6925_vm2, %v6926_v18  ;;  %v3034_v4 = vld [vmem:[%s8199_s19 + $0x68] sm:$0xff] }
 0xdb5   : > { %6629 = vmatprep.subr.bf16.mxu0 %v6924_v10 }
 0xe86   : > { %v2704_v5 = vpop.f32.mrb[18].mxu0 }
 0xe87   : > { %v2708_v6 = vmul.f32 0.35355338, %v2704_v5  ;;  %v6219_v7 = vpop.f32.mrb[19].mxu0  ;;  %v6654_v5 = vpack.c.bf16 %v3034_v4, %v3033_v3 }
 0xe88   : > { %v3036_v7 = vld [vmem:[%s8199_s19 + $0x78] sm:$0xff] }
 0xe89   : > { %v2709_v8 = vsel %vm1242_vm6, %v2708_v6, -inf }
 0xe8a   : > { %2710 = vmax.xlane.f32.xlu0 %v2709_v8 }
 0xf17   : > { %v2711_v9 = vpop.xlane.xlu0 %2710 }
 0xf18   : > { %v2712_v11 = vsub.f32 %v2708_v6, %v2711_v9  ;;  %v3035_v6 = vld [vmem:[%s8199_s19 + $0x70] sm:$0xff]  ;;  %v5635_v9 = vld [vmem:[%s8198_s18] ss:$0 sm:$0xff] }
 0xf19   : > { %v6657_v8 = vpack.c.bf16 %v3036_v7, %v3035_v6  ;;  %v5652_v6 = vld [vmem:[%s8254_s27 + $0x98] sm:$0xff] }
 0xf1a   : > { %v2713_v12 = vmul.f32 1.442695, %v2712_v11 }
 0xf1c   : > { %6824 = vpow2.f32 %v2713_v12 }
 0xf26   : > { %v6825_v13 = vpop.eup %6824 }
 0xf27   : > { %v2715_v14 = vsel %vm1242_vm6, %v6825_v13, 0.0 }
 0xf28   : > { %2716 = vadd.xlane.f32.xlu1 %v2715_v14 }
 0xfb5   : > { %v2717_v16 = vpop.xlane.xlu1 %2716 }
 0xfb6   : > { %6826 = vrcp.f32 %v2717_v16 }
 0xfc0   : > { %v6827_v17 = vpop.eup %6826 }
 0xfc1   : > { %v2719_v19 = vmul.f32 %v6827_v17, %v6825_v13 }
 0xfc3   : > { %6223 = vmatmul.mubr.msk.f32.vlgmr.msra.gmra.mrb[20].mxu0 %vm1254_vm7, %v2719_v19 }
 0xfc4   : > { %6238 = vmatprep.mubr.msk.f32.mxu0 %vm6925_vm2, %v6926_v18 }
0x1096   : > { %v2792_v20 = vpop.f32.mrb[20].mxu0 }
0x1097   : > { %v6224_v21 = vpop.f32.mrb[21].mxu0  ;;  %6228 = vmatmul.mubr.msk.f32.vlgmr.msra.gmra.mrb[26].mxu1 %vm1164_vm4, %v2792_v20 }
0x1098   : > { %6273 = vmatprep.mubr.msk.f32.mxu1 %vm6925_vm2, %v6926_v18  ;;  %6637 = vmatpush3.bf16.msra.mxu1 %v6636_v51 }
0x1099   : > { %6638 = vmatprep.subr.bf16.mxu1 %v6924_v10 }
0x109c   : > { %6640 = vmatpush3.bf16.msra.mxu1 %v6639_v54  ;;  %v5644_v54 = vld [vmem:[%s8253_s28 + $0x90] sm:$0xff] }
0x109d   : > { %6641 = vmatprep.subr.bf16.mxu1 %v6924_v10  ;;  %v6663_v56 = vpack.c.bf16 %v5645_v55, %v5644_v54  ;;  %v5675_v55 = vld [vmem:[%s8254_s27 + $0xa0] sm:$0xff] }
0x10a0   : > { %6643 = vmatpush3.bf16.msra.mxu1 %v6642_v57 }
0x10a1   : > { %6644 = vmatprep.subr.bf16.mxu1 %v6924_v10 }
0x116a   : > { %v2867_v22 = vpop.f32.mrb[26].mxu1 }
0x116b   : > { %v2871_v23 = vadd.f32 %v2867_v22, %v2382_v59  ;;  %v6229_v24 = vpop.f32.mrb[27].mxu1  ;;  %v3028_v59 = vld [vmem:[%s8199_s19 + $0x38] sm:$0xff] }
0x116c   : > { %v6645_v60 = vpack.c.bf16 %v3028_v59, %v3027_v58 }
0x116d   : > { %v2872_v26 = vadd.f32 %v2871_v23, %v7219_v62  ;;  %v2911_v62 = vld [vmem:[%s8197_s17 + $0x8] sm:$0xff] }
0x116e   : > { %v6630_v36 = vpack.c.bf16 %v2911_v62, %v2910_v35  ;;  %6646 = vmatpush3.bf16.msra.mxu1 %v6645_v60 }
0x116f   : > { %v7574_v27 = vadd.f32 %v5632_v25, %v2872_v26  ;;  %6647 = vmatprep.subr.bf16.mxu1 %v6924_v10 }
0x1170   : > { %6631 = vmatpush3.bf16.msra.mxu0 %v6630_v36 }
0x1171   : > { %v2883_v28 = vsel %vm888_vm1, %v7574_v27, 0.0  ;;  %6632 = vmatprep.subr.bf16.mxu0 %v6924_v10 }
0x1172   : > { %2884 = vadd.xlane.f32.xlu0 %v2883_v28  ;;  %6649 = vmatpush3.bf16.msra.mxu1 %v6648_v0  ;;  %v5649_v0 = vld [vmem:[%s8254_s27 + $0x80] sm:$0xff] }
0x1173   : > { %6650 = vmatprep.subr.bf16.mxu1 %v6924_v10  ;;  %v6666_v3 = vpack.c.bf16 %v5650_v1, %v5649_v0 }
0x1174   : > { %6634 = vmatpush3.bf16.msra.mxu0 %v6633_v39 }
0x1175   : > { %6659 = vmatprep.subr.bf16.mxu0 %v6924_v10 }
0x1176   : > { %6652 = vmatpush3.bf16.msra.mxu1 %v6651_v2 }
0x1177   : > { %6653 = vmatprep.subr.bf16.mxu1 %v6924_v10 }
0x117a   : > { %6655 = vmatpush3.bf16.msra.mxu1 %v6654_v5  ;;  %v5651_v5 = vld [vmem:[%s8254_s27 + $0x90] sm:$0xff] }
0x117b   : > { %6656 = vmatprep.subr.bf16.mxu1 %v6924_v10  ;;  %v6669_v7 = vpack.c.bf16 %v5652_v6, %v5651_v5 }
0x117e   : > { %6658 = vmatpush3.bf16.msra.mxu1 %v6657_v8  ;;  %v5656_v8 = vld [vmem:[%s8191_s11 + $0x80] sm:$0xff] }
0x117f   : > { %6314 = vmatprep.subr.mxu1 %v6926_v18 }
0x11ff   : > { %v2885_v29 = vpop.xlane.xlu0 %2884 }
0x1200   : > { %v2886_v30 = vmul.f32 0.03125, %v2885_v29 }
0x1202   : > { %v2887_v31 = vsub.f32 %v7574_v27, %v2886_v30 }
0x1204   : > { %v2888_v32 = vmul.f32 %v2887_v31, %v2887_v31 }
0x1206   : > { %v2889_v33 = vsel %vm888_vm1, %v2888_v32, 0.0 }
0x1207   : > { %2890 = vadd.xlane.f32.xlu1 %v2889_v33 }
0x1294   : > { %v2891_v40 = vpop.xlane.xlu1 %2890 }
0x1295   : > { %v2892_v41 = vmul.f32 0.03125, %v2891_v40 }
0x1297   : > { %v2893_v42 = vadd.f32 1e-06, %v2892_v41  ;;  %v5637_v41 = vld [vmem:[%s8200_s20] ss:$0 sm:$0xff] }
0x1299   : > { %6828 = vrsqrt.f32 %v2893_v42 }
0x12a3   : > { %v6829_v43 = vpop.eup %6828 }
0x12a4   : > { %v2895_v45 = vmul.f32 %v6829_v43, %v2887_v31 }
0x12a6   : > { %v2902_v47 = vmul.f32 %v5633_v44, %v2895_v45 }
0x12a8   : > { %v2909_v48 = vadd.f32 %v5634_v46, %v2902_v47 }
0x12aa   : > { %6239 = vmatmul.mubr.msk.f32.vlgmr.msra.gmra.mrb[22].mxu0 %vm928_vm3, %v2909_v48 }
0x12ab   : > { %6284 = vmatprep.mubr.msk.f32.mxu0 %vm6925_vm2, %v6926_v18 }
0x137d   : > { %v2990_v11 = vpop.f32.mrb[22].mxu0 }
0x137e   : > { %v2991_v12 = vadd.f32 %v5635_v9, %v2990_v11  ;;  %v6240_v13 = vpop.f32.mrb[23].mxu0  ;;  %v5657_v9 = vld [vmem:[%s8191_s11 + $0x88] sm:$0xff] }
0x137f   : > { %v6672_v11 = vpack.c.bf16 %v5657_v9, %v5656_v8  ;;  %v5659_v13 = vld [vmem:[%s8191_s11 + $0x98] sm:$0xff] }
0x1380   : > { %v2995_v14 = vmul.f32 0.70710677, %v2991_v12  ;;  %v2994_v38 = vmul.f32 0.5, %v2991_v12  ;;  %v5658_v12 = vld [vmem:[%s8191_s11 + $0x90] sm:$0xff] }
0x1382   : > { %v2996_v15 = vand.u32 2147483647, %v2995_v14  ;;  %vm3016_vm8 = vcmp.ge.f32.partialorder %v2995_v14, 0.0  ;;  %v6675_v14 = vpack.c.bf16 %v5659_v13, %v5658_v12 }
0x1384   : > { %v2997_v16 = vmul.f32 0.3275911, %v2996_v15  ;;  %v3010_v19 = vsub.f32 0.0, %v2996_v15 }
0x1386   : > { %v2998_v17 = vadd.f32 1.0, %v2997_v16  ;;  %v3011_v21 = vmul.f32 %v3010_v19, %v2996_v15 }
0x1388   : > { %6830 = vrcp.f32 %v2998_v17  ;;  %v3012_v24 = vmul.f32 1.442695, %v3011_v21  ;;  %v5654_v17 = vld [vmem:[%s8258_s10 + $0x4] ss:$0 sm:$0xff]  ;;  %v5669_v21 = vld [vmem:[%s8253_s28 + $0xa8] sm:$0xff] }
0x138a   : > { %6832 = vpow2.f32 %v3012_v24 }
0x1392   : > { %v6831_v20 = vpop.eup %6830 }
0x1393   : > { %v3001_v22 = vmul.f32 1.0614054, %v6831_v20 }
0x1394   : > { %v6833_v33 = vpop.eup %6832 }
0x1395   : > { %v3002_v23 = vadd.f32 -1.4531521, %v3001_v22  ;;  %v5647_v22 = vld [vmem:[%s8259_s8 + $0x4] ss:$0 sm:$0xff] }
0x1397   : > { %v3003_v25 = vmul.f32 %v6831_v20, %v3002_v23 }
0x1399   : > { %v3004_v26 = vadd.f32 1.4214138, %v3003_v25 }
0x139b   : > { %v3005_v28 = vmul.f32 %v6831_v20, %v3004_v26 }
0x139d   : > { %v3006_v29 = vadd.f32 -0.28449672, %v3005_v28  ;;  %v5670_v28 = vld [vmem:[%s8253_s28 + $0xb0] sm:$0xff] }
0x139f   : > { %v3007_v30 = vmul.f32 %v6831_v20, %v3006_v29  ;;  %v5671_v29 = vld [vmem:[%s8253_s28 + $0xb8] sm:$0xff] }
0x13a1   : > { %v3008_v31 = vadd.f32 0.2548296, %v3007_v30  ;;  %v5661_v30 = vld [vmem:[%s8192_s12 + $0x4] ss:$0 sm:$0xff] }
0x13a3   : > { %v3009_v32 = vmul.f32 %v6831_v20, %v3008_v31  ;;  %v5668_v20 = vld [vmem:[%s8253_s28 + $0xa0] sm:$0xff]  ;;  %v6681_v31 = vpack.c.bf16 %v5671_v29, %v5670_v28  ;;  %v5704_v28 = vld [vmem:[%s8254_s27 + $0xc8] sm:$0xff] }
0x13a4   : > { %v6678_v25 = vpack.c.bf16 %v5669_v21, %v5668_v20  ;;  %v5693_v21 = vld [vmem:[%s8193_s13 + $0x28] sm:$0xff] }
0x13a5   : > { %v3014_v35 = vmul.f32 %v6833_v33, %v3009_v32  ;;  %v5682_v33 = vld [vmem:[%s8191_s11 + $0xa0] sm:$0xff] }
0x13a7   : > { %v3015_v62 = vsub.f32 1.0, %v3014_v35  ;;  %v5683_v35 = vld [vmem:[%s8191_s11 + $0xa8] sm:$0xff] }
0x13a9   : > { %v3017_v36 = vsub.f32 0.0, %v3015_v62 }
0x13ab   : > { %v3018_v37 = vsel %vm3016_vm8, %v3015_v62, %v3017_v36 }
0x13ac   : > { %v3019_v39 = vadd.f32 1.0, %v3018_v37  ;;  %v6690_v37 = vpack.c.bf16 %v5683_v35, %v5682_v33  ;;  %v5696_v33 = vld [vmem:[%s8253_s28 + $0xc0] sm:$0xff]  ;;  %v5697_v35 = vld [vmem:[%s8253_s28 + $0xc8] sm:$0xff] }
0x13ae   : > { %v3020_v40 = vmul.f32 %v3019_v39, %v2994_v38  ;;  %v5684_v38 = vld [vmem:[%s8191_s11 + $0xb0] sm:$0xff]  ;;  %v5685_v39 = vld [vmem:[%s8191_s11 + $0xb8] sm:$0xff] }
0x13b0   : > { %6274 = vmatmul.mubr.f32.vlgmr.msra.gmra.mrb[28].mxu1 %v3020_v40  ;;  %v6693_v40 = vpack.c.bf16 %v5685_v39, %v5684_v38 }
0x13b1   : > { %6316 = vmatprep.mubr.msk.f32.mxu1 %vm6925_vm2, %v6926_v18 }
0x1483   : > { %v3110_v42 = vpop.f32.mrb[28].mxu1 }
0x1484   : > { %v3111_v43 = vadd.f32 %v5637_v41, %v3110_v42  ;;  %v6275_v44 = vpop.f32.mrb[29].mxu1 }
0x1486   : > { %v7668_v45 = vadd.f32 %v3111_v43, %v7574_v27  ;;  %v5643_v27 = vld [vmem:[%s8253_s28 + $0x88] sm:$0xff] }
0x1487   : > { %v6660_v53 = vpack.c.bf16 %v5643_v27, %v5642_v52 }
0x1488   : > { %v3119_v46 = vsel %vm888_vm1, %v7668_v45, 0.0 }
0x1489   : > { %3120 = vadd.xlane.f32.xlu0 %v3119_v46  ;;  %6661 = vmatpush3.bf16.msra.mxu0 %v6660_v53 }
0x148a   : > { %6662 = vmatprep.subr.bf16.mxu0 %v6924_v10 }
0x148d   : > { %6664 = vmatpush3.bf16.msra.mxu0 %v6663_v56  ;;  %v5676_v56 = vld [vmem:[%s8254_s27 + $0xa8] sm:$0xff] }
0x148e   : > { %6665 = vmatprep.subr.bf16.mxu0 %v6924_v10 }
0x1516   : > { %v3121_v47 = vpop.xlane.xlu0 %3120 }
0x1517   : > { %v3122_v48 = vmul.f32 0.03125, %v3121_v47 }
0x1519   : > { %v3123_v49 = vsub.f32 %v7668_v45, %v3122_v48 }
0x151b   : > { %v3124_v50 = vmul.f32 %v3123_v49, %v3123_v49 }
0x151d   : > { %v3125_v51 = vsel %vm888_vm1, %v3124_v50, 0.0 }
0x151e   : > { %3126 = vadd.xlane.f32.xlu1 %v3125_v51 }
0x15ab   : > { %v3127_v57 = vpop.xlane.xlu1 %3126 }
0x15ac   : > { %v3128_v58 = vmul.f32 0.03125, %v3127_v57 }
0x15ae   : > { %v3129_v59 = vadd.f32 1e-06, %v3128_v58  ;;  %v6684_v58 = vpack.c.bf16 %v5676_v56, %v5675_v55  ;;  %v5701_v56 = vld [vmem:[%s8259_s8 + $0x6] ss:$0 sm:$0xff] }
0x15b0   : > { %6834 = vrsqrt.f32 %v3129_v59 }
0x15ba   : > { %v6835_v60 = vpop.eup %6834 }
0x15bb   : > { %v3131_v63 = vmul.f32 %v6835_v60, %v3123_v49  ;;  %v5677_v60 = vld [vmem:[%s8254_s27 + $0xb0] sm:$0xff] }
0x15bd   : > { %v3138_v2 = vmul.f32 %v5640_v61, %v3131_v63  ;;  %v5678_v61 = vld [vmem:[%s8254_s27 + $0xb8] sm:$0xff] }
0x15be   : > { %v6687_v63 = vpack.c.bf16 %v5678_v61, %v5677_v60  ;;  %v5715_v60 = vld [vmem:[%s8192_s12 + $0x6] ss:$0 sm:$0xff] }
0x15bf   : > { %v7700_v4 = vadd.f32 %v5641_v34, %v3138_v2  ;;  %v5680_v34 = vld [vmem:[%s8258_s10 + $0x5] ss:$0 sm:$0xff] }
0x15c1   : > { %6285 = vmatmul.mubr.msk.f32.vlgmr.msra.gmra.mrb[24].mxu0 %vm928_vm3, %v7700_v4 }
0x15c2   : > { %6667 = vmatpush3.bf16.msra.mxu0 %v6666_v3  ;;  %6295 = vmatprep.mubr.msk.f32.mxu0 %vm6925_vm2, %v6926_v18  ;;  %v5673_v3 = vld [vmem:[%s8259_s8 + $0x5] ss:$0 sm:$0xff] }
0x15c3   : > { %6668 = vmatprep.subr.bf16.mxu0 %v6924_v10 }
0x15c6   : > { %6670 = vmatpush3.bf16.msra.mxu0 %v6669_v7  ;;  %v5687_v7 = vld [vmem:[%s8192_s12 + $0x5] ss:$0 sm:$0xff] }
0x15c7   : > { %6671 = vmatprep.subr.bf16.mxu0 %v6924_v10 }
0x15c9   : > { %6296 = vmatmul.mubr.msk.f32.vlgmr.msra.gmra.mrb[26].mxu0 %vm928_vm3, %v7700_v4 }
0x15ca   : > { %6673 = vmatpush3.bf16.msra.mxu0 %v6672_v11  ;;  %6306 = vmatprep.mubr.msk.f32.mxu0 %vm6925_vm2, %v6926_v18 }
0x15cb   : > { %6674 = vmatprep.subr.bf16.mxu0 %v6924_v10 }
0x15ce   : > { %6676 = vmatpush3.bf16.msra.mxu0 %v6675_v14 }
0x15cf   : > { %6309 = vmatprep.subr.mxu0 %v6926_v18 }
0x15d1   : > { %6307 = vmatmul.mubr.msk.f32.vlgmr.msra.gmra.mrb[28].mxu0 %vm928_vm3, %v7700_v4 }
0x15d2   : > { %6311 = vmatprep.mubr.msk.f32.mxu0 %vm6925_vm2, %v6926_v18 }
0x1694   : > { %v3228_v15 = vpop.f32.mrb[24].mxu0 }
0x1695   : > { %v6286_v16 = vpop.f32.mrb[25].mxu0  ;;  %v3229_v26 = vadd.f32 %v5647_v22, %v3228_v15 }
0x169c   : > { %v3311_v19 = vpop.f32.mrb[26].mxu0 }
0x169d   : > { %v3312_v23 = vadd.f32 %v5654_v17, %v3311_v19  ;;  %v6297_v24 = vpop.f32.mrb[27].mxu0 }
0x169f   : > { %6310 = vmatpush3.xpose.msk.msra.mxu0 %vm1164_vm4, %v3312_v23 }
0x16a0   : > { %6677 = vmatprep.subr.bf16.mxu0 %v6924_v10 }
0x16a2   : > { %6312 = vmatmul.mubr.msk.f32.vlgmr.msra.gmra.mrb[30].mxu0 %vm1164_vm4, %v3229_v26  ;;  %v5703_v26 = vld [vmem:[%s8254_s27 + $0xc0] sm:$0xff] }
0x16a3   : > { %6679 = vmatpush3.bf16.msra.mxu0 %v6678_v25  ;;  %6327 = vmatprep.mubr.msk.f32.mxu0 %vm6925_vm2, %v6926_v18  ;;  %v5667_v25 = vld [vmem:[%s8193_s13 + $0x20] sm:$0xff]  ;;  %v6702_v29 = vpack.c.bf16 %v5704_v28, %v5703_v26  ;;  %v5740_v26 = vld [vmem:[%s8191_s11 + $0xf8] sm:$0xff] }
0x16a4   : > { %v3394_v32 = vpop.f32.mrb[28].mxu0  ;;  %6680 = vmatprep.subr.bf16.mxu0 %v6924_v10 }
0x16a5   : > { %v3395_v62 = vadd.f32 %v5661_v30, %v3394_v32  ;;  %v6308_v36 = vpop.f32.mrb[29].mxu0  ;;  %v5705_v30 = vld [vmem:[%s8254_s27 + $0xd0] sm:$0xff] }
0x16a6   : > { %v5698_v36 = vld [vmem:[%s8253_s28 + $0xd0] sm:$0xff] }
0x16a7   : > { %6315 = vmatpush3.msk.msra.mxu1 %vm1258_vm5, %v3395_v62  ;;  %6682 = vmatpush3.bf16.msra.mxu0 %v6681_v31  ;;  %v5706_v31 = vld [vmem:[%s8254_s27 + $0xd8] sm:$0xff]  ;;  %v6696_v62 = vpack.c.bf16 %v5697_v35, %v5696_v33 }
0x16a8   : > { %6689 = vmatprep.subr.bf16.mxu0 %v6924_v10  ;;  %6683 = vmatprep.subr.bf16.mxu1 %v6924_v10  ;;  %v6705_v32 = vpack.c.bf16 %v5706_v31, %v5705_v30  ;;  %v5731_v30 = vld [vmem:[%s8254_s27 + $0xe8] sm:$0xff]  ;;  %v5733_v33 = vld [vmem:[%s8254_s27 + $0xf8] sm:$0xff] }
0x16aa   : > { %6328 = vmatmul.mubr.msk.f32.vlgmr.msra.gmra.mrb[32].mxu0 %vm928_vm3, %v7700_v4 }
0x16ab   : > { %6691 = vmatpush3.bf16.msra.mxu0 %v6690_v37  ;;  %6349 = vmatprep.mubr.msk.f32.mxu0 %vm6925_vm2, %v6926_v18  ;;  %v5699_v37 = vld [vmem:[%s8253_s28 + $0xd8] sm:$0xff] }
0x16ac   : > { %6692 = vmatprep.subr.bf16.mxu0 %v6924_v10 }
0x16af   : > { %6694 = vmatpush3.bf16.msra.mxu0 %v6693_v40  ;;  %v6699_v40 = vpack.c.bf16 %v5699_v37, %v5698_v36 }
0x16b0   : > { %6362 = vmatprep.subr.mxu0 %v6926_v18 }
0x16b2   : > { %6350 = vmatmul.mubr.msk.f32.vlgmr.msra.gmra.mrb[34].mxu0 %vm928_vm3, %v7700_v4 }
0x16b3   : > { %6364 = vmatprep.mubr.msk.f32.mxu0 %vm6925_vm2, %v6926_v18  ;;  %6363 = vmatpush3.msra.mxu0 %v5693_v21 }
0x16b4   : > { %6695 = vmatprep.subr.bf16.mxu0 %v6924_v10 }
0x1775   : > { %v3470_v41 = vpop.f32.mrb[30].mxu0 }
0x1776   : > { %v3474_v42 = vmul.f32 0.35355338, %v3470_v41  ;;  %v6313_v43 = vpop.f32.mrb[31].mxu0  ;;  %v5710_v41 = vld [vmem:[%s8191_s11 + $0xc0] sm:$0xff] }
0x1778   : > { %v3475_v44 = vsel %vm1242_vm6, %v3474_v42, -inf }
0x1779   : > { %3476 = vmax.xlane.f32.xlu0 %v3475_v44 }
0x177d   : > { %v3643_v46 = vpop.f32.mrb[32].mxu0 }
0x177e   : > { %v6329_v47 = vpop.f32.mrb[33].mxu0  ;;  %v3644_v8 = vadd.f32 %v5673_v3, %v3643_v46 }
0x177f   : > { %v5712_v47 = vld [vmem:[%s8191_s11 + $0xd0] sm:$0xff] }
0x1785   : > { %v3809_v48 = vpop.f32.mrb[34].mxu0 }
0x1786   : > { %v6351_v49 = vpop.f32.mrb[35].mxu0  ;;  %v3810_v9 = vadd.f32 %v5687_v7, %v3809_v48  ;;  %v5713_v48 = vld [vmem:[%s8191_s11 + $0xd8] sm:$0xff] }
0x1787   : > { %v5708_v49 = vld [vmem:[%s8258_s10 + $0x6] ss:$0 sm:$0xff] }
0x1806   : > { %v3477_v50 = vpop.xlane.xlu0 %3476 }
0x1807   : > { %v3478_v51 = vsub.f32 %v3474_v42, %v3477_v50  ;;  %v5711_v42 = vld [vmem:[%s8191_s11 + $0xc8] sm:$0xff]  ;;  %v6711_v50 = vpack.c.bf16 %v5713_v48, %v5712_v47  ;;  %v5728_v47 = vld [vmem:[%s8259_s8 + $0x7] ss:$0 sm:$0xff]  ;;  %s5476_s8 = sshll.u32 %s756_s4, 4  ;;  %s8140_s8 = int_to_ptr.vmem [resolvable:$true] %s5476_s8 }
0x1808   : > { %v6708_v46 = vpack.c.bf16 %v5711_v42, %v5710_v41  ;;  %s6860_s30 = scalar_lea.vmem %s8140_s8, 16 }
0x1809   : > { %v3479_v52 = vmul.f32 1.442695, %v3478_v51  ;;  %p6861_p11 = scmp.ne.s32.totalorder %s8140_s8, %s6860_s30 }
0x180b   : > { %6836 = vpow2.f32 %v3479_v52  ;;  %p6862_p12 = pnand %p6861_p11, %p7096_p5 }
0x180d   : > { %p6863_p13 = pneg %p6862_p12 }
0x1815   : > { %v6837_v27 = vpop.eup %6836 }
0x1816   : > { %v3481_v53 = vsel %vm1242_vm6, %v6837_v27, 0.0 }
0x1817   : > { %3482 = vadd.xlane.f32.xlu1 %v3481_v53 }
0x18a4   : > { %v3483_v54 = vpop.xlane.xlu1 %3482 }
0x18a5   : > { %6838 = vrcp.f32 %v3483_v54 }
0x18af   : > { %v6839_v57 = vpop.eup %6838 }
0x18b0   : > { %v3485_v59 = vmul.f32 %v6839_v57, %v6837_v27 }
0x18b2   : > { %6317 = vmatmul.mubr.msk.f32.vlgmr.msra.gmra.mrb[30].mxu1 %vm1254_vm7, %v3485_v59 }
0x18b3   : > { %6685 = vmatpush3.bf16.msra.mxu1 %v6684_v58  ;;  %6338 = vmatprep.mubr.msk.f32.mxu1 %vm6925_vm2, %v6926_v18 }
0x18b4   : > { %6686 = vmatprep.subr.bf16.mxu1 %v6924_v10 }
0x18b7   : > { %6688 = vmatpush3.bf16.msra.mxu1 %v6687_v63 }
0x18b8   : > { %6352 = vmatprep.subr.mxu1 %v6926_v18 }
0x18ba   : > { %6339 = vmatmul.mubr.msk.f32.vlgmr.msra.gmra.mrb[32].mxu1 %vm928_vm3, %v7700_v4 }
0x18bb   : > { %6354 = vmatprep.mubr.msk.f32.mxu1 %vm6925_vm2, %v6926_v18 }
0x1985   : > { %v3558_v0 = vpop.f32.mrb[30].mxu1 }
0x1986   : > { %v6318_v1 = vpop.f32.mrb[31].mxu1 }
0x198d   : > { %v3726_v2 = vpop.f32.mrb[32].mxu1 }
0x198e   : > { %v3727_v5 = vadd.f32 %v5680_v34, %v3726_v2  ;;  %v6340_v6 = vpop.f32.mrb[33].mxu1 }
0x1990   : > { %6353 = vmatpush3.xpose.msk.msra.mxu1 %vm1164_vm4, %v3727_v5 }
0x1991   : > { %6357 = vmatprep.subr.mxu1 %v6926_v18 }
0x1993   : > { %6355 = vmatmul.mubr.msk.f32.vlgmr.msra.gmra.mrb[34].mxu1 %vm1164_vm4, %v3644_v8 }
0x1994   : > { %6358 = vmatpush3.msk.msra.mxu1 %vm1258_vm5, %v3810_v9  ;;  %6359 = vmatprep.mubr.msk.f32.mxu1 %vm6925_vm2, %v6926_v18 }
0x1995   : > { %6367 = vmatprep.subr.mxu1 %v6926_v18 }
0x1a66   : > { %v3885_v11 = vpop.f32.mrb[34].mxu1 }
0x1a67   : > { %v3889_v12 = vmul.f32 0.35355338, %v3885_v11  ;;  %v6356_v13 = vpop.f32.mrb[35].mxu1  ;;  %v5721_v11 = vld [vmem:[%s8193_s13 + $0x30] sm:$0xff] }
0x1a68   : > { %v5723_v13 = vld [vmem:[%s8253_s28 + $0xe0] sm:$0xff] }
0x1a69   : > { %v3890_v14 = vsel %vm1242_vm6, %v3889_v12, -inf }
0x1a6a   : > { %3891 = vmax.xlane.f32.xlu0 %v3890_v14  ;;  %v5724_v14 = vld [vmem:[%s8253_s28 + $0xe8] sm:$0xff] }
0x1af7   : > { %v3892_v15 = vpop.xlane.xlu0 %3891 }
0x1af8   : > { %v3893_v16 = vsub.f32 %v3889_v12, %v3892_v15 }
0x1afa   : > { %v3894_v17 = vmul.f32 1.442695, %v3893_v16  ;;  %v6714_v16 = vpack.c.bf16 %v5724_v14, %v5723_v13 }
0x1afc   : > { %6840 = vpow2.f32 %v3894_v17 }
0x1b06   : > { %v6841_v19 = vpop.eup %6840 }
0x1b07   : > { %v3896_v20 = vsel %vm1242_vm6, %v6841_v19, 0.0 }
0x1b08   : > { %3897 = vadd.xlane.f32.xlu1 %v3896_v20  ;;  %v5726_v20 = vld [vmem:[%s8253_s28 + $0xf8] sm:$0xff] }
0x1b95   : > { %v3898_v22 = vpop.xlane.xlu1 %3897 }
0x1b96   : > { %6842 = vrcp.f32 %v3898_v22  ;;  %v5737_v22 = vld [vmem:[%s8191_s11 + $0xe0] sm:$0xff] }
0x1ba0   : > { %v6843_v23 = vpop.eup %6842 }
0x1ba1   : > { %v3900_v24 = vmul.f32 %v6843_v23, %v6841_v19  ;;  %v5725_v19 = vld [vmem:[%s8253_s28 + $0xf0] sm:$0xff]  ;;  %v5738_v23 = vld [vmem:[%s8191_s11 + $0xe8] sm:$0xff] }
0x1ba2   : > { %v6717_v21 = vpack.c.bf16 %v5726_v20, %v5725_v19  ;;  %v5758_v19 = vld [vmem:[%s8197_s17 + $0x30] sm:$0xff]  ;;  %v5759_v20 = vld [vmem:[%s8197_s17 + $0x38] sm:$0xff] }
0x1ba3   : > { %6360 = vmatmul.mubr.msk.f32.vlgmr.msra.gmra.mrb[36].mxu1 %vm1254_vm7, %v3900_v24  ;;  %v6726_v24 = vpack.c.bf16 %v5738_v23, %v5737_v22 }
0x1ba4   : > { %6368 = vmatpush3.msra.mxu1 %v5667_v25  ;;  %6369 = vmatprep.mubr.msk.f32.mxu1 %vm6925_vm2, %v6926_v18  ;;  %v5739_v25 = vld [vmem:[%s8191_s11 + $0xf0] sm:$0xff] }
0x1ba5   : > { %6701 = vmatprep.subr.bf16.mxu1 %v6924_v10  ;;  %v6729_v28 = vpack.c.bf16 %v5740_v26, %v5739_v25  ;;  %v5754_v26 = vld [vmem:[%s8195_s15 + $0x1] ss:$0 sm:$0xff] }
0x1ba7   : > { %6370 = vmatmul.mubr.msk.f32.vlgmr.msra.gmra.mrb[38].mxu1 %vm1164_vm4, %v3558_v0 }
0x1ba8   : > { %6703 = vmatpush3.bf16.msra.mxu1 %v6702_v29  ;;  %6391 = vmatprep.mubr.msk.f32.mxu1 %vm6925_vm2, %v6926_v18  ;;  %v5730_v29 = vld [vmem:[%s8254_s27 + $0xe0] sm:$0xff] }
0x1ba9   : > { %6704 = vmatprep.subr.bf16.mxu1 %v6924_v10  ;;  %v6720_v31 = vpack.c.bf16 %v5731_v30, %v5730_v29  ;;  %v5755_v29 = vld [vmem:[%s8196_s16 + $0x1] ss:$0 sm:$0xff] }
0x1bac   : > { %6706 = vmatpush3.bf16.msra.mxu1 %v6705_v32  ;;  %v5732_v32 = vld [vmem:[%s8254_s27 + $0xf0] sm:$0xff] }
0x1bad   : > { %6405 = vmatprep.subr.mxu1 %v6926_v18  ;;  %v6723_v36 = vpack.c.bf16 %v5733_v33, %v5732_v32  ;;  %v5763_v32 = vld [vmem:[%s8199_s19 + $0x80] sm:$0xff]  ;;  %v5764_v33 = vld [vmem:[%s8199_s19 + $0x88] sm:$0xff] }
0x1baf   : > { %6392 = vmatmul.mubr.msk.f32.vlgmr.msra.gmra.mrb[40].mxu1 %vm928_vm3, %v7700_v4 }
0x1bb0   : > { %6407 = vmatprep.mubr.msk.f32.mxu1 %vm6925_vm2, %v6926_v18 }
0x1c76   : > { %v3973_v38 = vpop.f32.mrb[36].mxu1 }
0x1c77   : > { %v6361_v39 = vpop.f32.mrb[37].mxu1  ;;  %6365 = vmatmul.mubr.msk.f32.vlgmr.msra.gmra.mrb[36].mxu0 %vm1164_vm4, %v3973_v38 }
0x1c78   : > { %6697 = vmatpush3.bf16.msra.mxu0 %v6696_v62  ;;  %6380 = vmatprep.mubr.msk.f32.mxu0 %vm6925_vm2, %v6926_v18 }
0x1c79   : > { %6698 = vmatprep.subr.bf16.mxu0 %v6924_v10 }
0x1c7a   : > { %v4121_v43 = vpop.f32.mrb[38].mxu1 }
0x1c7b   : > { %v6371_v44 = vpop.f32.mrb[39].mxu1 }
0x1c7c   : > { %6700 = vmatpush3.bf16.msra.mxu0 %v6699_v40  ;;  %v5735_v44 = vld [vmem:[%s8258_s10 + $0x7] ss:$0 sm:$0xff] }
0x1c7d   : > { %6707 = vmatprep.subr.bf16.mxu0 %v6924_v10 }
0x1c7f   : > { %6381 = vmatmul.mubr.msk.f32.vlgmr.msra.gmra.mrb[38].mxu0 %vm928_vm3, %v7700_v4 }
0x1c80   : > { %6709 = vmatpush3.bf16.msra.mxu0 %v6708_v46  ;;  %6402 = vmatprep.mubr.msk.f32.mxu0 %vm6925_vm2, %v6926_v18 }
0x1c81   : > { %6710 = vmatprep.subr.bf16.mxu0 %v6924_v10 }
0x1c82   : > { %v4287_v51 = vpop.f32.mrb[40].mxu1 }
0x1c83   : > { %v4288_v52 = vadd.f32 %v5708_v49, %v4287_v51  ;;  %v6393_v27 = vpop.f32.mrb[41].mxu1  ;;  %v5742_v49 = vld [vmem:[%s8192_s12 + $0x7] ss:$0 sm:$0xff] }
0x1c84   : > { %6712 = vmatpush3.bf16.msra.mxu0 %v6711_v50 }
0x1c85   : > { %6406 = vmatpush3.xpose.msk.msra.mxu1 %vm1164_vm4, %v4288_v52  ;;  %6415 = vmatprep.subr.mxu0 %v6926_v18 }
0x1c86   : > { %6410 = vmatprep.subr.mxu1 %v6926_v18 }
0x1c87   : > { %6403 = vmatmul.mubr.msk.f32.vlgmr.msra.gmra.mrb[40].mxu0 %vm928_vm3, %v7700_v4 }
0x1c88   : > { %6417 = vmatprep.mubr.msk.f32.mxu0 %vm6925_vm2, %v6926_v18  ;;  %6416 = vmatpush3.msra.mxu0 %v5721_v11 }
0x1c89   : > { %6719 = vmatprep.subr.bf16.mxu0 %v6924_v10 }
0x1d4a   : > { %v4048_v53 = vpop.f32.mrb[36].mxu0 }
0x1d4b   : > { %v7905_v54 = vadd.f32 %v4121_v43, %v4048_v53  ;;  %v6366_v55 = vpop.f32.mrb[37].mxu0 }
0x1d52   : > { %v4204_v57 = vpop.f32.mrb[38].mxu0 }
0x1d53   : > { %v4205_v58 = vadd.f32 %v5701_v56, %v4204_v57  ;;  %v6382_v59 = vpop.f32.mrb[39].mxu0 }
0x1d55   : > { %6408 = vmatmul.mubr.msk.f32.vlgmr.msra.gmra.mrb[42].mxu1 %vm1164_vm4, %v4205_v58 }
0x1d56   : > { %6412 = vmatprep.mubr.msk.f32.mxu1 %vm6925_vm2, %v6926_v18 }
0x1d5a   : > { %v4370_v61 = vpop.f32.mrb[40].mxu0 }
0x1d5b   : > { %v4371_v63 = vadd.f32 %v5715_v60, %v4370_v61  ;;  %v6404_v0 = vpop.f32.mrb[41].mxu0  ;;  %v5748_v60 = vld [vmem:[%s8193_s13 + $0x38] sm:$0xff] }
0x1d5d   : > { %6411 = vmatpush3.msk.msra.mxu1 %vm1258_vm5, %v4371_v63 }
0x1d5e   : > { %6713 = vmatprep.subr.bf16.mxu1 %v6924_v10 }
0x1e28   : > { %v4446_v1 = vpop.f32.mrb[42].mxu1 }
0x1e29   : > { %v4450_v34 = vmul.f32 0.35355338, %v4446_v1  ;;  %v6409_v2 = vpop.f32.mrb[43].mxu1 }
0x1e2b   : > { %v4451_v3 = vsel %vm1242_vm6, %v4450_v34, -inf }
0x1e2c   : > { %4452 = vmax.xlane.f32.xlu0 %v4451_v3 }
0x1eb9   : > { %v4453_v5 = vpop.xlane.xlu0 %4452 }
0x1eba   : > { %v4454_v6 = vsub.f32 %v4450_v34, %v4453_v5 }
0x1ebc   : > { %v4455_v7 = vmul.f32 1.442695, %v4454_v6  ;;  %v5751_v6 = vld [vmem:[%s8194_s14 + $0x1] ss:$0 sm:$0xff] }
0x1ebe   : > { %6844 = vpow2.f32 %v4455_v7 }
0x1ec8   : > { %v6845_v8 = vpop.eup %6844 }
0x1ec9   : > { %v4457_v9 = vsel %vm1242_vm6, %v6845_v8, 0.0 }
0x1eca   : > { %4458 = vadd.xlane.f32.xlu1 %v4457_v9 }
0x1f57   : > { %v4459_v12 = vpop.xlane.xlu1 %4458 }
0x1f58   : > { %6846 = vrcp.f32 %v4459_v12 }
0x1f62   : > { %v6847_v15 = vpop.eup %6846 }
0x1f63   : > { %v4461_v17 = vmul.f32 %v6847_v15, %v6845_v8 }
0x1f65   : > { %6413 = vmatmul.mubr.msk.f32.vlgmr.msra.gmra.mrb[44].mxu1 %vm1254_vm7, %v4461_v17 }
0x1f66   : > { %6715 = vmatpush3.bf16.msra.mxu1 %v6714_v16  ;;  %6428 = vmatprep.mubr.msk.f32.mxu1 %vm6925_vm2, %v6926_v18  ;;  %v5756_v16 = vld [vmem:[%s8197_s17 + $0x20] sm:$0xff] }
0x1f67   : > { %6716 = vmatprep.subr.bf16.mxu1 %v6924_v10 }
0x1f6a   : > { %6718 = vmatpush3.bf16.msra.mxu1 %v6717_v21  ;;  %v6735_v21 = vpack.c.bf16 %v5759_v20, %v5758_v19 }
0x1f6b   : > { %6725 = vmatprep.subr.bf16.mxu1 %v6924_v10 }
0x1f6d   : > { %6429 = vmatmul.mubr.msk.f32.vlgmr.msra.gmra.mrb[46].mxu1 %vm928_vm3, %v7700_v4 }
0x1f6e   : > { %6727 = vmatpush3.bf16.msra.mxu1 %v6726_v24  ;;  %6450 = vmatprep.mubr.msk.f32.mxu1 %vm6925_vm2, %v6926_v18 }
0x1f6f   : > { %6728 = vmatprep.subr.bf16.mxu1 %v6924_v10 }
0x1f72   : > { %6730 = vmatpush3.bf16.msra.mxu1 %v6729_v28 }
0x1f73   : > { %6463 = vmatprep.subr.mxu1 %v6926_v18 }
0x1f75   : > { %6451 = vmatmul.mubr.msk.f32.vlgmr.msra.gmra.mrb[48].mxu1 %vm928_vm3, %v7700_v4 }
0x1f76   : > { %6465 = vmatprep.mubr.msk.f32.mxu1 %vm6925_vm2, %v6926_v18  ;;  %6464 = vmatpush3.msra.mxu1 %v5748_v60 }
0x1f77   : > { %6737 = vmatprep.subr.bf16.mxu1 %v6924_v10 }
0x2038   : > { %v4534_v35 = vpop.f32.mrb[44].mxu1 }
0x2039   : > { %v6414_v62 = vpop.f32.mrb[45].mxu1  ;;  %6418 = vmatmul.mubr.msk.f32.vlgmr.msra.gmra.mrb[42].mxu0 %vm1164_vm4, %v4534_v35  ;;  %v6738_v35 = vpack.c.bf16 %v5764_v33, %v5763_v32 }
0x203a   : > { %6721 = vmatpush3.bf16.msra.mxu0 %v6720_v31  ;;  %6439 = vmatprep.mubr.msk.f32.mxu0 %vm6925_vm2, %v6926_v18  ;;  %v5765_v62 = vld [vmem:[%s8199_s19 + $0x90] sm:$0xff] }
0x203b   : > { %6722 = vmatprep.subr.bf16.mxu0 %v6924_v10 }
0x203e   : > { %6724 = vmatpush3.bf16.msra.mxu0 %v6723_v36 }
0x203f   : > { %6453 = vmatprep.subr.mxu0 %v6926_v18 }
0x2040   : > { %v4693_v37 = vpop.f32.mrb[46].mxu1 }
0x2041   : > { %v6430_v38 = vpop.f32.mrb[47].mxu1  ;;  %6440 = vmatmul.mubr.msk.f32.vlgmr.msra.gmra.mrb[44].mxu0 %vm928_vm3, %v7700_v4  ;;  %v4694_v50 = vadd.f32 %v5728_v47, %v4693_v37  ;;  %v5767_v37 = vld [vmem:[%s8199_s19 + $0xa0] sm:$0xff]  ;;  %v5773_v47 = vld [vmem:[%s8199_s19 + $0xd0] sm:$0xff] }
0x2042   : > { %6455 = vmatprep.mubr.msk.f32.mxu0 %vm6925_vm2, %v6926_v18  ;;  %v5768_v38 = vld [vmem:[%s8199_s19 + $0xa8] sm:$0xff] }
0x2048   : > { %v4859_v39 = vpop.f32.mrb[48].mxu1 }
0x2049   : > { %v6452_v40 = vpop.f32.mrb[49].mxu1  ;;  %v4860_v51 = vadd.f32 %v5742_v49, %v4859_v39  ;;  %v6744_v39 = vpack.c.bf16 %v5768_v38, %v5767_v37  ;;  %v5775_v49 = vld [vmem:[%s8199_s19 + $0xe0] sm:$0xff] }
0x204a   : > { %v5769_v40 = vld [vmem:[%s8199_s19 + $0xb0] sm:$0xff] }
0x210c   : > { %v4609_v41 = vpop.f32.mrb[42].mxu0 }
0x210d   : > { %v4613_v42 = vadd.f32 %v4609_v41, %v7905_v54  ;;  %v6419_v43 = vpop.f32.mrb[43].mxu0  ;;  %v5770_v41 = vld [vmem:[%s8199_s19 + $0xb8] sm:$0xff] }
0x210e   : > { %v5771_v43 = vld [vmem:[%s8199_s19 + $0xc0] sm:$0xff] }
0x2114   : > { %v4776_v46 = vpop.f32.mrb[44].mxu0 }
0x2115   : > { %v4777_v48 = vadd.f32 %v5735_v44, %v4776_v46  ;;  %v6441_v4 = vpop.f32.mrb[45].mxu0  ;;  %v5772_v44 = vld [vmem:[%s8199_s19 + $0xc8] sm:$0xff] }
0x2116   : > { %v6750_v46 = vpack.c.bf16 %v5772_v44, %v5771_v43  ;;  %v5385_v44 = vld [vmem:[%s8203_s23 + $0x10] sm:$0xff] }
0x2117   : > { %6454 = vmatpush3.xpose.msk.msra.mxu0 %vm1164_vm4, %v4777_v48  ;;  %v5774_v48 = vld [vmem:[%s8199_s19 + $0xd8] sm:$0xff] }
0x2118   : > { %6458 = vmatprep.subr.mxu0 %v6926_v18  ;;  %v6753_v4 = vpack.c.bf16 %v5774_v48, %v5773_v47 }
0x211a   : > { %6456 = vmatmul.mubr.msk.f32.vlgmr.msra.gmra.mrb[46].mxu0 %vm1164_vm4, %v4694_v50  ;;  %v5776_v50 = vld [vmem:[%s8199_s19 + $0xe8] sm:$0xff] }
0x211b   : > { %6459 = vmatpush3.msk.msra.mxu0 %vm1258_vm5, %v4860_v51  ;;  %6460 = vmatprep.mubr.msk.f32.mxu0 %vm6925_vm2, %v6926_v18  ;;  %v6756_v51 = vpack.c.bf16 %v5776_v50, %v5775_v49 }
0x211c   : > { %6731 = vmatprep.subr.bf16.mxu0 %v6924_v10 }
0x21ed   : > { %v4935_v52 = vpop.f32.mrb[46].mxu0 }
0x21ee   : > { %v4939_v27 = vmul.f32 0.35355338, %v4935_v52  ;;  %v6457_v53 = vpop.f32.mrb[47].mxu0  ;;  %v5777_v52 = vld [vmem:[%s8199_s19 + $0xf0] sm:$0xff] }
0x21f0   : > { %v4940_v54 = vsel %vm1242_vm6, %v4939_v27, -inf }
0x21f1   : > { %4941 = vmax.xlane.f32.xlu0 %v4940_v54  ;;  %v5761_v54 = vld [vmem:[%s8198_s18 + $0x1] ss:$0 sm:$0xff] }
0x227e   : > { %v4942_v55 = vpop.xlane.xlu0 %4941 }
0x227f   : > { %v4943_v56 = vsub.f32 %v4939_v27, %v4942_v55  ;;  %v5778_v27 = vld [vmem:[%s8199_s19 + $0xf8] sm:$0xff] }
0x2280   : > { %v6759_v53 = vpack.c.bf16 %v5778_v27, %v5777_v52  ;;  %v5367_v52 = vld [vmem:[%s8202_s22] sm:$0x1] }
0x2281   : > { %v4944_v57 = vmul.f32 1.442695, %v4943_v56 }
0x2283   : > { %6848 = vpow2.f32 %v4944_v57 }
0x228d   : > { %v6849_v58 = vpop.eup %6848 }
0x228e   : > { %v4946_v59 = vsel %vm1242_vm6, %v6849_v58, 0.0 }
0x228f   : > { %4947 = vadd.xlane.f32.xlu1 %v4946_v59 }
0x231c   : > { %v4948_v61 = vpop.xlane.xlu1 %4947 }
0x231d   : > { %6850 = vrcp.f32 %v4948_v61 }
0x2327   : > { %v6851_v63 = vpop.eup %6850 }
0x2328   : > { %v4950_v0 = vmul.f32 %v6851_v63, %v6849_v58 }
0x232a   : > { %6461 = vmatmul.mubr.msk.f32.vlgmr.msra.gmra.mrb[48].mxu0 %vm1254_vm7, %v4950_v0 }
0x232b   : > { %6476 = vmatprep.mubr.msk.f32.mxu0 %vm6925_vm2, %v6926_v18 }
0x23fd   : > { %v5023_v1 = vpop.f32.mrb[48].mxu0 }
0x23fe   : > { %v6462_v34 = vpop.f32.mrb[49].mxu0  ;;  %6466 = vmatmul.mubr.msk.f32.vlgmr.msra.gmra.mrb[50].mxu1 %vm1164_vm4, %v5023_v1 }
0x23ff   : > { %6511 = vmatprep.mubr.msk.f32.mxu1 %vm6925_vm2, %v6926_v18  ;;  %6739 = vmatpush3.bf16.msra.mxu1 %v6738_v35 }
0x2400   : > { %6740 = vmatprep.subr.bf16.mxu1 %v6924_v10 }
0x24d1   : > { %v5098_v2 = vpop.f32.mrb[50].mxu1 }
0x24d2   : > { %v5102_v3 = vadd.f32 %v5098_v2, %v4613_v42  ;;  %v6467_v5 = vpop.f32.mrb[51].mxu1  ;;  %v6747_v42 = vpack.c.bf16 %v5770_v41, %v5769_v40 }
0x24d4   : > { %v5103_v7 = vadd.f32 %v5102_v3, %v7668_v45  ;;  %v5757_v45 = vld [vmem:[%s8197_s17 + $0x28] sm:$0xff] }
0x24d5   : > { %v6732_v17 = vpack.c.bf16 %v5757_v45, %v5756_v16 }
0x24d6   : > { %v8017_v8 = vadd.f32 %v5751_v6, %v5103_v7 }
0x24d7   : > { %6733 = vmatpush3.bf16.msra.mxu0 %v6732_v17 }
0x24d8   : > { %v5117_v9 = vsel %vm888_vm1, %v8017_v8, 0.0  ;;  %6734 = vmatprep.subr.bf16.mxu0 %v6924_v10 }
0x24d9   : > { %5118 = vadd.xlane.f32.xlu0 %v5117_v9 }
0x24db   : > { %6736 = vmatpush3.bf16.msra.mxu0 %v6735_v21 }
0x24dc   : > { %6761 = vmatprep.subr.bf16.mxu0 %v6924_v10 }
0x2566   : > { %v5119_v11 = vpop.xlane.xlu0 %5118 }
0x2567   : > { %v5120_v12 = vmul.f32 0.03125, %v5119_v11 }
0x2569   : > { %v5121_v13 = vsub.f32 %v8017_v8, %v5120_v12 }
0x256b   : > { %v5122_v14 = vmul.f32 %v5121_v13, %v5121_v13 }
0x256d   : > { %v5123_v15 = vsel %vm888_vm1, %v5122_v14, 0.0 }
0x256e   : > { %5124 = vadd.xlane.f32.xlu1 %v5123_v15 }
0x25fb   : > { %v5125_v22 = vpop.xlane.xlu1 %5124 }
0x25fc   : > { %v5126_v23 = vmul.f32 0.03125, %v5125_v22  ;;  %v5780_v22 = vld [vmem:[%s8200_s20 + $0x1] ss:$0 sm:$0xff] }
0x25fe   : > { %v5127_v24 = vadd.f32 1e-06, %v5126_v23 }
0x2600   : > { %6852 = vrsqrt.f32 %v5127_v24 }
0x260a   : > { %v6853_v25 = vpop.eup %6852 }
0x260b   : > { %v5129_v28 = vmul.f32 %v6853_v25, %v5121_v13 }
0x260d   : > { %v5136_v30 = vmul.f32 %v5754_v26, %v5129_v28 }
0x260f   : > { %v5143_v31 = vadd.f32 %v5755_v29, %v5136_v30 }
0x2611   : > { %6477 = vmatmul.mubr.msk.f32.vlgmr.msra.gmra.mrb[50].mxu0 %vm928_vm3, %v5143_v31 }
0x2612   : > { %6522 = vmatprep.mubr.msk.f32.mxu0 %vm6925_vm2, %v6926_v18  ;;  %v5766_v18 = vld [vmem:[%s8199_s19 + $0x98] sm:$0xff] }
0x2613   : > { %v6741_v36 = vpack.c.bf16 %v5766_v18, %v5765_v62 }
0x2615   : > { %6742 = vmatpush3.bf16.msra.mxu1 %v6741_v36 }
0x2616   : > { %6743 = vmatprep.subr.bf16.mxu1 %v6924_v10 }
0x2619   : > { %6745 = vmatpush3.bf16.msra.mxu1 %v6744_v39 }
0x261a   : > { %6746 = vmatprep.subr.bf16.mxu1 %v6924_v10 }
0x261d   : > { %6748 = vmatpush3.bf16.msra.mxu1 %v6747_v42  ;;  %v5384_v42 = vld [vmem:[%s8203_s23 + $0x8] sm:$0xff] }
0x261e   : > { %6749 = vmatprep.subr.bf16.mxu1 %v6924_v10 }
0x2621   : > { %6751 = vmatpush3.bf16.msra.mxu1 %v6750_v46  ;;  %v5386_v46 = vld [vmem:[%s8203_s23 + $0x18] sm:$0xff] }
0x2622   : > { %6752 = vmatprep.subr.bf16.mxu1 %v6924_v10  ;;  %v6765_v47 = vpack.c.bf16 %v5386_v46, %v5385_v44 }
0x2625   : > { %6754 = vmatpush3.bf16.msra.mxu1 %v6753_v4 }
0x2626   : > { %6755 = vmatprep.subr.bf16.mxu1 %v6924_v10 }
0x2629   : > { %6757 = vmatpush3.bf16.msra.mxu1 %v6756_v51 }
0x262a   : > { %6758 = vmatprep.subr.bf16.mxu1 %v6924_v10 }
0x262d   : > { %6760 = vmatpush3.bf16.msra.mxu1 %v6759_v53 }
0x26e4   : > { %v5226_v55 = vpop.f32.mrb[50].mxu0 }
0x26e5   : > { %v5227_v56 = vadd.f32 %v5761_v54, %v5226_v55  ;;  %v6478_v57 = vpop.f32.mrb[51].mxu0  ;;  %v5387_v54 = vld [vmem:[%s8261_s25] sm:$0x1]  ;;  %s6864_s25 = sshll.u32 %s6927_s7, 4  ;;  %s6865_s25 = int_to_ptr.vmem [resolvable:$false] %s6864_s25 }
0x26e6   : > { %s6866_s10 = scalar_lea.vmem %s6865_s25, 32  ;;  %p6867_p0 = scmp.lt.s32.totalorder %s8140_s8, %s6865_s25 }
0x26e7   : > { %v5231_v58 = vmul.f32 0.70710677, %v5227_v56  ;;  %v5230_v19 = vmul.f32 0.5, %v5227_v56  ;;  %p6868_p1 = scmp.lt.s32.totalorder %s6866_s10, %s6860_s30 }
0x26e9   : > { %v5232_v59 = vand.u32 2147483647, %v5231_v58  ;;  %vm5252_vm9 = vcmp.ge.f32.partialorder %v5231_v58, 0.0  ;;  %p6869_p2 = por %p6868_p1, %p6867_p0 }
0x26eb   : > { %v5233_v60 = vmul.f32 0.3275911, %v5232_v59  ;;  %v5246_v63 = vsub.f32 0.0, %v5232_v59  ;;  %p6870_p3 = pnand %p6869_p2, %p6863_p13 }
0x26ed   : > { %v5234_v61 = vadd.f32 1.0, %v5233_v60  ;;  %v5247_v1 = vmul.f32 %v5246_v63, %v5232_v59 }
0x26ef   : > { %6854 = vrcp.f32 %v5234_v61  ;;  %v5248_v3 = vmul.f32 1.442695, %v5247_v1 }
0x26f1   : > { %6856 = vpow2.f32 %v5248_v3 }
0x26f9   : > { %v6855_v0 = vpop.eup %6854 }
0x26fa   : > { %v5237_v34 = vmul.f32 1.0614054, %v6855_v0 }
0x26fb   : > { %v6857_v14 = vpop.eup %6856 }
0x26fc   : > { %v5238_v2 = vadd.f32 -1.4531521, %v5237_v34 }
0x26fe   : > { %v5239_v5 = vmul.f32 %v6855_v0, %v5238_v2 }
0x2700   : > { %v5240_v6 = vadd.f32 1.4214138, %v5239_v5 }
0x2702   : > { %v5241_v7 = vmul.f32 %v6855_v0, %v5240_v6 }
0x2704   : > { %v5242_v9 = vadd.f32 -0.28449672, %v5241_v7 }
0x2706   : > { %v5243_v11 = vmul.f32 %v6855_v0, %v5242_v9 }
0x2708   : > { %v5244_v12 = vadd.f32 0.2548296, %v5243_v11 }
0x270a   : > { %v5245_v13 = vmul.f32 %v6855_v0, %v5244_v12 }
0x270c   : > { %v5250_v15 = vmul.f32 %v6857_v14, %v5245_v13 }
0x270e   : > { %v5251_v16 = vsub.f32 1.0, %v5250_v15 }
0x2710   : > { %v5253_v45 = vsub.f32 0.0, %v5251_v16 }
0x2712   : > { %v5254_v17 = vsel %vm5252_vm9, %v5251_v16, %v5253_v45 }
0x2713   : > { %v5255_v20 = vadd.f32 1.0, %v5254_v17 }
0x2715   : > { %v5256_v21 = vmul.f32 %v5255_v20, %v5230_v19 }
0x2717   : > { %6512 = vmatmul.mubr.f32.vlgmr.msra.gmra.mrb[52].mxu1 %v5256_v21 }
0x27ea   : > { %v5348_v23 = vpop.f32.mrb[52].mxu1 }
0x27eb   : > { %v5349_v24 = vadd.f32 %v5780_v22, %v5348_v23  ;;  %v6513_v25 = vpop.f32.mrb[53].mxu1 }
0x27ed   : > { %v5352_v26 = vadd.f32 %v5349_v24, %v8017_v8  ;;  %v5383_v8 = vld [vmem:[%s8203_s23] sm:$0xff] }
0x27ee   : > { %v6762_v43 = vpack.c.bf16 %v5384_v42, %v5383_v8 }
0x27ef   : > { %v5354_v28 = vrot.slane %v5352_v26, 1 }
0x27f0   : > { %6763 = vmatpush3.bf16.msra.mxu0 %v6762_v43 }
0x27f1   : > { %v5357_v29 = vsel %vm5356_vm10, %v5354_v28, 0.0  ;;  %6764 = vmatprep.subr.bf16.mxu0 %v6924_v10  ;;  %v5366_v10 = vld [vmem:[%s8201_s21] sm:$0x1] }
0x27f2   : > { %v5358_v30 = vrot.slane %v5357_v29, 4 }
0x27f4   : > { %v5359_v31 = vadd.f32 %v5358_v30, %v5357_v29  ;;  %6766 = vmatpush3.bf16.msra.mxu0 %v6765_v47 }
0x27f6   : > { %v5360_v32 = vrot.slane %v5359_v31, 2 }
0x27f8   : > { %v5361_v33 = vadd.f32 %v5360_v32, %v5359_v31 }
0x27fa   : > { %v5362_v35 = vrot.slane %v5361_v33, 1 }
0x27fc   : > { %v5363_v62 = vadd.f32 %v5362_v35, %v5361_v33 }
0x27fe   : > { %v5365_v18 = vmul.f32 0.25, %v5363_v62 }
0x2800   : > { %v5368_v36 = vsel %vm928_vm3, %v5365_v18, 0.0 }
0x2801   : > { %5369 = vadd.xlane.f32.xlu0 %v5368_v36 }
0x288e   : > { %v5370_v37 = vpop.xlane.xlu0 %5369 }
0x288f   : > { %v5371_v38 = vmul.f32 0.03125, %v5370_v37 }
0x2891   : > { %v5372_v39 = vsub.f32 %v5365_v18, %v5371_v38 }
0x2893   : > { %v5373_v40 = vmul.f32 %v5372_v39, %v5372_v39 }
0x2895   : > { %v5374_v41 = vsel %vm928_vm3, %v5373_v40, 0.0 }
0x2896   : > { %5375 = vadd.xlane.f32.xlu1 %v5374_v41 }
0x2923   : > { %v5376_v48 = vpop.xlane.xlu1 %5375 }
0x2924   : > { %v5377_v4 = vmul.f32 0.03125, %v5376_v48 }
0x2926   : > { %v5378_v49 = vadd.f32 1e-06, %v5377_v4 }
0x2928   : > { %6858 = vrsqrt.f32 %v5378_v49 }
0x2932   : > { %v6859_v50 = vpop.eup %6858 }
0x2933   : > { %v5380_v51 = vmul.f32 %v6859_v50, %v5372_v39 }
0x2935   : > { %v5381_v27 = vmul.f32 %v5380_v51, %v5366_v10 }
0x2937   : > { %v5382_v53 = vadd.f32 %v5381_v27, %v5367_v52 }
0x2939   : > { %6523 = vmatmul.mubr.msk.f32.vlgmr.msra.gmra.mrb[52].mxu0 %vm928_vm3, %v5382_v53 }
0x2a0c   : > { %v5457_v55 = vpop.f32.mrb[52].mxu0 }
0x2a0d   : > { %v5458_v56 = vadd.f32 %v5457_v55, %v5387_v54  ;;  %v6524_v57 = vpop.f32.mrb[53].mxu0 }
0x2a0f   : > { %5462 = vst.msk [vmem:[%s756_s4] sm:$0x1] %vm5461_vm11, %v5458_v56 }
0x2a10   : > { %6873 = shalt.err (!%p6870_p3)
}
0x2a11   : > { %s6874_s4 = scalar_lea.hbm %s8138_s24, 16  ;;  %s6878_s29 = scalar_lea.hbm %s8262_s5, 32 }
0x2a12   : > { %p6875_p4 = scmp.ne.s32.totalorder %s8138_s24, %s6874_s4  ;;  %p6879_p9 = scmp.lt.u32.totalorder %s8138_s24, %s8262_s5 }
0x2a13   : > { %p6880_p10 = scmp.lt.u32.totalorder %s6878_s29, %s6874_s4  ;;  %p6882_p12 = scmp.lt.u32.totalorder %s6874_s4, %s8138_s24 }
0x2a14   : > { %p6876_p7 = pnand %p6875_p4, %p7096_p5 }
0x2a15   : > { %p6881_p11 = por %p6880_p10, %p6879_p9 }
0x2a16   : > { %p6877_p8 = pneg %p6876_p7 }
0x2a17   : > { %p6883_p13 = por %p6882_p12, %p6881_p11 }
0x2a19   : > { %p6884_p0 = pnand %p6883_p13, %p6877_p8 }
0x2a1b   : > { %6887 = shalt.err (!%p6884_p0)
}
0x2a1c   : > { %6767 = dma.vmem_to_hbm [thread:$0]  (%p7096_p5), %s8140_s8, 16, %s8138_s24, %s5464_s6  }
0x2a1d PF: > { %s8263_s10 = sld [smem:[#allocation7_spill]]  ;;  %s8264_s30 = sld [smem:[#allocation5_spill]] }
0x2a23   : > { %p6773_p1 = scmp.ge.s32.totalorder %s8263_s10, 2  ;;  %s5488_s1 = sand.u32 1, %s8264_s30  }
0x2a24   : > { %s5489_s9 = scalar_lea.sflag [#allocation3], %s5488_s1 }
0x2a25   : > { %p6770_p2 = pnand %p6773_p1, %p7100_p6 }
0x2a27   : > { %6905 = dma.done.wait (!%p6770_p2), %s5489_s9, 16  }
0x2a28   : > { %6907 = vsyncadd (!%p6770_p2), %s5489_s9, 4294967280  ;;  %s8266_s30 = sld [smem:[#allocation8_spill]]  ;;  %s8267_s4 = sld [smem:[#allocation6_spill]] }
0x2a29   : > { %s8268_s6 = sld [smem:[#allocation9_spill]]  ;;  %s8269_s29 = smov %s6914_s2 }
0x2a2e   : > { %p35_p3 = scmp.ge.s32.totalorder %s8266_s30, 4   ;;  %s8270_s2 = smov %s8267_s4 }
0x2a30   :  { %37 = sbr.rel (!%p35_p3) target bundleno = 17 (0x11), region = 213 }
0x2a37   :  { %5493 = vsyncpa [#allocation3], 1 }
0x2a38   :  { %5495 = vsyncpa [#allocation3 + $0x1], 1 }

// kernel: dofa_forward.2
= control target key start
LH: loop header
LB: loop body
LE: loop exit
PB: predicated region body
PF: predicated region fallthrough
CT: control target
= control target key end

     0   :  { %v10683_v0 = vmov 0.0|0.0   ;;  %vm10684_vm0 = vmmov 0   ;;  %v14580_v4 = vmov 0.0   ;;  %vm286_vm1 = vcmask 1043456   ;;  %s14542_s1 = inlined_call_operand.vmem [shape: f32[128,128], index: 1, kind: input, shape index: {}]   ;;  %s14543_s3 = inlined_call_operand.vmem [shape: f32[128,128], index: 3, kind: input, shape index: {}]   ;;  %s14544_s0 = inlined_call_operand.vmem [shape: f32[4,128], index: 0, kind: input, shape index: {}]   ;;  %s14545_s7 = inlined_call_operand.vmem [shape: f32[4,128,32], index: 7, kind: input, shape index: {}]   ;;  %s14546_s2 = inlined_call_operand.vmem [shape: f32[1,128], index: 2, kind: input, shape index: {}]   ;;  %s14547_s9 = inlined_call_operand.vmem [shape: f32[4,128,32], index: 9, kind: input, shape index: {}]   ;;  %s14548_s5 = inlined_call_operand.vmem [shape: f32[128,128], index: 5, kind: input, shape index: {}]   ;;  %s14549_s4 = inlined_call_operand.vmem [shape: f32[1,128], index: 4, kind: input, shape index: {}]   ;;  %s14550_s11 = inlined_call_operand.vmem [shape: f32[4,128,32], index: 11, kind: input, shape index: {}]   ;;  %s14551_s6 = inlined_call_operand.vmem [shape: f32[1,128], index: 6, kind: input, shape index: {}]   ;;  %s14552_s10 = inlined_call_operand.vmem [shape: f32[4,1,32], index: 10, kind: input, shape index: {}]   ;;  %s14553_s8 = inlined_call_operand.vmem [shape: f32[4,1,32], index: 8, kind: input, shape index: {}]   ;;  %s14554_s12 = inlined_call_operand.vmem [shape: f32[4,1,32], index: 12, kind: input, shape index: {}]   ;;  %s14555_s13 = inlined_call_operand.vmem [shape: f32[4,32,128], index: 13, kind: input, shape index: {}]   ;;  %s14556_s14 = inlined_call_operand.vmem [shape: f32[1,128], index: 14, kind: input, shape index: {}]   ;;  %s14557_s17 = inlined_call_operand.vmem [shape: bf16[128,2048], index: 17, kind: input, shape index: {}]   ;;  %s14558_s15 = inlined_call_operand.vmem [shape: f32[1,128], index: 15, kind: input, shape index: {}]   ;;  %s14559_s16 = inlined_call_operand.vmem [shape: f32[1,128], index: 16, kind: input, shape index: {}]   ;;  %s14560_s19 = inlined_call_operand.vmem [shape: bf16[2048,128], index: 19, kind: input, shape index: {}]   ;;  %s14561_s18 = inlined_call_operand.vmem [shape: f32[1,2048], index: 18, kind: input, shape index: {}]   ;;  %s14562_s20 = inlined_call_operand.vmem [shape: f32[1,128], index: 20, kind: input, shape index: {}]   ;;  %s14563_s23 = inlined_call_operand.vmem [shape: bf16[128,2048], index: 23, kind: input, shape index: {}]   ;;  %s14564_s21 = inlined_call_operand.vmem [shape: f32[1,128], index: 21, kind: input, shape index: {}]   ;;  %s14565_s22 = inlined_call_operand.vmem [shape: f32[1,128], index: 22, kind: input, shape index: {}]   ;;  %s14566_s25 = inlined_call_operand.vmem [shape: f32[128,32], index: 25, kind: input, shape index: {}]   ;;  %s14567_s24 = inlined_call_operand.vmem [shape: f32[1,2048], index: 24, kind: input, shape index: {}]   ;;  %s14568_s27 = inlined_call_operand.vmem [shape: f32[8,2048], index: 27, kind: output, shape index: {0}]   ;;  %s14569_s26 = inlined_call_operand.vmem [shape: f32[1,32], index: 26, kind: input, shape index: {}]   ;;  %s14570_s28 = inlined_call_operand.vmem [shape: f32[8,32], index: 28, kind: output, shape index: {1}]  }
   0x1   :  { %14581 = sst [smem:[#allocation2_spill]] %s14542_s1  ;;  %9818 = vmatprep.subr.bf16.mxu0 %v10683_v0  ;;  %8897 = vmatprep.mubr.msk.f32.mxu0 %vm10684_vm0, %v14580_v4  ;;  %vm288_vm2 = vcmask 1044480   ;;  %vm752_vm3 = vcmask 261120   ;;  %vm882_vm6 = vcmask 64512  }
   0x2   :  { %14582 = sst [smem:[#allocation3_spill]] %s14543_s3  ;;  %9842 = vmatprep.subr.bf16.mxu1 %v10683_v0  ;;  %8932 = vmatprep.mubr.msk.f32.mxu1 %vm10684_vm0, %v14580_v4  ;;  %vm11284_vm4 = vmpackc.low %vm752_vm3, %vm752_vm3 }
   0x3   :  { %14583 = sst [smem:[#allocation4_spill]] %s14544_s0 }
   0x4   :  { %14584 = sst [smem:[#allocation5_spill]] %s14545_s7  ;;  %s14597_s1 = sld [smem:[#allocation4_spill]] }
   0x5   :  { %14585 = sst [smem:[#allocation6_spill]] %s14546_s2 }
   0x6   :  { %14586 = sst [smem:[#allocation7_spill]] %s14547_s9  ;;  %s14595_s9 = sld [smem:[#allocation2_spill]] }
   0x7   :  { %14587 = sst [smem:[#allocation8_spill]] %s14548_s5  ;;  %s14598_s5 = sld [smem:[#allocation5_spill]] }
   0x8   :  { %14588 = sst [smem:[#allocation9_spill]] %s14549_s4  ;;  %s14599_s2 = sld [smem:[#allocation6_spill]] }
   0x9   :  { %14589 = sst [smem:[#allocation10_spill]] %s14550_s11  ;;  %s14600_s30 = sld [smem:[#allocation7_spill]] }
   0xa   :  { %14590 = sst [smem:[#allocation11_spill]] %s14551_s6  ;;  %v10945_v47 = vld [vmem:[%s14597_s1] sm:$0xf]  ;;  %s14601_s29 = sld [smem:[#allocation8_spill]] }
   0xb   :  { %14591 = sst [smem:[#allocation12_spill]] %s14552_s10  ;;  %s14596_s6 = sld [smem:[#allocation3_spill]] }
   0xc   :  { %14592 = sst [smem:[#allocation13_spill]] %s14553_s8  ;;  %v90_v1 = vld [vmem:[%s14595_s9] sm:$0xff]  ;;  %v91_v2 = vld [vmem:[%s14595_s9 + $0x8] sm:$0xff]  ;;  %v92_v3 = vld [vmem:[%s14595_s9 + $0x10] sm:$0xff]  ;;  %s14602_s3 = sld [smem:[#allocation9_spill]] }
   0xd   :  { %14593 = sst [smem:[#allocation14_spill]] %s14554_s12  ;;  %v9819_v5 = vpack.c.bf16 %v91_v2, %v90_v1  ;;  %v93_v6 = vld [vmem:[%s14595_s9 + $0x18] sm:$0xff]  ;;  %v94_v8 = vld [vmem:[%s14595_s9 + $0x20] sm:$0xff]  ;;  %v95_v9 = vld [vmem:[%s14595_s9 + $0x28] sm:$0xff]  ;;  %s14603_s10 = sld [smem:[#allocation10_spill]] }
   0xe   :  { %14594 = sst [smem:[#allocation15_spill]] %s14570_s28  ;;  %v9822_v7 = vpack.c.bf16 %v93_v6, %v92_v3  ;;  %v9825_v14 = vpack.c.bf16 %v95_v9, %v94_v8  ;;  %v96_v16 = vld [vmem:[%s14595_s9 + $0x30] sm:$0xff]  ;;  %v97_v17 = vld [vmem:[%s14595_s9 + $0x38] sm:$0xff]  ;;  %v98_v22 = vld [vmem:[%s14595_s9 + $0x40] sm:$0xff]  ;;  %s14604_s1 = sld [smem:[#allocation11_spill]] }
   0xf   :  { %9820 = vmatpush3.bf16.msra.mxu0 %v9819_v5  ;;  %v9828_v21 = vpack.c.bf16 %v97_v17, %v96_v16  ;;  %v99_v23 = vld [vmem:[%s14595_s9 + $0x48] sm:$0xff]  ;;  %v100_v28 = vld [vmem:[%s14595_s9 + $0x50] sm:$0xff]  ;;  %v101_v29 = vld [vmem:[%s14595_s9 + $0x58] sm:$0xff]  ;;  %s14608_s11 = sld [smem:[#allocation13_spill]]  ;;  %s14609_s12 = sld [smem:[#allocation14_spill]] }
  0x10   :  { %9821 = vmatprep.subr.bf16.mxu0 %v10683_v0  ;;  %v9831_v27 = vpack.c.bf16 %v99_v23, %v98_v22  ;;  %v9834_v33 = vpack.c.bf16 %v101_v29, %v100_v28  ;;  %v102_v34 = vld [vmem:[%s14595_s9 + $0x60] sm:$0xff]  ;;  %v103_v35 = vld [vmem:[%s14595_s9 + $0x68] sm:$0xff]  ;;  %v104_v40 = vld [vmem:[%s14595_s9 + $0x70] sm:$0xff] }
  0x11   :  { %v184_v10 = vld [vmem:[%s14596_s6] sm:$0xff]  ;;  %v185_v11 = vld [vmem:[%s14596_s6 + $0x8] sm:$0xff]  ;;  %v186_v12 = vld [vmem:[%s14596_s6 + $0x10] sm:$0xff]  ;;  %v9837_v39 = vpack.c.bf16 %v103_v35, %v102_v34 }
  0x12   :  { %v187_v13 = vld [vmem:[%s14596_s6 + $0x18] sm:$0xff]  ;;  %v9843_v15 = vpack.c.bf16 %v185_v11, %v184_v10  ;;  %v188_v19 = vld [vmem:[%s14596_s6 + $0x20] sm:$0xff]  ;;  %v189_v20 = vld [vmem:[%s14596_s6 + $0x28] sm:$0xff] }
  0x13   :  { %9823 = vmatpush3.bf16.msra.mxu0 %v9822_v7  ;;  %v9846_v18 = vpack.c.bf16 %v187_v13, %v186_v12  ;;  %v9849_v24 = vpack.c.bf16 %v189_v20, %v188_v19  ;;  %v190_v25 = vld [vmem:[%s14596_s6 + $0x30] sm:$0xff]  ;;  %v191_v26 = vld [vmem:[%s14596_s6 + $0x38] sm:$0xff]  ;;  %v192_v31 = vld [vmem:[%s14596_s6 + $0x40] sm:$0xff] }
  0x14   :  { %9824 = vmatprep.subr.bf16.mxu0 %v10683_v0  ;;  %9844 = vmatpush3.bf16.msra.mxu1 %v9843_v15  ;;  %v9852_v30 = vpack.c.bf16 %v191_v26, %v190_v25  ;;  %v193_v32 = vld [vmem:[%s14596_s6 + $0x48] sm:$0xff]  ;;  %v194_v37 = vld [vmem:[%s14596_s6 + $0x50] sm:$0xff]  ;;  %v195_v38 = vld [vmem:[%s14596_s6 + $0x58] sm:$0xff] }
  0x15   :  { %9845 = vmatprep.subr.bf16.mxu1 %v10683_v0  ;;  %v9855_v36 = vpack.c.bf16 %v193_v32, %v192_v31  ;;  %v105_v41 = vld [vmem:[%s14595_s9 + $0x78] sm:$0xff]  ;;  %v9858_v42 = vpack.c.bf16 %v195_v38, %v194_v37  ;;  %v196_v43 = vld [vmem:[%s14596_s6 + $0x60] sm:$0xff]  ;;  %v197_v44 = vld [vmem:[%s14596_s6 + $0x68] sm:$0xff]  ;;  %s14605_s9 = sld [smem:[#allocation12_spill]] }
  0x16   :  { %v9840_v45 = vpack.c.bf16 %v105_v41, %v104_v40  ;;  %v9861_v46 = vpack.c.bf16 %v197_v44, %v196_v43  ;;  %v198_v48 = vld [vmem:[%s14596_s6 + $0x70] sm:$0xff]  ;;  %v199_v49 = vld [vmem:[%s14596_s6 + $0x78] sm:$0xff]  ;;  %v313_v51 = vld [vmem:[%s14598_s5] sm:$0xff] }
  0x17   :  { %9826 = vmatpush3.bf16.msra.mxu0 %v9825_v14  ;;  %v9864_v50 = vpack.c.bf16 %v199_v49, %v198_v48  ;;  %v314_v52 = vld [vmem:[%s14598_s5 + $0x8] sm:$0xff]  ;;  %v315_v54 = vld [vmem:[%s14598_s5 + $0x10] sm:$0xff]  ;;  %v316_v55 = vld [vmem:[%s14598_s5 + $0x18] sm:$0xff] }
  0x18   :  { %9827 = vmatprep.subr.bf16.mxu0 %v10683_v0  ;;  %9847 = vmatpush3.bf16.msra.mxu1 %v9846_v18  ;;  %v9867_v53 = vpack.c.bf16 %v314_v52, %v313_v51  ;;  %v9870_v56 = vpack.c.bf16 %v316_v55, %v315_v54  ;;  %v317_v57 = vld [vmem:[%s14598_s5 + $0x20] sm:$0xff]  ;;  %v318_v58 = vld [vmem:[%s14598_s5 + $0x28] sm:$0xff]  ;;  %v319_v60 = vld [vmem:[%s14598_s5 + $0x30] sm:$0xff] }
  0x19   :  { %9848 = vmatprep.subr.bf16.mxu1 %v10683_v0  ;;  %v9873_v59 = vpack.c.bf16 %v318_v58, %v317_v57  ;;  %v320_v61 = vld [vmem:[%s14598_s5 + $0x38] sm:$0xff]  ;;  %v321_v63 = vld [vmem:[%s14598_s5 + $0x40] sm:$0xff]  ;;  %v322_v1 = vld [vmem:[%s14598_s5 + $0x48] sm:$0xff] }
  0x1a   :  { %v9876_v62 = vpack.c.bf16 %v320_v61, %v319_v60  ;;  %v9879_v2 = vpack.c.bf16 %v322_v1, %v321_v63  ;;  %v323_v3 = vld [vmem:[%s14598_s5 + $0x50] sm:$0xff]  ;;  %v324_v5 = vld [vmem:[%s14598_s5 + $0x58] sm:$0xff]  ;;  %v7623_v7 = vld [vmem:[%s14599_s2] ss:$0 sm:$0xff] }
  0x1b   :  { %9829 = vmatpush3.bf16.msra.mxu0 %v9828_v21  ;;  %v9882_v6 = vpack.c.bf16 %v324_v5, %v323_v3  ;;  %v406_v8 = vld [vmem:[%s14600_s30] sm:$0xff]  ;;  %v407_v9 = vld [vmem:[%s14600_s30 + $0x8] sm:$0xff]  ;;  %v408_v15 = vld [vmem:[%s14600_s30 + $0x10] sm:$0xff] }
  0x1c   :  { %9830 = vmatprep.subr.bf16.mxu0 %v10683_v0  ;;  %9850 = vmatpush3.bf16.msra.mxu1 %v9849_v24  ;;  %v9891_v13 = vpack.c.bf16 %v407_v9, %v406_v8  ;;  %v409_v16 = vld [vmem:[%s14600_s30 + $0x18] sm:$0xff]  ;;  %v410_v18 = vld [vmem:[%s14600_s30 + $0x20] sm:$0xff]  ;;  %v411_v19 = vld [vmem:[%s14600_s30 + $0x28] sm:$0xff] }
  0x1d   :  { %9851 = vmatprep.subr.bf16.mxu1 %v10683_v0  ;;  %v9894_v17 = vpack.c.bf16 %v409_v16, %v408_v15  ;;  %v9897_v20 = vpack.c.bf16 %v411_v19, %v410_v18  ;;  %v412_v21 = vld [vmem:[%s14600_s30 + $0x30] sm:$0xff]  ;;  %v413_v22 = vld [vmem:[%s14600_s30 + $0x38] sm:$0xff]  ;;  %v414_v24 = vld [vmem:[%s14600_s30 + $0x40] sm:$0xff] }
  0x1e   :  { %v9900_v23 = vpack.c.bf16 %v413_v22, %v412_v21  ;;  %v415_v25 = vld [vmem:[%s14600_s30 + $0x48] sm:$0xff]  ;;  %v417_v28 = vld [vmem:[%s14600_s30 + $0x58] sm:$0xff]  ;;  %v11081_v38 = vld [vmem:[%s14601_s29 + $0x10] sm:$0xff] }
  0x1f   :  { %9832 = vmatpush3.bf16.msra.mxu0 %v9831_v27  ;;  %v9903_v26 = vpack.c.bf16 %v415_v25, %v414_v24  ;;  %v416_v27 = vld [vmem:[%s14600_s30 + $0x50] sm:$0xff]  ;;  %v419_v31 = vld [vmem:[%s14600_s30 + $0x68] sm:$0xff]  ;;  %v421_v34 = vld [vmem:[%s14600_s30 + $0x78] sm:$0xff] }
  0x20   :  { %9833 = vmatprep.subr.bf16.mxu0 %v10683_v0  ;;  %9853 = vmatpush3.bf16.msra.mxu1 %v9852_v30  ;;  %v9906_v29 = vpack.c.bf16 %v417_v28, %v416_v27  ;;  %v418_v30 = vld [vmem:[%s14600_s30 + $0x60] sm:$0xff]  ;;  %v11073_v37 = vld [vmem:[%s14601_s29 + $0x8] sm:$0xff]  ;;  %v11121_v43 = vld [vmem:[%s14601_s29 + $0x38] sm:$0xff] }
  0x21   :  { %9854 = vmatprep.subr.bf16.mxu1 %v10683_v0  ;;  %v9909_v32 = vpack.c.bf16 %v419_v31, %v418_v30  ;;  %v11097_v40 = vld [vmem:[%s14601_s29 + $0x20] sm:$0xff]  ;;  %v11105_v41 = vld [vmem:[%s14601_s29 + $0x28] sm:$0xff]  ;;  %v11153_v48 = vld [vmem:[%s14601_s29 + $0x58] sm:$0xff] }
  0x22   :  { %v11129_v44 = vld [vmem:[%s14601_s29 + $0x40] sm:$0xff]  ;;  %v326_v51 = vld [vmem:[%s14598_s5 + $0x68] sm:$0xff]  ;;  %v327_v54 = vld [vmem:[%s14598_s5 + $0x70] sm:$0xff] }
  0x23   :  { %9835 = vmatpush3.bf16.msra.mxu0 %v9834_v33  ;;  %v420_v33 = vld [vmem:[%s14600_s30 + $0x70] sm:$0xff]  ;;  %v11161_v49 = vld [vmem:[%s14601_s29 + $0x60] sm:$0xff]  ;;  %v11175_v52 = vld [vmem:[%s14601_s29 + $0x68] sm:$0xff] }
  0x24   :  { %9836 = vmatprep.subr.bf16.mxu0 %v10683_v0  ;;  %9856 = vmatpush3.bf16.msra.mxu1 %v9855_v36  ;;  %v9912_v35 = vpack.c.bf16 %v421_v34, %v420_v33  ;;  %v11064_v36 = vld [vmem:[%s14601_s29] sm:$0xff]  ;;  %v328_v55 = vld [vmem:[%s14598_s5 + $0x78] sm:$0xff]  ;;  %v580_v1 = vld [vmem:[%s14603_s10 + $0x8] sm:$0xff] }
  0x25   :  { %9857 = vmatprep.subr.bf16.mxu1 %v10683_v0  ;;  %v9888_v57 = vpack.c.bf16 %v328_v55, %v327_v54  ;;  %v11199_v58 = vld [vmem:[%s14601_s29 + $0x78] sm:$0xff]  ;;  %v579_v63 = vld [vmem:[%s14603_s10] sm:$0xff]  ;;  %v589_v19 = vld [vmem:[%s14603_s10 + $0x50] sm:$0xff] }
  0x26   :  { %v7625_v3 = vld [vmem:[%s14604_s1] ss:$0 sm:$0xff]  ;;  %v582_v8 = vld [vmem:[%s14603_s10 + $0x18] sm:$0xff]  ;;  %v593_v25 = vld [vmem:[%s14603_s10 + $0x70] sm:$0xff] }
  0x27   :  { %9838 = vmatpush3.bf16.msra.mxu0 %v9837_v39  ;;  %v11089_v39 = vld [vmem:[%s14601_s29 + $0x18] sm:$0xff]  ;;  %v587_v16 = vld [vmem:[%s14603_s10 + $0x40] sm:$0xff] }
  0x28   :  { %9839 = vmatprep.subr.bf16.mxu0 %v10683_v0  ;;  %9859 = vmatpush3.bf16.msra.mxu1 %v9858_v42  ;;  %v11113_v42 = vld [vmem:[%s14601_s29 + $0x30] sm:$0xff]  ;;  %v591_v22 = vld [vmem:[%s14603_s10 + $0x60] sm:$0xff] }
  0x29   :  { %9860 = vmatprep.subr.bf16.mxu1 %v10683_v0  ;;  %v11277_v27 = vld [vmem:[%s14605_s9] ss:$0 sm:$0xff] }
  0x2b   :  { %9841 = vmatpush3.bf16.msra.mxu0 %v9840_v45  ;;  %v11137_v45 = vld [vmem:[%s14601_s29 + $0x48] sm:$0xff] }
  0x2c   :  { %9866 = vmatprep.subr.bf16.mxu0 %v10683_v0  ;;  %9862 = vmatpush3.bf16.msra.mxu1 %v9861_v46  ;;  %v11145_v46 = vld [vmem:[%s14601_s29 + $0x50] sm:$0xff] }
  0x2d   :  { %9863 = vmatprep.subr.bf16.mxu1 %v10683_v0 }
  0x2e   :  { %8898 = vmatmul.mubr.f32.vlgmr.msra.gmra.mrb[0].mxu0 %v10945_v47 }
  0x2f   :  { %8967 = vmatprep.mubr.msk.f32.mxu0 %vm10684_vm0, %v14580_v4  ;;  %9868 = vmatpush3.bf16.msra.mxu0 %v9867_v53 }
  0x30   :  { %9865 = vmatpush3.bf16.msra.mxu1 %v9864_v50  ;;  %9869 = vmatprep.subr.bf16.mxu0 %v10683_v0  ;;  %v325_v50 = vld [vmem:[%s14598_s5 + $0x60] sm:$0xff] }
  0x31   :  { %9890 = vmatprep.subr.bf16.mxu1 %v10683_v0  ;;  %v9885_v53 = vpack.c.bf16 %v326_v51, %v325_v50 }
  0x33   :  { %9871 = vmatpush3.bf16.msra.mxu0 %v9870_v56  ;;  %v11190_v56 = vld [vmem:[%s14601_s29 + $0x70] sm:$0xff] }
  0x34   :  { %9872 = vmatprep.subr.bf16.mxu0 %v10683_v0 }
  0x37   :  { %9874 = vmatpush3.bf16.msra.mxu0 %v9873_v59  ;;  %v7624_v59 = vld [vmem:[%s14602_s3] ss:$0 sm:$0xff] }
  0x38   :  { %9875 = vmatprep.subr.bf16.mxu0 %v10683_v0 }
  0x3b   :  { %9877 = vmatpush3.bf16.msra.mxu0 %v9876_v62 }
  0x3c   :  { %9878 = vmatprep.subr.bf16.mxu0 %v10683_v0 }
  0x3f   :  { %9880 = vmatpush3.bf16.msra.mxu0 %v9879_v2 }
  0x40   :  { %9881 = vmatprep.subr.bf16.mxu0 %v10683_v0 }
  0x43   :  { %9883 = vmatpush3.bf16.msra.mxu0 %v9882_v6  ;;  %v9915_v6 = vpack.c.bf16 %v580_v1, %v579_v63 }
  0x44   :  { %9884 = vmatprep.subr.bf16.mxu0 %v10683_v0 }
  0x47   :  { %9886 = vmatpush3.bf16.msra.mxu0 %v9885_v53 }
  0x48   :  { %9887 = vmatprep.subr.bf16.mxu0 %v10683_v0 }
  0x4b   :  { %9889 = vmatpush3.bf16.msra.mxu0 %v9888_v57 }
  0x4c   :  { %9914 = vmatprep.subr.bf16.mxu0 %v10683_v0 }
 0x101   :  { %v179_v10 = vpop.f32.mrb[0].mxu0 }
 0x102   :  { %v180_v11 = vadd.f32 %v7623_v7, %v179_v10  ;;  %v8899_v12 = vpop.f32.mrb[1].mxu0  ;;  %v581_v7 = vld [vmem:[%s14603_s10 + $0x10] sm:$0xff]  ;;  %v583_v10 = vld [vmem:[%s14603_s10 + $0x20] sm:$0xff] }
 0x104   :  { %v183_v14 = vmax.f32 %v180_v11, 0.0  ;;  %v584_v11 = vld [vmem:[%s14603_s10 + $0x28] sm:$0xff] }
 0x105   :  { %v9921_v12 = vpack.c.bf16 %v584_v11, %v583_v10 }
 0x106   :  { %8933 = vmatmul.mubr.f32.vlgmr.msra.gmra.mrb[0].mxu1 %v183_v14  ;;  %v586_v14 = vld [vmem:[%s14603_s10 + $0x38] sm:$0xff] }
 0x107   :  { %9892 = vmatpush3.bf16.msra.mxu1 %v9891_v13  ;;  %9002 = vmatprep.mubr.msk.f32.mxu1 %vm10684_vm0, %v14580_v4  ;;  %v585_v13 = vld [vmem:[%s14603_s10 + $0x30] sm:$0xff] }
 0x108   :  { %9893 = vmatprep.subr.bf16.mxu1 %v10683_v0  ;;  %v9924_v15 = vpack.c.bf16 %v586_v14, %v585_v13 }
 0x10b   :  { %9895 = vmatpush3.bf16.msra.mxu1 %v9894_v17  ;;  %v588_v17 = vld [vmem:[%s14603_s10 + $0x48] sm:$0xff] }
 0x10c   :  { %9896 = vmatprep.subr.bf16.mxu1 %v10683_v0  ;;  %v9927_v18 = vpack.c.bf16 %v588_v17, %v587_v16 }
 0x10f   :  { %9898 = vmatpush3.bf16.msra.mxu1 %v9897_v20  ;;  %v590_v20 = vld [vmem:[%s14603_s10 + $0x58] sm:$0xff] }
 0x110   :  { %9899 = vmatprep.subr.bf16.mxu1 %v10683_v0  ;;  %v9930_v21 = vpack.c.bf16 %v590_v20, %v589_v19 }
 0x113   :  { %9901 = vmatpush3.bf16.msra.mxu1 %v9900_v23  ;;  %v592_v23 = vld [vmem:[%s14603_s10 + $0x68] sm:$0xff] }
 0x114   :  { %9902 = vmatprep.subr.bf16.mxu1 %v10683_v0  ;;  %v9933_v24 = vpack.c.bf16 %v592_v23, %v591_v22 }
 0x117   :  { %9904 = vmatpush3.bf16.msra.mxu1 %v9903_v26  ;;  %v594_v26 = vld [vmem:[%s14603_s10 + $0x78] sm:$0xff] }
 0x118   :  { %9905 = vmatprep.subr.bf16.mxu1 %v10683_v0 }
 0x11b   :  { %9907 = vmatpush3.bf16.msra.mxu1 %v9906_v29  ;;  %v9936_v29 = vpack.c.bf16 %v594_v26, %v593_v25 }
 0x11c   :  { %9908 = vmatprep.subr.bf16.mxu1 %v10683_v0 }
 0x11f   :  { %9910 = vmatpush3.bf16.msra.mxu1 %v9909_v32 }
 0x120   :  { %9911 = vmatprep.subr.bf16.mxu1 %v10683_v0 }
 0x123   :  { %9913 = vmatpush3.bf16.msra.mxu1 %v9912_v35 }
 0x124   :  { %9938 = vmatprep.subr.bf16.mxu1 %v10683_v0 }
 0x126   :  { %9003 = vmatmul.mubr.f32.vlgmr.msra.gmra.mrb[2].mxu1 %v11064_v36 }
 0x127   :  { %9005 = vmatprep.mubr.msk.f32.mxu1 %vm10684_vm0, %v14580_v4 }
 0x12a   :  { %9006 = vmatmul.mubr.f32.gmra.mrb[4].mxu1 %v11073_v37 }
 0x12b   :  { %9008 = vmatprep.mubr.msk.f32.mxu1 %vm10684_vm0, %v14580_v4 }
 0x12e   :  { %9009 = vmatmul.mubr.f32.gmra.mrb[6].mxu1 %v11081_v38 }
 0x12f   :  { %9011 = vmatprep.mubr.msk.f32.mxu1 %vm10684_vm0, %v14580_v4 }
 0x132   :  { %9012 = vmatmul.mubr.f32.gmra.mrb[8].mxu1 %v11089_v39 }
 0x133   :  { %9014 = vmatprep.mubr.msk.f32.mxu1 %vm10684_vm0, %v14580_v4 }
 0x136   :  { %9015 = vmatmul.mubr.f32.gmra.mrb[10].mxu1 %v11097_v40 }
 0x137   :  { %9017 = vmatprep.mubr.msk.f32.mxu1 %vm10684_vm0, %v14580_v4 }
 0x13a   :  { %9018 = vmatmul.mubr.f32.gmra.mrb[12].mxu1 %v11105_v41 }
 0x13b   :  { %9020 = vmatprep.mubr.msk.f32.mxu1 %vm10684_vm0, %v14580_v4 }
 0x13e   :  { %9021 = vmatmul.mubr.f32.gmra.mrb[14].mxu1 %v11113_v42 }
 0x13f   :  { %9023 = vmatprep.mubr.msk.f32.mxu1 %vm10684_vm0, %v14580_v4 }
 0x142   :  { %9024 = vmatmul.mubr.f32.gmra.mrb[16].mxu1 %v11121_v43 }
 0x143   :  { %9026 = vmatprep.mubr.msk.f32.mxu1 %vm10684_vm0, %v14580_v4 }
 0x146   :  { %9027 = vmatmul.mubr.f32.gmra.mrb[18].mxu1 %v11129_v44 }
 0x147   :  { %9029 = vmatprep.mubr.msk.f32.mxu1 %vm10684_vm0, %v14580_v4 }
 0x14a   :  { %9030 = vmatmul.mubr.f32.gmra.mrb[20].mxu1 %v11137_v45 }
 0x14b   :  { %9032 = vmatprep.mubr.msk.f32.mxu1 %vm10684_vm0, %v14580_v4 }
 0x14e   :  { %9033 = vmatmul.mubr.f32.gmra.mrb[22].mxu1 %v11145_v46 }
 0x14f   :  { %9035 = vmatprep.mubr.msk.f32.mxu1 %vm10684_vm0, %v14580_v4 }
 0x152   :  { %9036 = vmatmul.mubr.f32.gmra.mrb[24].mxu1 %v11153_v48 }
 0x153   :  { %9038 = vmatprep.mubr.msk.f32.mxu1 %vm10684_vm0, %v14580_v4 }
 0x156   :  { %9039 = vmatmul.mubr.f32.gmra.mrb[26].mxu1 %v11161_v49 }
 0x157   :  { %9041 = vmatprep.mubr.msk.f32.mxu1 %vm10684_vm0, %v14580_v4 }
 0x15a   :  { %9042 = vmatmul.mubr.f32.gmra.mrb[28].mxu1 %v11175_v52 }
 0x15b   :  { %9044 = vmatprep.mubr.msk.f32.mxu1 %vm10684_vm0, %v14580_v4 }
 0x15e   :  { %9045 = vmatmul.mubr.f32.gmra.mrb[30].mxu1 %v11190_v56 }
 0x15f   :  { %9047 = vmatprep.mubr.msk.f32.mxu1 %vm10684_vm0, %v14580_v4 }
 0x162   :  { %9048 = vmatmul.mubr.f32.gmra.mrb[32].mxu1 %v11199_v58 }
 0x163   :  { %9050 = vmatprep.mubr.msk.f32.mxu1 %vm10684_vm0, %v14580_v4 }
 0x1d9   :  { %v273_v60 = vpop.f32.mrb[0].mxu1 }
 0x1da   :  { %v274_v61 = vadd.f32 %v7624_v59, %v273_v60  ;;  %v8934_v62 = vpop.f32.mrb[1].mxu1 }
 0x1dc   :  { %v277_v2 = vmax.f32 %v274_v61, 0.0 }
 0x1de   :  { %v278_v5 = vadd.f32 %v277_v2, %v10945_v47  ;;  %v9918_v47 = vpack.c.bf16 %v582_v8, %v581_v7 }
 0x1e0   :  { %v11223_v9 = vsel %vm286_vm1, %v278_v5, %v7625_v3 }
 0x1e1   :  { %8968 = vmatmul.mubr.msk.f32.vlgmr.msra.gmra.mrb[2].mxu0 %vm288_vm2, %v11223_v9  ;;  %9051 = vmatmul.mubr.msk.f32.gmra.mrb[34].mxu1 %vm288_vm2, %v11223_v9 }
 0x1e2   :  { %9916 = vmatpush3.bf16.msra.mxu0 %v9915_v6  ;;  %9085 = vmatprep.mubr.msk.f32.mxu0 %vm10684_vm0, %v14580_v4 }
 0x1e3   :  { %9917 = vmatprep.subr.bf16.mxu0 %v10683_v0  ;;  %871 = vmatprep.mubr.f32.mxu1 %v14580_v4 }
 0x1e6   :  { %9919 = vmatpush3.bf16.msra.mxu0 %v9918_v47 }
 0x1e7   :  { %9920 = vmatprep.subr.bf16.mxu0 %v10683_v0 }
 0x1ea   :  { %9922 = vmatpush3.bf16.msra.mxu0 %v9921_v12 }
 0x1eb   :  { %9923 = vmatprep.subr.bf16.mxu0 %v10683_v0 }
 0x1ee   :  { %9925 = vmatpush3.bf16.msra.mxu0 %v9924_v15 }
 0x1ef   :  { %9926 = vmatprep.subr.bf16.mxu0 %v10683_v0 }
 0x1f2   :  { %9928 = vmatpush3.bf16.msra.mxu0 %v9927_v18 }
 0x1f3   :  { %9929 = vmatprep.subr.bf16.mxu0 %v10683_v0 }
 0x1f6   :  { %9931 = vmatpush3.bf16.msra.mxu0 %v9930_v21 }
 0x1f7   :  { %9932 = vmatprep.subr.bf16.mxu0 %v10683_v0 }
 0x1f9   :  { %v495_v28 = vpop.f32.mrb[2].mxu1 }
 0x1fa   :  { %9934 = vmatpush3.bf16.msra.mxu0 %v9933_v24  ;;  %v9004_v30 = vpop.f32.mrb[3].mxu1  ;;  %v496_v31 = vadd.f32 %v11277_v27, %v495_v28 }
 0x1fb   :  { %9935 = vmatprep.subr.bf16.mxu0 %v10683_v0 }
 0x1fd   :  { %v500_v32 = vpop.f32.mrb[4].mxu1 }
 0x1fe   :  { %9937 = vmatpush3.bf16.msra.mxu0 %v9936_v29  ;;  %v501_v33 = vadd.f32 %v11277_v27, %v500_v32  ;;  %v9007_v34 = vpop.f32.mrb[5].mxu1 }
 0x1ff   :  { %9970 = vmatprep.subr.bf16.mxu0 %v10683_v0 }
 0x200   :  { %v9939_v50 = vpack.c.bf16 %v501_v33, %v496_v31 }
 0x201   :  { %9086 = vmatmul.mubr.f32.vlgmr.msra.gmra.mrb[4].mxu0 %v11064_v36  ;;  %v505_v51 = vpop.f32.mrb[6].mxu1 }
 0x202   :  { %9088 = vmatprep.mubr.msk.f32.mxu0 %vm10684_vm0, %v14580_v4  ;;  %9941 = vmatpush1.bf16.xpose.msk.msra.mxu1 %vm11284_vm4, %v9939_v50  ;;  %v9010_v53 = vpop.f32.mrb[7].mxu1  ;;  %v506_v54 = vadd.f32 %v11277_v27, %v505_v51 }
 0x203   :  { %9942 = vmatprep.subr.bf16.mxu1 %v10683_v0 }
 0x205   :  { %9089 = vmatmul.mubr.f32.gmra.mrb[6].mxu0 %v11073_v37  ;;  %v510_v55 = vpop.f32.mrb[8].mxu1 }
 0x206   :  { %9091 = vmatprep.mubr.msk.f32.mxu0 %vm10684_vm0, %v14580_v4  ;;  %v511_v57 = vadd.f32 %v11277_v27, %v510_v55  ;;  %v9013_v59 = vpop.f32.mrb[9].mxu1 }
 0x208   :  { %v9943_v60 = vpack.c.bf16 %v511_v57, %v506_v54 }
 0x209   :  { %9092 = vmatmul.mubr.f32.gmra.mrb[8].mxu0 %v11081_v38  ;;  %v515_v61 = vpop.f32.mrb[10].mxu1 }
 0x20a   :  { %9094 = vmatprep.mubr.msk.f32.mxu0 %vm10684_vm0, %v14580_v4  ;;  %9945 = vmatpush1.bf16.xpose.msk.msra.mxu1 %vm11284_vm4, %v9943_v60  ;;  %v9016_v62 = vpop.f32.mrb[11].mxu1  ;;  %v516_v63 = vadd.f32 %v11277_v27, %v515_v61 }
 0x20b   :  { %9946 = vmatprep.subr.bf16.mxu1 %v10683_v0  ;;  %v7651_v62 = vld [vmem:[%s14598_s5 + $0x80] sm:$0xff] }
 0x20d   :  { %9095 = vmatmul.mubr.f32.gmra.mrb[10].mxu0 %v11089_v39  ;;  %v520_v1 = vpop.f32.mrb[12].mxu1 }
 0x20e   :  { %9097 = vmatprep.mubr.msk.f32.mxu0 %vm10684_vm0, %v14580_v4  ;;  %v521_v2 = vadd.f32 %v11277_v27, %v520_v1  ;;  %v9019_v3 = vpop.f32.mrb[13].mxu1  ;;  %v7626_v1 = vld [vmem:[%s14608_s11] ss:$0 sm:$0xff] }
 0x210   :  { %v9947_v5 = vpack.c.bf16 %v521_v2, %v516_v63  ;;  %v7652_v63 = vld [vmem:[%s14598_s5 + $0x88] sm:$0xff] }
 0x211   :  { %9098 = vmatmul.mubr.f32.gmra.mrb[12].mxu0 %v11097_v40  ;;  %v525_v6 = vpop.f32.mrb[14].mxu1 }
 0x212   :  { %9100 = vmatprep.mubr.msk.f32.mxu0 %vm10684_vm0, %v14580_v4  ;;  %9949 = vmatpush1.bf16.xpose.msk.msra.mxu1 %vm11284_vm4, %v9947_v5  ;;  %v9022_v7 = vpop.f32.mrb[15].mxu1  ;;  %v526_v8 = vadd.f32 %v11277_v27, %v525_v6  ;;  %v9995_v6 = vpack.c.bf16 %v7652_v63, %v7651_v62  ;;  %v7694_v62 = vld [vmem:[%s14603_s10 + $0xa8] sm:$0xff] }
 0x213   :  { %9950 = vmatprep.subr.bf16.mxu1 %v10683_v0 }
 0x215   :  { %9101 = vmatmul.mubr.f32.gmra.mrb[14].mxu0 %v11105_v41  ;;  %v530_v47 = vpop.f32.mrb[16].mxu1 }
 0x216   :  { %9103 = vmatprep.mubr.msk.f32.mxu0 %vm10684_vm0, %v14580_v4  ;;  %v531_v10 = vadd.f32 %v11277_v27, %v530_v47  ;;  %v9025_v11 = vpop.f32.mrb[17].mxu1  ;;  %v7654_v47 = vld [vmem:[%s14598_s5 + $0x98] sm:$0xff] }
 0x217   :  { %v7656_v11 = vld [vmem:[%s14598_s5 + $0xa8] sm:$0xff] }
 0x218   :  { %v9951_v12 = vpack.c.bf16 %v531_v10, %v526_v8  ;;  %v7653_v8 = vld [vmem:[%s14598_s5 + $0x90] sm:$0xff]  ;;  %v7655_v10 = vld [vmem:[%s14598_s5 + $0xa0] sm:$0xff] }
 0x219   :  { %9104 = vmatmul.mubr.f32.gmra.mrb[16].mxu0 %v11113_v42  ;;  %v535_v13 = vpop.f32.mrb[18].mxu1 }
 0x21a   :  { %9106 = vmatprep.mubr.msk.f32.mxu0 %vm10684_vm0, %v14580_v4  ;;  %9953 = vmatpush1.bf16.xpose.msk.msra.mxu1 %vm11284_vm4, %v9951_v12  ;;  %v9028_v14 = vpop.f32.mrb[19].mxu1  ;;  %v536_v15 = vadd.f32 %v11277_v27, %v535_v13  ;;  %v10001_v12 = vpack.c.bf16 %v7656_v11, %v7655_v10  ;;  %v7657_v13 = vld [vmem:[%s14598_s5 + $0xb0] sm:$0xff]  ;;  %v7697_v11 = vld [vmem:[%s14603_s10 + $0xc0] sm:$0xff] }
 0x21b   :  { %9954 = vmatprep.subr.bf16.mxu1 %v10683_v0  ;;  %v7658_v14 = vld [vmem:[%s14598_s5 + $0xb8] sm:$0xff] }
 0x21d   :  { %9107 = vmatmul.mubr.f32.gmra.mrb[18].mxu0 %v11121_v43  ;;  %v540_v16 = vpop.f32.mrb[20].mxu1 }
 0x21e   :  { %9109 = vmatprep.mubr.msk.f32.mxu0 %vm10684_vm0, %v14580_v4  ;;  %v541_v17 = vadd.f32 %v11277_v27, %v540_v16  ;;  %v9031_v18 = vpop.f32.mrb[21].mxu1  ;;  %v7659_v16 = vld [vmem:[%s14598_s5 + $0xc0] sm:$0xff] }
 0x220   :  { %v9955_v19 = vpack.c.bf16 %v541_v17, %v536_v15  ;;  %v10004_v15 = vpack.c.bf16 %v7658_v14, %v7657_v13  ;;  %v7660_v17 = vld [vmem:[%s14598_s5 + $0xc8] sm:$0xff] }
 0x221   :  { %9110 = vmatmul.mubr.f32.gmra.mrb[20].mxu0 %v11129_v44  ;;  %v545_v20 = vpop.f32.mrb[22].mxu1  ;;  %v10007_v18 = vpack.c.bf16 %v7660_v17, %v7659_v16  ;;  %v7699_v17 = vld [vmem:[%s14603_s10 + $0xd0] sm:$0xff] }
 0x222   :  { %9112 = vmatprep.mubr.msk.f32.mxu0 %vm10684_vm0, %v14580_v4  ;;  %9957 = vmatpush1.bf16.xpose.msk.msra.mxu1 %vm11284_vm4, %v9955_v19  ;;  %v9034_v21 = vpop.f32.mrb[23].mxu1  ;;  %v546_v22 = vadd.f32 %v11277_v27, %v545_v20  ;;  %v7661_v19 = vld [vmem:[%s14598_s5 + $0xd0] sm:$0xff]  ;;  %v7662_v20 = vld [vmem:[%s14598_s5 + $0xd8] sm:$0xff] }
 0x223   :  { %9958 = vmatprep.subr.bf16.mxu1 %v10683_v0  ;;  %v10010_v21 = vpack.c.bf16 %v7662_v20, %v7661_v19 }
 0x225   :  { %9113 = vmatmul.mubr.f32.gmra.mrb[22].mxu0 %v11137_v45  ;;  %v550_v23 = vpop.f32.mrb[24].mxu1 }
 0x226   :  { %9115 = vmatprep.mubr.msk.f32.mxu0 %vm10684_vm0, %v14580_v4  ;;  %v551_v24 = vadd.f32 %v11277_v27, %v550_v23  ;;  %v9037_v25 = vpop.f32.mrb[25].mxu1  ;;  %v7664_v23 = vld [vmem:[%s14598_s5 + $0xe8] sm:$0xff] }
 0x227   :  { %v7665_v25 = vld [vmem:[%s14598_s5 + $0xf0] sm:$0xff] }
 0x228   :  { %v9959_v26 = vpack.c.bf16 %v551_v24, %v546_v22  ;;  %v7663_v22 = vld [vmem:[%s14598_s5 + $0xe0] sm:$0xff] }
 0x229   :  { %9116 = vmatmul.mubr.f32.gmra.mrb[24].mxu0 %v11145_v46  ;;  %v555_v28 = vpop.f32.mrb[26].mxu1  ;;  %v10013_v24 = vpack.c.bf16 %v7664_v23, %v7663_v22 }
 0x22a   :  { %9118 = vmatprep.mubr.msk.f32.mxu0 %vm10684_vm0, %v14580_v4  ;;  %9961 = vmatpush1.bf16.xpose.msk.msra.mxu1 %vm11284_vm4, %v9959_v26  ;;  %v9040_v29 = vpop.f32.mrb[27].mxu1  ;;  %v556_v30 = vadd.f32 %v11277_v27, %v555_v28  ;;  %v7666_v26 = vld [vmem:[%s14598_s5 + $0xf8] sm:$0xff] }
 0x22b   :  { %9962 = vmatprep.subr.bf16.mxu1 %v10683_v0  ;;  %v10016_v28 = vpack.c.bf16 %v7666_v26, %v7665_v25  ;;  %v7689_v29 = vld [vmem:[%s14603_s10 + $0x80] sm:$0xff]  ;;  %v7702_v25 = vld [vmem:[%s14603_s10 + $0xe8] sm:$0xff] }
 0x22d   :  { %9119 = vmatmul.mubr.f32.gmra.mrb[26].mxu0 %v11153_v48  ;;  %v560_v31 = vpop.f32.mrb[28].mxu1 }
 0x22e   :  { %9121 = vmatprep.mubr.msk.f32.mxu0 %vm10684_vm0, %v14580_v4  ;;  %v561_v32 = vadd.f32 %v11277_v27, %v560_v31  ;;  %v9043_v33 = vpop.f32.mrb[29].mxu1  ;;  %v11450_v31 = vld [vmem:[%s14609_s12] ss:$0 sm:$0xff] }
 0x230   :  { %v9963_v34 = vpack.c.bf16 %v561_v32, %v556_v30  ;;  %v7690_v30 = vld [vmem:[%s14603_s10 + $0x88] sm:$0xff] }
 0x231   :  { %9122 = vmatmul.mubr.f32.gmra.mrb[28].mxu0 %v11161_v49  ;;  %v565_v50 = vpop.f32.mrb[30].mxu1 }
 0x232   :  { %9124 = vmatprep.mubr.msk.f32.mxu0 %vm10684_vm0, %v14580_v4  ;;  %9965 = vmatpush1.bf16.xpose.msk.msra.mxu1 %vm11284_vm4, %v9963_v34  ;;  %v9046_v51 = vpop.f32.mrb[31].mxu1  ;;  %v566_v53 = vadd.f32 %v11277_v27, %v565_v50  ;;  %v10043_v34 = vpack.c.bf16 %v7690_v30, %v7689_v29 }
 0x233   :  { %9966 = vmatprep.subr.bf16.mxu1 %v10683_v0  ;;  %v7691_v51 = vld [vmem:[%s14603_s10 + $0x90] sm:$0xff] }
 0x235   :  { %9125 = vmatmul.mubr.f32.gmra.mrb[30].mxu0 %v11175_v52  ;;  %v570_v54 = vpop.f32.mrb[32].mxu1 }
 0x236   :  { %9127 = vmatprep.mubr.msk.f32.mxu0 %vm10684_vm0, %v14580_v4  ;;  %v571_v55 = vadd.f32 %v11277_v27, %v570_v54  ;;  %v9049_v57 = vpop.f32.mrb[33].mxu1 }
 0x238   :  { %v9967_v59 = vpack.c.bf16 %v571_v55, %v566_v53  ;;  %v7692_v53 = vld [vmem:[%s14603_s10 + $0x98] sm:$0xff] }
 0x239   :  { %9128 = vmatmul.mubr.f32.gmra.mrb[32].mxu0 %v11190_v56 }
 0x23a   :  { %9130 = vmatprep.mubr.msk.f32.mxu0 %vm10684_vm0, %v14580_v4  ;;  %9969 = vmatpush1.bf16.xpose.msk.msra.mxu1 %vm11284_vm4, %v9967_v59  ;;  %v10046_v59 = vpack.c.bf16 %v7692_v53, %v7691_v51 }
 0x23b   :  { %839 = vmatprep.subr.mxu1 %v14580_v4 }
 0x23d   :  { %9131 = vmatmul.mubr.f32.gmra.mrb[34].mxu0 %v11199_v58 }
 0x23e   :  { %9133 = vmatprep.mubr.msk.f32.mxu0 %vm10684_vm0, %v14580_v4 }
 0x241   :  { %9134 = vmatmul.mubr.msk.f32.gmra.mrb[36].mxu0 %vm288_vm2, %v11223_v9 }
 0x2b4   :  { %v402_v60 = vpop.f32.mrb[2].mxu0  ;;  %v575_v61 = vpop.f32.mrb[34].mxu1 }
 0x2b5   :  { %v576_v2 = vadd.f32 %v11277_v27, %v575_v61  ;;  %v8969_v3 = vpop.f32.mrb[3].mxu0  ;;  %v9052_v5 = vpop.f32.mrb[35].mxu1  ;;  %v403_v7 = vadd.f32 %v7626_v1, %v402_v60  ;;  %v9998_v27 = vpack.c.bf16 %v7654_v47, %v7653_v8  ;;  %v7693_v61 = vld [vmem:[%s14603_s10 + $0xa0] sm:$0xff] }
 0x2b6   :  { %v7695_v5 = vld [vmem:[%s14603_s10 + $0xb0] sm:$0xff] }
 0x2b7   :  { %7648 = vmatpush1.xpose.msk.msra.mxu1 %vm752_vm3, %v576_v2  ;;  %v10049_v2 = vpack.c.bf16 %v7694_v62, %v7693_v61 }
 0x2b8   :  { %9994 = vmatprep.subr.bf16.mxu1 %v10683_v0 }
 0x2ba   :  { %7649 = vmatmul.mubr.msk.f32.vlgmr.msra.gmra.mrb[36].mxu1 %vm752_vm3, %v403_v7 }
 0x2bb   :  { %9996 = vmatpush3.bf16.msra.mxu1 %v9995_v6  ;;  %9168 = vmatprep.mubr.msk.f32.mxu1 %vm10684_vm0, %v14580_v4  ;;  %v7696_v6 = vld [vmem:[%s14603_s10 + $0xb8] sm:$0xff] }
 0x2bc   :  { %9997 = vmatprep.subr.bf16.mxu1 %v10683_v0 }
 0x2bf   :  { %9999 = vmatpush3.bf16.msra.mxu1 %v9998_v27  ;;  %v10052_v27 = vpack.c.bf16 %v7696_v6, %v7695_v5 }
 0x2c0   :  { %10000 = vmatprep.subr.bf16.mxu1 %v10683_v0 }
 0x2c3   :  { %10002 = vmatpush3.bf16.msra.mxu1 %v10001_v12  ;;  %v7698_v12 = vld [vmem:[%s14603_s10 + $0xc8] sm:$0xff] }
 0x2c4   :  { %10003 = vmatprep.subr.bf16.mxu1 %v10683_v0 }
 0x2c7   :  { %10005 = vmatpush3.bf16.msra.mxu1 %v10004_v15  ;;  %v10055_v15 = vpack.c.bf16 %v7698_v12, %v7697_v11 }
 0x2c8   :  { %10006 = vmatprep.subr.bf16.mxu1 %v10683_v0 }
 0x2cb   :  { %10008 = vmatpush3.bf16.msra.mxu1 %v10007_v18  ;;  %v7700_v18 = vld [vmem:[%s14603_s10 + $0xd8] sm:$0xff] }
 0x2cc   :  { %10009 = vmatprep.subr.bf16.mxu1 %v10683_v0  ;;  %v10058_v22 = vpack.c.bf16 %v7700_v18, %v7699_v17 }
 0x2cf   :  { %10011 = vmatpush3.bf16.msra.mxu1 %v10010_v21 }
 0x2d0   :  { %10012 = vmatprep.subr.bf16.mxu1 %v10683_v0 }
 0x2d3   :  { %10014 = vmatpush3.bf16.msra.mxu1 %v10013_v24  ;;  %v7701_v24 = vld [vmem:[%s14603_s10 + $0xe0] sm:$0xff] }
 0x2d4   :  { %10015 = vmatprep.subr.bf16.mxu1 %v10683_v0  ;;  %v668_v32 = vpop.f32.mrb[4].mxu0  ;;  %v10061_v29 = vpack.c.bf16 %v7702_v25, %v7701_v24 }
 0x2d5   :  { %v9087_v33 = vpop.f32.mrb[5].mxu0  ;;  %v669_v50 = vadd.f32 %v11450_v31, %v668_v32  ;;  %v7703_v32 = vld [vmem:[%s14603_s10 + $0xf0] sm:$0xff] }
 0x2d6   :  { %v7704_v33 = vld [vmem:[%s14603_s10 + $0xf8] sm:$0xff] }
 0x2d7   :  { %10017 = vmatpush3.bf16.msra.mxu1 %v10016_v28  ;;  %v10064_v53 = vpack.c.bf16 %v7704_v33, %v7703_v32 }
 0x2d8   :  { %10042 = vmatprep.subr.bf16.mxu1 %v10683_v0  ;;  %v673_v54 = vpop.f32.mrb[6].mxu0 }
 0x2d9   :  { %v674_v55 = vadd.f32 %v11450_v31, %v673_v54  ;;  %v9090_v57 = vpop.f32.mrb[7].mxu0 }
 0x2da   :  { %9169 = vmatmul.mubr.msk.f32.vlgmr.msra.gmra.mrb[38].mxu1 %vm288_vm2, %v11223_v9 }
 0x2db   :  { %10044 = vmatpush3.bf16.msra.mxu1 %v10043_v34  ;;  %v9971_v60 = vpack.c.bf16 %v674_v55, %v669_v50  ;;  %9286 = vmatprep.mubr.msk.f32.mxu1 %vm10684_vm0, %v14580_v4 }
 0x2dc   :  { %10045 = vmatprep.subr.bf16.mxu1 %v10683_v0  ;;  %v678_v63 = vpop.f32.mrb[8].mxu0 }
 0x2dd   :  { %v9093_v1 = vpop.f32.mrb[9].mxu0  ;;  %9972 = vmatpush1.bf16.msra.mxu0 %v9971_v60  ;;  %v679_v3 = vadd.f32 %v11450_v31, %v678_v63 }
 0x2de   :  { %9973 = vmatprep.subr.bf16.mxu0 %v10683_v0 }
 0x2df   :  { %10047 = vmatpush3.bf16.msra.mxu1 %v10046_v59 }
 0x2e0   :  { %10048 = vmatprep.subr.bf16.mxu1 %v10683_v0  ;;  %v683_v7 = vpop.f32.mrb[10].mxu0 }
 0x2e1   :  { %v684_v8 = vadd.f32 %v11450_v31, %v683_v7  ;;  %v9096_v47 = vpop.f32.mrb[11].mxu0 }
 0x2e3   :  { %10050 = vmatpush3.bf16.msra.mxu1 %v10049_v2  ;;  %v9974_v10 = vpack.c.bf16 %v684_v8, %v679_v3 }
 0x2e4   :  { %10051 = vmatprep.subr.bf16.mxu1 %v10683_v0  ;;  %v688_v13 = vpop.f32.mrb[12].mxu0 }
 0x2e5   :  { %v9099_v14 = vpop.f32.mrb[13].mxu0  ;;  %9975 = vmatpush1.bf16.msra.mxu0 %v9974_v10  ;;  %v689_v16 = vadd.f32 %v11450_v31, %v688_v13 }
 0x2e6   :  { %9976 = vmatprep.subr.bf16.mxu0 %v10683_v0 }
 0x2e7   :  { %10053 = vmatpush3.bf16.msra.mxu1 %v10052_v27 }
 0x2e8   :  { %10054 = vmatprep.subr.bf16.mxu1 %v10683_v0  ;;  %v693_v19 = vpop.f32.mrb[14].mxu0 }
 0x2e9   :  { %v694_v20 = vadd.f32 %v11450_v31, %v693_v19  ;;  %v9102_v21 = vpop.f32.mrb[15].mxu0 }
 0x2eb   :  { %10056 = vmatpush3.bf16.msra.mxu1 %v10055_v15  ;;  %v9977_v23 = vpack.c.bf16 %v694_v20, %v689_v16 }
 0x2ec   :  { %10057 = vmatprep.subr.bf16.mxu1 %v10683_v0  ;;  %v698_v26 = vpop.f32.mrb[16].mxu0 }
 0x2ed   :  { %v9105_v28 = vpop.f32.mrb[17].mxu0  ;;  %9978 = vmatpush1.bf16.msra.mxu0 %v9977_v23  ;;  %v699_v30 = vadd.f32 %v11450_v31, %v698_v26 }
 0x2ee   :  { %9979 = vmatprep.subr.bf16.mxu0 %v10683_v0 }
 0x2ef   :  { %10059 = vmatpush3.bf16.msra.mxu1 %v10058_v22  ;;  %v11599_v22 = vld [vmem:[%s14609_s12 + $0x1] ss:$0 sm:$0xff] }
 0x2f0   :  { %10060 = vmatprep.subr.bf16.mxu1 %v10683_v0  ;;  %v703_v34 = vpop.f32.mrb[18].mxu0 }
 0x2f1   :  { %v704_v50 = vadd.f32 %v11450_v31, %v703_v34  ;;  %v9108_v51 = vpop.f32.mrb[19].mxu0 }
 0x2f3   :  { %10062 = vmatpush3.bf16.msra.mxu1 %v10061_v29  ;;  %v9980_v54 = vpack.c.bf16 %v704_v50, %v699_v30 }
 0x2f4   :  { %10063 = vmatprep.subr.bf16.mxu1 %v10683_v0  ;;  %v708_v55 = vpop.f32.mrb[20].mxu0 }
 0x2f5   :  { %v9111_v57 = vpop.f32.mrb[21].mxu0  ;;  %9981 = vmatpush1.bf16.msra.mxu0 %v9980_v54  ;;  %v709_v59 = vadd.f32 %v11450_v31, %v708_v55 }
 0x2f6   :  { %9982 = vmatprep.subr.bf16.mxu0 %v10683_v0 }
 0x2f7   :  { %10065 = vmatpush3.bf16.msra.mxu1 %v10064_v53 }
 0x2f8   :  { %v713_v60 = vpop.f32.mrb[22].mxu0  ;;  %10098 = vmatprep.subr.bf16.mxu1 %v10683_v0 }
 0x2f9   :  { %v714_v61 = vadd.f32 %v11450_v31, %v713_v60  ;;  %v9114_v62 = vpop.f32.mrb[23].mxu0 }
 0x2fa   :  { %9287 = vmatmul.mubr.f32.vlgmr.msra.gmra.mrb[40].mxu1 %v11064_v36 }
 0x2fb   :  { %9289 = vmatprep.mubr.msk.f32.mxu1 %vm10684_vm0, %v14580_v4  ;;  %v9983_v63 = vpack.c.bf16 %v714_v61, %v709_v59 }
 0x2fc   :  { %v718_v1 = vpop.f32.mrb[24].mxu0 }
 0x2fd   :  { %v9117_v2 = vpop.f32.mrb[25].mxu0  ;;  %9984 = vmatpush1.bf16.msra.mxu0 %v9983_v63  ;;  %v719_v3 = vadd.f32 %v11450_v31, %v718_v1 }
 0x2fe   :  { %9290 = vmatmul.mubr.f32.gmra.mrb[42].mxu1 %v11073_v37  ;;  %9985 = vmatprep.subr.bf16.mxu0 %v10683_v0 }
 0x2ff   :  { %9292 = vmatprep.mubr.msk.f32.mxu1 %vm10684_vm0, %v14580_v4 }
 0x300   :  { %v723_v5 = vpop.f32.mrb[26].mxu0 }
 0x301   :  { %v724_v6 = vadd.f32 %v11450_v31, %v723_v5  ;;  %v9120_v36 = vpop.f32.mrb[27].mxu0 }
 0x302   :  { %9293 = vmatmul.mubr.f32.gmra.mrb[44].mxu1 %v11081_v38 }
 0x303   :  { %9295 = vmatprep.mubr.msk.f32.mxu1 %vm10684_vm0, %v14580_v4  ;;  %v9986_v7 = vpack.c.bf16 %v724_v6, %v719_v3 }
 0x304   :  { %v728_v8 = vpop.f32.mrb[28].mxu0 }
 0x305   :  { %v9123_v47 = vpop.f32.mrb[29].mxu0  ;;  %9987 = vmatpush1.bf16.msra.mxu0 %v9986_v7  ;;  %v729_v37 = vadd.f32 %v11450_v31, %v728_v8 }
 0x306   :  { %9296 = vmatmul.mubr.f32.gmra.mrb[46].mxu1 %v11089_v39  ;;  %9988 = vmatprep.subr.bf16.mxu0 %v10683_v0 }
 0x307   :  { %9298 = vmatprep.mubr.msk.f32.mxu1 %vm10684_vm0, %v14580_v4 }
 0x308   :  { %v733_v27 = vpop.f32.mrb[30].mxu0 }
 0x309   :  { %v734_v10 = vadd.f32 %v11450_v31, %v733_v27  ;;  %v9126_v38 = vpop.f32.mrb[31].mxu0 }
 0x30a   :  { %9299 = vmatmul.mubr.f32.gmra.mrb[48].mxu1 %v11097_v40 }
 0x30b   :  { %v9989_v11 = vpack.c.bf16 %v734_v10, %v729_v37  ;;  %9301 = vmatprep.mubr.msk.f32.mxu1 %vm10684_vm0, %v14580_v4 }
 0x30c   :  { %v738_v12 = vpop.f32.mrb[32].mxu0 }
 0x30d   :  { %v9129_v13 = vpop.f32.mrb[33].mxu0  ;;  %9990 = vmatpush1.bf16.msra.mxu0 %v9989_v11  ;;  %v739_v39 = vadd.f32 %v11450_v31, %v738_v12 }
 0x30e   :  { %9302 = vmatmul.mubr.f32.gmra.mrb[50].mxu1 %v11105_v41  ;;  %9991 = vmatprep.subr.bf16.mxu0 %v10683_v0 }
 0x30f   :  { %9304 = vmatprep.mubr.msk.f32.mxu1 %vm10684_vm0, %v14580_v4 }
 0x310   :  { %v743_v14 = vpop.f32.mrb[34].mxu0 }
 0x311   :  { %v744_v15 = vadd.f32 %v11450_v31, %v743_v14  ;;  %v9132_v40 = vpop.f32.mrb[35].mxu0 }
 0x312   :  { %9305 = vmatmul.mubr.f32.gmra.mrb[52].mxu1 %v11113_v42  ;;  %v306_v42 = vlaneseq }
 0x313   :  { %v9992_v16 = vpack.c.bf16 %v744_v15, %v739_v39  ;;  %9307 = vmatprep.mubr.msk.f32.mxu1 %vm10684_vm0, %v14580_v4 }
 0x314   :  { %v748_v17 = vpop.f32.mrb[36].mxu0 }
 0x315   :  { %v9135_v18 = vpop.f32.mrb[37].mxu0  ;;  %9993 = vmatpush1.bf16.msra.mxu0 %v9992_v16  ;;  %v749_v41 = vadd.f32 %v11450_v31, %v748_v17 }
 0x316   :  { %9308 = vmatmul.mubr.f32.gmra.mrb[54].mxu1 %v11121_v43  ;;  %935 = vmatprep.subr.mxu0 %v14580_v4  ;;  %v307_v43 = vand.u32 127, %v306_v42 }
 0x317   :  { %9310 = vmatprep.mubr.msk.f32.mxu1 %vm10684_vm0, %v14580_v4 }
 0x319   :  { %936 = vmatpush1.msra.mxu0 %v749_v41 }
 0x31a   :  { %9311 = vmatmul.mubr.f32.gmra.mrb[56].mxu1 %v11129_v44  ;;  %10018 = vmatprep.subr.bf16.mxu0 %v10683_v0  ;;  %v308_v44 = vadd.s32 128, %v307_v43 }
 0x31b   :  { %9313 = vmatprep.mubr.msk.f32.mxu1 %vm10684_vm0, %v14580_v4 }
 0x31c   :  { %vm310_vm5 = vcmp.lt.s32.totalorder %v308_v44, 133 }
 0x31e   :  { %9314 = vmatmul.mubr.f32.gmra.mrb[58].mxu1 %v11137_v45 }
 0x31f   :  { %9316 = vmatprep.mubr.msk.f32.mxu1 %vm10684_vm0, %v14580_v4 }
 0x322   :  { %9317 = vmatmul.mubr.f32.gmra.mrb[60].mxu1 %v11145_v46  ;;  %v10686_v46 = vmov -1e+30  }
 0x323   :  { %9319 = vmatprep.mubr.msk.f32.mxu1 %vm10684_vm0, %v14580_v4 }
 0x326   :  { %9320 = vmatmul.mubr.f32.gmra.mrb[62].mxu1 %v11153_v48  ;;  %v11584_v48 = vsel %vm310_vm5, 0.0, %v10686_v46 }
 0x327   :  { %9322 = vmatprep.mubr.msk.f32.mxu1 %vm10684_vm0, %v14580_v4 }
 0x32a   :  { %9323 = vmatmul.mubr.f32.gmra.mrb[64].mxu1 %v11161_v49 }
 0x32b   :  { %9325 = vmatprep.mubr.msk.f32.mxu1 %vm10684_vm0, %v14580_v4 }
 0x32e   :  { %9326 = vmatmul.mubr.f32.gmra.mrb[66].mxu1 %v11175_v52 }
 0x32f   :  { %9328 = vmatprep.mubr.msk.f32.mxu1 %vm10684_vm0, %v14580_v4 }
 0x332   :  { %9329 = vmatmul.mubr.f32.gmra.mrb[68].mxu1 %v11190_v56 }
 0x333   :  { %9331 = vmatprep.mubr.msk.f32.mxu1 %vm10684_vm0, %v14580_v4 }
 0x336   :  { %9332 = vmatmul.mubr.f32.gmra.mrb[70].mxu1 %v11199_v58 }
 0x337   :  { %9334 = vmatprep.mubr.msk.f32.mxu1 %vm10684_vm0, %v14580_v4 }
 0x33a   :  { %9335 = vmatmul.mubr.msk.f32.gmra.mrb[72].mxu1 %vm288_vm2, %v11223_v9 }
 0x38d   :  { %v873_v45 = vpop.f32.mrb[36].mxu1 }
 0x38e   :  { %v875_v49 = vpop.f32.mrb[37].mxu1  ;;  %v11589_v58 = vmul.f32 0.17677669, %v873_v45 }
 0x38f   :  { %v879_v52 = vmul.f32 0.17677669, %v875_v49 }
 0x391   :  { %v11587_v56 = vadd.f32 %v879_v52, %v11584_v48 }
 0x393   :  { %v883_v31 = vsel %vm882_vm6, %v11587_v56, -inf }
 0x394   :  { %v884_v19 = vmax.f32 %v11589_v58, %v883_v31 }
 0x396   :  { %885 = vmax.xlane.f32.xlu0 %v884_v19 }
 0x3ad   :  { %v11594_v20 = vpop.f32.mrb[38].mxu1 }
 0x3ae   :  { %v9170_v21 = vpop.f32.mrb[39].mxu1 }
 0x3cd   :  { %v1338_v23 = vpop.f32.mrb[40].mxu1 }
 0x3ce   :  { %v9288_v24 = vpop.f32.mrb[41].mxu1  ;;  %v1339_v25 = vadd.f32 %v11599_v22, %v1338_v23 }
 0x3d1   :  { %v1343_v26 = vpop.f32.mrb[42].mxu1 }
 0x3d2   :  { %v1344_v28 = vadd.f32 %v11599_v22, %v1343_v26  ;;  %v9291_v29 = vpop.f32.mrb[43].mxu1 }
 0x3d4   :  { %v10099_v30 = vpack.c.bf16 %v1344_v28, %v1339_v25 }
 0x3d5   :  { %v1348_v32 = vpop.f32.mrb[44].mxu1 }
 0x3d6   :  { %v9294_v33 = vpop.f32.mrb[45].mxu1  ;;  %10100 = vmatpush1.bf16.msra.mxu1 %v10099_v30  ;;  %v1349_v34 = vadd.f32 %v11599_v22, %v1348_v32 }
 0x3d7   :  { %10101 = vmatprep.subr.bf16.mxu1 %v10683_v0 }
 0x3d9   :  { %v1353_v50 = vpop.f32.mrb[46].mxu1 }
 0x3da   :  { %v1354_v51 = vadd.f32 %v11599_v22, %v1353_v50  ;;  %v9297_v53 = vpop.f32.mrb[47].mxu1 }
 0x3dc   :  { %v10102_v54 = vpack.c.bf16 %v1354_v51, %v1349_v34 }
 0x3dd   :  { %v1358_v55 = vpop.f32.mrb[48].mxu1 }
 0x3de   :  { %v9300_v57 = vpop.f32.mrb[49].mxu1  ;;  %10103 = vmatpush1.bf16.msra.mxu1 %v10102_v54  ;;  %v1359_v59 = vadd.f32 %v11599_v22, %v1358_v55 }
 0x3df   :  { %10104 = vmatprep.subr.bf16.mxu1 %v10683_v0 }
 0x3e1   :  { %v1363_v60 = vpop.f32.mrb[50].mxu1 }
 0x3e2   :  { %v1364_v61 = vadd.f32 %v11599_v22, %v1363_v60  ;;  %v9303_v62 = vpop.f32.mrb[51].mxu1 }
 0x3e3   :  { %v7673_v62 = vld [vmem:[%s14600_s30 + $0x98] sm:$0xff] }
 0x3e4   :  { %v10105_v63 = vpack.c.bf16 %v1364_v61, %v1359_v59  ;;  %v7672_v61 = vld [vmem:[%s14600_s30 + $0x90] sm:$0xff] }
 0x3e5   :  { %v1368_v1 = vpop.f32.mrb[52].mxu1 }
 0x3e6   :  { %v9306_v2 = vpop.f32.mrb[53].mxu1  ;;  %10106 = vmatpush1.bf16.msra.mxu1 %v10105_v63  ;;  %v1369_v3 = vadd.f32 %v11599_v22, %v1368_v1  ;;  %v10022_v63 = vpack.c.bf16 %v7673_v62, %v7672_v61  ;;  %v7674_v1 = vld [vmem:[%s14600_s30 + $0xa0] sm:$0xff] }
 0x3e7   :  { %10107 = vmatprep.subr.bf16.mxu1 %v10683_v0  ;;  %v7675_v2 = vld [vmem:[%s14600_s30 + $0xa8] sm:$0xff] }
 0x3e9   :  { %v1373_v5 = vpop.f32.mrb[54].mxu1 }
 0x3ea   :  { %v1374_v6 = vadd.f32 %v11599_v22, %v1373_v5  ;;  %v9309_v36 = vpop.f32.mrb[55].mxu1  ;;  %v7676_v5 = vld [vmem:[%s14600_s30 + $0xb0] sm:$0xff] }
 0x3ec   :  { %v10108_v7 = vpack.c.bf16 %v1374_v6, %v1369_v3  ;;  %v10025_v3 = vpack.c.bf16 %v7675_v2, %v7674_v1  ;;  %v7677_v6 = vld [vmem:[%s14600_s30 + $0xb8] sm:$0xff] }
 0x3ed   :  { %v1378_v8 = vpop.f32.mrb[56].mxu1  ;;  %v10028_v36 = vpack.c.bf16 %v7677_v6, %v7676_v5 }
 0x3ee   :  { %v9312_v47 = vpop.f32.mrb[57].mxu1  ;;  %10109 = vmatpush1.bf16.msra.mxu1 %v10108_v7  ;;  %v1379_v37 = vadd.f32 %v11599_v22, %v1378_v8  ;;  %v7678_v7 = vld [vmem:[%s14600_s30 + $0xc0] sm:$0xff]  ;;  %v7679_v8 = vld [vmem:[%s14600_s30 + $0xc8] sm:$0xff] }
 0x3ef   :  { %10110 = vmatprep.subr.bf16.mxu1 %v10683_v0  ;;  %v10031_v47 = vpack.c.bf16 %v7679_v8, %v7678_v7 }
 0x3f1   :  { %v1383_v27 = vpop.f32.mrb[58].mxu1 }
 0x3f2   :  { %v1384_v10 = vadd.f32 %v11599_v22, %v1383_v27  ;;  %v9315_v38 = vpop.f32.mrb[59].mxu1  ;;  %v7681_v27 = vld [vmem:[%s14600_s30 + $0xd8] sm:$0xff] }
 0x3f3   :  { %v7682_v38 = vld [vmem:[%s14600_s30 + $0xe0] sm:$0xff] }
 0x3f4   :  { %v10111_v11 = vpack.c.bf16 %v1384_v10, %v1379_v37  ;;  %v7680_v37 = vld [vmem:[%s14600_s30 + $0xd0] sm:$0xff] }
 0x3f5   :  { %v1388_v12 = vpop.f32.mrb[60].mxu1  ;;  %v10034_v10 = vpack.c.bf16 %v7681_v27, %v7680_v37 }
 0x3f6   :  { %v9318_v13 = vpop.f32.mrb[61].mxu1  ;;  %10112 = vmatpush1.bf16.msra.mxu1 %v10111_v11  ;;  %v1389_v39 = vadd.f32 %v11599_v22, %v1388_v12  ;;  %v7683_v11 = vld [vmem:[%s14600_s30 + $0xe8] sm:$0xff] }
 0x3f7   :  { %10113 = vmatprep.subr.bf16.mxu1 %v10683_v0  ;;  %v10037_v12 = vpack.c.bf16 %v7683_v11, %v7682_v38  ;;  %v7684_v13 = vld [vmem:[%s14600_s30 + $0xf0] sm:$0xff] }
 0x3f9   :  { %v1393_v14 = vpop.f32.mrb[62].mxu1 }
 0x3fa   :  { %v1394_v15 = vadd.f32 %v11599_v22, %v1393_v14  ;;  %v9321_v40 = vpop.f32.mrb[63].mxu1 }
 0x3fb   :  { %v11700_v40 = vld [vmem:[%s14601_s29 + $0x8] sm:$0xff] }
 0x3fc   :  { %v10114_v16 = vpack.c.bf16 %v1394_v15, %v1389_v39  ;;  %v7685_v39 = vld [vmem:[%s14600_s30 + $0xf8] sm:$0xff]  ;;  %v11692_v15 = vld [vmem:[%s14601_s29] sm:$0xff] }
 0x3fd   :  { %v1398_v17 = vpop.f32.mrb[64].mxu1  ;;  %v10040_v14 = vpack.c.bf16 %v7685_v39, %v7684_v13 }
 0x3fe   :  { %v9324_v18 = vpop.f32.mrb[65].mxu1  ;;  %10115 = vmatpush1.bf16.msra.mxu1 %v10114_v16  ;;  %v1399_v41 = vadd.f32 %v11599_v22, %v1398_v17  ;;  %v11708_v16 = vld [vmem:[%s14601_s29 + $0x10] sm:$0xff]  ;;  %v11716_v17 = vld [vmem:[%s14601_s29 + $0x18] sm:$0xff] }
 0x3ff   :  { %10116 = vmatprep.subr.bf16.mxu1 %v10683_v0  ;;  %v11724_v18 = vld [vmem:[%s14601_s29 + $0x20] sm:$0xff] }
 0x401   :  { %v1403_v43 = vpop.f32.mrb[66].mxu1 }
 0x402   :  { %v1404_v44 = vadd.f32 %v11599_v22, %v1403_v43  ;;  %v9327_v45 = vpop.f32.mrb[67].mxu1  ;;  %v11740_v43 = vld [vmem:[%s14601_s29 + $0x30] sm:$0xff] }
 0x403   :  { %v11756_v45 = vld [vmem:[%s14601_s29 + $0x40] sm:$0xff] }
 0x404   :  { %v10117_v46 = vpack.c.bf16 %v1404_v44, %v1399_v41  ;;  %v11732_v41 = vld [vmem:[%s14601_s29 + $0x28] sm:$0xff]  ;;  %v11748_v44 = vld [vmem:[%s14601_s29 + $0x38] sm:$0xff] }
 0x405   :  { %v1408_v49 = vpop.f32.mrb[68].mxu1 }
 0x406   :  { %v9330_v52 = vpop.f32.mrb[69].mxu1  ;;  %10118 = vmatpush1.bf16.msra.mxu1 %v10117_v46  ;;  %v1409_v31 = vadd.f32 %v11599_v22, %v1408_v49  ;;  %v11764_v46 = vld [vmem:[%s14601_s29 + $0x48] sm:$0xff]  ;;  %v11772_v49 = vld [vmem:[%s14601_s29 + $0x50] sm:$0xff] }
 0x407   :  { %10119 = vmatprep.subr.bf16.mxu1 %v10683_v0  ;;  %v11780_v52 = vld [vmem:[%s14601_s29 + $0x58] sm:$0xff] }
 0x409   :  { %v1413_v19 = vpop.f32.mrb[70].mxu1 }
 0x40a   :  { %v1414_v21 = vadd.f32 %v11599_v22, %v1413_v19  ;;  %v9333_v23 = vpop.f32.mrb[71].mxu1  ;;  %v11796_v19 = vld [vmem:[%s14601_s29 + $0x68] sm:$0xff] }
 0x40b   :  { %v11812_v23 = vld [vmem:[%s14601_s29 + $0x78] sm:$0xff] }
 0x40c   :  { %v10120_v24 = vpack.c.bf16 %v1414_v21, %v1409_v31  ;;  %v11788_v31 = vld [vmem:[%s14601_s29 + $0x60] sm:$0xff]  ;;  %v11804_v21 = vld [vmem:[%s14601_s29 + $0x70] sm:$0xff] }
 0x40d   :  { %v1418_v25 = vpop.f32.mrb[72].mxu1 }
 0x40e   :  { %v9336_v26 = vpop.f32.mrb[73].mxu1  ;;  %10121 = vmatpush1.bf16.msra.mxu1 %v10120_v24  ;;  %v1419_v28 = vadd.f32 %v11599_v22, %v1418_v25  ;;  %v7670_v22 = vld [vmem:[%s14600_s30 + $0x80] sm:$0xff] }
 0x40f   :  { %1603 = vmatprep.subr.mxu1 %v14580_v4 }
 0x412   :  { %1604 = vmatpush1.msra.mxu1 %v1419_v28 }
 0x413   :  { %10122 = vmatprep.subr.bf16.mxu1 %v10683_v0 }
 0x423   :  { %v886_v29 = vpop.xlane.xlu0 %885 }
 0x424   :  { %v887_v30 = vsub.f32 %v11589_v58, %v886_v29  ;;  %v888_v32 = vsub.f32 %v11587_v56, %v886_v29  ;;  %v7671_v56 = vld [vmem:[%s14600_s30 + $0x88] sm:$0xff]  ;;  %v11825_v29 = vld [vmem:[%s14605_s9 + $0x1] ss:$0 sm:$0xff] }
 0x425   :  { %v10019_v60 = vpack.c.bf16 %v7671_v56, %v7670_v22 }
 0x426   :  { %v889_v33 = vmul.f32 1.442695, %v887_v30  ;;  %v891_v34 = vmul.f32 1.442695, %v888_v32 }
 0x428   :  { %10559 = vpow2.f32 %v889_v33 }
 0x429   :  { %10561 = vpow2.f32 %v891_v34 }
 0x432   :  { %v10560_v50 = vpop.eup %10559 }
 0x433   :  { %v10562_v51 = vpop.eup %10561 }
 0x434   :  { %v893_v53 = vsel %vm882_vm6, %v10562_v51, 0.0 }
 0x435   :  { %v894_v54 = vadd.f32 %v10560_v50, %v893_v53 }
 0x437   :  { %895 = vadd.xlane.f32.xlu0 %v894_v54 }
 0x4c4   :  { %v896_v55 = vpop.xlane.xlu0 %895 }
 0x4c5   :  { %10563 = vrcp.f32 %v896_v55 }
 0x4cf   :  { %v10564_v58 = vpop.eup %10563 }
 0x4d0   :  { %v898_v57 = vmul.f32 %v10564_v58, %v10560_v50  ;;  %v899_v59 = vmul.f32 %v10564_v58, %v10562_v51 }
 0x4d2   :  { %7650 = vmatprep.mubr.msk.f32.mxu0 %vm882_vm6, %v899_v59 }
 0x4d3   :  { %968 = vmatmul.mubr.f32.vlgmr.msra.gmra.mrb[38].mxu0 %v898_v57 }
 0x4d4   :  { %10020 = vmatpush3.bf16.msra.mxu0 %v10019_v60  ;;  %9203 = vmatprep.mubr.msk.f32.mxu0 %vm10684_vm0, %v14580_v4 }
 0x4d5   :  { %10021 = vmatprep.subr.bf16.mxu0 %v10683_v0 }
 0x4d8   :  { %10023 = vmatpush3.bf16.msra.mxu0 %v10022_v63 }
 0x4d9   :  { %10024 = vmatprep.subr.bf16.mxu0 %v10683_v0 }
 0x4dc   :  { %10026 = vmatpush3.bf16.msra.mxu0 %v10025_v3 }
 0x4dd   :  { %10027 = vmatprep.subr.bf16.mxu0 %v10683_v0 }
 0x4e0   :  { %10029 = vmatpush3.bf16.msra.mxu0 %v10028_v36 }
 0x4e1   :  { %10030 = vmatprep.subr.bf16.mxu0 %v10683_v0 }
 0x4e4   :  { %10032 = vmatpush3.bf16.msra.mxu0 %v10031_v47 }
 0x4e5   :  { %10033 = vmatprep.subr.bf16.mxu0 %v10683_v0 }
 0x4e8   :  { %10035 = vmatpush3.bf16.msra.mxu0 %v10034_v10 }
 0x4e9   :  { %10036 = vmatprep.subr.bf16.mxu0 %v10683_v0 }
 0x4ec   :  { %10038 = vmatpush3.bf16.msra.mxu0 %v10037_v12 }
 0x4ed   :  { %10039 = vmatprep.subr.bf16.mxu0 %v10683_v0 }
 0x4f0   :  { %10041 = vmatpush3.bf16.msra.mxu0 %v10040_v14 }
 0x4f1   :  { %10066 = vmatprep.subr.bf16.mxu0 %v10683_v0 }
 0x4f3   :  { %9204 = vmatmul.mubr.f32.vlgmr.msra.gmra.mrb[40].mxu0 %v11692_v15 }
 0x4f4   :  { %9206 = vmatprep.mubr.msk.f32.mxu0 %vm10684_vm0, %v14580_v4 }
 0x4f7   :  { %9207 = vmatmul.mubr.f32.gmra.mrb[42].mxu0 %v11700_v40 }
 0x4f8   :  { %9209 = vmatprep.mubr.msk.f32.mxu0 %vm10684_vm0, %v14580_v4 }
 0x4fb   :  { %9210 = vmatmul.mubr.f32.gmra.mrb[44].mxu0 %v11708_v16 }
 0x4fc   :  { %9212 = vmatprep.mubr.msk.f32.mxu0 %vm10684_vm0, %v14580_v4 }
 0x4ff   :  { %9213 = vmatmul.mubr.f32.gmra.mrb[46].mxu0 %v11716_v17 }
 0x500   :  { %9215 = vmatprep.mubr.msk.f32.mxu0 %vm10684_vm0, %v14580_v4 }
 0x503   :  { %9216 = vmatmul.mubr.f32.gmra.mrb[48].mxu0 %v11724_v18 }
 0x504   :  { %9218 = vmatprep.mubr.msk.f32.mxu0 %vm10684_vm0, %v14580_v4 }
 0x507   :  { %9219 = vmatmul.mubr.f32.gmra.mrb[50].mxu0 %v11732_v41 }
 0x508   :  { %9221 = vmatprep.mubr.msk.f32.mxu0 %vm10684_vm0, %v14580_v4 }
 0x50b   :  { %9222 = vmatmul.mubr.f32.gmra.mrb[52].mxu0 %v11740_v43 }
 0x50c   :  { %9224 = vmatprep.mubr.msk.f32.mxu0 %vm10684_vm0, %v14580_v4 }
 0x50f   :  { %9225 = vmatmul.mubr.f32.gmra.mrb[54].mxu0 %v11748_v44 }
 0x510   :  { %9227 = vmatprep.mubr.msk.f32.mxu0 %vm10684_vm0, %v14580_v4 }
 0x513   :  { %9228 = vmatmul.mubr.f32.gmra.mrb[56].mxu0 %v11756_v45 }
 0x514   :  { %9230 = vmatprep.mubr.msk.f32.mxu0 %vm10684_vm0, %v14580_v4 }
 0x517   :  { %9231 = vmatmul.mubr.f32.gmra.mrb[58].mxu0 %v11764_v46 }
 0x518   :  { %9233 = vmatprep.mubr.msk.f32.mxu0 %vm10684_vm0, %v14580_v4 }
 0x51b   :  { %9234 = vmatmul.mubr.f32.gmra.mrb[60].mxu0 %v11772_v49 }
 0x51c   :  { %9236 = vmatprep.mubr.msk.f32.mxu0 %vm10684_vm0, %v14580_v4 }
 0x51f   :  { %9237 = vmatmul.mubr.f32.gmra.mrb[62].mxu0 %v11780_v52 }
 0x520   :  { %9239 = vmatprep.mubr.msk.f32.mxu0 %vm10684_vm0, %v14580_v4 }
 0x523   :  { %9240 = vmatmul.mubr.f32.gmra.mrb[64].mxu0 %v11788_v31 }
 0x524   :  { %9242 = vmatprep.mubr.msk.f32.mxu0 %vm10684_vm0, %v14580_v4 }
 0x527   :  { %9243 = vmatmul.mubr.f32.gmra.mrb[66].mxu0 %v11796_v19 }
 0x528   :  { %9245 = vmatprep.mubr.msk.f32.mxu0 %vm10684_vm0, %v14580_v4 }
 0x52b   :  { %9246 = vmatmul.mubr.f32.gmra.mrb[68].mxu0 %v11804_v21 }
 0x52c   :  { %9248 = vmatprep.mubr.msk.f32.mxu0 %vm10684_vm0, %v14580_v4 }
 0x52f   :  { %9249 = vmatmul.mubr.f32.gmra.mrb[70].mxu0 %v11812_v23 }
 0x530   :  { %9251 = vmatprep.mubr.msk.f32.mxu0 %vm10684_vm0, %v14580_v4 }
 0x533   :  { %9252 = vmatmul.mubr.msk.f32.gmra.mrb[72].mxu0 %vm288_vm2, %v11223_v9 }
 0x534   :  { %1540 = vmatprep.mubr.f32.mxu0 %v14580_v4 }
 0x5a6   :  { %v11820_v24 = vpop.f32.mrb[38].mxu0 }
 0x5a7   :  { %v971_v25 = vpop.f32.mrb[39].mxu0 }
 0x5c6   :  { %v1163_v26 = vpop.f32.mrb[40].mxu0 }
 0x5c7   :  { %v9205_v28 = vpop.f32.mrb[41].mxu0  ;;  %v1164_v32 = vadd.f32 %v11825_v29, %v1163_v26 }
 0x5ca   :  { %v1168_v30 = vpop.f32.mrb[42].mxu0 }
 0x5cb   :  { %v1169_v33 = vadd.f32 %v11825_v29, %v1168_v30  ;;  %v9208_v34 = vpop.f32.mrb[43].mxu0 }
 0x5cd   :  { %v10067_v50 = vpack.c.bf16 %v1169_v33, %v1164_v32 }
 0x5ce   :  { %v1173_v51 = vpop.f32.mrb[44].mxu0 }
 0x5cf   :  { %v9211_v53 = vpop.f32.mrb[45].mxu0  ;;  %10069 = vmatpush1.bf16.xpose.msk.msra.mxu0 %vm11284_vm4, %v10067_v50  ;;  %v1174_v55 = vadd.f32 %v11825_v29, %v1173_v51 }
 0x5d0   :  { %10070 = vmatprep.subr.bf16.mxu0 %v10683_v0 }
 0x5d2   :  { %v1178_v54 = vpop.f32.mrb[46].mxu0 }
 0x5d3   :  { %v1179_v22 = vadd.f32 %v11825_v29, %v1178_v54  ;;  %v9214_v56 = vpop.f32.mrb[47].mxu0 }
 0x5d5   :  { %v10071_v58 = vpack.c.bf16 %v1179_v22, %v1174_v55 }
 0x5d6   :  { %v1183_v57 = vpop.f32.mrb[48].mxu0 }
 0x5d7   :  { %v9217_v59 = vpop.f32.mrb[49].mxu0  ;;  %10073 = vmatpush1.bf16.xpose.msk.msra.mxu0 %vm11284_vm4, %v10071_v58  ;;  %v1184_v61 = vadd.f32 %v11825_v29, %v1183_v57 }
 0x5d8   :  { %10074 = vmatprep.subr.bf16.mxu0 %v10683_v0 }
 0x5da   :  { %v1188_v60 = vpop.f32.mrb[50].mxu0 }
 0x5db   :  { %v1189_v62 = vadd.f32 %v11825_v29, %v1188_v60  ;;  %v9220_v63 = vpop.f32.mrb[51].mxu0 }
 0x5dd   :  { %v10075_v1 = vpack.c.bf16 %v1189_v62, %v1184_v61 }
 0x5de   :  { %v1193_v2 = vpop.f32.mrb[52].mxu0 }
 0x5df   :  { %v9223_v3 = vpop.f32.mrb[53].mxu0  ;;  %10077 = vmatpush1.bf16.xpose.msk.msra.mxu0 %vm11284_vm4, %v10075_v1  ;;  %v1194_v6 = vadd.f32 %v11825_v29, %v1193_v2  ;;  %v7733_v1 = vld [vmem:[%s14598_s5 + $0x100] sm:$0xff]  ;;  %v7734_v2 = vld [vmem:[%s14598_s5 + $0x108] sm:$0xff] }
 0x5e0   :  { %10078 = vmatprep.subr.bf16.mxu0 %v10683_v0  ;;  %v7668_v3 = vld [vmem:[%s14608_s11 + $0x1] ss:$0 sm:$0xff] }
 0x5e2   :  { %v1198_v5 = vpop.f32.mrb[54].mxu0 }
 0x5e3   :  { %v1199_v36 = vadd.f32 %v11825_v29, %v1198_v5  ;;  %v9226_v7 = vpop.f32.mrb[55].mxu0  ;;  %v1069_v5 = vadd.f32 %v7668_v3, %v11594_v20  ;;  %v7737_v20 = vld [vmem:[%s14598_s5 + $0x120] sm:$0xff] }
 0x5e5   :  { %v10079_v8 = vpack.c.bf16 %v1199_v36, %v1194_v6  ;;  %v7735_v6 = vld [vmem:[%s14598_s5 + $0x110] sm:$0xff]  ;;  %v7736_v36 = vld [vmem:[%s14598_s5 + $0x118] sm:$0xff] }
 0x5e6   :  { %v1203_v47 = vpop.f32.mrb[56].mxu0  ;;  %v10138_v7 = vpack.c.bf16 %v7736_v36, %v7735_v6  ;;  %v7785_v36 = vld [vmem:[%s14603_s10 + $0x170] sm:$0xff] }
 0x5e7   :  { %v9229_v37 = vpop.f32.mrb[57].mxu0  ;;  %10081 = vmatpush1.bf16.xpose.msk.msra.mxu0 %vm11284_vm4, %v10079_v8  ;;  %v1204_v10 = vadd.f32 %v11825_v29, %v1203_v47  ;;  %v7738_v8 = vld [vmem:[%s14598_s5 + $0x128] sm:$0xff] }
 0x5e8   :  { %10082 = vmatprep.subr.bf16.mxu0 %v10683_v0  ;;  %v10141_v47 = vpack.c.bf16 %v7738_v8, %v7737_v20  ;;  %v7739_v37 = vld [vmem:[%s14598_s5 + $0x130] sm:$0xff] }
 0x5ea   :  { %v1208_v27 = vpop.f32.mrb[58].mxu0 }
 0x5eb   :  { %v1209_v38 = vadd.f32 %v11825_v29, %v1208_v27  ;;  %v9232_v11 = vpop.f32.mrb[59].mxu0  ;;  %v7740_v27 = vld [vmem:[%s14598_s5 + $0x138] sm:$0xff] }
 0x5ec   :  { %v7742_v11 = vld [vmem:[%s14598_s5 + $0x148] sm:$0xff] }
 0x5ed   :  { %v10083_v12 = vpack.c.bf16 %v1209_v38, %v1204_v10  ;;  %v10144_v10 = vpack.c.bf16 %v7740_v27, %v7739_v37  ;;  %v7741_v38 = vld [vmem:[%s14598_s5 + $0x140] sm:$0xff] }
 0x5ee   :  { %v1213_v13 = vpop.f32.mrb[60].mxu0 }
 0x5ef   :  { %v9235_v39 = vpop.f32.mrb[61].mxu0  ;;  %10085 = vmatpush1.bf16.xpose.msk.msra.mxu0 %vm11284_vm4, %v10083_v12  ;;  %v1214_v25 = vadd.f32 %v11825_v29, %v1213_v13  ;;  %v10147_v12 = vpack.c.bf16 %v7742_v11, %v7741_v38  ;;  %v7743_v13 = vld [vmem:[%s14598_s5 + $0x150] sm:$0xff] }
 0x5f0   :  { %10086 = vmatprep.subr.bf16.mxu0 %v10683_v0  ;;  %v7744_v39 = vld [vmem:[%s14598_s5 + $0x158] sm:$0xff] }
 0x5f2   :  { %v1218_v14 = vpop.f32.mrb[62].mxu0 }
 0x5f3   :  { %v1219_v26 = vadd.f32 %v11825_v29, %v1218_v14  ;;  %v9238_v28 = vpop.f32.mrb[63].mxu0  ;;  %v10150_v14 = vpack.c.bf16 %v7744_v39, %v7743_v13  ;;  %v12056_v39 = vld [vmem:[%s14609_s12 + $0x2] ss:$0 sm:$0xff] }
 0x5f5   :  { %v10087_v30 = vpack.c.bf16 %v1219_v26, %v1214_v25  ;;  %v7745_v25 = vld [vmem:[%s14598_s5 + $0x160] sm:$0xff]  ;;  %v7746_v26 = vld [vmem:[%s14598_s5 + $0x168] sm:$0xff] }
 0x5f6   :  { %v1223_v32 = vpop.f32.mrb[64].mxu0  ;;  %v10153_v28 = vpack.c.bf16 %v7746_v26, %v7745_v25 }
 0x5f7   :  { %v9241_v33 = vpop.f32.mrb[65].mxu0  ;;  %10089 = vmatpush1.bf16.xpose.msk.msra.mxu0 %vm11284_vm4, %v10087_v30  ;;  %v1224_v50 = vadd.f32 %v11825_v29, %v1223_v32  ;;  %v7747_v30 = vld [vmem:[%s14598_s5 + $0x170] sm:$0xff]  ;;  %v7748_v32 = vld [vmem:[%s14598_s5 + $0x178] sm:$0xff] }
 0x5f8   :  { %10090 = vmatprep.subr.bf16.mxu0 %v10683_v0  ;;  %v10156_v33 = vpack.c.bf16 %v7748_v32, %v7747_v30 }
 0x5fa   :  { %v1228_v34 = vpop.f32.mrb[66].mxu0 }
 0x5fb   :  { %v1229_v51 = vadd.f32 %v11825_v29, %v1228_v34  ;;  %v9244_v53 = vpop.f32.mrb[67].mxu0  ;;  %v7771_v34 = vld [vmem:[%s14603_s10 + $0x100] sm:$0xff] }
 0x5fc   :  { %v7773_v53 = vld [vmem:[%s14603_s10 + $0x110] sm:$0xff] }
 0x5fd   :  { %v10091_v54 = vpack.c.bf16 %v1229_v51, %v1224_v50  ;;  %v7772_v50 = vld [vmem:[%s14603_s10 + $0x108] sm:$0xff] }
 0x5fe   :  { %v1233_v55 = vpop.f32.mrb[68].mxu0  ;;  %v10183_v51 = vpack.c.bf16 %v7772_v50, %v7771_v34 }
 0x5ff   :  { %v9247_v22 = vpop.f32.mrb[69].mxu0  ;;  %10093 = vmatpush1.bf16.xpose.msk.msra.mxu0 %vm11284_vm4, %v10091_v54  ;;  %v1234_v58 = vadd.f32 %v11825_v29, %v1233_v55  ;;  %v7774_v54 = vld [vmem:[%s14603_s10 + $0x118] sm:$0xff] }
 0x600   :  { %10094 = vmatprep.subr.bf16.mxu0 %v10683_v0  ;;  %v10186_v55 = vpack.c.bf16 %v7774_v54, %v7773_v53  ;;  %v7775_v22 = vld [vmem:[%s14603_s10 + $0x120] sm:$0xff] }
 0x602   :  { %v1238_v56 = vpop.f32.mrb[70].mxu0 }
 0x603   :  { %v1239_v57 = vadd.f32 %v11825_v29, %v1238_v56  ;;  %v9250_v59 = vpop.f32.mrb[71].mxu0  ;;  %v7776_v56 = vld [vmem:[%s14603_s10 + $0x128] sm:$0xff] }
 0x604   :  { %v7778_v59 = vld [vmem:[%s14603_s10 + $0x138] sm:$0xff] }
 0x605   :  { %v10095_v60 = vpack.c.bf16 %v1239_v57, %v1234_v58  ;;  %v10189_v58 = vpack.c.bf16 %v7776_v56, %v7775_v22  ;;  %v7777_v57 = vld [vmem:[%s14603_s10 + $0x130] sm:$0xff] }
 0x606   :  { %v1243_v61 = vpop.f32.mrb[72].mxu0 }
 0x607   :  { %v1244_v62 = vadd.f32 %v11825_v29, %v1243_v61  ;;  %v9253_v63 = vpop.f32.mrb[73].mxu0  ;;  %10097 = vmatpush1.bf16.xpose.msk.msra.mxu0 %vm11284_vm4, %v10095_v60  ;;  %v10135_v29 = vpack.c.bf16 %v7734_v2, %v7733_v1  ;;  %v10192_v60 = vpack.c.bf16 %v7778_v59, %v7777_v57  ;;  %v7779_v61 = vld [vmem:[%s14603_s10 + $0x140] sm:$0xff]  ;;  %v7781_v1 = vld [vmem:[%s14603_s10 + $0x150] sm:$0xff]  ;;  %v7782_v2 = vld [vmem:[%s14603_s10 + $0x158] sm:$0xff] }
 0x608   :  { %1508 = vmatprep.subr.mxu0 %v14580_v4  ;;  %v10198_v3 = vpack.c.bf16 %v7782_v2, %v7781_v1 }
 0x60f   :  { %7724 = vmatpush1.xpose.msk.msra.mxu0 %vm752_vm3, %v1244_v62  ;;  %v7780_v62 = vld [vmem:[%s14603_s10 + $0x148] sm:$0xff] }
 0x610   :  { %10134 = vmatprep.subr.bf16.mxu0 %v10683_v0  ;;  %v10195_v63 = vpack.c.bf16 %v7780_v62, %v7779_v61 }
 0x612   :  { %7725 = vmatmul.mubr.msk.f32.vlgmr.msra.gmra.mrb[74].mxu0 %vm752_vm3, %v1069_v5  ;;  %v7784_v5 = vld [vmem:[%s14603_s10 + $0x168] sm:$0xff] }
 0x613   :  { %10136 = vmatpush3.bf16.msra.mxu0 %v10135_v29  ;;  %9391 = vmatprep.mubr.msk.f32.mxu0 %vm10684_vm0, %v14580_v4  ;;  %v7783_v29 = vld [vmem:[%s14603_s10 + $0x160] sm:$0xff] }
 0x614   :  { %10137 = vmatprep.subr.bf16.mxu0 %v10683_v0  ;;  %v10201_v6 = vpack.c.bf16 %v7784_v5, %v7783_v29 }
 0x617   :  { %10139 = vmatpush3.bf16.msra.mxu0 %v10138_v7  ;;  %v7786_v7 = vld [vmem:[%s14603_s10 + $0x178] sm:$0xff] }
 0x618   :  { %10140 = vmatprep.subr.bf16.mxu0 %v10683_v0  ;;  %v10204_v20 = vpack.c.bf16 %v7786_v7, %v7785_v36 }
 0x61b   :  { %10142 = vmatpush3.bf16.msra.mxu0 %v10141_v47 }
 0x61c   :  { %10143 = vmatprep.subr.bf16.mxu0 %v10683_v0 }
 0x61f   :  { %10145 = vmatpush3.bf16.msra.mxu0 %v10144_v10 }
 0x620   :  { %10146 = vmatprep.subr.bf16.mxu0 %v10683_v0 }
 0x623   :  { %10148 = vmatpush3.bf16.msra.mxu0 %v10147_v12 }
 0x624   :  { %10149 = vmatprep.subr.bf16.mxu0 %v10683_v0 }
 0x627   :  { %10151 = vmatpush3.bf16.msra.mxu0 %v10150_v14 }
 0x628   :  { %10152 = vmatprep.subr.bf16.mxu0 %v10683_v0 }
 0x62b   :  { %10154 = vmatpush3.bf16.msra.mxu0 %v10153_v28 }
 0x62c   :  { %10155 = vmatprep.subr.bf16.mxu0 %v10683_v0 }
 0x62f   :  { %10157 = vmatpush3.bf16.msra.mxu0 %v10156_v33 }
 0x630   :  { %10182 = vmatprep.subr.bf16.mxu0 %v10683_v0 }
 0x632   :  { %9392 = vmatmul.mubr.msk.f32.vlgmr.msra.gmra.mrb[76].mxu0 %vm288_vm2, %v11223_v9 }
 0x633   :  { %10184 = vmatpush3.bf16.msra.mxu0 %v10183_v51  ;;  %9509 = vmatprep.mubr.msk.f32.mxu0 %vm10684_vm0, %v14580_v4 }
 0x634   :  { %10185 = vmatprep.subr.bf16.mxu0 %v10683_v0 }
 0x637   :  { %10187 = vmatpush3.bf16.msra.mxu0 %v10186_v55 }
 0x638   :  { %10188 = vmatprep.subr.bf16.mxu0 %v10683_v0 }
 0x63b   :  { %10190 = vmatpush3.bf16.msra.mxu0 %v10189_v58 }
 0x63c   :  { %10191 = vmatprep.subr.bf16.mxu0 %v10683_v0 }
 0x63f   :  { %10193 = vmatpush3.bf16.msra.mxu0 %v10192_v60 }
 0x640   :  { %10194 = vmatprep.subr.bf16.mxu0 %v10683_v0 }
 0x643   :  { %10196 = vmatpush3.bf16.msra.mxu0 %v10195_v63 }
 0x644   :  { %10197 = vmatprep.subr.bf16.mxu0 %v10683_v0 }
 0x647   :  { %10199 = vmatpush3.bf16.msra.mxu0 %v10198_v3 }
 0x648   :  { %10200 = vmatprep.subr.bf16.mxu0 %v10683_v0 }
 0x64b   :  { %10202 = vmatpush3.bf16.msra.mxu0 %v10201_v6 }
 0x64c   :  { %10203 = vmatprep.subr.bf16.mxu0 %v10683_v0 }
 0x64f   :  { %10205 = vmatpush3.bf16.msra.mxu0 %v10204_v20 }
 0x650   :  { %10238 = vmatprep.subr.bf16.mxu0 %v10683_v0 }
 0x652   :  { %9510 = vmatmul.mubr.f32.vlgmr.msra.gmra.mrb[78].mxu0 %v11692_v15 }
 0x653   :  { %9512 = vmatprep.mubr.msk.f32.mxu0 %vm10684_vm0, %v14580_v4 }
 0x656   :  { %9513 = vmatmul.mubr.f32.gmra.mrb[80].mxu0 %v11700_v40 }
 0x657   :  { %9515 = vmatprep.mubr.msk.f32.mxu0 %vm10684_vm0, %v14580_v4 }
 0x65a   :  { %9516 = vmatmul.mubr.f32.gmra.mrb[82].mxu0 %v11708_v16 }
 0x65b   :  { %9518 = vmatprep.mubr.msk.f32.mxu0 %vm10684_vm0, %v14580_v4 }
 0x65e   :  { %9519 = vmatmul.mubr.f32.gmra.mrb[84].mxu0 %v11716_v17 }
 0x65f   :  { %9521 = vmatprep.mubr.msk.f32.mxu0 %vm10684_vm0, %v14580_v4 }
 0x662   :  { %9522 = vmatmul.mubr.f32.gmra.mrb[86].mxu0 %v11724_v18 }
 0x663   :  { %9524 = vmatprep.mubr.msk.f32.mxu0 %vm10684_vm0, %v14580_v4 }
 0x666   :  { %9525 = vmatmul.mubr.f32.gmra.mrb[88].mxu0 %v11732_v41 }
 0x667   :  { %9527 = vmatprep.mubr.msk.f32.mxu0 %vm10684_vm0, %v14580_v4 }
 0x66a   :  { %9528 = vmatmul.mubr.f32.gmra.mrb[90].mxu0 %v11740_v43 }
 0x66b   :  { %9530 = vmatprep.mubr.msk.f32.mxu0 %vm10684_vm0, %v14580_v4 }
 0x66e   :  { %9531 = vmatmul.mubr.f32.gmra.mrb[92].mxu0 %v11748_v44 }
 0x66f   :  { %9533 = vmatprep.mubr.msk.f32.mxu0 %vm10684_vm0, %v14580_v4 }
 0x672   :  { %9534 = vmatmul.mubr.f32.gmra.mrb[94].mxu0 %v11756_v45 }
 0x673   :  { %9536 = vmatprep.mubr.msk.f32.mxu0 %vm10684_vm0, %v14580_v4 }
 0x676   :  { %9537 = vmatmul.mubr.f32.gmra.mrb[96].mxu0 %v11764_v46 }
 0x677   :  { %9539 = vmatprep.mubr.msk.f32.mxu0 %vm10684_vm0, %v14580_v4 }
 0x67a   :  { %9540 = vmatmul.mubr.f32.gmra.mrb[98].mxu0 %v11772_v49 }
 0x67b   :  { %9542 = vmatprep.mubr.msk.f32.mxu0 %vm10684_vm0, %v14580_v4 }
 0x67e   :  { %9543 = vmatmul.mubr.f32.gmra.mrb[100].mxu0 %v11780_v52 }
 0x67f   :  { %9545 = vmatprep.mubr.msk.f32.mxu0 %vm10684_vm0, %v14580_v4 }
 0x682   :  { %9546 = vmatmul.mubr.f32.gmra.mrb[102].mxu0 %v11788_v31 }
 0x683   :  { %9548 = vmatprep.mubr.msk.f32.mxu0 %vm10684_vm0, %v14580_v4 }
 0x686   :  { %9549 = vmatmul.mubr.f32.gmra.mrb[104].mxu0 %v11796_v19 }
 0x687   :  { %9551 = vmatprep.mubr.msk.f32.mxu0 %vm10684_vm0, %v14580_v4 }
 0x68a   :  { %9552 = vmatmul.mubr.f32.gmra.mrb[106].mxu0 %v11804_v21 }
 0x68b   :  { %9554 = vmatprep.mubr.msk.f32.mxu0 %vm10684_vm0, %v14580_v4 }
 0x68e   :  { %9555 = vmatmul.mubr.f32.gmra.mrb[108].mxu0 %v11812_v23 }
 0x68f   :  { %9557 = vmatprep.mubr.msk.f32.mxu0 %vm10684_vm0, %v14580_v4 }
 0x692   :  { %9558 = vmatmul.mubr.msk.f32.gmra.mrb[110].mxu0 %vm288_vm2, %v11223_v9 }
 0x6e5   :  { %v1542_v8 = vpop.f32.mrb[74].mxu0 }
 0x6e6   :  { %v1544_v47 = vpop.f32.mrb[75].mxu0  ;;  %v12046_v10 = vmul.f32 0.17677669, %v1542_v8 }
 0x6e7   :  { %v1548_v37 = vmul.f32 0.17677669, %v1544_v47 }
 0x6e9   :  { %v12044_v27 = vadd.f32 %v1548_v37, %v11584_v48 }
 0x6eb   :  { %v1551_v38 = vsel %vm882_vm6, %v12044_v27, -inf }
 0x6ec   :  { %v1552_v11 = vmax.f32 %v12046_v10, %v1551_v38 }
 0x6ee   :  { %1553 = vmax.xlane.f32.xlu1 %v1552_v11 }
 0x705   :  { %v12051_v12 = vpop.f32.mrb[76].mxu0 }
 0x706   :  { %v9393_v13 = vpop.f32.mrb[77].mxu0 }
 0x725   :  { %v2153_v14 = vpop.f32.mrb[78].mxu0 }
 0x726   :  { %v9511_v25 = vpop.f32.mrb[79].mxu0  ;;  %v2154_v26 = vadd.f32 %v12056_v39, %v2153_v14 }
 0x729   :  { %v2158_v28 = vpop.f32.mrb[80].mxu0 }
 0x72a   :  { %v2159_v30 = vadd.f32 %v12056_v39, %v2158_v28  ;;  %v9514_v32 = vpop.f32.mrb[81].mxu0 }
 0x72c   :  { %v10239_v33 = vpack.c.bf16 %v2159_v30, %v2154_v26 }
 0x72d   :  { %v2163_v34 = vpop.f32.mrb[82].mxu0 }
 0x72e   :  { %v9517_v50 = vpop.f32.mrb[83].mxu0  ;;  %10240 = vmatpush1.bf16.msra.mxu0 %v10239_v33  ;;  %v2164_v51 = vadd.f32 %v12056_v39, %v2163_v34 }
 0x72f   :  { %10241 = vmatprep.subr.bf16.mxu0 %v10683_v0 }
 0x731   :  { %v2168_v53 = vpop.f32.mrb[84].mxu0 }
 0x732   :  { %v2169_v54 = vadd.f32 %v12056_v39, %v2168_v53  ;;  %v9520_v55 = vpop.f32.mrb[85].mxu0 }
 0x734   :  { %v10242_v22 = vpack.c.bf16 %v2169_v54, %v2164_v51 }
 0x735   :  { %v2173_v56 = vpop.f32.mrb[86].mxu0 }
 0x736   :  { %v9523_v58 = vpop.f32.mrb[87].mxu0  ;;  %10243 = vmatpush1.bf16.msra.mxu0 %v10242_v22  ;;  %v2174_v57 = vadd.f32 %v12056_v39, %v2173_v56 }
 0x737   :  { %10244 = vmatprep.subr.bf16.mxu0 %v10683_v0 }
 0x739   :  { %v2178_v59 = vpop.f32.mrb[88].mxu0 }
 0x73a   :  { %v2179_v60 = vadd.f32 %v12056_v39, %v2178_v59  ;;  %v9526_v61 = vpop.f32.mrb[89].mxu0 }
 0x73c   :  { %v10245_v62 = vpack.c.bf16 %v2179_v60, %v2174_v57 }
 0x73d   :  { %v2183_v63 = vpop.f32.mrb[90].mxu0 }
 0x73e   :  { %v9529_v1 = vpop.f32.mrb[91].mxu0  ;;  %10246 = vmatpush1.bf16.msra.mxu0 %v10245_v62  ;;  %v2184_v2 = vadd.f32 %v12056_v39, %v2183_v63 }
 0x73f   :  { %10247 = vmatprep.subr.bf16.mxu0 %v10683_v0 }
 0x741   :  { %v2188_v3 = vpop.f32.mrb[92].mxu0 }
 0x742   :  { %v2189_v29 = vadd.f32 %v12056_v39, %v2188_v3  ;;  %v9532_v5 = vpop.f32.mrb[93].mxu0 }
 0x744   :  { %v10248_v6 = vpack.c.bf16 %v2189_v29, %v2184_v2 }
 0x745   :  { %v2193_v36 = vpop.f32.mrb[94].mxu0 }
 0x746   :  { %v9535_v7 = vpop.f32.mrb[95].mxu0  ;;  %10249 = vmatpush1.bf16.msra.mxu0 %v10248_v6  ;;  %v2194_v20 = vadd.f32 %v12056_v39, %v2193_v36 }
 0x747   :  { %10250 = vmatprep.subr.bf16.mxu0 %v10683_v0 }
 0x749   :  { %v2198_v8 = vpop.f32.mrb[96].mxu0 }
 0x74a   :  { %v2199_v47 = vadd.f32 %v12056_v39, %v2198_v8  ;;  %v9538_v37 = vpop.f32.mrb[97].mxu0 }
 0x74c   :  { %v10251_v38 = vpack.c.bf16 %v2199_v47, %v2194_v20 }
 0x74d   :  { %v2203_v11 = vpop.f32.mrb[98].mxu0 }
 0x74e   :  { %v9541_v13 = vpop.f32.mrb[99].mxu0  ;;  %10252 = vmatpush1.bf16.msra.mxu0 %v10251_v38  ;;  %v2204_v14 = vadd.f32 %v12056_v39, %v2203_v11  ;;  %v7729_v11 = vld [vmem:[%s14555_s13 + $0x30] sm:$0xff] }
 0x74f   :  { %10253 = vmatprep.subr.bf16.mxu0 %v10683_v0  ;;  %v7730_v13 = vld [vmem:[%s14555_s13 + $0x38] sm:$0xff] }
 0x751   :  { %v2208_v25 = vpop.f32.mrb[100].mxu0 }
 0x752   :  { %v2209_v26 = vadd.f32 %v12056_v39, %v2208_v25  ;;  %v9544_v28 = vpop.f32.mrb[101].mxu0  ;;  %v973_v25 = vld [vmem:[%s14555_s13] sm:$0xff] }
 0x754   :  { %v10254_v30 = vpack.c.bf16 %v2209_v26, %v2204_v14  ;;  %v10126_v14 = vpack.c.bf16 %v7730_v13, %v7729_v11  ;;  %v974_v26 = vld [vmem:[%s14555_s13 + $0x8] sm:$0xff] }
 0x755   :  { %v2213_v32 = vpop.f32.mrb[102].mxu0  ;;  %v10129_v28 = vpack.c.bf16 %v974_v26, %v973_v25 }
 0x756   :  { %v9547_v33 = vpop.f32.mrb[103].mxu0  ;;  %10255 = vmatpush1.bf16.msra.mxu0 %v10254_v30  ;;  %v2214_v34 = vadd.f32 %v12056_v39, %v2213_v32  ;;  %v975_v30 = vld [vmem:[%s14555_s13 + $0x10] sm:$0xff]  ;;  %v976_v32 = vld [vmem:[%s14555_s13 + $0x18] sm:$0xff] }
 0x757   :  { %10256 = vmatprep.subr.bf16.mxu0 %v10683_v0 }
 0x759   :  { %v2218_v50 = vpop.f32.mrb[104].mxu0 }
 0x75a   :  { %v2219_v51 = vadd.f32 %v12056_v39, %v2218_v50  ;;  %v9550_v53 = vpop.f32.mrb[105].mxu0  ;;  %v10132_v50 = vpack.c.bf16 %v976_v32, %v975_v30 }
 0x75b   :  { %v7753_v53 = vld [vmem:[%s14600_s30 + $0x108] sm:$0xff] }
 0x75c   :  { %v10257_v54 = vpack.c.bf16 %v2219_v51, %v2214_v34  ;;  %v7752_v51 = vld [vmem:[%s14600_s30 + $0x100] sm:$0xff] }
 0x75d   :  { %v2223_v55 = vpop.f32.mrb[106].mxu0 }
 0x75e   :  { %v9553_v22 = vpop.f32.mrb[107].mxu0  ;;  %10258 = vmatpush1.bf16.msra.mxu0 %v10257_v54  ;;  %v2224_v56 = vadd.f32 %v12056_v39, %v2223_v55  ;;  %v10159_v54 = vpack.c.bf16 %v7753_v53, %v7752_v51  ;;  %v7754_v55 = vld [vmem:[%s14600_s30 + $0x110] sm:$0xff] }
 0x75f   :  { %10259 = vmatprep.subr.bf16.mxu0 %v10683_v0  ;;  %v7755_v22 = vld [vmem:[%s14600_s30 + $0x118] sm:$0xff] }
 0x761   :  { %v2228_v58 = vpop.f32.mrb[108].mxu0 }
 0x762   :  { %v2229_v57 = vadd.f32 %v12056_v39, %v2228_v58  ;;  %v9556_v59 = vpop.f32.mrb[109].mxu0  ;;  %v7756_v58 = vld [vmem:[%s14600_s30 + $0x120] sm:$0xff] }
 0x764   :  { %v10260_v60 = vpack.c.bf16 %v2229_v57, %v2224_v56  ;;  %v10162_v56 = vpack.c.bf16 %v7755_v22, %v7754_v55  ;;  %v7757_v57 = vld [vmem:[%s14600_s30 + $0x128] sm:$0xff] }
 0x765   :  { %v2233_v61 = vpop.f32.mrb[110].mxu0  ;;  %v10165_v59 = vpack.c.bf16 %v7757_v57, %v7756_v58 }
 0x766   :  { %v9559_v62 = vpop.f32.mrb[111].mxu0  ;;  %10261 = vmatpush1.bf16.msra.mxu0 %v10260_v60  ;;  %v2234_v63 = vadd.f32 %v12056_v39, %v2233_v61  ;;  %v7727_v39 = vld [vmem:[%s14555_s13 + $0x20] sm:$0xff]  ;;  %v7759_v60 = vld [vmem:[%s14600_s30 + $0x138] sm:$0xff] }
 0x767   :  { %2418 = vmatprep.subr.mxu0 %v14580_v4  ;;  %v7760_v62 = vld [vmem:[%s14600_s30 + $0x140] sm:$0xff] }
 0x76a   :  { %2419 = vmatpush1.msra.mxu0 %v2234_v63  ;;  %v7761_v63 = vld [vmem:[%s14600_s30 + $0x148] sm:$0xff] }
 0x76b   :  { %10292 = vmatprep.subr.bf16.mxu0 %v10683_v0 }
 0x77b   :  { %v1554_v1 = vpop.xlane.xlu1 %1553 }
 0x77c   :  { %v1555_v2 = vsub.f32 %v12046_v10, %v1554_v1  ;;  %v1556_v3 = vsub.f32 %v12044_v27, %v1554_v1  ;;  %v7728_v27 = vld [vmem:[%s14555_s13 + $0x28] sm:$0xff]  ;;  %v10171_v1 = vpack.c.bf16 %v7761_v63, %v7760_v62 }
 0x77d   :  { %v10123_v38 = vpack.c.bf16 %v7728_v27, %v7727_v39 }
 0x77e   :  { %v1557_v29 = vmul.f32 1.442695, %v1555_v2  ;;  %v1559_v5 = vmul.f32 1.442695, %v1556_v3  ;;  %v7762_v2 = vld [vmem:[%s14600_s30 + $0x150] sm:$0xff]  ;;  %v7763_v3 = vld [vmem:[%s14600_s30 + $0x158] sm:$0xff] }
 0x780   :  { %10565 = vpow2.f32 %v1557_v29  ;;  %v10174_v29 = vpack.c.bf16 %v7763_v3, %v7762_v2 }
 0x781   :  { %10567 = vpow2.f32 %v1559_v5  ;;  %v7764_v5 = vld [vmem:[%s14600_s30 + $0x160] sm:$0xff] }
 0x78a   :  { %v10566_v6 = vpop.eup %10565 }
 0x78b   :  { %v10568_v36 = vpop.eup %10567 }
 0x78c   :  { %v1561_v7 = vsel %vm882_vm6, %v10568_v36, 0.0 }
 0x78d   :  { %v1562_v20 = vadd.f32 %v10566_v6, %v1561_v7  ;;  %v7766_v7 = vld [vmem:[%s14600_s30 + $0x170] sm:$0xff] }
 0x78f   :  { %1563 = vadd.xlane.f32.xlu1 %v1562_v20  ;;  %v7767_v20 = vld [vmem:[%s14600_s30 + $0x178] sm:$0xff] }
 0x81c   :  { %v1564_v8 = vpop.xlane.xlu1 %1563 }
 0x81d   :  { %10569 = vrcp.f32 %v1564_v8  ;;  %v10180_v8 = vpack.c.bf16 %v7767_v20, %v7766_v7 }
 0x827   :  { %v10570_v10 = vpop.eup %10569 }
 0x828   :  { %v1566_v47 = vmul.f32 %v10570_v10, %v10566_v6  ;;  %v1567_v37 = vmul.f32 %v10570_v10, %v10568_v36  ;;  %v7765_v6 = vld [vmem:[%s14600_s30 + $0x168] sm:$0xff] }
 0x829   :  { %v10177_v36 = vpack.c.bf16 %v7765_v6, %v7764_v5 }
 0x82a   :  { %7726 = vmatprep.mubr.msk.f32.mxu1 %vm882_vm6, %v1567_v37 }
 0x82b   :  { %1636 = vmatmul.mubr.f32.vlgmr.msra.gmra.mrb[74].mxu1 %v1566_v47 }
 0x82c   :  { %10124 = vmatpush3.bf16.msra.mxu1 %v10123_v38  ;;  %9345 = vmatprep.mubr.msk.f32.mxu1 %vm10684_vm0, %v14580_v4 }
 0x82d   :  { %10125 = vmatprep.subr.bf16.mxu1 %v10683_v0 }
 0x830   :  { %10127 = vmatpush3.bf16.msra.mxu1 %v10126_v14 }
 0x831   :  { %10128 = vmatprep.subr.bf16.mxu1 %v10683_v0 }
 0x8fe   :  { %v1637_v33 = vpop.f32.mrb[74].mxu1 }
 0x8ff   :  { %v1639_v34 = vpop.f32.mrb[75].mxu1  ;;  %9346 = vmatmul.mubr.msk.f32.vlgmr.msra.gmra.mrb[76].mxu1 %vm752_vm3, %v1637_v33 }
 0x900   :  { %10130 = vmatpush3.bf16.msra.mxu1 %v10129_v28  ;;  %9356 = vmatprep.mubr.msk.f32.mxu1 %vm10684_vm0, %v14580_v4 }
 0x901   :  { %10131 = vmatprep.subr.bf16.mxu1 %v10683_v0 }
 0x904   :  { %10133 = vmatpush3.bf16.msra.mxu1 %v10132_v50 }
 0x905   :  { %10158 = vmatprep.subr.bf16.mxu1 %v10683_v0 }
 0x907   :  { %9357 = vmatmul.mubr.msk.f32.vlgmr.msra.gmra.mrb[78].mxu1 %vm752_vm3, %v11820_v24  ;;  %v7758_v24 = vld [vmem:[%s14600_s30 + $0x130] sm:$0xff] }
 0x908   :  { %10160 = vmatpush3.bf16.msra.mxu1 %v10159_v54  ;;  %9426 = vmatprep.mubr.msk.f32.mxu1 %vm10684_vm0, %v14580_v4  ;;  %v10168_v61 = vpack.c.bf16 %v7759_v60, %v7758_v24 }
 0x909   :  { %10161 = vmatprep.subr.bf16.mxu1 %v10683_v0 }
 0x90c   :  { %10163 = vmatpush3.bf16.msra.mxu1 %v10162_v56 }
 0x90d   :  { %10164 = vmatprep.subr.bf16.mxu1 %v10683_v0 }
 0x910   :  { %10166 = vmatpush3.bf16.msra.mxu1 %v10165_v59 }
 0x911   :  { %10167 = vmatprep.subr.bf16.mxu1 %v10683_v0 }
 0x914   :  { %10169 = vmatpush3.bf16.msra.mxu1 %v10168_v61 }
 0x915   :  { %10170 = vmatprep.subr.bf16.mxu1 %v10683_v0 }
 0x918   :  { %10172 = vmatpush3.bf16.msra.mxu1 %v10171_v1 }
 0x919   :  { %10173 = vmatprep.subr.bf16.mxu1 %v10683_v0 }
 0x91c   :  { %10175 = vmatpush3.bf16.msra.mxu1 %v10174_v29 }
 0x91d   :  { %10176 = vmatprep.subr.bf16.mxu1 %v10683_v0 }
 0x920   :  { %10178 = vmatpush3.bf16.msra.mxu1 %v10177_v36 }
 0x921   :  { %10179 = vmatprep.subr.bf16.mxu1 %v10683_v0 }
 0x924   :  { %10181 = vmatpush3.bf16.msra.mxu1 %v10180_v8 }
 0x925   :  { %10206 = vmatprep.subr.bf16.mxu1 %v10683_v0 }
 0x927   :  { %9427 = vmatmul.mubr.f32.vlgmr.msra.gmra.mrb[80].mxu1 %v11692_v15 }
 0x928   :  { %9429 = vmatprep.mubr.msk.f32.mxu1 %vm10684_vm0, %v14580_v4 }
 0x92b   :  { %9430 = vmatmul.mubr.f32.gmra.mrb[82].mxu1 %v11700_v40 }
 0x92c   :  { %9432 = vmatprep.mubr.msk.f32.mxu1 %vm10684_vm0, %v14580_v4 }
 0x92f   :  { %9433 = vmatmul.mubr.f32.gmra.mrb[84].mxu1 %v11708_v16 }
 0x930   :  { %9435 = vmatprep.mubr.msk.f32.mxu1 %vm10684_vm0, %v14580_v4 }
 0x933   :  { %9436 = vmatmul.mubr.f32.gmra.mrb[86].mxu1 %v11716_v17 }
 0x934   :  { %9438 = vmatprep.mubr.msk.f32.mxu1 %vm10684_vm0, %v14580_v4 }
 0x937   :  { %9439 = vmatmul.mubr.f32.gmra.mrb[88].mxu1 %v11724_v18 }
 0x938   :  { %9441 = vmatprep.mubr.msk.f32.mxu1 %vm10684_vm0, %v14580_v4 }
 0x93b   :  { %9442 = vmatmul.mubr.f32.gmra.mrb[90].mxu1 %v11732_v41 }
 0x93c   :  { %9444 = vmatprep.mubr.msk.f32.mxu1 %vm10684_vm0, %v14580_v4 }
 0x93f   :  { %9445 = vmatmul.mubr.f32.gmra.mrb[92].mxu1 %v11740_v43 }
 0x940   :  { %9447 = vmatprep.mubr.msk.f32.mxu1 %vm10684_vm0, %v14580_v4 }
 0x943   :  { %9448 = vmatmul.mubr.f32.gmra.mrb[94].mxu1 %v11748_v44  ;;  %v12237_v44 = vld [vmem:[%s14605_s9 + $0x2] ss:$0 sm:$0xff] }
 0x944   :  { %9450 = vmatprep.mubr.msk.f32.mxu1 %vm10684_vm0, %v14580_v4 }
 0x947   :  { %9451 = vmatmul.mubr.f32.gmra.mrb[96].mxu1 %v11756_v45 }
 0x948   :  { %9453 = vmatprep.mubr.msk.f32.mxu1 %vm10684_vm0, %v14580_v4 }
 0x94b   :  { %9454 = vmatmul.mubr.f32.gmra.mrb[98].mxu1 %v11764_v46 }
 0x94c   :  { %9456 = vmatprep.mubr.msk.f32.mxu1 %vm10684_vm0, %v14580_v4 }
 0x94f   :  { %9457 = vmatmul.mubr.f32.gmra.mrb[100].mxu1 %v11772_v49 }
 0x950   :  { %9459 = vmatprep.mubr.msk.f32.mxu1 %vm10684_vm0, %v14580_v4 }
 0x953   :  { %9460 = vmatmul.mubr.f32.gmra.mrb[102].mxu1 %v11780_v52 }
 0x954   :  { %9462 = vmatprep.mubr.msk.f32.mxu1 %vm10684_vm0, %v14580_v4 }
 0x957   :  { %9463 = vmatmul.mubr.f32.gmra.mrb[104].mxu1 %v11788_v31 }
 0x958   :  { %9465 = vmatprep.mubr.msk.f32.mxu1 %vm10684_vm0, %v14580_v4 }
 0x95b   :  { %9466 = vmatmul.mubr.f32.gmra.mrb[106].mxu1 %v11796_v19 }
 0x95c   :  { %9468 = vmatprep.mubr.msk.f32.mxu1 %vm10684_vm0, %v14580_v4 }
 0x95f   :  { %9469 = vmatmul.mubr.f32.gmra.mrb[108].mxu1 %v11804_v21 }
 0x960   :  { %9471 = vmatprep.mubr.msk.f32.mxu1 %vm10684_vm0, %v14580_v4 }
 0x963   :  { %9472 = vmatmul.mubr.f32.gmra.mrb[110].mxu1 %v11812_v23 }
 0x964   :  { %9474 = vmatprep.mubr.msk.f32.mxu1 %vm10684_vm0, %v14580_v4 }
 0x967   :  { %9475 = vmatmul.mubr.msk.f32.gmra.mrb[112].mxu1 %vm288_vm2, %v11223_v9 }
 0x968   :  { %2355 = vmatprep.mubr.f32.mxu1 %v14580_v4 }
 0x9d2   :  { %v1715_v15 = vpop.f32.mrb[76].mxu1 }
 0x9d3   :  { %v9347_v40 = vpop.f32.mrb[77].mxu1 }
 0x9da   :  { %v1788_v16 = vpop.f32.mrb[78].mxu1 }
 0x9db   :  { %v12232_v17 = vadd.f32 %v1788_v16, %v1715_v15  ;;  %v9358_v18 = vpop.f32.mrb[79].mxu1 }
 0x9fa   :  { %v1978_v41 = vpop.f32.mrb[80].mxu1 }
 0x9fb   :  { %v9428_v43 = vpop.f32.mrb[81].mxu1  ;;  %v1979_v46 = vadd.f32 %v12237_v44, %v1978_v41 }
 0x9fe   :  { %v1983_v45 = vpop.f32.mrb[82].mxu1 }
 0x9ff   :  { %v1984_v49 = vadd.f32 %v12237_v44, %v1983_v45  ;;  %v9431_v52 = vpop.f32.mrb[83].mxu1 }
 0xa01   :  { %v10207_v31 = vpack.c.bf16 %v1984_v49, %v1979_v46  ;;  %v7750_v49 = vld [vmem:[%s14608_s11 + $0x2] ss:$0 sm:$0xff] }
 0xa02   :  { %v1988_v19 = vpop.f32.mrb[84].mxu1  ;;  %v1884_v52 = vadd.f32 %v7750_v49, %v12051_v12  ;;  %v12408_v49 = vld [vmem:[%s14601_s29 + $0x28] sm:$0xff] }
 0xa03   :  { %v9434_v21 = vpop.f32.mrb[85].mxu1  ;;  %10209 = vmatpush1.bf16.xpose.msk.msra.mxu1 %vm11284_vm4, %v10207_v31  ;;  %v1989_v39 = vadd.f32 %v12237_v44, %v1988_v19 }
 0xa04   :  { %10210 = vmatprep.subr.bf16.mxu1 %v10683_v0 }
 0xa06   :  { %v1993_v23 = vpop.f32.mrb[86].mxu1 }
 0xa07   :  { %v1994_v27 = vadd.f32 %v12237_v44, %v1993_v23  ;;  %v9437_v10 = vpop.f32.mrb[87].mxu1 }
 0xa09   :  { %v10211_v47 = vpack.c.bf16 %v1994_v27, %v1989_v39 }
 0xa0a   :  { %v1998_v37 = vpop.f32.mrb[88].mxu1 }
 0xa0b   :  { %v9440_v38 = vpop.f32.mrb[89].mxu1  ;;  %10213 = vmatpush1.bf16.xpose.msk.msra.mxu1 %vm11284_vm4, %v10211_v47  ;;  %v1999_v13 = vadd.f32 %v12237_v44, %v1998_v37 }
 0xa0c   :  { %10214 = vmatprep.subr.bf16.mxu1 %v10683_v0 }
 0xa0e   :  { %v2003_v11 = vpop.f32.mrb[90].mxu1 }
 0xa0f   :  { %v2004_v14 = vadd.f32 %v12237_v44, %v2003_v11  ;;  %v9443_v25 = vpop.f32.mrb[91].mxu1 }
 0xa11   :  { %v10215_v26 = vpack.c.bf16 %v2004_v14, %v1999_v13 }
 0xa12   :  { %v2008_v28 = vpop.f32.mrb[92].mxu1 }
 0xa13   :  { %v9446_v30 = vpop.f32.mrb[93].mxu1  ;;  %10217 = vmatpush1.bf16.xpose.msk.msra.mxu1 %vm11284_vm4, %v10215_v26  ;;  %v2009_v33 = vadd.f32 %v12237_v44, %v2008_v28  ;;  %v7809_v26 = vld [vmem:[%s14555_s13 + $0x40] sm:$0xff]  ;;  %v7810_v28 = vld [vmem:[%s14555_s13 + $0x48] sm:$0xff] }
 0xa14   :  { %10218 = vmatprep.subr.bf16.mxu1 %v10683_v0  ;;  %v7811_v30 = vld [vmem:[%s14555_s13 + $0x50] sm:$0xff] }
 0xa16   :  { %v2013_v32 = vpop.f32.mrb[94].mxu1 }
 0xa17   :  { %v2014_v34 = vadd.f32 %v12237_v44, %v2013_v32  ;;  %v9449_v50 = vpop.f32.mrb[95].mxu1  ;;  %v10263_v32 = vpack.c.bf16 %v7810_v28, %v7809_v26  ;;  %v7818_v28 = vld [vmem:[%s14598_s5 + $0x1a0] sm:$0xff] }
 0xa19   :  { %v10219_v51 = vpack.c.bf16 %v2014_v34, %v2009_v33  ;;  %v7812_v33 = vld [vmem:[%s14555_s13 + $0x58] sm:$0xff] }
 0xa1a   :  { %v2018_v53 = vpop.f32.mrb[96].mxu1  ;;  %v10266_v34 = vpack.c.bf16 %v7812_v33, %v7811_v30  ;;  %v7819_v30 = vld [vmem:[%s14598_s5 + $0x1a8] sm:$0xff]  ;;  %v7820_v33 = vld [vmem:[%s14598_s5 + $0x1b0] sm:$0xff] }
 0xa1b   :  { %v9452_v54 = vpop.f32.mrb[97].mxu1  ;;  %10221 = vmatpush1.bf16.xpose.msk.msra.mxu1 %vm11284_vm4, %v10219_v51  ;;  %v2019_v22 = vadd.f32 %v12237_v44, %v2018_v53  ;;  %v7833_v51 = vld [vmem:[%s14600_s30 + $0x180] sm:$0xff]  ;;  %v7834_v53 = vld [vmem:[%s14600_s30 + $0x188] sm:$0xff] }
 0xa1c   :  { %10222 = vmatprep.subr.bf16.mxu1 %v10683_v0 }
 0xa1e   :  { %v2023_v55 = vpop.f32.mrb[98].mxu1 }
 0xa1f   :  { %v2024_v56 = vadd.f32 %v12237_v44, %v2023_v55  ;;  %v9455_v58 = vpop.f32.mrb[99].mxu1 }
 0xa20   :  { %v7835_v58 = vld [vmem:[%s14600_s30 + $0x190] sm:$0xff] }
 0xa21   :  { %v10223_v57 = vpack.c.bf16 %v2024_v56, %v2019_v22  ;;  %v10293_v56 = vpack.c.bf16 %v7834_v53, %v7833_v51  ;;  %v7822_v51 = vld [vmem:[%s14598_s5 + $0x1c0] sm:$0xff]  ;;  %v7823_v53 = vld [vmem:[%s14598_s5 + $0x1c8] sm:$0xff] }
 0xa22   :  { %v2028_v59 = vpop.f32.mrb[100].mxu1 }
 0xa23   :  { %v9458_v24 = vpop.f32.mrb[101].mxu1  ;;  %10225 = vmatpush1.bf16.xpose.msk.msra.mxu1 %vm11284_vm4, %v10223_v57  ;;  %v2029_v61 = vadd.f32 %v12237_v44, %v2028_v59  ;;  %v7836_v57 = vld [vmem:[%s14600_s30 + $0x198] sm:$0xff] }
 0xa24   :  { %10226 = vmatprep.subr.bf16.mxu1 %v10683_v0  ;;  %v10296_v59 = vpack.c.bf16 %v7836_v57, %v7835_v58  ;;  %v7837_v24 = vld [vmem:[%s14600_s30 + $0x1a0] sm:$0xff]  ;;  %v7827_v57 = vld [vmem:[%s14598_s5 + $0x1e8] sm:$0xff] }
 0xa25   :  { %v7826_v58 = vld [vmem:[%s14598_s5 + $0x1e0] sm:$0xff] }
 0xa26   :  { %v2033_v60 = vpop.f32.mrb[102].mxu1 }
 0xa27   :  { %v2034_v62 = vadd.f32 %v12237_v44, %v2033_v60  ;;  %v9461_v63 = vpop.f32.mrb[103].mxu1  ;;  %v7838_v60 = vld [vmem:[%s14600_s30 + $0x1a8] sm:$0xff] }
 0xa28   :  { %v7840_v63 = vld [vmem:[%s14600_s30 + $0x1b8] sm:$0xff] }
 0xa29   :  { %v10227_v1 = vpack.c.bf16 %v2034_v62, %v2029_v61  ;;  %v10299_v61 = vpack.c.bf16 %v7838_v60, %v7837_v24  ;;  %v7839_v62 = vld [vmem:[%s14600_s30 + $0x1b0] sm:$0xff]  ;;  %v7829_v60 = vld [vmem:[%s14598_s5 + $0x1f8] sm:$0xff] }
 0xa2a   :  { %v2038_v2 = vpop.f32.mrb[104].mxu1  ;;  %v7828_v24 = vld [vmem:[%s14598_s5 + $0x1f0] sm:$0xff] }
 0xa2b   :  { %v9464_v3 = vpop.f32.mrb[105].mxu1  ;;  %10229 = vmatpush1.bf16.xpose.msk.msra.mxu1 %vm11284_vm4, %v10227_v1  ;;  %v2039_v5 = vadd.f32 %v12237_v44, %v2038_v2  ;;  %v10302_v1 = vpack.c.bf16 %v7840_v63, %v7839_v62  ;;  %v7841_v2 = vld [vmem:[%s14600_s30 + $0x1c0] sm:$0xff]  ;;  %v7853_v63 = vld [vmem:[%s14603_s10 + $0x188] sm:$0xff] }
 0xa2c   :  { %10230 = vmatprep.subr.bf16.mxu1 %v10683_v0  ;;  %v7842_v3 = vld [vmem:[%s14600_s30 + $0x1c8] sm:$0xff]  ;;  %v7852_v62 = vld [vmem:[%s14603_s10 + $0x180] sm:$0xff] }
 0xa2e   :  { %v2043_v29 = vpop.f32.mrb[106].mxu1 }
 0xa2f   :  { %v2044_v6 = vadd.f32 %v12237_v44, %v2043_v29  ;;  %v9467_v36 = vpop.f32.mrb[107].mxu1  ;;  %v10305_v29 = vpack.c.bf16 %v7842_v3, %v7841_v2  ;;  %v7854_v2 = vld [vmem:[%s14603_s10 + $0x190] sm:$0xff]  ;;  %v7855_v3 = vld [vmem:[%s14603_s10 + $0x198] sm:$0xff] }
 0xa31   :  { %v10231_v7 = vpack.c.bf16 %v2044_v6, %v2039_v5  ;;  %v7843_v5 = vld [vmem:[%s14600_s30 + $0x1d0] sm:$0xff]  ;;  %v7844_v6 = vld [vmem:[%s14600_s30 + $0x1d8] sm:$0xff] }
 0xa32   :  { %v2048_v20 = vpop.f32.mrb[108].mxu1  ;;  %v10308_v36 = vpack.c.bf16 %v7844_v6, %v7843_v5 }
 0xa33   :  { %v9470_v8 = vpop.f32.mrb[109].mxu1  ;;  %10233 = vmatpush1.bf16.xpose.msk.msra.mxu1 %vm11284_vm4, %v10231_v7  ;;  %v2049_v40 = vadd.f32 %v12237_v44, %v2048_v20  ;;  %v7845_v7 = vld [vmem:[%s14600_s30 + $0x1e0] sm:$0xff]  ;;  %v7846_v20 = vld [vmem:[%s14600_s30 + $0x1e8] sm:$0xff] }
 0xa34   :  { %10234 = vmatprep.subr.bf16.mxu1 %v10683_v0  ;;  %v10311_v8 = vpack.c.bf16 %v7846_v20, %v7845_v7  ;;  %v7856_v20 = vld [vmem:[%s14603_s10 + $0x1a0] sm:$0xff] }
 0xa36   :  { %v2053_v15 = vpop.f32.mrb[110].mxu1 }
 0xa37   :  { %v2054_v16 = vadd.f32 %v12237_v44, %v2053_v15  ;;  %v9473_v18 = vpop.f32.mrb[111].mxu1  ;;  %v7847_v15 = vld [vmem:[%s14600_s30 + $0x1f0] sm:$0xff] }
 0xa38   :  { %v12368_v18 = vld [vmem:[%s14601_s29] sm:$0xff] }
 0xa39   :  { %v10235_v41 = vpack.c.bf16 %v2054_v16, %v2049_v40  ;;  %v7848_v40 = vld [vmem:[%s14600_s30 + $0x1f8] sm:$0xff] }
 0xa3a   :  { %v2058_v43 = vpop.f32.mrb[112].mxu1  ;;  %v10314_v16 = vpack.c.bf16 %v7848_v40, %v7847_v15 }
 0xa3b   :  { %v2059_v45 = vadd.f32 %v12237_v44, %v2058_v43  ;;  %v9476_v46 = vpop.f32.mrb[113].mxu1  ;;  %10237 = vmatpush1.bf16.xpose.msk.msra.mxu1 %vm11284_vm4, %v10235_v41  ;;  %v12376_v41 = vld [vmem:[%s14601_s29 + $0x8] sm:$0xff]  ;;  %v12384_v43 = vld [vmem:[%s14601_s29 + $0x10] sm:$0xff] }
 0xa3c   :  { %2323 = vmatprep.subr.mxu1 %v14580_v4  ;;  %v12400_v46 = vld [vmem:[%s14601_s29 + $0x20] sm:$0xff] }
 0xa43   :  { %7806 = vmatpush1.xpose.msk.msra.mxu1 %vm752_vm3, %v2059_v45  ;;  %v12392_v45 = vld [vmem:[%s14601_s29 + $0x18] sm:$0xff] }
 0xa44   :  { %10262 = vmatprep.subr.bf16.mxu1 %v10683_v0 }
 0xa46   :  { %7807 = vmatmul.mubr.msk.f32.vlgmr.msra.gmra.mrb[114].mxu1 %vm752_vm3, %v1884_v52  ;;  %v12416_v52 = vld [vmem:[%s14601_s29 + $0x30] sm:$0xff] }
 0xa47   :  { %9568 = vmatprep.mubr.msk.f32.mxu1 %vm10684_vm0, %v14580_v4  ;;  %10264 = vmatpush3.bf16.msra.mxu1 %v10263_v32  ;;  %v10275_v32 = vpack.c.bf16 %v7819_v30, %v7818_v28  ;;  %v7860_v28 = vld [vmem:[%s14603_s10 + $0x1c0] sm:$0xff]  ;;  %v7861_v30 = vld [vmem:[%s14603_s10 + $0x1c8] sm:$0xff] }
 0xa48   :  { %10265 = vmatprep.subr.bf16.mxu1 %v10683_v0 }
 0xa4b   :  { %10267 = vmatpush3.bf16.msra.mxu1 %v10266_v34  ;;  %v7821_v34 = vld [vmem:[%s14598_s5 + $0x1b8] sm:$0xff] }
 0xa4c   :  { %10268 = vmatprep.subr.bf16.mxu1 %v10683_v0 }
 0xb19   :  { %v2357_v44 = vpop.f32.mrb[114].mxu1 }
 0xb1a   :  { %v2359_v31 = vpop.f32.mrb[115].mxu1  ;;  %v2362_v23 = vmul.f32 0.17677669, %v2357_v44  ;;  %v12424_v44 = vld [vmem:[%s14601_s29 + $0x38] sm:$0xff] }
 0xb1b   :  { %v2363_v19 = vmul.f32 0.17677669, %v2359_v31  ;;  %v12432_v31 = vld [vmem:[%s14601_s29 + $0x40] sm:$0xff] }
 0xb1d   :  { %v2365_v21 = vadd.f32 %v2363_v19, %v11584_v48  ;;  %v12440_v19 = vld [vmem:[%s14601_s29 + $0x48] sm:$0xff] }
 0xb1f   :  { %v2366_v39 = vsel %vm882_vm6, %v2365_v21, -inf }
 0xb20   :  { %v2367_v27 = vmax.f32 %v2362_v23, %v2366_v39  ;;  %v12464_v39 = vld [vmem:[%s14601_s29 + $0x60] sm:$0xff] }
 0xb22   :  { %2368 = vmax.xlane.f32.xlu0 %v2367_v27  ;;  %v12472_v27 = vld [vmem:[%s14601_s29 + $0x68] sm:$0xff] }
 0xbaf   :  { %v2369_v10 = vpop.xlane.xlu0 %2368 }
 0xbb0   :  { %v2370_v47 = vsub.f32 %v2362_v23, %v2369_v10  ;;  %v2371_v12 = vsub.f32 %v2365_v21, %v2369_v10  ;;  %v12448_v21 = vld [vmem:[%s14601_s29 + $0x50] sm:$0xff]  ;;  %v12456_v23 = vld [vmem:[%s14601_s29 + $0x58] sm:$0xff] }
 0xbb1   :  { %v12480_v10 = vld [vmem:[%s14601_s29 + $0x70] sm:$0xff] }
 0xbb2   :  { %v2372_v37 = vmul.f32 1.442695, %v2370_v47  ;;  %v2374_v38 = vmul.f32 1.442695, %v2371_v12  ;;  %v12488_v47 = vld [vmem:[%s14601_s29 + $0x78] sm:$0xff]  ;;  %v7814_v12 = vld [vmem:[%s14598_s5 + $0x180] sm:$0xff] }
 0xbb4   :  { %10571 = vpow2.f32 %v2372_v37  ;;  %v7815_v37 = vld [vmem:[%s14598_s5 + $0x188] sm:$0xff] }
 0xbb5   :  { %10573 = vpow2.f32 %v2374_v38  ;;  %v10269_v38 = vpack.c.bf16 %v7815_v37, %v7814_v12 }
 0xbbe   :  { %v10572_v11 = vpop.eup %10571 }
 0xbbf   :  { %v10574_v13 = vpop.eup %10573 }
 0xbc0   :  { %v2376_v14 = vsel %vm882_vm6, %v10574_v13, 0.0 }
 0xbc1   :  { %v2377_v25 = vadd.f32 %v10572_v11, %v2376_v14 }
 0xbc3   :  { %2378 = vadd.xlane.f32.xlu1 %v2377_v25 }
 0xc50   :  { %v2379_v50 = vpop.xlane.xlu1 %2378 }
 0xc51   :  { %10575 = vrcp.f32 %v2379_v50  ;;  %v10278_v50 = vpack.c.bf16 %v7821_v34, %v7820_v33 }
 0xc5b   :  { %v10576_v54 = vpop.eup %10575 }
 0xc5c   :  { %v2381_v55 = vmul.f32 %v10576_v54, %v10572_v11  ;;  %v2382_v22 = vmul.f32 %v10576_v54, %v10574_v13  ;;  %v7816_v11 = vld [vmem:[%s14598_s5 + $0x190] sm:$0xff]  ;;  %v7817_v13 = vld [vmem:[%s14598_s5 + $0x198] sm:$0xff]  ;;  %v10281_v54 = vpack.c.bf16 %v7823_v53, %v7822_v51 }
 0xc5d   :  { %v10272_v26 = vpack.c.bf16 %v7817_v13, %v7816_v11  ;;  %v7859_v11 = vld [vmem:[%s14603_s10 + $0x1b8] sm:$0xff]  ;;  %v7862_v53 = vld [vmem:[%s14603_s10 + $0x1d0] sm:$0xff] }
 0xc5e   :  { %7808 = vmatprep.mubr.msk.f32.mxu0 %vm882_vm6, %v2382_v22  ;;  %v7825_v22 = vld [vmem:[%s14598_s5 + $0x1d8] sm:$0xff] }
 0xc5f   :  { %2451 = vmatmul.mubr.f32.vlgmr.msra.gmra.mrb[112].mxu0 %v2381_v55  ;;  %v7824_v55 = vld [vmem:[%s14598_s5 + $0x1d0] sm:$0xff] }
 0xc60   :  { %10294 = vmatpush3.bf16.msra.mxu0 %v10293_v56  ;;  %9638 = vmatprep.mubr.msk.f32.mxu0 %vm10684_vm0, %v14580_v4  ;;  %v10284_v56 = vpack.c.bf16 %v7825_v22, %v7824_v55 }
 0xc61   :  { %10295 = vmatprep.subr.bf16.mxu0 %v10683_v0 }
 0xc64   :  { %10297 = vmatpush3.bf16.msra.mxu0 %v10296_v59  ;;  %v10287_v59 = vpack.c.bf16 %v7827_v57, %v7826_v58  ;;  %v7864_v57 = vld [vmem:[%s14603_s10 + $0x1e0] sm:$0xff] }
 0xc65   :  { %10298 = vmatprep.subr.bf16.mxu0 %v10683_v0 }
 0xc68   :  { %10300 = vmatpush3.bf16.msra.mxu0 %v10299_v61  ;;  %v10290_v61 = vpack.c.bf16 %v7829_v60, %v7828_v24 }
 0xc69   :  { %10301 = vmatprep.subr.bf16.mxu0 %v10683_v0 }
 0xc6c   :  { %10303 = vmatpush3.bf16.msra.mxu0 %v10302_v1  ;;  %v10317_v1 = vpack.c.bf16 %v7853_v63, %v7852_v62 }
 0xc6d   :  { %10304 = vmatprep.subr.bf16.mxu0 %v10683_v0 }
 0xc70   :  { %10306 = vmatpush3.bf16.msra.mxu0 %v10305_v29  ;;  %v12570_v29 = vld [vmem:[%s14605_s9 + $0x3] ss:$0 sm:$0xff] }
 0xc71   :  { %10307 = vmatprep.subr.bf16.mxu0 %v10683_v0 }
 0xc74   :  { %10309 = vmatpush3.bf16.msra.mxu0 %v10308_v36  ;;  %v10320_v36 = vpack.c.bf16 %v7855_v3, %v7854_v2  ;;  %v7867_v2 = vld [vmem:[%s14603_s10 + $0x1f8] sm:$0xff] }
 0xc75   :  { %10310 = vmatprep.subr.bf16.mxu0 %v10683_v0 }
 0xc78   :  { %10312 = vmatpush3.bf16.msra.mxu0 %v10311_v8  ;;  %v7857_v8 = vld [vmem:[%s14603_s10 + $0x1a8] sm:$0xff] }
 0xc79   :  { %10313 = vmatprep.subr.bf16.mxu0 %v10683_v0  ;;  %v10323_v12 = vpack.c.bf16 %v7857_v8, %v7856_v20 }
 0xc7c   :  { %10315 = vmatpush3.bf16.msra.mxu0 %v10314_v16 }
 0xc7d   :  { %10340 = vmatprep.subr.bf16.mxu0 %v10683_v0 }
 0xc7f   :  { %9639 = vmatmul.mubr.f32.vlgmr.msra.gmra.mrb[114].mxu0 %v12368_v18 }
 0xc80   :  { %9641 = vmatprep.mubr.msk.f32.mxu0 %vm10684_vm0, %v14580_v4 }
 0xc83   :  { %9642 = vmatmul.mubr.f32.gmra.mrb[116].mxu0 %v12376_v41 }
 0xc84   :  { %9644 = vmatprep.mubr.msk.f32.mxu0 %vm10684_vm0, %v14580_v4 }
 0xc87   :  { %9645 = vmatmul.mubr.f32.gmra.mrb[118].mxu0 %v12384_v43 }
 0xc88   :  { %9647 = vmatprep.mubr.msk.f32.mxu0 %vm10684_vm0, %v14580_v4 }
 0xc8b   :  { %9648 = vmatmul.mubr.f32.gmra.mrb[120].mxu0 %v12392_v45 }
 0xc8c   :  { %9650 = vmatprep.mubr.msk.f32.mxu0 %vm10684_vm0, %v14580_v4 }
 0xc8f   :  { %9651 = vmatmul.mubr.f32.gmra.mrb[122].mxu0 %v12400_v46 }
 0xc90   :  { %9653 = vmatprep.mubr.msk.f32.mxu0 %vm10684_vm0, %v14580_v4 }
 0xc93   :  { %9654 = vmatmul.mubr.f32.gmra.mrb[124].mxu0 %v12408_v49 }
 0xc94   :  { %9656 = vmatprep.mubr.msk.f32.mxu0 %vm10684_vm0, %v14580_v4 }
 0xc97   :  { %9657 = vmatmul.mubr.f32.gmra.mrb[126].mxu0 %v12416_v52 }
 0xc98   :  { %9659 = vmatprep.mubr.msk.f32.mxu0 %vm10684_vm0, %v14580_v4 }
 0xc9b   :  { %9660 = vmatmul.mubr.f32.gmra.mrb[128].mxu0 %v12424_v44 }
 0xc9c   :  { %9662 = vmatprep.mubr.msk.f32.mxu0 %vm10684_vm0, %v14580_v4 }
 0xc9f   :  { %9663 = vmatmul.mubr.f32.gmra.mrb[130].mxu0 %v12432_v31 }
 0xca0   :  { %9665 = vmatprep.mubr.msk.f32.mxu0 %vm10684_vm0, %v14580_v4 }
 0xca3   :  { %9666 = vmatmul.mubr.f32.gmra.mrb[132].mxu0 %v12440_v19 }
 0xca4   :  { %9668 = vmatprep.mubr.msk.f32.mxu0 %vm10684_vm0, %v14580_v4 }
 0xca7   :  { %9669 = vmatmul.mubr.f32.gmra.mrb[134].mxu0 %v12448_v21 }
 0xca8   :  { %9671 = vmatprep.mubr.msk.f32.mxu0 %vm10684_vm0, %v14580_v4 }
 0xcab   :  { %9672 = vmatmul.mubr.f32.gmra.mrb[136].mxu0 %v12456_v23 }
 0xcac   :  { %9674 = vmatprep.mubr.msk.f32.mxu0 %vm10684_vm0, %v14580_v4 }
 0xcaf   :  { %9675 = vmatmul.mubr.f32.gmra.mrb[138].mxu0 %v12464_v39 }
 0xcb0   :  { %9677 = vmatprep.mubr.msk.f32.mxu0 %vm10684_vm0, %v14580_v4 }
 0xcb3   :  { %9678 = vmatmul.mubr.f32.gmra.mrb[140].mxu0 %v12472_v27 }
 0xcb4   :  { %9680 = vmatprep.mubr.msk.f32.mxu0 %vm10684_vm0, %v14580_v4 }
 0xcb7   :  { %9681 = vmatmul.mubr.f32.gmra.mrb[142].mxu0 %v12480_v10 }
 0xcb8   :  { %9683 = vmatprep.mubr.msk.f32.mxu0 %vm10684_vm0, %v14580_v4 }
 0xcbb   :  { %9684 = vmatmul.mubr.f32.gmra.mrb[144].mxu0 %v12488_v47 }
 0xcbc   :  { %9686 = vmatprep.mubr.msk.f32.mxu0 %vm10684_vm0, %v14580_v4 }
 0xcbf   :  { %9687 = vmatmul.mubr.msk.f32.gmra.mrb[146].mxu0 %vm288_vm2, %v11223_v9 }
 0xcc0   :  { %3098 = vmatprep.mubr.f32.mxu0 %v14580_v4 }
 0xd32   :  { %v2452_v14 = vpop.f32.mrb[112].mxu0 }
 0xd33   :  { %v2454_v25 = vpop.f32.mrb[113].mxu0  ;;  %9569 = vmatmul.mubr.msk.f32.vlgmr.msra.gmra.mrb[116].mxu1 %vm752_vm3, %v2452_v14 }
 0xd34   :  { %10270 = vmatpush3.bf16.msra.mxu1 %v10269_v38  ;;  %9603 = vmatprep.mubr.msk.f32.mxu1 %vm10684_vm0, %v14580_v4  ;;  %v7858_v38 = vld [vmem:[%s14603_s10 + $0x1b0] sm:$0xff] }
 0xd35   :  { %10271 = vmatprep.subr.bf16.mxu1 %v10683_v0  ;;  %v10326_v25 = vpack.c.bf16 %v7859_v11, %v7858_v38 }
 0xd38   :  { %10273 = vmatpush3.bf16.msra.mxu1 %v10272_v26 }
 0xd39   :  { %10274 = vmatprep.subr.bf16.mxu1 %v10683_v0 }
 0xd3c   :  { %10276 = vmatpush3.bf16.msra.mxu1 %v10275_v32 }
 0xd3d   :  { %10277 = vmatprep.subr.bf16.mxu1 %v10683_v0 }
 0xd40   :  { %10279 = vmatpush3.bf16.msra.mxu1 %v10278_v50  ;;  %v10329_v50 = vpack.c.bf16 %v7861_v30, %v7860_v28 }
 0xd41   :  { %10280 = vmatprep.subr.bf16.mxu1 %v10683_v0 }
 0xd44   :  { %10282 = vmatpush3.bf16.msra.mxu1 %v10281_v54  ;;  %v7863_v54 = vld [vmem:[%s14603_s10 + $0x1d8] sm:$0xff] }
 0xd45   :  { %10283 = vmatprep.subr.bf16.mxu1 %v10683_v0 }
 0xd48   :  { %10285 = vmatpush3.bf16.msra.mxu1 %v10284_v56  ;;  %v10332_v56 = vpack.c.bf16 %v7863_v54, %v7862_v53 }
 0xd49   :  { %10286 = vmatprep.subr.bf16.mxu1 %v10683_v0 }
 0xd4c   :  { %10288 = vmatpush3.bf16.msra.mxu1 %v10287_v59  ;;  %v7865_v59 = vld [vmem:[%s14603_s10 + $0x1e8] sm:$0xff] }
 0xd4d   :  { %10289 = vmatprep.subr.bf16.mxu1 %v10683_v0  ;;  %v10335_v62 = vpack.c.bf16 %v7865_v59, %v7864_v57 }
 0xd50   :  { %10291 = vmatpush3.bf16.msra.mxu1 %v10290_v61 }
 0xd51   :  { %10316 = vmatprep.subr.bf16.mxu1 %v10683_v0 }
 0xd52   :  { %v2721_v5 = vpop.f32.mrb[114].mxu0 }
 0xd53   :  { %9604 = vmatmul.mubr.msk.f32.vlgmr.msra.gmra.mrb[118].mxu1 %vm288_vm2, %v11223_v9  ;;  %v9640_v6 = vpop.f32.mrb[115].mxu0  ;;  %v2722_v7 = vadd.f32 %v12570_v29, %v2721_v5 }
 0xd54   :  { %10318 = vmatpush3.bf16.msra.mxu1 %v10317_v1  ;;  %9721 = vmatprep.mubr.msk.f32.mxu1 %vm10684_vm0, %v14580_v4  ;;  %v7866_v1 = vld [vmem:[%s14603_s10 + $0x1f0] sm:$0xff]  ;;  %s14611_s10 = sld [smem:[#allocation15_spill]] }
 0xd55   :  { %10319 = vmatprep.subr.bf16.mxu1 %v10683_v0  ;;  %v10338_v6 = vpack.c.bf16 %v7867_v2, %v7866_v1 }
 0xd56   :  { %v2726_v15 = vpop.f32.mrb[116].mxu0 }
 0xd57   :  { %v2727_v40 = vadd.f32 %v12570_v29, %v2726_v15  ;;  %v9643_v16 = vpop.f32.mrb[117].mxu0 }
 0xd58   :  { %10321 = vmatpush3.bf16.msra.mxu1 %v10320_v36 }
 0xd59   :  { %v10341_v37 = vpack.c.bf16 %v2727_v40, %v2722_v7  ;;  %10322 = vmatprep.subr.bf16.mxu1 %v10683_v0 }
 0xd5a   :  { %v2731_v13 = vpop.f32.mrb[118].mxu0 }
 0xd5b   :  { %10343 = vmatpush1.bf16.xpose.msk.msra.mxu0 %vm11284_vm4, %v10341_v37  ;;  %v9646_v14 = vpop.f32.mrb[119].mxu0  ;;  %v2732_v26 = vadd.f32 %v12570_v29, %v2731_v13 }
 0xd5c   :  { %10324 = vmatpush3.bf16.msra.mxu1 %v10323_v12  ;;  %10344 = vmatprep.subr.bf16.mxu0 %v10683_v0 }
 0xd5d   :  { %10325 = vmatprep.subr.bf16.mxu1 %v10683_v0 }
 0xd5e   :  { %v2736_v32 = vpop.f32.mrb[120].mxu0 }
 0xd5f   :  { %v2737_v33 = vadd.f32 %v12570_v29, %v2736_v32  ;;  %v9649_v34 = vpop.f32.mrb[121].mxu0 }
 0xd60   :  { %10327 = vmatpush3.bf16.msra.mxu1 %v10326_v25 }
 0xd61   :  { %v10345_v51 = vpack.c.bf16 %v2737_v33, %v2732_v26  ;;  %10328 = vmatprep.subr.bf16.mxu1 %v10683_v0 }
 0xd62   :  { %v2741_v55 = vpop.f32.mrb[122].mxu0 }
 0xd63   :  { %10347 = vmatpush1.bf16.xpose.msk.msra.mxu0 %vm11284_vm4, %v10345_v51  ;;  %v9652_v22 = vpop.f32.mrb[123].mxu0  ;;  %v2742_v58 = vadd.f32 %v12570_v29, %v2741_v55 }
 0xd64   :  { %10330 = vmatpush3.bf16.msra.mxu1 %v10329_v50  ;;  %10348 = vmatprep.subr.bf16.mxu0 %v10683_v0 }
 0xd65   :  { %10331 = vmatprep.subr.bf16.mxu1 %v10683_v0 }
 0xd66   :  { %v2746_v24 = vpop.f32.mrb[124].mxu0 }
 0xd67   :  { %v2747_v60 = vadd.f32 %v12570_v29, %v2746_v24  ;;  %v9655_v61 = vpop.f32.mrb[125].mxu0 }
 0xd68   :  { %10333 = vmatpush3.bf16.msra.mxu1 %v10332_v56 }
 0xd69   :  { %v10349_v63 = vpack.c.bf16 %v2747_v60, %v2742_v58  ;;  %10334 = vmatprep.subr.bf16.mxu1 %v10683_v0 }
 0xd6a   :  { %v2751_v3 = vpop.f32.mrb[126].mxu0 }
 0xd6b   :  { %10351 = vmatpush1.bf16.xpose.msk.msra.mxu0 %vm11284_vm4, %v10349_v63  ;;  %v9658_v5 = vpop.f32.mrb[127].mxu0  ;;  %v2752_v36 = vadd.f32 %v12570_v29, %v2751_v3 }
 0xd6c   :  { %10336 = vmatpush3.bf16.msra.mxu1 %v10335_v62  ;;  %10352 = vmatprep.subr.bf16.mxu0 %v10683_v0 }
 0xd6d   :  { %10337 = vmatprep.subr.bf16.mxu1 %v10683_v0 }
 0xd6e   :  { %v2756_v7 = vpop.f32.mrb[128].mxu0 }
 0xd6f   :  { %v2757_v20 = vadd.f32 %v12570_v29, %v2756_v7  ;;  %v9661_v8 = vpop.f32.mrb[129].mxu0 }
 0xd70   :  { %10339 = vmatpush3.bf16.msra.mxu1 %v10338_v6 }
 0xd71   :  { %v10353_v15 = vpack.c.bf16 %v2757_v20, %v2752_v36  ;;  %10372 = vmatprep.subr.bf16.mxu1 %v10683_v0 }
 0xd72   :  { %v2761_v40 = vpop.f32.mrb[130].mxu0 }
 0xd73   :  { %9722 = vmatmul.mubr.f32.vlgmr.msra.gmra.mrb[120].mxu1 %v12368_v18  ;;  %10355 = vmatpush1.bf16.xpose.msk.msra.mxu0 %vm11284_vm4, %v10353_v15  ;;  %v9664_v16 = vpop.f32.mrb[131].mxu0  ;;  %v2762_v12 = vadd.f32 %v12570_v29, %v2761_v40 }
 0xd74   :  { %9724 = vmatprep.mubr.msk.f32.mxu1 %vm10684_vm0, %v14580_v4  ;;  %10356 = vmatprep.subr.bf16.mxu0 %v10683_v0 }
 0xd76   :  { %v2766_v37 = vpop.f32.mrb[132].mxu0 }
 0xd77   :  { %v2767_v38 = vadd.f32 %v12570_v29, %v2766_v37  ;;  %9725 = vmatmul.mubr.f32.gmra.mrb[122].mxu1 %v12376_v41  ;;  %v9667_v11 = vpop.f32.mrb[133].mxu0 }
 0xd78   :  { %9727 = vmatprep.mubr.msk.f32.mxu1 %vm10684_vm0, %v14580_v4 }
 0xd79   :  { %v10357_v18 = vpack.c.bf16 %v2767_v38, %v2762_v12 }
 0xd7a   :  { %v2771_v13 = vpop.f32.mrb[134].mxu0 }
 0xd7b   :  { %9728 = vmatmul.mubr.f32.gmra.mrb[124].mxu1 %v12384_v43  ;;  %10359 = vmatpush1.bf16.xpose.msk.msra.mxu0 %vm11284_vm4, %v10357_v18  ;;  %v9670_v14 = vpop.f32.mrb[135].mxu0  ;;  %v2772_v25 = vadd.f32 %v12570_v29, %v2771_v13 }
 0xd7c   :  { %9730 = vmatprep.mubr.msk.f32.mxu1 %vm10684_vm0, %v14580_v4  ;;  %10360 = vmatprep.subr.bf16.mxu0 %v10683_v0 }
 0xd7e   :  { %v2776_v41 = vpop.f32.mrb[136].mxu0 }
 0xd7f   :  { %v2777_v26 = vadd.f32 %v12570_v29, %v2776_v41  ;;  %9731 = vmatmul.mubr.f32.gmra.mrb[126].mxu1 %v12392_v45  ;;  %v9673_v28 = vpop.f32.mrb[137].mxu0 }
 0xd80   :  { %9733 = vmatprep.mubr.msk.f32.mxu1 %vm10684_vm0, %v14580_v4 }
 0xd81   :  { %v10361_v43 = vpack.c.bf16 %v2777_v26, %v2772_v25 }
 0xd82   :  { %v2781_v30 = vpop.f32.mrb[138].mxu0 }
 0xd83   :  { %9734 = vmatmul.mubr.f32.gmra.mrb[128].mxu1 %v12400_v46  ;;  %10363 = vmatpush1.bf16.xpose.msk.msra.mxu0 %vm11284_vm4, %v10361_v43  ;;  %v9676_v32 = vpop.f32.mrb[139].mxu0  ;;  %v2782_v33 = vadd.f32 %v12570_v29, %v2781_v30 }
 0xd84   :  { %9736 = vmatprep.mubr.msk.f32.mxu1 %vm10684_vm0, %v14580_v4  ;;  %10364 = vmatprep.subr.bf16.mxu0 %v10683_v0 }
 0xd86   :  { %v2786_v45 = vpop.f32.mrb[140].mxu0 }
 0xd87   :  { %v2787_v34 = vadd.f32 %v12570_v29, %v2786_v45  ;;  %9737 = vmatmul.mubr.f32.gmra.mrb[130].mxu1 %v12408_v49  ;;  %v9679_v50 = vpop.f32.mrb[141].mxu0 }
 0xd88   :  { %9739 = vmatprep.mubr.msk.f32.mxu1 %vm10684_vm0, %v14580_v4 }
 0xd89   :  { %v10365_v46 = vpack.c.bf16 %v2787_v34, %v2782_v33 }
 0xd8a   :  { %v2791_v51 = vpop.f32.mrb[142].mxu0 }
 0xd8b   :  { %9740 = vmatmul.mubr.f32.gmra.mrb[132].mxu1 %v12416_v52  ;;  %10367 = vmatpush1.bf16.xpose.msk.msra.mxu0 %vm11284_vm4, %v10365_v46  ;;  %v9682_v53 = vpop.f32.mrb[143].mxu0  ;;  %v2792_v54 = vadd.f32 %v12570_v29, %v2791_v51 }
 0xd8c   :  { %9742 = vmatprep.mubr.msk.f32.mxu1 %vm10684_vm0, %v14580_v4  ;;  %10368 = vmatprep.subr.bf16.mxu0 %v10683_v0 }
 0xd8e   :  { %v2796_v49 = vpop.f32.mrb[144].mxu0 }
 0xd8f   :  { %v2797_v55 = vadd.f32 %v12570_v29, %v2796_v49  ;;  %9743 = vmatmul.mubr.f32.gmra.mrb[134].mxu1 %v12424_v44  ;;  %v9685_v22 = vpop.f32.mrb[145].mxu0 }
 0xd90   :  { %9745 = vmatprep.mubr.msk.f32.mxu1 %vm10684_vm0, %v14580_v4 }
 0xd91   :  { %v10369_v52 = vpack.c.bf16 %v2797_v55, %v2792_v54 }
 0xd92   :  { %v2801_v56 = vpop.f32.mrb[146].mxu0 }
 0xd93   :  { %v2802_v58 = vadd.f32 %v12570_v29, %v2801_v56  ;;  %v9688_v57 = vpop.f32.mrb[147].mxu0  ;;  %9746 = vmatmul.mubr.f32.gmra.mrb[136].mxu1 %v12432_v31  ;;  %10371 = vmatpush1.bf16.xpose.msk.msra.mxu0 %vm11284_vm4, %v10369_v52 }
 0xd94   :  { %9748 = vmatprep.mubr.msk.f32.mxu1 %vm10684_vm0, %v14580_v4  ;;  %3066 = vmatprep.subr.mxu0 %v14580_v4 }
 0xd97   :  { %9749 = vmatmul.mubr.f32.gmra.mrb[138].mxu1 %v12440_v19  ;;  %v7831_v19 = vld [vmem:[%s14608_s11 + $0x3] ss:$0 sm:$0xff] }
 0xd98   :  { %9751 = vmatprep.mubr.msk.f32.mxu1 %vm10684_vm0, %v14580_v4 }
 0xd9b   :  { %9752 = vmatmul.mubr.f32.gmra.mrb[140].mxu1 %v12448_v21  ;;  %7887 = vmatpush1.xpose.msk.msra.mxu0 %vm752_vm3, %v2802_v58 }
 0xd9c   :  { %9754 = vmatprep.mubr.msk.f32.mxu1 %vm10684_vm0, %v14580_v4 }
 0xd9f   :  { %9755 = vmatmul.mubr.f32.gmra.mrb[142].mxu1 %v12456_v23 }
 0xda0   :  { %9757 = vmatprep.mubr.msk.f32.mxu1 %vm10684_vm0, %v14580_v4 }
 0xda3   :  { %9758 = vmatmul.mubr.f32.gmra.mrb[144].mxu1 %v12464_v39 }
 0xda4   :  { %9760 = vmatprep.mubr.msk.f32.mxu1 %vm10684_vm0, %v14580_v4 }
 0xda7   :  { %9761 = vmatmul.mubr.f32.gmra.mrb[146].mxu1 %v12472_v27  ;;  %v12722_v27 = vld [vmem:[%s14609_s12 + $0x3] ss:$0 sm:$0xff] }
 0xda8   :  { %9763 = vmatprep.mubr.msk.f32.mxu1 %vm10684_vm0, %v14580_v4 }
 0xdab   :  { %9764 = vmatmul.mubr.f32.gmra.mrb[148].mxu1 %v12480_v10 }
 0xdac   :  { %9766 = vmatprep.mubr.msk.f32.mxu1 %vm10684_vm0, %v14580_v4 }
 0xdaf   :  { %9767 = vmatmul.mubr.f32.gmra.mrb[150].mxu1 %v12488_v47 }
 0xdb0   :  { %9769 = vmatprep.mubr.msk.f32.mxu1 %vm10684_vm0, %v14580_v4 }
 0xdb3   :  { %9770 = vmatmul.mubr.msk.f32.gmra.mrb[152].mxu1 %vm288_vm2, %v11223_v9 }
 0xe06   :  { %v2530_v35 = vpop.f32.mrb[116].mxu1 }
 0xe07   :  { %v12713_v44 = vadd.f32 %v2530_v35, %v12232_v17  ;;  %v9570_v31 = vpop.f32.mrb[117].mxu1 }
 0xe26   :  { %v2626_v21 = vpop.f32.mrb[118].mxu1 }
 0xe27   :  { %v2627_v23 = vadd.f32 %v7831_v19, %v2626_v21  ;;  %v9605_v39 = vpop.f32.mrb[119].mxu1 }
 0xe29   :  { %7888 = vmatmul.mubr.msk.f32.vlgmr.msra.gmra.mrb[148].mxu0 %vm752_vm3, %v2627_v23 }
 0xe46   :  { %v2896_v10 = vpop.f32.mrb[120].mxu1 }
 0xe47   :  { %v9723_v47 = vpop.f32.mrb[121].mxu1  ;;  %v2897_v17 = vadd.f32 %v12722_v27, %v2896_v10 }
 0xe4a   :  { %v2901_v29 = vpop.f32.mrb[122].mxu1 }
 0xe4b   :  { %v2902_v59 = vadd.f32 %v12722_v27, %v2901_v29  ;;  %v9726_v24 = vpop.f32.mrb[123].mxu1 }
 0xe4d   :  { %v10373_v60 = vpack.c.bf16 %v2902_v59, %v2897_v17 }
 0xe4e   :  { %v2906_v61 = vpop.f32.mrb[124].mxu1 }
 0xe4f   :  { %v9729_v62 = vpop.f32.mrb[125].mxu1  ;;  %10374 = vmatpush1.bf16.msra.mxu1 %v10373_v60  ;;  %v2907_v63 = vadd.f32 %v12722_v27, %v2906_v61 }
 0xe50   :  { %10375 = vmatprep.subr.bf16.mxu1 %v10683_v0 }
 0xe52   :  { %v2911_v1 = vpop.f32.mrb[126].mxu1 }
 0xe53   :  { %v2912_v2 = vadd.f32 %v12722_v27, %v2911_v1  ;;  %v9732_v3 = vpop.f32.mrb[127].mxu1 }
 0xe55   :  { %v10376_v5 = vpack.c.bf16 %v2912_v2, %v2907_v63 }
 0xe56   :  { %v2916_v6 = vpop.f32.mrb[128].mxu1 }
 0xe57   :  { %v9735_v36 = vpop.f32.mrb[129].mxu1  ;;  %10377 = vmatpush1.bf16.msra.mxu1 %v10376_v5  ;;  %v2917_v7 = vadd.f32 %v12722_v27, %v2916_v6 }
 0xe58   :  { %10378 = vmatprep.subr.bf16.mxu1 %v10683_v0 }
 0xe5a   :  { %v2921_v20 = vpop.f32.mrb[130].mxu1 }
 0xe5b   :  { %v2922_v8 = vadd.f32 %v12722_v27, %v2921_v20  ;;  %v9738_v15 = vpop.f32.mrb[131].mxu1 }
 0xe5d   :  { %v10379_v40 = vpack.c.bf16 %v2922_v8, %v2917_v7  ;;  %v7891_v8 = vld [vmem:[%s14555_s13 + $0x68] sm:$0xff] }
 0xe5e   :  { %v2926_v16 = vpop.f32.mrb[132].mxu1 }
 0xe5f   :  { %v9741_v12 = vpop.f32.mrb[133].mxu1  ;;  %10380 = vmatpush1.bf16.msra.mxu1 %v10379_v40  ;;  %v2927_v37 = vadd.f32 %v12722_v27, %v2926_v16 }
 0xe60   :  { %10381 = vmatprep.subr.bf16.mxu1 %v10683_v0 }
 0xe62   :  { %v2931_v38 = vpop.f32.mrb[134].mxu1 }
 0xe63   :  { %v2932_v11 = vadd.f32 %v12722_v27, %v2931_v38  ;;  %v9744_v18 = vpop.f32.mrb[135].mxu1  ;;  %v7893_v38 = vld [vmem:[%s14555_s13 + $0x78] sm:$0xff] }
 0xe65   :  { %v10382_v13 = vpack.c.bf16 %v2932_v11, %v2927_v37  ;;  %v7892_v37 = vld [vmem:[%s14555_s13 + $0x70] sm:$0xff] }
 0xe66   :  { %v2936_v14 = vpop.f32.mrb[136].mxu1  ;;  %v10400_v11 = vpack.c.bf16 %v7893_v38, %v7892_v37 }
 0xe67   :  { %v9747_v25 = vpop.f32.mrb[137].mxu1  ;;  %10383 = vmatpush1.bf16.msra.mxu1 %v10382_v13  ;;  %v2937_v41 = vadd.f32 %v12722_v27, %v2936_v14 }
 0xe68   :  { %10384 = vmatprep.subr.bf16.mxu1 %v10683_v0  ;;  %v7895_v25 = vld [vmem:[%s14556_s14] ss:$0 sm:$0xff] }
 0xe6a   :  { %v2941_v26 = vpop.f32.mrb[138].mxu1 }
 0xe6b   :  { %v2942_v28 = vadd.f32 %v12722_v27, %v2941_v26  ;;  %v9750_v43 = vpop.f32.mrb[139].mxu1 }
 0xe6c   :  { %v12776_v43 = vsel %vm288_vm2, %v11223_v9, 0.0  ;;  %v3325_v9 = vld [vmem:[%s14557_s17 + $0x48] sm:$0xff] }
 0xe6d   :  { %v10385_v30 = vpack.c.bf16 %v2942_v28, %v2937_v41 }
 0xe6e   :  { %v2946_v32 = vpop.f32.mrb[140].mxu1 }
 0xe6f   :  { %v9753_v33 = vpop.f32.mrb[141].mxu1  ;;  %10386 = vmatpush1.bf16.msra.mxu1 %v10385_v30  ;;  %v2947_v45 = vadd.f32 %v12722_v27, %v2946_v32  ;;  %v3316_v32 = vld [vmem:[%s14557_s17] sm:$0xff] }
 0xe70   :  { %10387 = vmatprep.subr.bf16.mxu1 %v10683_v0  ;;  %v3324_v33 = vld [vmem:[%s14557_s17 + $0x40] sm:$0xff] }
 0xe72   :  { %v2951_v34 = vpop.f32.mrb[142].mxu1 }
 0xe73   :  { %v2952_v50 = vadd.f32 %v12722_v27, %v2951_v34  ;;  %v9756_v46 = vpop.f32.mrb[143].mxu1  ;;  %v7899_v34 = vcombine.high %v3316_v32, %v3324_v33 }
 0xe74   :  { %v3340_v46 = vld [vmem:[%s14557_s17 + $0xc0] sm:$0xff] }
 0xe75   :  { %v10388_v51 = vpack.c.bf16 %v2952_v50, %v2947_v45  ;;  %v7898_v45 = vcombine.low %v3316_v32, %v3324_v33  ;;  %v3332_v50 = vld [vmem:[%s14557_s17 + $0x80] sm:$0xff]  ;;  %4168 = vmatprep.subr.bf16.mxu0 %v7899_v34  ;;  %v3437_v34 = vld [vmem:[%s14557_s17 + $0x3c8] sm:$0xff] }
 0xe76   :  { %v2956_v53 = vpop.f32.mrb[144].mxu1  ;;  %v3428_v32 = vld [vmem:[%s14557_s17 + $0x380] sm:$0xff] }
 0xe77   :  { %v9759_v54 = vpop.f32.mrb[145].mxu1  ;;  %10389 = vmatpush1.bf16.msra.mxu1 %v10388_v51  ;;  %v2957_v49 = vadd.f32 %v12722_v27, %v2956_v53  ;;  %4169 = vmatpush1.bf16.msra.mxu0 %v7898_v45  ;;  %v3436_v33 = vld [vmem:[%s14557_s17 + $0x3c0] sm:$0xff] }
 0xe78   :  { %10390 = vmatprep.subr.bf16.mxu1 %v10683_v0  ;;  %v7915_v54 = vcombine.high %v3332_v50, %v3340_v46  ;;  %v8011_v45 = vcombine.high %v3428_v32, %v3436_v33 }
 0xe7a   :  { %v2961_v55 = vpop.f32.mrb[146].mxu1  ;;  %4170 = vmatprep.subr.bf16.mxu0 %v7915_v54  ;;  %v3319_v54 = vld [vmem:[%s14557_s17 + $0x18] sm:$0xff] }
 0xe7b   :  { %v2962_v22 = vadd.f32 %v12722_v27, %v2961_v55  ;;  %v9762_v52 = vpop.f32.mrb[147].mxu1  ;;  %v3341_v55 = vld [vmem:[%s14557_s17 + $0xc8] sm:$0xff] }
 0xe7d   :  { %v10391_v56 = vpack.c.bf16 %v2962_v22, %v2957_v49  ;;  %v3333_v49 = vld [vmem:[%s14557_s17 + $0x88] sm:$0xff]  ;;  %v3348_v22 = vld [vmem:[%s14557_s17 + $0x100] sm:$0xff] }
 0xe7e   :  { %v2966_v58 = vpop.f32.mrb[148].mxu1  ;;  %v7917_v52 = vcombine.high %v3333_v49, %v3341_v55 }
 0xe7f   :  { %v9765_v57 = vpop.f32.mrb[149].mxu1  ;;  %10392 = vmatpush1.bf16.msra.mxu1 %v10391_v56  ;;  %v2967_v35 = vadd.f32 %v12722_v27, %v2966_v58  ;;  %v3356_v56 = vld [vmem:[%s14557_s17 + $0x140] sm:$0xff]  ;;  %v3349_v58 = vld [vmem:[%s14557_s17 + $0x108] sm:$0xff] }
 0xe80   :  { %10393 = vmatprep.subr.bf16.mxu1 %v10683_v0  ;;  %v3357_v57 = vld [vmem:[%s14557_s17 + $0x148] sm:$0xff] }
 0xe82   :  { %v2971_v31 = vpop.f32.mrb[150].mxu1 }
 0xe83   :  { %v2972_v19 = vadd.f32 %v12722_v27, %v2971_v31  ;;  %v9768_v21 = vpop.f32.mrb[151].mxu1  ;;  %v7916_v31 = vcombine.low %v3333_v49, %v3341_v55  ;;  %v3327_v55 = vld [vmem:[%s14557_s17 + $0x58] sm:$0xff] }
 0xe84   :  { %v7933_v21 = vcombine.high %v3349_v58, %v3357_v57 }
 0xe85   :  { %v10394_v23 = vpack.c.bf16 %v2972_v19, %v2967_v35  ;;  %v7914_v35 = vcombine.low %v3332_v50, %v3340_v46  ;;  %v7931_v19 = vcombine.high %v3348_v22, %v3356_v56 }
 0xe86   :  { %v2976_v39 = vpop.f32.mrb[152].mxu1 }
 0xe87   :  { %v9771_v10 = vpop.f32.mrb[153].mxu1  ;;  %10395 = vmatpush1.bf16.msra.mxu1 %v10394_v23  ;;  %v2977_v47 = vadd.f32 %v12722_v27, %v2976_v39  ;;  %4171 = vmatpush1.bf16.msra.mxu0 %v7914_v35  ;;  %v7930_v23 = vcombine.low %v3348_v22, %v3356_v56  ;;  %v7932_v39 = vcombine.low %v3349_v58, %v3357_v57  ;;  %v10687_v58 = vmov 0  }
 0xe88   :  { %3161 = vmatprep.subr.mxu1 %v14580_v4  ;;  %4172 = vmatprep.subr.bf16.mxu0 %v7931_v19  ;;  %v7905_v56 = vcombine.high %v3319_v54, %v3327_v55 }
 0xe89   :  { %4200 = vmatprep.mubr.bf16.mxu0 %v10687_v58 }
 0xe8b   :  { %3162 = vmatpush1.msra.mxu1 %v2977_v47  ;;  %4173 = vmatpush1.bf16.msra.mxu0 %v7930_v23 }
 0xe8c   :  { %10396 = vmatprep.subr.bf16.mxu1 %v10683_v0 }
 0xefc   :  { %v3100_v17 = vpop.f32.mrb[148].mxu0 }
 0xefd   :  { %v3102_v29 = vpop.f32.mrb[149].mxu0  ;;  %v3105_v60 = vmul.f32 0.17677669, %v3100_v17 }
 0xefe   :  { %v3106_v59 = vmul.f32 0.17677669, %v3102_v29 }
 0xf00   :  { %v3108_v24 = vadd.f32 %v3106_v59, %v11584_v48  ;;  %v7890_v48 = vld [vmem:[%s14555_s13 + $0x60] sm:$0xff] }
 0xf01   :  { %v10397_v12 = vpack.c.bf16 %v7891_v8, %v7890_v48  ;;  %v3364_v59 = vld [vmem:[%s14557_s17 + $0x180] sm:$0xff] }
 0xf02   :  { %v3109_v61 = vsel %vm882_vm6, %v3108_v24, -inf  ;;  %v3396_v8 = vld [vmem:[%s14557_s17 + $0x280] sm:$0xff] }
 0xf03   :  { %v3110_v62 = vmax.f32 %v3105_v60, %v3109_v61 }
 0xf05   :  { %3111 = vmax.xlane.f32.xlu0 %v3110_v62  ;;  %v3373_v62 = vld [vmem:[%s14557_s17 + $0x1c8] sm:$0xff] }
 0xf92   :  { %v3112_v63 = vpop.xlane.xlu0 %3111 }
 0xf93   :  { %v3113_v1 = vsub.f32 %v3105_v60, %v3112_v63  ;;  %v3114_v2 = vsub.f32 %v3108_v24, %v3112_v63  ;;  %v3372_v24 = vld [vmem:[%s14557_s17 + $0x1c0] sm:$0xff]  ;;  %v3365_v60 = vld [vmem:[%s14557_s17 + $0x188] sm:$0xff] }
 0xf94   :  { %v7947_v61 = vcombine.high %v3364_v59, %v3372_v24  ;;  %v7946_v63 = vcombine.low %v3364_v59, %v3372_v24  ;;  %v3335_v59 = vld [vmem:[%s14557_s17 + $0x98] sm:$0xff] }
 0xf95   :  { %v3115_v3 = vmul.f32 1.442695, %v3113_v1  ;;  %v3117_v5 = vmul.f32 1.442695, %v3114_v2  ;;  %v7948_v1 = vcombine.low %v3365_v60, %v3373_v62  ;;  %v7949_v2 = vcombine.high %v3365_v60, %v3373_v62 }
 0xf96   :  { %4174 = vmatprep.subr.bf16.mxu0 %v7947_v61 }
 0xf97   :  { %10577 = vpow2.f32 %v3115_v3  ;;  %4175 = vmatpush1.bf16.msra.mxu0 %v7946_v63  ;;  %v3380_v3 = vld [vmem:[%s14557_s17 + $0x200] sm:$0xff]  ;;  %v3350_v63 = vld [vmem:[%s14557_s17 + $0x110] sm:$0xff] }
 0xf98   :  { %10579 = vpow2.f32 %v3117_v5  ;;  %v3388_v5 = vld [vmem:[%s14557_s17 + $0x240] sm:$0xff] }
 0xfa1   :  { %v10578_v27 = vpop.eup %10577 }
 0xfa2   :  { %v10580_v6 = vpop.eup %10579 }
 0xfa3   :  { %v3119_v36 = vsel %vm882_vm6, %v10580_v6, 0.0 }
 0xfa4   :  { %v3120_v7 = vadd.f32 %v10578_v27, %v3119_v36  ;;  %v3389_v36 = vld [vmem:[%s14557_s17 + $0x248] sm:$0xff] }
 0xfa6   :  { %3121 = vadd.xlane.f32.xlu1 %v3120_v7  ;;  %v7962_v7 = vcombine.low %v3380_v3, %v3388_v5 }
0x1033   :  { %v3122_v20 = vpop.xlane.xlu1 %3121 }
0x1034   :  { %10581 = vrcp.f32 %v3122_v20 }
0x103e   :  { %v10582_v15 = vpop.eup %10581 }
0x103f   :  { %v3124_v40 = vmul.f32 %v10582_v15, %v10578_v27  ;;  %v3125_v16 = vmul.f32 %v10582_v15, %v10580_v6  ;;  %v3381_v27 = vld [vmem:[%s14557_s17 + $0x208] sm:$0xff]  ;;  %v7963_v6 = vcombine.high %v3380_v3, %v3388_v5  ;;  %v3404_v15 = vld [vmem:[%s14557_s17 + $0x2c0] sm:$0xff]  ;;  %v3359_v3 = vld [vmem:[%s14557_s17 + $0x158] sm:$0xff] }
0x1040   :  { %v7964_v20 = vcombine.low %v3381_v27, %v3389_v36  ;;  %v7965_v48 = vcombine.high %v3381_v27, %v3389_v36  ;;  %v7978_v37 = vcombine.low %v3396_v8, %v3404_v15 }
0x1041   :  { %7889 = vmatprep.mubr.msk.f32.mxu1 %vm882_vm6, %v3125_v16  ;;  %4176 = vmatprep.subr.bf16.mxu0 %v7963_v6  ;;  %v7979_v16 = vcombine.high %v3396_v8, %v3404_v15  ;;  %v3375_v8 = vld [vmem:[%s14557_s17 + $0x1d8] sm:$0xff] }
0x1042   :  { %3194 = vmatmul.mubr.f32.vlgmr.msra.gmra.mrb[154].mxu1 %v3124_v40  ;;  %4177 = vmatpush1.bf16.msra.mxu0 %v7962_v7  ;;  %v3397_v40 = vld [vmem:[%s14557_s17 + $0x288] sm:$0xff]  ;;  %v3366_v7 = vld [vmem:[%s14557_s17 + $0x190] sm:$0xff] }
0x1043   :  { %10398 = vmatpush3.bf16.msra.mxu1 %v10397_v12  ;;  %9780 = vmatprep.mubr.msk.f32.mxu1 %vm10684_vm0, %v14580_v4  ;;  %v3405_v12 = vld [vmem:[%s14557_s17 + $0x2c8] sm:$0xff] }
0x1044   :  { %10399 = vmatprep.subr.bf16.mxu1 %v10683_v0  ;;  %v7980_v38 = vcombine.low %v3397_v40, %v3405_v12  ;;  %4178 = vmatprep.subr.bf16.mxu0 %v7979_v16 }
0x1046   :  { %4179 = vmatpush1.bf16.msra.mxu0 %v7978_v37  ;;  %v3382_v37 = vld [vmem:[%s14557_s17 + $0x210] sm:$0xff] }
0x1047   :  { %10401 = vmatpush3.bf16.msra.mxu1 %v10400_v11  ;;  %v7981_v11 = vcombine.high %v3397_v40, %v3405_v12 }
0x1115   :  { %v3195_v18 = vpop.f32.mrb[154].mxu1 }
0x1116   :  { %v3197_v13 = vpop.f32.mrb[155].mxu1  ;;  %9781 = vmatmul.mubr.msk.f32.vlgmr.msra.gmra.mrb[156].mxu1 %vm752_vm3, %v3195_v18  ;;  %v3412_v18 = vld [vmem:[%s14557_s17 + $0x300] sm:$0xff] }
0x1117   :  { %v3420_v13 = vld [vmem:[%s14557_s17 + $0x340] sm:$0xff]  ;;  %4241 = vmatprep.mubr.bf16.mxu1 %v10687_v58 }
0x11e9   :  { %v3273_v14 = vpop.f32.mrb[156].mxu1 }
0x11ea   :  { %v3277_v41 = vadd.f32 %v3273_v14, %v12713_v44  ;;  %v9782_v26 = vpop.f32.mrb[157].mxu1  ;;  %v3317_v44 = vld [vmem:[%s14557_s17 + $0x8] sm:$0xff] }
0x11eb   :  { %v7900_v51 = vcombine.low %v3317_v44, %v3325_v9  ;;  %v7901_v53 = vcombine.high %v3317_v44, %v3325_v9  ;;  %v3413_v14 = vld [vmem:[%s14557_s17 + $0x308] sm:$0xff]  ;;  %v7994_v26 = vcombine.low %v3412_v18, %v3420_v13  ;;  %v8010_v9 = vcombine.low %v3428_v32, %v3436_v33  ;;  %v3407_v32 = vld [vmem:[%s14557_s17 + $0x2d8] sm:$0xff] }
0x11ec   :  { %v3285_v28 = vadd.f32 %v7895_v25, %v3277_v41  ;;  %v7995_v25 = vcombine.high %v3412_v18, %v3420_v13  ;;  %v3421_v41 = vld [vmem:[%s14557_s17 + $0x348] sm:$0xff]  ;;  %v3391_v18 = vld [vmem:[%s14557_s17 + $0x258] sm:$0xff] }
0x11ed   :  { %4209 = vmatprep.subr.bf16.mxu1 %v7901_v53  ;;  %v3429_v44 = vld [vmem:[%s14557_s17 + $0x388] sm:$0xff]  ;;  %v3326_v53 = vld [vmem:[%s14557_s17 + $0x50] sm:$0xff] }
0x11ee   :  { %v3286_v30 = vadd.f32 %v3285_v28, %v12776_v43  ;;  %4210 = vmatpush1.bf16.msra.mxu1 %v7900_v51  ;;  %v7996_v28 = vcombine.low %v3413_v14, %v3421_v41  ;;  %4180 = vmatprep.subr.bf16.mxu0 %v7995_v25  ;;  %v8012_v50 = vcombine.low %v3429_v44, %v3437_v34  ;;  %v3318_v51 = vld [vmem:[%s14557_s17 + $0x10] sm:$0xff] }
0x11ef   :  { %4211 = vmatprep.subr.bf16.mxu1 %v7917_v52  ;;  %4181 = vmatpush1.bf16.msra.mxu0 %v7994_v26  ;;  %v8013_v46 = vcombine.high %v3429_v44, %v3437_v34  ;;  %v7903_v49 = vcombine.high %v3318_v51, %v3326_v53  ;;  %v7902_v22 = vcombine.low %v3318_v51, %v3326_v53  ;;  %v3398_v26 = vld [vmem:[%s14557_s17 + $0x290] sm:$0xff]  ;;  %v3423_v51 = vld [vmem:[%s14557_s17 + $0x358] sm:$0xff] }
0x11f0   :  { %3289 = vadd.xlane.f32.xlu0 %v3286_v30  ;;  %4182 = vmatprep.subr.bf16.mxu0 %v8011_v45  ;;  %v7904_v52 = vcombine.low %v3319_v54, %v3327_v55 }
0x11f2   :  { %4212 = vmatpush1.bf16.msra.mxu1 %v7916_v31 }
0x11f3   :  { %4213 = vmatprep.subr.bf16.mxu1 %v7933_v21  ;;  %4183 = vmatpush1.bf16.msra.mxu0 %v8010_v9  ;;  %v7896_v21 = vld [vmem:[%s14558_s15] ss:$0 sm:$0xff]  ;;  %v3414_v9 = vld [vmem:[%s14557_s17 + $0x310] sm:$0xff] }
0x11f4   :  { %4250 = vmatprep.subr.bf16.mxu0 %v7903_v49 }
0x11f6   :  { %4214 = vmatpush1.bf16.msra.mxu1 %v7932_v39  ;;  %v7897_v39 = vld [vmem:[%s14559_s16] ss:$0 sm:$0xff] }
0x11f7   :  { %4215 = vmatprep.subr.bf16.mxu1 %v7949_v2  ;;  %v3351_v2 = vld [vmem:[%s14557_s17 + $0x118] sm:$0xff] }
0x11f8   :  { %v7937_v36 = vcombine.high %v3351_v2, %v3359_v3  ;;  %v7936_v40 = vcombine.low %v3351_v2, %v3359_v3  ;;  %v3345_v2 = vld [vmem:[%s14557_s17 + $0xe8] sm:$0xff] }
0x11fa   :  { %4216 = vmatpush1.bf16.msra.mxu1 %v7948_v1  ;;  %v3358_v1 = vld [vmem:[%s14557_s17 + $0x150] sm:$0xff] }
0x11fb   :  { %4217 = vmatprep.subr.bf16.mxu1 %v7965_v48  ;;  %v7935_v6 = vcombine.high %v3350_v63, %v3358_v1  ;;  %v3367_v48 = vld [vmem:[%s14557_s17 + $0x198] sm:$0xff]  ;;  %v7934_v15 = vcombine.low %v3350_v63, %v3358_v1  ;;  %v3344_v63 = vld [vmem:[%s14557_s17 + $0xe0] sm:$0xff]  ;;  %v3337_v1 = vld [vmem:[%s14557_s17 + $0xa8] sm:$0xff] }
0x11fc   :  { %v7953_v12 = vcombine.high %v3367_v48, %v3375_v8 }
0x11fe   :  { %4218 = vmatpush1.bf16.msra.mxu1 %v7964_v20  ;;  %v3374_v20 = vld [vmem:[%s14557_s17 + $0x1d0] sm:$0xff] }
0x11ff   :  { %4219 = vmatprep.subr.bf16.mxu1 %v7981_v11  ;;  %v7951_v16 = vcombine.high %v3366_v7, %v3374_v20  ;;  %v3383_v11 = vld [vmem:[%s14557_s17 + $0x218] sm:$0xff]  ;;  %v7950_v13 = vcombine.low %v3366_v7, %v3374_v20  ;;  %v3360_v7 = vld [vmem:[%s14557_s17 + $0x160] sm:$0xff]  ;;  %v3353_v20 = vld [vmem:[%s14557_s17 + $0x128] sm:$0xff] }
0x1200   :  { %v7968_v44 = vcombine.low %v3383_v11, %v3391_v18 }
0x1202   :  { %4220 = vmatpush1.bf16.msra.mxu1 %v7980_v38  ;;  %v3390_v38 = vld [vmem:[%s14557_s17 + $0x250] sm:$0xff] }
0x1203   :  { %v7967_v25 = vcombine.high %v3382_v37, %v3390_v38  ;;  %v7966_v33 = vcombine.low %v3382_v37, %v3390_v38  ;;  %v3376_v37 = vld [vmem:[%s14557_s17 + $0x1e0] sm:$0xff]  ;;  %v3369_v38 = vld [vmem:[%s14557_s17 + $0x1a8] sm:$0xff] }
0x127d   :  { %v3290_v10 = vpop.xlane.xlu0 %3289 }
0x127e   :  { %v3292_v47 = vmul.f32 0.0078125, %v3290_v10 }
0x1280   :  { %v12815_v17 = vsub.f32 %v3286_v30, %v3292_v47  ;;  %v7997_v30 = vcombine.high %v3413_v14, %v3421_v41  ;;  %v3334_v47 = vld [vmem:[%s14557_s17 + $0x90] sm:$0xff]  ;;  %v7952_v14 = vcombine.low %v3367_v48, %v3375_v8  ;;  %v7969_v41 = vcombine.high %v3383_v11, %v3391_v18  ;;  %v3361_v48 = vld [vmem:[%s14557_s17 + $0x168] sm:$0xff] }
0x1281   :  { %v3377_v11 = vld [vmem:[%s14557_s17 + $0x1e8] sm:$0xff] }
0x1282   :  { %v3294_v29 = vmul.f32 %v12815_v17, %v12815_v17  ;;  %4221 = vmatprep.subr.bf16.mxu1 %v7997_v30  ;;  %v3399_v30 = vld [vmem:[%s14557_s17 + $0x298] sm:$0xff] }
0x1283   :  { %4222 = vmatpush1.bf16.msra.mxu1 %v7996_v28  ;;  %v3406_v28 = vld [vmem:[%s14557_s17 + $0x2d0] sm:$0xff]  ;;  %v7985_v34 = vcombine.high %v3399_v30, %v3407_v32  ;;  %v7984_v54 = vcombine.low %v3399_v30, %v3407_v32  ;;  %v3393_v30 = vld [vmem:[%s14557_s17 + $0x268] sm:$0xff] }
0x1284   :  { %3295 = vadd.xlane.f32.xlu1 %v3294_v29  ;;  %4223 = vmatprep.subr.bf16.mxu1 %v8013_v46  ;;  %v3342_v29 = vld [vmem:[%s14557_s17 + $0xd0] sm:$0xff]  ;;  %v7983_v45 = vcombine.high %v3398_v26, %v3406_v28  ;;  %v3415_v46 = vld [vmem:[%s14557_s17 + $0x318] sm:$0xff]  ;;  %v7982_v53 = vcombine.low %v3398_v26, %v3406_v28  ;;  %v3392_v26 = vld [vmem:[%s14557_s17 + $0x260] sm:$0xff] }
0x1285   :  { %v7919_v61 = vcombine.high %v3334_v47, %v3342_v29  ;;  %v7918_v5 = vcombine.low %v3334_v47, %v3342_v29  ;;  %v8001_v55 = vcombine.high %v3415_v46, %v3423_v51  ;;  %v3329_v47 = vld [vmem:[%s14557_s17 + $0x68] sm:$0xff] }
0x1286   :  { %v3385_v28 = vld [vmem:[%s14557_s17 + $0x228] sm:$0xff] }
0x1287   :  { %4224 = vmatpush1.bf16.msra.mxu1 %v8012_v50  ;;  %v3422_v50 = vld [vmem:[%s14557_s17 + $0x350] sm:$0xff] }
0x1288   :  { %4291 = vmatprep.subr.bf16.mxu1 %v7905_v56  ;;  %v7999_v49 = vcombine.high %v3414_v9, %v3422_v50  ;;  %v3431_v56 = vld [vmem:[%s14557_s17 + $0x398] sm:$0xff] }
0x1311   :  { %v3296_v57 = vpop.xlane.xlu1 %3295 }
0x1312   :  { %v3297_v35 = vmul.f32 0.0078125, %v3296_v57  ;;  %v3439_v57 = vld [vmem:[%s14557_s17 + $0x3d8] sm:$0xff] }
0x1314   :  { %v3298_v31 = vadd.f32 1e-05, %v3297_v35  ;;  %v7998_v35 = vcombine.low %v3414_v9, %v3422_v50  ;;  %v3408_v9 = vld [vmem:[%s14557_s17 + $0x2e0] sm:$0xff]  ;;  %v3401_v50 = vld [vmem:[%s14557_s17 + $0x2a8] sm:$0xff] }
0x1316   :  { %10583 = vrsqrt.f32 %v3298_v31  ;;  %v8000_v31 = vcombine.low %v3415_v46, %v3423_v51  ;;  %v3409_v46 = vld [vmem:[%s14557_s17 + $0x2e8] sm:$0xff] }
0x1320   :  { %v10584_v19 = vpop.eup %10583 }
0x1321   :  { %v3300_v23 = vmul.f32 %v10584_v19, %v12815_v17  ;;  %v3343_v17 = vld [vmem:[%s14557_s17 + $0xd8] sm:$0xff] }
0x1322   :  { %v7921_v62 = vcombine.high %v3335_v59, %v3343_v17  ;;  %v7920_v27 = vcombine.low %v3335_v59, %v3343_v17  ;;  %v8016_v59 = vcombine.low %v3431_v56, %v3439_v57 }
0x1323   :  { %v3307_v10 = vmul.f32 %v7896_v21, %v3300_v23  ;;  %v8017_v21 = vcombine.high %v3431_v56, %v3439_v57  ;;  %v3320_v23 = vld [vmem:[%s14557_s17 + $0x20] sm:$0xff]  ;;  %v3425_v56 = vld [vmem:[%s14557_s17 + $0x368] sm:$0xff] }
0x1325   :  { %v12912_v24 = vadd.f32 %v7897_v39, %v3307_v10  ;;  %v3328_v39 = vld [vmem:[%s14557_s17 + $0x60] sm:$0xff]  ;;  %v3321_v10 = vld [vmem:[%s14557_s17 + $0x28] sm:$0xff] }
0x1326   :  { %v7907_v17 = vcombine.high %v3320_v23, %v3328_v39  ;;  %v7906_v3 = vcombine.low %v3320_v23, %v3328_v39  ;;  %v3440_v23 = vld [vmem:[%s14557_s17 + $0x3e0] sm:$0xff]  ;;  %v3433_v39 = vld [vmem:[%s14557_s17 + $0x3a8] sm:$0xff] }
0x1327   :  { %v12916_v60 = vpack.c.bf16 %v12912_v24, %v12912_v24 }
0x1329   :  { %4201 = vmatmul.mubr.bf16.vlgmr.msra.gmra.mrb[152].mxu0 %v12916_v60  ;;  %4242 = vmatmul.mubr.bf16.vlgmr.msra.gmra.mrb[160].mxu1 %v12916_v60 }
0x132a   :  { %4251 = vmatpush1.bf16.msra.mxu0 %v7902_v22  ;;  %4292 = vmatpush1.bf16.msra.mxu1 %v7904_v52  ;;  %v3430_v22 = vld [vmem:[%s14557_s17 + $0x390] sm:$0xff] }
0x132b   :  { %4252 = vmatprep.subr.bf16.mxu0 %v7919_v61  ;;  %4293 = vmatprep.subr.bf16.mxu1 %v7921_v62  ;;  %v3438_v52 = vld [vmem:[%s14557_s17 + $0x3d0] sm:$0xff]  ;;  %v7909_v61 = vcombine.high %v3321_v10, %v3329_v47  ;;  %v3336_v62 = vld [vmem:[%s14557_s17 + $0xa0] sm:$0xff] }
0x132c   :  { %4282 = vmatprep.mubr.bf16.mxu0 %v10687_v58  ;;  %4323 = vmatprep.mubr.bf16.mxu1 %v10687_v58  ;;  %v8015_v19 = vcombine.high %v3430_v22, %v3438_v52  ;;  %v8014_v29 = vcombine.low %v3430_v22, %v3438_v52  ;;  %v7922_v8 = vcombine.low %v3336_v62, %v3344_v63  ;;  %v3424_v22 = vld [vmem:[%s14557_s17 + $0x360] sm:$0xff]  ;;  %v3417_v52 = vld [vmem:[%s14557_s17 + $0x328] sm:$0xff] }
0x132e   :  { %4253 = vmatpush1.bf16.msra.mxu0 %v7918_v5  ;;  %4294 = vmatpush1.bf16.msra.mxu1 %v7920_v27  ;;  %v7908_v5 = vcombine.low %v3321_v10, %v3329_v47  ;;  %v7923_v27 = vcombine.high %v3336_v62, %v3344_v63  ;;  %v3441_v10 = vld [vmem:[%s14557_s17 + $0x3e8] sm:$0xff]  ;;  %v3330_v62 = vld [vmem:[%s14557_s17 + $0x70] sm:$0xff]  ;;  %v3323_v63 = vld [vmem:[%s14557_s17 + $0x38] sm:$0xff] }
0x132f   :  { %4254 = vmatprep.subr.bf16.mxu0 %v7935_v6  ;;  %4295 = vmatprep.subr.bf16.mxu1 %v7937_v36  ;;  %v7925_v6 = vcombine.high %v3337_v1, %v3345_v2  ;;  %v3352_v36 = vld [vmem:[%s14557_s17 + $0x120] sm:$0xff] }
0x1330   :  { %v7938_v18 = vcombine.low %v3352_v36, %v3360_v7 }
0x1332   :  { %4255 = vmatpush1.bf16.msra.mxu0 %v7934_v15  ;;  %4296 = vmatpush1.bf16.msra.mxu1 %v7936_v40  ;;  %v7924_v15 = vcombine.low %v3337_v1, %v3345_v2  ;;  %v7939_v40 = vcombine.high %v3352_v36, %v3360_v7  ;;  %v3331_v1 = vld [vmem:[%s14557_s17 + $0x78] sm:$0xff]  ;;  %v3346_v36 = vld [vmem:[%s14557_s17 + $0xf0] sm:$0xff] }
0x1333   :  { %4256 = vmatprep.subr.bf16.mxu0 %v7951_v16  ;;  %4297 = vmatprep.subr.bf16.mxu1 %v7953_v12  ;;  %v7941_v16 = vcombine.high %v3353_v20, %v3361_v48  ;;  %v3368_v12 = vld [vmem:[%s14557_s17 + $0x1a0] sm:$0xff]  ;;  %v3339_v7 = vld [vmem:[%s14557_s17 + $0xb8] sm:$0xff] }
0x1334   :  { %v7954_v32 = vcombine.low %v3368_v12, %v3376_v37 }
0x1336   :  { %4257 = vmatpush1.bf16.msra.mxu0 %v7950_v13  ;;  %4298 = vmatpush1.bf16.msra.mxu1 %v7952_v14  ;;  %v7940_v13 = vcombine.low %v3353_v20, %v3361_v48  ;;  %v7955_v14 = vcombine.high %v3368_v12, %v3376_v37  ;;  %v3347_v20 = vld [vmem:[%s14557_s17 + $0xf8] sm:$0xff]  ;;  %v3362_v12 = vld [vmem:[%s14557_s17 + $0x170] sm:$0xff] }
0x1337   :  { %4258 = vmatprep.subr.bf16.mxu0 %v7967_v25  ;;  %4299 = vmatprep.subr.bf16.mxu1 %v7969_v41  ;;  %v7957_v25 = vcombine.high %v3369_v38, %v3377_v11  ;;  %v3384_v41 = vld [vmem:[%s14557_s17 + $0x220] sm:$0xff]  ;;  %v3355_v37 = vld [vmem:[%s14557_s17 + $0x138] sm:$0xff] }
0x1338   :  { %v7970_v51 = vcombine.low %v3384_v41, %v3392_v26 }
0x133a   :  { %4259 = vmatpush1.bf16.msra.mxu0 %v7966_v33  ;;  %4300 = vmatpush1.bf16.msra.mxu1 %v7968_v44  ;;  %v7956_v33 = vcombine.low %v3369_v38, %v3377_v11  ;;  %v7971_v44 = vcombine.high %v3384_v41, %v3392_v26  ;;  %v3363_v38 = vld [vmem:[%s14557_s17 + $0x178] sm:$0xff]  ;;  %v3378_v41 = vld [vmem:[%s14557_s17 + $0x1f0] sm:$0xff] }
0x133b   :  { %4260 = vmatprep.subr.bf16.mxu0 %v7983_v45  ;;  %4301 = vmatprep.subr.bf16.mxu1 %v7985_v34  ;;  %v7973_v45 = vcombine.high %v3385_v28, %v3393_v30  ;;  %v3400_v34 = vld [vmem:[%s14557_s17 + $0x2a0] sm:$0xff]  ;;  %v3371_v26 = vld [vmem:[%s14557_s17 + $0x1b8] sm:$0xff] }
0x133c   :  { %v7986_v57 = vcombine.low %v3400_v34, %v3408_v9 }
0x133e   :  { %4261 = vmatpush1.bf16.msra.mxu0 %v7982_v53  ;;  %4302 = vmatpush1.bf16.msra.mxu1 %v7984_v54  ;;  %v7972_v53 = vcombine.low %v3385_v28, %v3393_v30  ;;  %v7987_v54 = vcombine.high %v3400_v34, %v3408_v9  ;;  %v3379_v28 = vld [vmem:[%s14557_s17 + $0x1f8] sm:$0xff]  ;;  %v3394_v34 = vld [vmem:[%s14557_s17 + $0x270] sm:$0xff] }
0x133f   :  { %4262 = vmatprep.subr.bf16.mxu0 %v7999_v49  ;;  %4303 = vmatprep.subr.bf16.mxu1 %v8001_v55  ;;  %v7989_v49 = vcombine.high %v3401_v50, %v3409_v46  ;;  %v3416_v55 = vld [vmem:[%s14557_s17 + $0x320] sm:$0xff]  ;;  %v3387_v9 = vld [vmem:[%s14557_s17 + $0x238] sm:$0xff] }
0x1340   :  { %v8002_v47 = vcombine.low %v3416_v55, %v3424_v22 }
0x1342   :  { %4263 = vmatpush1.bf16.msra.mxu0 %v7998_v35  ;;  %4304 = vmatpush1.bf16.msra.mxu1 %v8000_v31  ;;  %v7988_v35 = vcombine.low %v3401_v50, %v3409_v46  ;;  %v8003_v31 = vcombine.high %v3416_v55, %v3424_v22  ;;  %v3395_v50 = vld [vmem:[%s14557_s17 + $0x278] sm:$0xff]  ;;  %v3410_v55 = vld [vmem:[%s14557_s17 + $0x2f0] sm:$0xff] }
0x1343   :  { %4264 = vmatprep.subr.bf16.mxu0 %v8015_v19  ;;  %4305 = vmatprep.subr.bf16.mxu1 %v8017_v21  ;;  %v8005_v19 = vcombine.high %v3417_v52, %v3425_v56  ;;  %v3432_v21 = vld [vmem:[%s14557_s17 + $0x3a0] sm:$0xff]  ;;  %v3403_v22 = vld [vmem:[%s14557_s17 + $0x2b8] sm:$0xff] }
0x1344   :  { %v8018_v2 = vcombine.low %v3432_v21, %v3440_v23 }
0x1346   :  { %4265 = vmatpush1.bf16.msra.mxu0 %v8014_v29  ;;  %4306 = vmatpush1.bf16.msra.mxu1 %v8016_v59  ;;  %v8004_v29 = vcombine.low %v3417_v52, %v3425_v56  ;;  %v8019_v59 = vcombine.high %v3432_v21, %v3440_v23  ;;  %v3411_v52 = vld [vmem:[%s14557_s17 + $0x2f8] sm:$0xff]  ;;  %v3426_v21 = vld [vmem:[%s14557_s17 + $0x370] sm:$0xff] }
0x1347   :  { %4332 = vmatprep.subr.bf16.mxu0 %v7907_v17  ;;  %4373 = vmatprep.subr.bf16.mxu1 %v7909_v61  ;;  %v8021_v17 = vcombine.high %v3433_v39, %v3441_v10  ;;  %v3322_v61 = vld [vmem:[%s14557_s17 + $0x30] sm:$0xff]  ;;  %v3419_v23 = vld [vmem:[%s14557_s17 + $0x338] sm:$0xff] }
0x1348   :  { %v7910_v48 = vcombine.low %v3322_v61, %v3330_v62 }
0x1349   :  { %4283 = vmatmul.mubr.bf16.vlgmr.msra.gmra.mrb[156].mxu0 %v12916_v60  ;;  %4324 = vmatmul.mubr.bf16.vlgmr.msra.gmra.mrb[164].mxu1 %v12916_v60 }
0x134a   :  { %4333 = vmatpush1.bf16.msra.mxu0 %v7906_v3  ;;  %4374 = vmatpush1.bf16.msra.mxu1 %v7908_v5  ;;  %v8020_v3 = vcombine.low %v3433_v39, %v3441_v10  ;;  %v7911_v5 = vcombine.high %v3322_v61, %v3330_v62  ;;  %v3427_v39 = vld [vmem:[%s14557_s17 + $0x378] sm:$0xff]  ;;  %v3442_v61 = vld [vmem:[%s14557_s17 + $0x3f0] sm:$0xff] }
0x134b   :  { %4334 = vmatprep.subr.bf16.mxu0 %v7923_v27  ;;  %4375 = vmatprep.subr.bf16.mxu1 %v7925_v6  ;;  %v7913_v27 = vcombine.high %v3323_v63, %v3331_v1  ;;  %v3338_v6 = vld [vmem:[%s14557_s17 + $0xb0] sm:$0xff]  ;;  %v3435_v62 = vld [vmem:[%s14557_s17 + $0x3b8] sm:$0xff] }
0x134c   :  { %4364 = vmatprep.mubr.bf16.mxu0 %v10687_v58  ;;  %4405 = vmatprep.mubr.bf16.mxu1 %v10687_v58  ;;  %v7926_v11 = vcombine.low %v3338_v6, %v3346_v36 }
0x134e   :  { %4335 = vmatpush1.bf16.msra.mxu0 %v7922_v8  ;;  %4376 = vmatpush1.bf16.msra.mxu1 %v7924_v15  ;;  %v7912_v8 = vcombine.low %v3323_v63, %v3331_v1  ;;  %v7927_v15 = vcombine.high %v3338_v6, %v3346_v36  ;;  %v3443_v63 = vld [vmem:[%s14557_s17 + $0x3f8] sm:$0xff]  ;;  %v10431_v36 = vld [vmem:[%s14560_s19 + $0x40] sm:$0xff]  }
0x134f   :  { %4336 = vmatprep.subr.bf16.mxu0 %v7939_v40  ;;  %4377 = vmatprep.subr.bf16.mxu1 %v7941_v16  ;;  %v7929_v40 = vcombine.high %v3339_v7, %v3347_v20  ;;  %v3354_v16 = vld [vmem:[%s14557_s17 + $0x130] sm:$0xff]  ;;  %v8024_v6 = vcombine.low %v3435_v62, %v3443_v63 }
0x1350   :  { %v7942_v30 = vcombine.low %v3354_v16, %v3362_v12 }
0x1352   :  { %4337 = vmatpush1.bf16.msra.mxu0 %v7938_v18  ;;  %4378 = vmatpush1.bf16.msra.mxu1 %v7940_v13  ;;  %v7928_v18 = vcombine.low %v3339_v7, %v3347_v20  ;;  %v7943_v13 = vcombine.high %v3354_v16, %v3362_v12  ;;  %v10432_v7 = vld [vmem:[%s14560_s19 + $0xc0] sm:$0xff]   ;;  %v10439_v16 = vld [vmem:[%s14560_s19 + $0x50] sm:$0xff]  }
0x1353   :  { %4338 = vmatprep.subr.bf16.mxu0 %v7955_v14  ;;  %4379 = vmatprep.subr.bf16.mxu1 %v7957_v25  ;;  %v7945_v14 = vcombine.high %v3355_v37, %v3363_v38  ;;  %v3370_v25 = vld [vmem:[%s14557_s17 + $0x1b0] sm:$0xff]  ;;  %v10433_v20 = vld [vmem:[%s14560_s19] sm:$0xff]  }
0x1354   :  { %v7958_v46 = vcombine.low %v3370_v25, %v3378_v41  ;;  %v10440_v12 = vld [vmem:[%s14560_s19 + $0xd0] sm:$0xff]  }
0x1356   :  { %4339 = vmatpush1.bf16.msra.mxu0 %v7954_v32  ;;  %4380 = vmatpush1.bf16.msra.mxu1 %v7956_v33  ;;  %v7944_v32 = vcombine.low %v3355_v37, %v3363_v38  ;;  %v7959_v33 = vcombine.high %v3370_v25, %v3378_v41  ;;  %v10441_v37 = vld [vmem:[%s14560_s19 + $0x10] sm:$0xff]   ;;  %v10447_v25 = vld [vmem:[%s14560_s19 + $0x60] sm:$0xff]  }
0x1357   :  { %4340 = vmatprep.subr.bf16.mxu0 %v7971_v44  ;;  %4381 = vmatprep.subr.bf16.mxu1 %v7973_v45  ;;  %v7961_v44 = vcombine.high %v3371_v26, %v3379_v28  ;;  %v3386_v45 = vld [vmem:[%s14557_s17 + $0x230] sm:$0xff]  ;;  %v10448_v41 = vld [vmem:[%s14560_s19 + $0xe0] sm:$0xff]  }
0x1358   :  { %v7974_v56 = vcombine.low %v3386_v45, %v3394_v34  ;;  %v10442_v38 = vld [vmem:[%s14560_s19 + $0x90] sm:$0xff]  }
0x135a   :  { %4341 = vmatpush1.bf16.msra.mxu0 %v7970_v51  ;;  %4382 = vmatpush1.bf16.msra.mxu1 %v7972_v53  ;;  %v7960_v51 = vcombine.low %v3371_v26, %v3379_v28  ;;  %v7975_v53 = vcombine.high %v3386_v45, %v3394_v34  ;;  %v10449_v26 = vld [vmem:[%s14560_s19 + $0x20] sm:$0xff]   ;;  %v10455_v45 = vld [vmem:[%s14560_s19 + $0x70] sm:$0xff]  }
0x135b   :  { %4342 = vmatprep.subr.bf16.mxu0 %v7987_v54  ;;  %4383 = vmatprep.subr.bf16.mxu1 %v7989_v49  ;;  %v7977_v54 = vcombine.high %v3387_v9, %v3395_v50  ;;  %v3402_v49 = vld [vmem:[%s14557_s17 + $0x2b0] sm:$0xff]  ;;  %v10450_v28 = vld [vmem:[%s14560_s19 + $0xa0] sm:$0xff]  }
0x135c   :  { %v7990_v10 = vcombine.low %v3402_v49, %v3410_v55  ;;  %v10456_v34 = vld [vmem:[%s14560_s19 + $0xf0] sm:$0xff]  }
0x135e   :  { %4343 = vmatpush1.bf16.msra.mxu0 %v7986_v57  ;;  %4384 = vmatpush1.bf16.msra.mxu1 %v7988_v35  ;;  %v7976_v57 = vcombine.low %v3387_v9, %v3395_v50  ;;  %v7991_v35 = vcombine.high %v3402_v49, %v3410_v55  ;;  %v10457_v9 = vld [vmem:[%s14560_s19 + $0x30] sm:$0xff]   ;;  %v10463_v49 = vld [vmem:[%s14560_s19 + $0x140] sm:$0xff]  }
0x135f   :  { %4344 = vmatprep.subr.bf16.mxu0 %v8003_v31  ;;  %4385 = vmatprep.subr.bf16.mxu1 %v8005_v19  ;;  %v7993_v31 = vcombine.high %v3403_v22, %v3411_v52  ;;  %v3418_v19 = vld [vmem:[%s14557_s17 + $0x330] sm:$0xff]  ;;  %v10464_v55 = vld [vmem:[%s14560_s19 + $0x1c0] sm:$0xff]  }
0x1360   :  { %v8006_v1 = vcombine.low %v3418_v19, %v3426_v21  ;;  %v10458_v50 = vld [vmem:[%s14560_s19 + $0xb0] sm:$0xff]  }
0x1362   :  { %4345 = vmatpush1.bf16.msra.mxu0 %v8002_v47  ;;  %4386 = vmatpush1.bf16.msra.mxu1 %v8004_v29  ;;  %v7992_v47 = vcombine.low %v3403_v22, %v3411_v52  ;;  %v8007_v29 = vcombine.high %v3418_v19, %v3426_v21  ;;  %v13299_v22 = vshrl.u32 %v306_v42, 7 }
0x1363   :  { %4346 = vmatprep.subr.bf16.mxu0 %v8019_v59  ;;  %4387 = vmatprep.subr.bf16.mxu1 %v8021_v17  ;;  %v8009_v59 = vcombine.high %v3419_v23, %v3427_v39  ;;  %v3434_v17 = vld [vmem:[%s14557_s17 + $0x3b0] sm:$0xff] }
0x1364   :  { %v13302_v52 = vsub.s32 0, %v13299_v22 }
0x1366   :  { %4347 = vmatpush1.bf16.msra.mxu0 %v8018_v2  ;;  %4388 = vmatpush1.bf16.msra.mxu1 %v8020_v3  ;;  %v8008_v2 = vcombine.low %v3419_v23, %v3427_v39  ;;  %v8023_v3 = vcombine.high %v3434_v17, %v3442_v61 }
0x1367   :  { %4414 = vmatprep.subr.bf16.mxu0 %v7911_v5  ;;  %4455 = vmatprep.subr.bf16.mxu1 %v7913_v27  ;;  %v8025_v5 = vcombine.high %v3435_v62, %v3443_v63  ;;  %v8022_v27 = vcombine.low %v3434_v17, %v3442_v61 }
0x1369   :  { %4365 = vmatmul.mubr.bf16.vlgmr.msra.gmra.mrb[160].mxu0 %v12916_v60  ;;  %4406 = vmatmul.mubr.bf16.vlgmr.msra.gmra.mrb[168].mxu1 %v12916_v60 }
0x136a   :  { %4415 = vmatpush1.bf16.msra.mxu0 %v7910_v48  ;;  %4456 = vmatpush1.bf16.msra.mxu1 %v7912_v8  ;;  %v10434_v48 = vld [vmem:[%s14560_s19 + $0x80] sm:$0xff]   ;;  %v10436_v8 = vld [vmem:[%s14560_s19 + $0xc8] sm:$0xff]  }
0x136b   :  { %4416 = vmatprep.subr.bf16.mxu0 %v7927_v15  ;;  %4457 = vmatprep.subr.bf16.mxu1 %v7929_v40  ;;  %v10437_v15 = vld [vmem:[%s14560_s19 + $0x8] sm:$0xff]  }
0x136c   :  { %4446 = vmatprep.mubr.bf16.mxu0 %v10687_v58  ;;  %4487 = vmatprep.mubr.bf16.mxu1 %v10687_v58  ;;  %v10438_v40 = vld [vmem:[%s14560_s19 + $0x88] sm:$0xff]  }
0x136e   :  { %4417 = vmatpush1.bf16.msra.mxu0 %v7926_v11  ;;  %4458 = vmatpush1.bf16.msra.mxu1 %v7928_v18  ;;  %v10443_v11 = vld [vmem:[%s14560_s19 + $0x58] sm:$0xff]  }
0x136f   :  { %4418 = vmatprep.subr.bf16.mxu0 %v7943_v13  ;;  %4459 = vmatprep.subr.bf16.mxu1 %v7945_v14  ;;  %v10444_v18 = vld [vmem:[%s14560_s19 + $0xd8] sm:$0xff]  }
0x1370   :  { %v10445_v13 = vld [vmem:[%s14560_s19 + $0x18] sm:$0xff]  }
0x1371   :  { %v10446_v14 = vld [vmem:[%s14560_s19 + $0x98] sm:$0xff]  }
0x1372   :  { %4419 = vmatpush1.bf16.msra.mxu0 %v7942_v30  ;;  %4460 = vmatpush1.bf16.msra.mxu1 %v7944_v32  ;;  %v10451_v30 = vld [vmem:[%s14560_s19 + $0x68] sm:$0xff]  }
0x1373   :  { %4420 = vmatprep.subr.bf16.mxu0 %v7959_v33  ;;  %4461 = vmatprep.subr.bf16.mxu1 %v7961_v44  ;;  %v10452_v32 = vld [vmem:[%s14560_s19 + $0xe8] sm:$0xff]  }
0x1374   :  { %v10453_v33 = vld [vmem:[%s14560_s19 + $0x28] sm:$0xff]  }
0x1375   :  { %v10454_v44 = vld [vmem:[%s14560_s19 + $0xa8] sm:$0xff]  }
0x1376   :  { %4421 = vmatpush1.bf16.msra.mxu0 %v7958_v46  ;;  %4462 = vmatpush1.bf16.msra.mxu1 %v7960_v51  ;;  %v10459_v46 = vld [vmem:[%s14560_s19 + $0x78] sm:$0xff]  }
0x1377   :  { %4422 = vmatprep.subr.bf16.mxu0 %v7975_v53  ;;  %4463 = vmatprep.subr.bf16.mxu1 %v7977_v54  ;;  %v10460_v51 = vld [vmem:[%s14560_s19 + $0xf8] sm:$0xff]  }
0x1378   :  { %v10461_v53 = vld [vmem:[%s14560_s19 + $0x38] sm:$0xff]  }
0x1379   :  { %v10462_v54 = vld [vmem:[%s14560_s19 + $0xb8] sm:$0xff]  }
0x137a   :  { %4423 = vmatpush1.bf16.msra.mxu0 %v7974_v56  ;;  %4464 = vmatpush1.bf16.msra.mxu1 %v7976_v57  ;;  %v13305_v56 = vsub.s32 2, %v13299_v22  ;;  %v13310_v57 = vld [vmem:[%s14561_s18] sm:$0xff] }
0x137b   :  { %4424 = vmatprep.subr.bf16.mxu0 %v7991_v35  ;;  %4465 = vmatprep.subr.bf16.mxu1 %v7993_v31  ;;  %v13313_v35 = vsub.s32 1, %v13299_v22  ;;  %v13316_v31 = vsub.s32 3, %v13299_v22  ;;  %v3451_v42 = vrot.slane %v13310_v57, %v13302_v52 }
0x137c   :  { %v3459_v19 = vrot.slane %v13310_v57, %v13305_v56 }
0x137d   :  { %v3455_v21 = vrot.slane %v13310_v57, %v13313_v35 }
0x137e   :  { %4425 = vmatpush1.bf16.msra.mxu0 %v7990_v10  ;;  %4466 = vmatpush1.bf16.msra.mxu1 %v7992_v47  ;;  %v3463_v10 = vrot.slane %v13310_v57, %v13316_v31 }
0x137f   :  { %4426 = vmatprep.subr.bf16.mxu0 %v8007_v29  ;;  %4467 = vmatprep.subr.bf16.mxu1 %v8009_v59 }
0x1382   :  { %4427 = vmatpush1.bf16.msra.mxu0 %v8006_v1  ;;  %4468 = vmatpush1.bf16.msra.mxu1 %v8008_v2 }
0x1383   :  { %4428 = vmatprep.subr.bf16.mxu0 %v8023_v3  ;;  %4469 = vmatprep.subr.bf16.mxu1 %v8025_v5 }
0x1386   :  { %4429 = vmatpush1.bf16.msra.mxu0 %v8022_v27  ;;  %4470 = vmatpush1.bf16.msra.mxu1 %v8024_v6 }
0x1387   :  { %8672 = vmatprep.subr.bf16.mxu0 %v10431_v36  ;;  %8694 = vmatprep.subr.bf16.mxu1 %v10432_v7 }
0x1389   :  { %4447 = vmatmul.mubr.bf16.vlgmr.msra.gmra.mrb[164].mxu0 %v12916_v60  ;;  %4488 = vmatmul.mubr.bf16.vlgmr.msra.gmra.mrb[172].mxu1 %v12916_v60  ;;  %v10435_v60 = vld [vmem:[%s14560_s19 + $0x48] sm:$0xff]  }
0x138a   :  { %8673 = vmatpush3.bf16.msra.mxu0 %v10433_v20  ;;  %8695 = vmatpush3.bf16.msra.mxu1 %v10434_v48 }
0x138b   :  { %8674 = vmatprep.subr.bf16.mxu0 %v10435_v60  ;;  %8696 = vmatprep.subr.bf16.mxu1 %v10436_v8 }
0x138e   :  { %8675 = vmatpush3.bf16.msra.mxu0 %v10437_v15  ;;  %8697 = vmatpush3.bf16.msra.mxu1 %v10438_v40 }
0x138f   :  { %8676 = vmatprep.subr.bf16.mxu0 %v10439_v16  ;;  %8698 = vmatprep.subr.bf16.mxu1 %v10440_v12 }
0x1392   :  { %8677 = vmatpush3.bf16.msra.mxu0 %v10441_v37  ;;  %8699 = vmatpush3.bf16.msra.mxu1 %v10442_v38 }
0x1393   :  { %8678 = vmatprep.subr.bf16.mxu0 %v10443_v11  ;;  %8700 = vmatprep.subr.bf16.mxu1 %v10444_v18 }
0x1396   :  { %8679 = vmatpush3.bf16.msra.mxu0 %v10445_v13  ;;  %8701 = vmatpush3.bf16.msra.mxu1 %v10446_v14 }
0x1397   :  { %8680 = vmatprep.subr.bf16.mxu0 %v10447_v25  ;;  %8702 = vmatprep.subr.bf16.mxu1 %v10448_v41 }
0x139a   :  { %8681 = vmatpush3.bf16.msra.mxu0 %v10449_v26  ;;  %8703 = vmatpush3.bf16.msra.mxu1 %v10450_v28  ;;  %v13357_v26 = vsub.s32 4, %v13299_v22  ;;  %v13360_v28 = vsub.s32 6, %v13299_v22 }
0x139b   :  { %8682 = vmatprep.subr.bf16.mxu0 %v10451_v30  ;;  %8704 = vmatprep.subr.bf16.mxu1 %v10452_v32 }
0x139e   :  { %8683 = vmatpush3.bf16.msra.mxu0 %v10453_v33  ;;  %8705 = vmatpush3.bf16.msra.mxu1 %v10454_v44 }
0x139f   :  { %8684 = vmatprep.subr.bf16.mxu0 %v10455_v45  ;;  %8706 = vmatprep.subr.bf16.mxu1 %v10456_v34  ;;  %v13365_v34 = vsub.s32 5, %v13299_v22 }
0x13a2   :  { %8685 = vmatpush3.bf16.msra.mxu0 %v10457_v9  ;;  %8707 = vmatpush3.bf16.msra.mxu1 %v10458_v50 }
0x13a3   :  { %8686 = vmatprep.subr.bf16.mxu0 %v10459_v46  ;;  %8708 = vmatprep.subr.bf16.mxu1 %v10460_v51 }
0x13a6   :  { %8687 = vmatpush3.bf16.msra.mxu0 %v10461_v53  ;;  %8709 = vmatpush3.bf16.msra.mxu1 %v10462_v54 }
0x13a7   :  { %8716 = vmatprep.subr.bf16.mxu0 %v10463_v49  ;;  %8738 = vmatprep.subr.bf16.mxu1 %v10464_v55  ;;  %v3467_v55 = vrot.slane %v13310_v57, %v13357_v26 }
0x13fc   :  { %v4202_v23 = vpop.f32.mrb[152].mxu0  ;;  %v4243_v39 = vpop.f32.mrb[160].mxu1 }
0x13fd   :  { %v13326_v47 = vadd.f32 %v4202_v23, %v3451_v42  ;;  %v13328_v29 = vadd.f32 %v4243_v39, %v3459_v19  ;;  %v4204_v59 = vpop.f32.mrb[153].mxu0  ;;  %v4245_v17 = vpop.f32.mrb[161].mxu1  ;;  %v3475_v42 = vrot.slane %v13310_v57, %v13360_v28 }
0x13fe   :  { %v13330_v61 = vadd.f32 %v4204_v59, %v3455_v21  ;;  %v4206_v62 = vpop.f32.mrb[154].mxu0  ;;  %v4247_v63 = vpop.f32.mrb[162].mxu1  ;;  %v13341_v5 = vadd.f32 %v4245_v17, %v3463_v10  ;;  %v3471_v21 = vrot.slane %v13310_v57, %v13365_v34 }
0x13ff   :  { %v13333_v1 = vmul.f32 0.70710677, %v13326_v47  ;;  %v13336_v2 = vmul.f32 0.70710677, %v13328_v29  ;;  %v4207_v40 = vpop.f32.mrb[155].mxu0  ;;  %v4248_v16 = vpop.f32.mrb[163].mxu1 }
0x1400   :  { %v13339_v3 = vmul.f32 0.70710677, %v13330_v61  ;;  %v13347_v60 = vmul.f32 0.70710677, %v13341_v5 }
0x1401   :  { %v4528_v27 = vand.u32 2147483647, %v13333_v1  ;;  %v4530_v6 = vand.u32 2147483647, %v13336_v2  ;;  %vm4848_vm7 = vcmp.ge.f32.partialorder %v13333_v1, 0.0  ;;  %vm4850_vm8 = vcmp.ge.f32.partialorder %v13336_v2, 0.0 }
0x1402   :  { %v4529_v36 = vand.u32 2147483647, %v13339_v3  ;;  %v13350_v37 = vand.u32 2147483647, %v13347_v60  ;;  %vm4849_vm9 = vcmp.ge.f32.partialorder %v13339_v3, 0.0  ;;  %vm4851_vm10 = vcmp.ge.f32.partialorder %v13347_v60, 0.0 }
0x1403   :  { %v4544_v7 = vmul.f32 0.3275911, %v4528_v27  ;;  %v4546_v20 = vmul.f32 0.3275911, %v4530_v6  ;;  %v4752_v11 = vsub.f32 0.0, %v4528_v27  ;;  %v4754_v46 = vsub.f32 0.0, %v4530_v6 }
0x1404   :  { %v4545_v48 = vmul.f32 0.3275911, %v4529_v36  ;;  %v4547_v38 = vmul.f32 0.3275911, %v13350_v37  ;;  %v4753_v54 = vsub.f32 0.0, %v4529_v36  ;;  %v10465_v2 = vld [vmem:[%s14560_s19 + $0x100] sm:$0xff]  }
0x1405   :  { %v4560_v8 = vadd.f32 1.0, %v4544_v7  ;;  %v4562_v15 = vadd.f32 1.0, %v4546_v20  ;;  %v4768_v32 = vmul.f32 %v4752_v11, %v4528_v27  ;;  %v4770_v10 = vmul.f32 %v4754_v46, %v4530_v6 }
0x1406   :  { %v4561_v12 = vadd.f32 1.0, %v4545_v48  ;;  %v4563_v18 = vadd.f32 1.0, %v4547_v38  ;;  %v4769_v63 = vmul.f32 %v4753_v54, %v4529_v36 }
0x1407   :  { %10585 = vrcp.f32 %v4560_v8  ;;  %v4784_v53 = vmul.f32 1.442695, %v4768_v32  ;;  %v4788_v11 = vmul.f32 1.442695, %v4770_v10 }
0x1408   :  { %10587 = vrcp.f32 %v4562_v15 }
0x1409   :  { %10589 = vrcp.f32 %v4561_v12 }
0x140a   :  { %10591 = vrcp.f32 %v4563_v18 }
0x140b   :  { %10593 = vpow2.f32 %v4784_v53 }
0x140c   :  { %10595 = vpow2.f32 %v4788_v11 }
0x1411   :  { %v10586_v13 = vpop.eup %10585 }
0x1412   :  { %v13353_v14 = vpop.eup %10587  ;;  %v4608_v25 = vmul.f32 1.0614054, %v10586_v13 }
0x1413   :  { %v4610_v41 = vmul.f32 1.0614054, %v13353_v14  ;;  %v13362_v33 = vpop.eup %10589 }
0x1414   :  { %v4624_v30 = vadd.f32 -1.4531521, %v4608_v25  ;;  %v4609_v9 = vmul.f32 1.0614054, %v13362_v33  ;;  %v13380_v8 = vpop.eup %10591 }
0x1415   :  { %v4626_v44 = vadd.f32 -1.4531521, %v4610_v41  ;;  %v10594_v10 = vpop.eup %10593 }
0x1416   :  { %v4640_v45 = vmul.f32 %v10586_v13, %v4624_v30  ;;  %v4625_v23 = vadd.f32 -1.4531521, %v4609_v9  ;;  %v4755_v30 = vsub.f32 0.0, %v13350_v37 }
0x1417   :  { %v4642_v50 = vmul.f32 %v13353_v14, %v4626_v44  ;;  %v13393_v44 = vsub.s32 7, %v13299_v22 }
0x1418   :  { %v4656_v51 = vadd.f32 1.4214138, %v4640_v45  ;;  %v4641_v6 = vmul.f32 %v13362_v33, %v4625_v23  ;;  %v4786_v45 = vmul.f32 1.442695, %v4769_v63 }
0x1419   :  { %v4658_v49 = vadd.f32 1.4214138, %v4642_v50  ;;  %v4611_v50 = vmul.f32 1.0614054, %v13380_v8 }
0x141a   :  { %v4672_v19 = vmul.f32 %v10586_v13, %v4656_v51  ;;  %v4657_v54 = vadd.f32 1.4214138, %v4641_v6  ;;  %10597 = vpow2.f32 %v4786_v45 }
0x141b   :  { %v4674_v39 = vmul.f32 %v13353_v14, %v4658_v49 }
0x141c   :  { %v4688_v59 = vadd.f32 -0.28449672, %v4672_v19  ;;  %v4284_v17 = vpop.f32.mrb[156].mxu0  ;;  %v4325_v62 = vpop.f32.mrb[164].mxu1  ;;  %v3479_v19 = vrot.slane %v13310_v57, %v13393_v44 }
0x141d   :  { %v13376_v27 = vadd.f32 %v4284_v17, %v3467_v55  ;;  %v13378_v7 = vadd.f32 %v4325_v62, %v3475_v42  ;;  %v4286_v20 = vpop.f32.mrb[157].mxu0  ;;  %v4327_v48 = vpop.f32.mrb[165].mxu1  ;;  %v4690_v40 = vadd.f32 -0.28449672, %v4674_v39  ;;  %v4627_v39 = vadd.f32 -1.4531521, %v4611_v50 }
0x141e   :  { %v4704_v15 = vmul.f32 %v10586_v13, %v4688_v59  ;;  %v13382_v16 = vadd.f32 %v4286_v20, %v3471_v21  ;;  %v4288_v12 = vpop.f32.mrb[158].mxu0  ;;  %v4329_v38 = vpop.f32.mrb[166].mxu1  ;;  %v4771_v21 = vmul.f32 %v4755_v30, %v13350_v37  ;;  %v4673_v62 = vmul.f32 %v13362_v33, %v4657_v54 }
0x141f   :  { %v13386_v18 = vmul.f32 0.70710677, %v13376_v27  ;;  %v4289_v36 = vpop.f32.mrb[159].mxu0  ;;  %v4330_v25 = vpop.f32.mrb[167].mxu1  ;;  %v13390_v32 = vmul.f32 0.70710677, %v13378_v7  ;;  %v4706_v46 = vmul.f32 %v13353_v14, %v4690_v40  ;;  %v13413_v20 = vadd.f32 %v4327_v48, %v3479_v19 }
0x1420   :  { %v4720_v41 = vadd.f32 0.2548296, %v4704_v15  ;;  %v13402_v53 = vmul.f32 0.70710677, %v13382_v16  ;;  %v4790_v15 = vmul.f32 1.442695, %v4771_v21  ;;  %v4643_v57 = vmul.f32 %v13380_v8, %v4627_v39  ;;  %v10596_v48 = vpop.eup %10595 }
0x1421   :  { %v4532_v9 = vand.u32 2147483647, %v13386_v18  ;;  %v13399_v51 = vand.u32 2147483647, %v13390_v32  ;;  %v4722_v59 = vadd.f32 0.2548296, %v4706_v46 }
0x1422   :  { %v4736_v49 = vmul.f32 %v10586_v13, %v4720_v41  ;;  %v13406_v42 = vand.u32 2147483647, %v13402_v53  ;;  %v4689_v12 = vadd.f32 -0.28449672, %v4673_v62  ;;  %v13418_v6 = vmul.f32 0.70710677, %v13413_v20 }
0x1423   :  { %v4548_v55 = vmul.f32 0.3275911, %v4532_v9  ;;  %v4550_v22 = vmul.f32 0.3275911, %v13399_v51  ;;  %v4738_v40 = vmul.f32 %v13353_v14, %v4722_v59  ;;  %v13424_v36 = vld [vmem:[%s14561_s18 + $0x8] sm:$0xff]  ;;  %v4756_v25 = vsub.f32 0.0, %v4532_v9 }
0x1424   :  { %v4549_v13 = vmul.f32 0.3275911, %v13406_v42  ;;  %v4816_v63 = vmul.f32 %v10594_v10, %v4736_v49  ;;  %v4705_v11 = vmul.f32 %v13362_v33, %v4689_v12  ;;  %v4659_v41 = vadd.f32 1.4214138, %v4643_v57  ;;  %v10598_v45 = vpop.eup %10597 }
0x1425   :  { %v4564_v23 = vadd.f32 1.0, %v4548_v55  ;;  %v4566_v17 = vadd.f32 1.0, %v4550_v22  ;;  %v4818_v30 = vmul.f32 %v10596_v48, %v4738_v40  ;;  %v3483_v54 = vrot.slane %v13424_v36, %v13302_v52 }
0x1426   :  { %v4565_v37 = vadd.f32 1.0, %v4549_v13  ;;  %v4832_v38 = vsub.f32 1.0, %v4816_v63  ;;  %v4721_v14 = vadd.f32 0.2548296, %v4705_v11  ;;  %v4675_v46 = vmul.f32 %v13380_v8, %v4659_v41 }
0x1427   :  { %10599 = vrcp.f32 %v4564_v23  ;;  %v4496_v49 = vmul.f32 0.5, %v13326_v47  ;;  %v13431_v55 = vand.u32 2147483647, %v13418_v6  ;;  %v3491_v19 = vrot.slane %v13424_v36, %v13305_v56 }
0x1428   :  { %10601 = vrcp.f32 %v4566_v17  ;;  %v4864_v50 = vsub.f32 0.0, %v4832_v38  ;;  %v4737_v22 = vmul.f32 %v13362_v33, %v4721_v14  ;;  %v13439_v23 = vmul.f32 0.5, %v13328_v29 }
0x1429   :  { %10603 = vpow2.f32 %v4790_v15  ;;  %v4497_v39 = vmul.f32 0.5, %v13330_v61  ;;  %v4772_v10 = vmul.f32 %v4756_v25, %v4532_v9  ;;  %v4691_v59 = vadd.f32 -0.28449672, %v4675_v46 }
0x142a   :  { %10605 = vrcp.f32 %v4565_v37  ;;  %v4834_v47 = vsub.f32 1.0, %v4818_v30  ;;  %v4817_v33 = vmul.f32 %v10598_v45, %v4737_v22  ;;  %v4880_v62 = vsel %vm4848_vm7, %v4832_v38, %v4864_v50 }
0x142b   :  { %v4707_v29 = vmul.f32 %v13380_v8, %v4691_v59  ;;  %v4758_v61 = vsub.f32 0.0, %v13399_v51  ;;  %v4551_v9 = vmul.f32 0.3275911, %v13431_v55  ;;  %v4792_v40 = vmul.f32 1.442695, %v4772_v10 }
0x142c   :  { %v4833_v57 = vsub.f32 1.0, %v4817_v33  ;;  %v3487_v12 = vrot.slane %v13424_v36, %v13313_v35  ;;  %v4896_v11 = vadd.f32 1.0, %v4880_v62  ;;  %v4866_v38 = vsub.f32 0.0, %v4834_v47 }
0x142d   :  { %v4723_v1 = vadd.f32 0.2548296, %v4707_v29  ;;  %v4774_v46 = vmul.f32 %v4758_v61, %v13399_v51  ;;  %v4567_v22 = vadd.f32 1.0, %v4551_v9  ;;  %10607 = vpow2.f32 %v4792_v40 }
0x142e   :  { %v4865_v25 = vsub.f32 0.0, %v4833_v57  ;;  %v4882_v3 = vsel %vm4850_vm8, %v4834_v47, %v4866_v38  ;;  %vm4852_vm11 = vcmp.ge.f32.partialorder %v13386_v18, 0.0  ;;  %v10487_v18 = vld [vmem:[%s14560_s19 + $0x170] sm:$0xff]   ;;  %vm4854_vm12 = vcmp.ge.f32.partialorder %v13390_v32, 0.0 }
0x142f   :  { %v4739_v14 = vmul.f32 %v13380_v8, %v4723_v1  ;;  %v4796_v9 = vmul.f32 1.442695, %v4774_v46  ;;  %10609 = vrcp.f32 %v4567_v22  ;;  %vm4853_vm13 = vcmp.ge.f32.partialorder %v13402_v53, 0.0 }
0x1430   :  { %v4881_v10 = vsel %vm4849_vm9, %v4833_v57, %v4865_v25  ;;  %vm4855_vm14 = vcmp.ge.f32.partialorder %v13418_v6, 0.0  ;;  %v10501_v6 = vld [vmem:[%s14560_s19 + $0x208] sm:$0xff]  }
0x1431   :  { %v13436_v21 = vpop.eup %10599  ;;  %v4897_v33 = vadd.f32 1.0, %v4881_v10  ;;  %10611 = vpow2.f32 %v4796_v9  ;;  %v10468_v9 = vld [vmem:[%s14560_s19 + $0x1c8] sm:$0xff]  }
0x1432   :  { %v13442_v17 = vpop.eup %10601  ;;  %v4612_v13 = vmul.f32 1.0614054, %v13436_v21 }
0x1433   :  { %v4614_v63 = vmul.f32 1.0614054, %v13442_v17  ;;  %v10604_v41 = vpop.eup %10603 }
0x1434   :  { %v4628_v15 = vadd.f32 -1.4531521, %v4612_v13  ;;  %v13458_v45 = vpop.eup %10605  ;;  %v4757_v13 = vsub.f32 0.0, %v13406_v42  ;;  %v4819_v62 = vmul.f32 %v10604_v41, %v4739_v14 }
0x1435   :  { %v4630_v37 = vadd.f32 -1.4531521, %v4614_v63  ;;  %v4912_v63 = vmul.f32 %v4896_v11, %v4496_v49  ;;  %v4613_v51 = vmul.f32 1.0614054, %v13458_v45 }
0x1436   :  { %v4644_v48 = vmul.f32 %v13436_v21, %v4628_v15  ;;  %v4913_v15 = vmul.f32 %v4897_v33, %v4497_v39  ;;  %v4773_v60 = vmul.f32 %v4757_v13, %v13406_v42 }
0x1437   :  { %v4646_v30 = vmul.f32 %v13442_v17, %v4630_v37  ;;  %v4835_v37 = vsub.f32 1.0, %v4819_v62  ;;  %v4928_v39 = vpack.c.bf16 %v4912_v63, %v4912_v63  ;;  %v4629_v62 = vadd.f32 -1.4531521, %v4613_v51 }
0x1438   :  { %v4660_v50 = vadd.f32 1.4214138, %v4644_v48  ;;  %v4898_v48 = vadd.f32 1.0, %v4882_v3  ;;  %v4929_v25 = vpack.c.bf16 %v4913_v15, %v4913_v15  ;;  %v4499_v63 = vmul.f32 0.5, %v13341_v5 }
0x1439   :  { %v4662_v59 = vadd.f32 1.4214138, %v4646_v30  ;;  %v4867_v49 = vsub.f32 0.0, %v4835_v37  ;;  %v10467_v30 = vld [vmem:[%s14560_s19 + $0x148] sm:$0xff]  }
0x143a   :  { %v4676_v29 = vmul.f32 %v13436_v21, %v4660_v50  ;;  %6007 = vmatprep.mubr.bf16.mxu0 %v4929_v25 }
0x143b   :  { %v4678_v8 = vmul.f32 %v13442_v17, %v4662_v59  ;;  %6008 = vmatmul.mubr.bf16.vlgmr.msra.gmra.mrb[168].mxu0 %v4928_v39 }
0x143c   :  { %v4692_v61 = vadd.f32 -0.28449672, %v4676_v29  ;;  %v4366_v57 = vpop.f32.mrb[160].mxu0  ;;  %v4407_v1 = vpop.f32.mrb[168].mxu1  ;;  %8717 = vmatpush3.bf16.msra.mxu0 %v10465_v2  ;;  %v4794_v2 = vmul.f32 1.442695, %v4773_v60 }
0x143d   :  { %v13470_v47 = vadd.f32 %v4366_v57, %v3483_v54  ;;  %v4368_v40 = vpop.f32.mrb[161].mxu0  ;;  %v13472_v11 = vpop.f32.mrb[169].mxu1  ;;  %v4694_v41 = vadd.f32 -0.28449672, %v4678_v8  ;;  %v13481_v14 = vadd.f32 %v4407_v1, %v3491_v19  ;;  %v4883_v54 = vsel %vm4851_vm10, %v4835_v37, %v4867_v49  ;;  %8718 = vmatprep.subr.bf16.mxu0 %v10467_v30 }
0x143e   :  { %v4708_v38 = vmul.f32 %v13436_v21, %v4692_v61  ;;  %v4370_v50 = vpop.f32.mrb[162].mxu0  ;;  %v4411_v46 = vpop.f32.mrb[170].mxu1  ;;  %v13488_v10 = vadd.f32 %v4368_v40, %v3487_v12  ;;  %v4899_v29 = vadd.f32 1.0, %v4883_v54  ;;  %v4914_v8 = vmul.f32 %v4898_v48, %v13439_v23  ;;  %v10469_v12 = vld [vmem:[%s14560_s19 + $0x108] sm:$0xff]   ;;  %v10471_v23 = vld [vmem:[%s14560_s19 + $0x150] sm:$0xff]   ;;  %v10466_v48 = vld [vmem:[%s14560_s19 + $0x180] sm:$0xff]  }
0x143f   :  { %v13486_v22 = vmul.f32 0.70710677, %v13470_v47  ;;  %v4371_v59 = vpop.f32.mrb[163].mxu0  ;;  %v4412_v33 = vpop.f32.mrb[171].mxu1  ;;  %v13492_v19 = vmul.f32 0.70710677, %v13481_v14  ;;  %v4710_v37 = vmul.f32 %v13442_v17, %v4694_v41  ;;  %v4645_v57 = vmul.f32 %v13458_v45, %v4629_v62 }
0x1440   :  { %v4724_v3 = vadd.f32 0.2548296, %v4708_v38  ;;  %v4915_v51 = vmul.f32 %v4899_v29, %v4499_v63  ;;  %v13512_v61 = vmul.f32 0.70710677, %v13488_v10  ;;  %v4930_v49 = vpack.c.bf16 %v4914_v8, %v4914_v8  ;;  %8719 = vmatpush3.bf16.msra.mxu0 %v10469_v12  ;;  %v10473_v38 = vld [vmem:[%s14560_s19 + $0x110] sm:$0xff]   ;;  %v10475_v59 = vld [vmem:[%s14560_s19 + $0x158] sm:$0xff]  }
0x1441   :  { %v13500_v15 = vand.u32 2147483647, %v13486_v22  ;;  %v13508_v42 = vand.u32 2147483647, %v13492_v19  ;;  %v4759_v40 = vsub.f32 0.0, %v13431_v55  ;;  %8720 = vmatprep.subr.bf16.mxu0 %v10471_v23  ;;  %v3495_v33 = vrot.slane %v13424_v36, %v13316_v31  ;;  %v10470_v63 = vld [vmem:[%s14560_s19 + $0x188] sm:$0xff]  }
0x1442   :  { %v4740_v5 = vmul.f32 %v13436_v21, %v4724_v3  ;;  %v10608_v21 = vpop.eup %10607  ;;  %v4931_v1 = vpack.c.bf16 %v4915_v51, %v4915_v51  ;;  %v4726_v50 = vadd.f32 0.2548296, %v4710_v37  ;;  %v13529_v54 = vand.u32 2147483647, %v13512_v61  ;;  %v10472_v29 = vld [vmem:[%s14560_s19 + $0x1d0] sm:$0xff]   ;;  %v10477_v8 = vld [vmem:[%s14560_s19 + $0x118] sm:$0xff]  }
0x1443   :  { %v4552_v13 = vmul.f32 0.3275911, %v13500_v15  ;;  %v4554_v25 = vmul.f32 0.3275911, %v13508_v42  ;;  %v13526_v41 = vpop.eup %10609  ;;  %v4661_v62 = vadd.f32 1.4214138, %v4645_v57  ;;  %v4775_v3 = vmul.f32 %v4759_v40, %v13431_v55 }
0x1444   :  { %v4820_v30 = vmul.f32 %v10608_v21, %v4740_v5  ;;  %6047 = vmatprep.mubr.bf16.mxu1 %v4931_v1  ;;  %8721 = vmatpush3.bf16.msra.mxu0 %v10473_v38  ;;  %v4615_v60 = vmul.f32 1.0614054, %v13526_v41  ;;  %v4742_v5 = vmul.f32 %v13442_v17, %v4726_v50  ;;  %v4553_v37 = vmul.f32 0.3275911, %v13529_v54  ;;  %v10479_v55 = vld [vmem:[%s14560_s19 + $0x160] sm:$0xff]   ;;  %v10476_v17 = vld [vmem:[%s14560_s19 + $0x1d8] sm:$0xff]   ;;  %v10612_v21 = vpop.eup %10611 }
0x1445   :  { %v4568_v39 = vadd.f32 1.0, %v4552_v13  ;;  %v4570_v46 = vadd.f32 1.0, %v4554_v25  ;;  %6048 = vmatmul.mubr.bf16.vlgmr.msra.gmra.mrb[176].mxu1 %v4930_v49  ;;  %8722 = vmatprep.subr.bf16.mxu0 %v10475_v59  ;;  %v13553_v51 = vadd.f32 %v13472_v11, %v3495_v33  ;;  %v4677_v23 = vmul.f32 %v13458_v45, %v4661_v62  ;;  %v10474_v13 = vld [vmem:[%s14560_s19 + $0x190] sm:$0xff]   ;;  %v10481_v57 = vld [vmem:[%s14560_s19 + $0x120] sm:$0xff]   ;;  %v10483_v40 = vld [vmem:[%s14560_s19 + $0x168] sm:$0xff]  }
0x1446   :  { %8739 = vmatpush3.bf16.msra.mxu1 %v10466_v48  ;;  %v4836_v12 = vsub.f32 1.0, %v4820_v30  ;;  %v4798_v1 = vmul.f32 1.442695, %v4775_v3  ;;  %v4631_v48 = vadd.f32 -1.4531521, %v4615_v60  ;;  %v13565_v49 = vmul.f32 %v10612_v21, %v4742_v5  ;;  %v10478_v30 = vld [vmem:[%s14560_s19 + $0x198] sm:$0xff]  }
0x1447   :  { %10613 = vrcp.f32 %v4568_v39  ;;  %8740 = vmatprep.subr.bf16.mxu1 %v10468_v9  ;;  %v4693_v11 = vadd.f32 -0.28449672, %v4677_v23  ;;  %v13571_v9 = vmul.f32 0.70710677, %v13553_v51  ;;  %v10480_v50 = vld [vmem:[%s14560_s19 + $0x1e0] sm:$0xff]   ;;  %v10485_v59 = vld [vmem:[%s14560_s19 + $0x128] sm:$0xff]   ;;  %v3503_v21 = vrot.slane %v13424_v36, %v13365_v34 }
0x1448   :  { %10615 = vrcp.f32 %v4570_v46  ;;  %8723 = vmatpush3.bf16.msra.mxu0 %v10477_v8  ;;  %v4868_v25 = vsub.f32 0.0, %v4836_v12  ;;  %v4647_v38 = vmul.f32 %v13526_v41, %v4631_v48  ;;  %vm4856_vm15 = vcmp.ge.f32.partialorder %v13486_v22, 0.0 }
0x1449   :  { %10617 = vpow2.f32 %v4794_v2  ;;  %v4569_v2 = vadd.f32 1.0, %v4553_v37  ;;  %8724 = vmatprep.subr.bf16.mxu0 %v10479_v55  ;;  %v4709_v39 = vmul.f32 %v13458_v45, %v4693_v11  ;;  %v13596_v5 = vand.u32 2147483647, %v13571_v9  ;;  %v10489_v11 = vld [vmem:[%s14560_s19 + $0x130] sm:$0xff]  }
0x144a   :  { %8741 = vmatpush3.bf16.msra.mxu1 %v10470_v63  ;;  %10619 = vpow2.f32 %v4798_v1  ;;  %v4663_v62 = vadd.f32 1.4214138, %v4647_v38  ;;  %v4884_v3 = vsel %vm4852_vm11, %v4836_v12, %v4868_v25  ;;  %v4760_v38 = vsub.f32 0.0, %v13500_v15 }
0x144b   :  { %8742 = vmatprep.subr.bf16.mxu1 %v10472_v29  ;;  %v4725_v33 = vadd.f32 0.2548296, %v4709_v39  ;;  %v4838_v29 = vsub.f32 1.0, %v13565_v49  ;;  %10621 = vrcp.f32 %v4569_v2  ;;  %v3511_v49 = vrot.slane %v13424_v36, %v13393_v44 }
0x144c   :  { %8725 = vmatpush3.bf16.msra.mxu0 %v10481_v57  ;;  %v4679_v55 = vmul.f32 %v13526_v41, %v4663_v62  ;;  %v3507_v57 = vrot.slane %v13424_v36, %v13360_v28  ;;  %v4900_v2 = vadd.f32 1.0, %v4884_v3  ;;  %v10488_v62 = vld [vmem:[%s14560_s19 + $0x1f0] sm:$0xff]   ;;  %vm4858_vm1 = vcmp.ge.f32.partialorder %v13492_v19, 0.0 }
0x144d   :  { %8726 = vmatprep.subr.bf16.mxu0 %v10483_v40  ;;  %v4741_v37 = vmul.f32 %v13458_v45, %v4725_v33  ;;  %v10484_v45 = vld [vmem:[%s14560_s19 + $0x1e8] sm:$0xff]   ;;  %v4870_v40 = vsub.f32 0.0, %v4838_v29  ;;  %vm4857_vm2 = vcmp.ge.f32.partialorder %v13512_v61, 0.0  ;;  %v10522_v19 = vld [vmem:[%s14560_s19 + $0x2b0] sm:$0xff]   ;;  %vm4859_vm4 = vcmp.ge.f32.partialorder %v13571_v9, 0.0 }
0x144e   :  { %8743 = vmatpush3.bf16.msra.mxu1 %v10474_v13  ;;  %v10482_v13 = vld [vmem:[%s14560_s19 + $0x1a0] sm:$0xff]   ;;  %v4695_v25 = vadd.f32 -0.28449672, %v4679_v55  ;;  %v10486_v33 = vld [vmem:[%s14560_s19 + $0x1a8] sm:$0xff]   ;;  %v4762_v55 = vsub.f32 0.0, %v13508_v42 }
0x144f   :  { %8744 = vmatprep.subr.bf16.mxu1 %v10476_v17  ;;  %v3499_v17 = vrot.slane %v13424_v36, %v13357_v26  ;;  %v10507_v36 = vld [vmem:[%s14560_s19 + $0x258] sm:$0xff]  }
0x1450   :  { %8727 = vmatpush3.bf16.msra.mxu0 %v10485_v59  ;;  %v4555_v59 = vmul.f32 0.3275911, %v13596_v5 }
0x1451   :  { %v13581_v46 = vpop.eup %10613  ;;  %8728 = vmatprep.subr.bf16.mxu0 %v10487_v18  ;;  %v4500_v18 = vmul.f32 0.5, %v13376_v27 }
0x1452   :  { %v13587_v63 = vpop.eup %10615  ;;  %v4616_v8 = vmul.f32 1.0614054, %v13581_v46  ;;  %8745 = vmatpush3.bf16.msra.mxu1 %v10478_v30  ;;  %v10491_v30 = vld [vmem:[%s14560_s19 + $0x178] sm:$0xff]   ;;  %v4571_v32 = vadd.f32 1.0, %v4555_v59 }
0x1453   :  { %v4618_v60 = vmul.f32 1.0614054, %v13587_v63  ;;  %v10618_v12 = vpop.eup %10617  ;;  %8746 = vmatprep.subr.bf16.mxu1 %v10480_v50  ;;  %v4916_v4 = vmul.f32 %v4900_v2, %v4500_v18 }
0x1454   :  { %v4632_v23 = vadd.f32 -1.4531521, %v4616_v8  ;;  %v4821_v48 = vmul.f32 %v10618_v12, %v4741_v37  ;;  %v4711_v8 = vmul.f32 %v13526_v41, %v4695_v25  ;;  %v10493_v12 = vld [vmem:[%s14560_s19 + $0x138] sm:$0xff]   ;;  %8729 = vmatpush3.bf16.msra.mxu0 %v10489_v11  ;;  %v4886_v25 = vsel %vm4854_vm12, %v4838_v29, %v4870_v40 }
0x1455   :  { %v4634_v1 = vadd.f32 -1.4531521, %v4618_v60  ;;  %v13633_v60 = vmul.f32 0.5, %v13378_v7  ;;  %v4776_v7 = vmul.f32 %v4760_v38, %v13500_v15  ;;  %8730 = vmatprep.subr.bf16.mxu0 %v10491_v30  ;;  %v4501_v29 = vmul.f32 0.5, %v13382_v16  ;;  %v10490_v15 = vld [vmem:[%s14560_s19 + $0x1b0] sm:$0xff]  }
0x1456   :  { %v4648_v39 = vmul.f32 %v13581_v46, %v4632_v23  ;;  %v4837_v3 = vsub.f32 1.0, %v4821_v48  ;;  %8747 = vmatpush3.bf16.msra.mxu1 %v10482_v13  ;;  %v4727_v48 = vadd.f32 0.2548296, %v4711_v8  ;;  %v10495_v13 = vld [vmem:[%s14560_s19 + $0x240] sm:$0xff]   ;;  %v4778_v40 = vmul.f32 %v4762_v55, %v13508_v42 }
0x1457   :  { %v4650_v50 = vmul.f32 %v13587_v63, %v4634_v1  ;;  %8748 = vmatprep.subr.bf16.mxu1 %v10484_v45  ;;  %v4902_v18 = vadd.f32 1.0, %v4886_v25  ;;  %v4761_v55 = vsub.f32 0.0, %v13529_v54  ;;  %10623 = vrcp.f32 %v4571_v32 }
0x1458   :  { %v4664_v37 = vadd.f32 1.4214138, %v4648_v39  ;;  %v4869_v1 = vsub.f32 0.0, %v4837_v3  ;;  %v10620_v39 = vpop.eup %10619  ;;  %v4743_v45 = vmul.f32 %v13526_v41, %v4727_v48  ;;  %v10492_v41 = vld [vmem:[%s14560_s19 + $0x1f8] sm:$0xff]   ;;  %8731 = vmatpush3.bf16.msra.mxu0 %v10493_v12  ;;  %v4932_v48 = vpack.c.bf16 %v4916_v4, %v4916_v4 }
0x1459   :  { %v4666_v23 = vadd.f32 1.4214138, %v4650_v50  ;;  %v13647_v11 = vpop.eup %10621  ;;  %8760 = vmatprep.subr.bf16.mxu0 %v10495_v13 }
0x145a   :  { %v4680_v27 = vmul.f32 %v13581_v46, %v4664_v37  ;;  %v4885_v50 = vsel %vm4853_vm13, %v4837_v3, %v4869_v1  ;;  %8749 = vmatpush3.bf16.msra.mxu1 %v10486_v33  ;;  %v4823_v16 = vmul.f32 %v10620_v39, %v4743_v45  ;;  %v4800_v37 = vmul.f32 1.442695, %v4776_v7 }
0x145b   :  { %v4682_v53 = vmul.f32 %v13587_v63, %v4666_v23  ;;  %v4901_v38 = vadd.f32 1.0, %v4885_v50  ;;  %8750 = vmatprep.subr.bf16.mxu1 %v10488_v62  ;;  %v10494_v62 = vld [vmem:[%s14560_s19 + $0x1b8] sm:$0xff]   ;;  %v4617_v13 = vmul.f32 1.0614054, %v13647_v11 }
0x145c   :  { %v4448_v30 = vpop.f32.mrb[164].mxu0  ;;  %v4489_v2 = vpop.f32.mrb[172].mxu1  ;;  %v4696_v59 = vadd.f32 -0.28449672, %v4680_v27  ;;  %10625 = vpow2.f32 %v4800_v37 }
0x145d   :  { %v13658_v3 = vadd.f32 %v4448_v30, %v3499_v17  ;;  %v13660_v8 = vadd.f32 %v4489_v2, %v3507_v57  ;;  %v4450_v42 = vpop.f32.mrb[165].mxu0  ;;  %v13662_v33 = vpop.f32.mrb[173].mxu1  ;;  %v4917_v23 = vmul.f32 %v4901_v38, %v4501_v29  ;;  %v4839_v17 = vsub.f32 1.0, %v4823_v16  ;;  %v10497_v57 = vld [vmem:[%s14560_s19 + $0x200] sm:$0xff]   ;;  %v10499_v38 = vld [vmem:[%s14560_s19 + $0x248] sm:$0xff]  }
0x145e   :  { %v4452_v1 = vpop.f32.mrb[166].mxu0  ;;  %v4493_v12 = vpop.f32.mrb[174].mxu1  ;;  %v4698_v39 = vadd.f32 -0.28449672, %v4682_v53  ;;  %8751 = vmatpush3.bf16.msra.mxu1 %v10490_v15  ;;  %v4712_v4 = vmul.f32 %v13581_v46, %v4696_v59  ;;  %v10496_v29 = vld [vmem:[%s14560_s19 + $0x2c0] sm:$0xff]   ;;  %v13691_v15 = vadd.f32 %v4450_v42, %v3503_v21  ;;  %v4503_v59 = vmul.f32 0.5, %v13413_v20 }
0x145f   :  { %v13672_v25 = vmul.f32 0.70710677, %v13658_v3  ;;  %v4453_v27 = vpop.f32.mrb[167].mxu0  ;;  %v4494_v7 = vpop.f32.mrb[175].mxu1  ;;  %v4933_v50 = vpack.c.bf16 %v4917_v23, %v4917_v23  ;;  %v13675_v45 = vmul.f32 0.70710677, %v13660_v8  ;;  %8752 = vmatprep.subr.bf16.mxu1 %v10492_v41  ;;  %v4777_v41 = vmul.f32 %v4761_v55, %v13529_v54 }
0x1460   :  { %v4871_v32 = vsub.f32 0.0, %v4839_v17  ;;  %v4804_v30 = vmul.f32 1.442695, %v4778_v40  ;;  %v4918_v1 = vmul.f32 %v4902_v18, %v13633_v60  ;;  %v4633_v42 = vadd.f32 -1.4531521, %v4617_v13  ;;  %v10503_v54 = vld [vmem:[%s14560_s19 + $0x250] sm:$0xff]  }
0x1461   :  { %v13686_v53 = vand.u32 2147483647, %v13672_v25  ;;  %6087 = vmatprep.mubr.bf16.mxu0 %v4933_v50  ;;  %v13695_v2 = vand.u32 2147483647, %v13675_v45  ;;  %v4728_v37 = vadd.f32 0.2548296, %v4712_v4  ;;  %v4714_v20 = vmul.f32 %v13587_v63, %v4698_v39  ;;  %v13729_v13 = vpop.eup %10623 }
0x1462   :  { %v4887_v16 = vsel %vm4855_vm14, %v4839_v17, %v4871_v32  ;;  %6088 = vmatmul.mubr.bf16.vlgmr.msra.gmra.mrb[172].mxu0 %v4932_v48  ;;  %8753 = vmatpush3.bf16.msra.mxu1 %v10494_v62  ;;  %v13710_v18 = vmul.f32 0.70710677, %v13691_v15  ;;  %10627 = vpow2.f32 %v4804_v30  ;;  %v4802_v12 = vmul.f32 1.442695, %v4777_v41  ;;  %v10498_v27 = vld [vmem:[%s14560_s19 + $0x280] sm:$0xff]   ;;  %v10505_v7 = vld [vmem:[%s14560_s19 + $0x210] sm:$0xff]  }
0x1463   :  { %v4556_v23 = vmul.f32 0.3275911, %v13686_v53  ;;  %v4903_v21 = vadd.f32 1.0, %v4887_v16  ;;  %8761 = vmatpush3.bf16.msra.mxu0 %v10497_v57  ;;  %v4558_v40 = vmul.f32 0.3275911, %v13695_v2  ;;  %8782 = vmatprep.subr.bf16.mxu1 %v10496_v29  ;;  %v4763_v48 = vsub.f32 0.0, %v13596_v5 }
0x1464   :  { %8762 = vmatprep.subr.bf16.mxu0 %v10499_v38  ;;  %v13714_v17 = vand.u32 2147483647, %v13710_v18  ;;  %v13726_v39 = vadd.f32 %v13662_v33, %v3511_v49  ;;  %v4649_v50 = vmul.f32 %v13647_v11, %v4633_v42  ;;  %v4934_v4 = vpack.c.bf16 %v4918_v1, %v4918_v1  ;;  %v10500_v38 = vld [vmem:[%s14560_s19 + $0x2c8] sm:$0xff]   ;;  %v10509_v16 = vld [vmem:[%s14560_s19 + $0x218] sm:$0xff]  }
0x1465   :  { %v4572_v60 = vadd.f32 1.0, %v4556_v23  ;;  %v4919_v55 = vmul.f32 %v4903_v21, %v4503_v59  ;;  %v4574_v62 = vadd.f32 1.0, %v4558_v40  ;;  %v4744_v32 = vmul.f32 %v13581_v46, %v4728_v37  ;;  %v10502_v46 = vld [vmem:[%s14560_s19 + $0x288] sm:$0xff]   ;;  %v10504_v21 = vld [vmem:[%s14560_s19 + $0x2d0] sm:$0xff]  }
0x1466   :  { %v4730_v29 = vadd.f32 0.2548296, %v4714_v20  ;;  %v4557_v30 = vmul.f32 0.3275911, %v13714_v17  ;;  %v4779_v49 = vmul.f32 %v4763_v48, %v13596_v5  ;;  %v10626_v59 = vpop.eup %10625  ;;  %v13744_v41 = vmul.f32 0.70710677, %v13726_v39 }
0x1467   :  { %10629 = vrcp.f32 %v4572_v60  ;;  %v4935_v57 = vpack.c.bf16 %v4919_v55, %v4919_v55  ;;  %8763 = vmatpush3.bf16.msra.mxu0 %v10501_v6  ;;  %v4665_v23 = vadd.f32 1.4214138, %v4649_v50  ;;  %v13749_v1 = vmul.f32 %v10626_v59, %v4744_v32  ;;  %v10511_v6 = vld [vmem:[%s14560_s19 + $0x260] sm:$0xff]   ;;  %v10506_v60 = vld [vmem:[%s14560_s19 + $0x290] sm:$0xff]   ;;  %v10515_v50 = vld [vmem:[%s14560_s19 + $0x268] sm:$0xff]  }
0x1468   :  { %10631 = vrcp.f32 %v4574_v62  ;;  %8764 = vmatprep.subr.bf16.mxu0 %v10503_v54  ;;  %v4573_v33 = vadd.f32 1.0, %v4557_v30  ;;  %v4746_v5 = vmul.f32 %v13587_v63, %v4730_v29  ;;  %v4619_v40 = vmul.f32 1.0614054, %v13729_v13  ;;  %v10513_v62 = vld [vmem:[%s14560_s19 + $0x220] sm:$0xff]  }
0x1469   :  { %6127 = vmatprep.mubr.bf16.mxu1 %v4935_v57  ;;  %10633 = vpow2.f32 %v4802_v12  ;;  %v13760_v42 = vand.u32 2147483647, %v13744_v41  ;;  %v4681_v37 = vmul.f32 %v13647_v11, %v4665_v23  ;;  %v4806_v20 = vmul.f32 1.442695, %v4779_v49  ;;  %v10517_v23 = vld [vmem:[%s14560_s19 + $0x228] sm:$0xff]  }
0x146a   :  { %6128 = vmatmul.mubr.bf16.vlgmr.msra.gmra.mrb[180].mxu1 %v4934_v4  ;;  %10635 = vrcp.f32 %v4573_v33  ;;  %v4635_v63 = vadd.f32 -1.4531521, %v4619_v40  ;;  %v4840_v57 = vsub.f32 1.0, %v13749_v1  ;;  %v4765_v49 = vsub.f32 0.0, %v13714_v17  ;;  %v10510_v33 = vld [vmem:[%s14560_s19 + $0x298] sm:$0xff]   ;;  %v10512_v40 = vld [vmem:[%s14560_s19 + $0x2e0] sm:$0xff]  }
0x146b   :  { %8783 = vmatpush3.bf16.msra.mxu1 %v10498_v27  ;;  %8765 = vmatpush3.bf16.msra.mxu0 %v10505_v7  ;;  %v4559_v55 = vmul.f32 0.3275911, %v13760_v42  ;;  %v4697_v12 = vadd.f32 -0.28449672, %v4681_v37  ;;  %v10508_v7 = vld [vmem:[%s14560_s19 + $0x2d8] sm:$0xff]   ;;  %10637 = vpow2.f32 %v4806_v20  ;;  %v10519_v37 = vld [vmem:[%s14560_s19 + $0x270] sm:$0xff]  }
0x146c   :  { %8784 = vmatprep.subr.bf16.mxu1 %v10500_v38  ;;  %8766 = vmatprep.subr.bf16.mxu0 %v10507_v36  ;;  %v10628_v54 = vpop.eup %10627  ;;  %v4651_v4 = vmul.f32 %v13729_v13, %v4635_v63  ;;  %v4767_v22 = vsub.f32 0.0, %v13760_v42  ;;  %vm4861_vm5 = vcmp.ge.f32.partialorder %v13710_v18, 0.0  ;;  %v10543_v18 = vld [vmem:[%s14560_s19 + $0x360] sm:$0xff]   ;;  %vm4863_vm6 = vcmp.ge.f32.partialorder %v13744_v41, 0.0 }
0x146d   :  { %v13773_v27 = vmul.f32 %v10628_v54, %v4746_v5  ;;  %v4575_v38 = vadd.f32 1.0, %v4559_v55  ;;  %v4713_v30 = vmul.f32 %v13647_v11, %v4697_v12  ;;  %v4872_v5 = vsub.f32 0.0, %v4840_v57 }
0x146e   :  { %v4667_v59 = vadd.f32 1.4214138, %v4651_v4  ;;  %v4504_v54 = vmul.f32 0.5, %v13470_v47  ;;  %v13810_v12 = vmul.f32 0.5, %v13488_v10  ;;  %v10514_v47 = vld [vmem:[%s14560_s19 + $0x2a0] sm:$0xff]   ;;  %vm4860_vm7 = vcmp.ge.f32.partialorder %v13672_v25, 0.0 }
0x146f   :  { %8785 = vmatpush3.bf16.msra.mxu1 %v10502_v46  ;;  %8767 = vmatpush3.bf16.msra.mxu0 %v10509_v16  ;;  %v4764_v16 = vsub.f32 0.0, %v13686_v53  ;;  %10639 = vrcp.f32 %v4575_v38  ;;  %v4729_v1 = vadd.f32 0.2548296, %v4713_v30  ;;  %v4511_v41 = vmul.f32 0.5, %v13726_v39  ;;  %v10548_v25 = vld [vmem:[%s14560_s19 + $0x3e8] sm:$0xff]   ;;  %v10553_v39 = vld [vmem:[%s14560_s19 + $0x330] sm:$0xff]  }
0x1470   :  { %8786 = vmatprep.subr.bf16.mxu1 %v10504_v21  ;;  %8768 = vmatprep.subr.bf16.mxu0 %v10511_v6  ;;  %v4842_v21 = vsub.f32 1.0, %v13773_v27  ;;  %v4683_v20 = vmul.f32 %v13729_v13, %v4667_v59  ;;  %v4766_v27 = vsub.f32 0.0, %v13695_v2  ;;  %vm4862_vm8 = vcmp.ge.f32.partialorder %v13675_v45, 0.0  ;;  %v10556_v45 = vld [vmem:[%s14560_s19 + $0x3f8] sm:$0xff]  }
0x1471   :  { %v13770_v48 = vpop.eup %10629  ;;  %v4745_v55 = vmul.f32 %v13647_v11, %v4729_v1  ;;  %v10521_v11 = vld [vmem:[%s14560_s19 + $0x230] sm:$0xff]  }
0x1472   :  { %v13782_v32 = vpop.eup %10631  ;;  %v4620_v29 = vmul.f32 1.0614054, %v13770_v48  ;;  %v4874_v30 = vsub.f32 0.0, %v4842_v21 }
0x1473   :  { %v4622_v36 = vmul.f32 1.0614054, %v13782_v32  ;;  %8787 = vmatpush3.bf16.msra.mxu1 %v10506_v60  ;;  %8769 = vmatpush3.bf16.msra.mxu0 %v10513_v62  ;;  %v10634_v63 = vpop.eup %10633 }
0x1474   :  { %v4636_v46 = vadd.f32 -1.4531521, %v4620_v29  ;;  %8788 = vmatprep.subr.bf16.mxu1 %v10508_v7  ;;  %8770 = vmatprep.subr.bf16.mxu0 %v10515_v50  ;;  %v13807_v62 = vpop.eup %10635  ;;  %v4781_v7 = vmul.f32 %v4765_v49, %v13714_v17  ;;  %v4699_v50 = vadd.f32 -0.28449672, %v4683_v20  ;;  %v4825_v10 = vmul.f32 %v10634_v63, %v4745_v55  ;;  %v10516_v49 = vld [vmem:[%s14560_s19 + $0x2e8] sm:$0xff]  }
0x1475   :  { %v4638_v6 = vadd.f32 -1.4531521, %v4622_v36  ;;  %v4621_v38 = vmul.f32 1.0614054, %v13807_v62  ;;  %v4888_v17 = vsel %vm4856_vm15, %v4840_v57, %v4872_v5  ;;  %v4780_v36 = vmul.f32 %v4764_v16, %v13686_v53  ;;  %v10638_v63 = vpop.eup %10637 }
0x1476   :  { %v4652_v60 = vmul.f32 %v13770_v48, %v4636_v46  ;;  %v4715_v59 = vmul.f32 %v13729_v13, %v4699_v50  ;;  %v4841_v57 = vsub.f32 1.0, %v4825_v10  ;;  %v4810_v53 = vmul.f32 1.442695, %v4781_v7  ;;  %v10520_v50 = vld [vmem:[%s14560_s19 + $0x2f0] sm:$0xff]  }
0x1477   :  { %v4654_v29 = vmul.f32 %v13782_v32, %v4638_v6  ;;  %8789 = vmatpush3.bf16.msra.mxu1 %v10510_v33  ;;  %8771 = vmatpush3.bf16.msra.mxu0 %v10517_v23  ;;  %v10523_v33 = vld [vmem:[%s14560_s19 + $0x278] sm:$0xff]   ;;  %v4637_v23 = vadd.f32 -1.4531521, %v4621_v38  ;;  %v4904_v1 = vadd.f32 1.0, %v4888_v17  ;;  %v10518_v6 = vld [vmem:[%s14560_s19 + $0x2a8] sm:$0xff]   ;;  %v4782_v7 = vmul.f32 %v4766_v27, %v13695_v2 }
0x1478   :  { %v4668_v4 = vadd.f32 1.4214138, %v4652_v60  ;;  %8790 = vmatprep.subr.bf16.mxu1 %v10512_v40  ;;  %8772 = vmatprep.subr.bf16.mxu0 %v10519_v37  ;;  %v4731_v16 = vadd.f32 0.2548296, %v4715_v59  ;;  %v10525_v40 = vld [vmem:[%s14560_s19 + $0x238] sm:$0xff]   ;;  %v4873_v37 = vsub.f32 0.0, %v4841_v57  ;;  %v4783_v10 = vmul.f32 %v4767_v22, %v13760_v42 }
0x1479   :  { %v4670_v5 = vadd.f32 1.4214138, %v4654_v29  ;;  %v4653_v20 = vmul.f32 %v13807_v62, %v4637_v23  ;;  %v4808_v55 = vmul.f32 1.442695, %v4780_v36  ;;  %v10527_v29 = vld [vmem:[%s14560_s19 + $0x340] sm:$0xff]   ;;  %10641 = vpow2.f32 %v4810_v53 }
0x147a   :  { %v4684_v46 = vmul.f32 %v13770_v48, %v4668_v4  ;;  %v4747_v4 = vmul.f32 %v13729_v13, %v4731_v16  ;;  %v4889_v2 = vsel %vm4857_vm2, %v4841_v57, %v4873_v37  ;;  %v4920_v36 = vmul.f32 %v4904_v1, %v4504_v54  ;;  %v10529_v16 = vld [vmem:[%s14560_s19 + $0x300] sm:$0xff]  }
0x147b   :  { %8791 = vmatpush3.bf16.msra.mxu1 %v10514_v47  ;;  %8773 = vmatpush3.bf16.msra.mxu0 %v10521_v11  ;;  %v13851_v47 = vpop.eup %10639  ;;  %v4890_v11 = vsel %vm4858_vm1, %v4842_v21, %v4874_v30  ;;  %v4669_v27 = vadd.f32 1.4214138, %v4653_v20  ;;  %v4905_v38 = vadd.f32 1.0, %v4889_v2  ;;  %v10524_v21 = vld [vmem:[%s14560_s19 + $0x2f8] sm:$0xff]   ;;  %v4506_v59 = vmul.f32 0.5, %v13481_v14 }
0x147c   :  { %v4700_v60 = vadd.f32 -0.28449672, %v4684_v46  ;;  %8792 = vmatprep.subr.bf16.mxu1 %v10516_v49  ;;  %8774 = vmatprep.subr.bf16.mxu0 %v10523_v33  ;;  %v4827_v17 = vmul.f32 %v10638_v63, %v4747_v4  ;;  %v4623_v13 = vmul.f32 1.0614054, %v13851_v47  ;;  %v4686_v49 = vmul.f32 %v13782_v32, %v4670_v5  ;;  %v10526_v14 = vld [vmem:[%s14560_s19 + $0x2b8] sm:$0xff]  }
0x147d   :  { %v4685_v42 = vmul.f32 %v13807_v62, %v4669_v27  ;;  %v4921_v30 = vmul.f32 %v4905_v38, %v13810_v12  ;;  %10643 = vpow2.f32 %v4808_v55  ;;  %v4814_v46 = vmul.f32 1.442695, %v4783_v10 }
0x147e   :  { %v4716_v61 = vmul.f32 %v13770_v48, %v4700_v60  ;;  %v4843_v54 = vsub.f32 1.0, %v4827_v17  ;;  %v4639_v33 = vadd.f32 -1.4531521, %v4623_v13  ;;  %v4906_v57 = vadd.f32 1.0, %v4890_v11  ;;  %v10533_v11 = vld [vmem:[%s14560_s19 + $0x308] sm:$0xff]  }
0x147f   :  { %8793 = vmatpush3.bf16.msra.mxu1 %v10518_v6  ;;  %8775 = vmatpush3.bf16.msra.mxu0 %v10525_v40  ;;  %v4701_v22 = vadd.f32 -0.28449672, %v4685_v42  ;;  %v4937_v23 = vpack.c.bf16 %v4921_v30, %v4921_v30  ;;  %v4936_v5 = vpack.c.bf16 %v4920_v36, %v4920_v36  ;;  %v4702_v12 = vadd.f32 -0.28449672, %v4686_v49  ;;  %v10528_v6 = vld [vmem:[%s14560_s19 + $0x3c0] sm:$0xff]   ;;  %v10531_v40 = vld [vmem:[%s14560_s19 + $0x348] sm:$0xff]  }
0x1480   :  { %8794 = vmatprep.subr.bf16.mxu1 %v10520_v50  ;;  %8804 = vmatprep.subr.bf16.mxu0 %v10527_v29  ;;  %v4875_v53 = vsub.f32 0.0, %v4843_v54  ;;  %v4655_v1 = vmul.f32 %v13851_v47, %v4639_v33  ;;  %v4732_v20 = vadd.f32 0.2548296, %v4716_v61  ;;  %v4812_v63 = vmul.f32 1.442695, %v4782_v7  ;;  %v10530_v49 = vld [vmem:[%s14560_s19 + $0x380] sm:$0xff]  }
0x1481   :  { %v4717_v37 = vmul.f32 %v13807_v62, %v4701_v22  ;;  %6167 = vmatprep.mubr.bf16.mxu0 %v4937_v23  ;;  %v4507_v55 = vmul.f32 0.5, %v13553_v51  ;;  %10645 = vpow2.f32 %v4814_v46  ;;  %v4922_v29 = vmul.f32 %v4906_v57, %v4506_v59  ;;  %v10535_v51 = vld [vmem:[%s14560_s19 + $0x350] sm:$0xff]   ;;  %v10532_v61 = vld [vmem:[%s14560_s19 + $0x3c8] sm:$0xff]  }
0x1482   :  { %v4891_v9 = vsel %vm4859_vm4, %v4843_v54, %v4875_v53  ;;  %v4671_v60 = vadd.f32 1.4214138, %v4655_v1  ;;  %6168 = vmatmul.mubr.bf16.vlgmr.msra.gmra.mrb[176].mxu0 %v4936_v5  ;;  %v4718_v7 = vmul.f32 %v13782_v32, %v4702_v12  ;;  %v4748_v17 = vmul.f32 %v13770_v48, %v4732_v20  ;;  %v10539_v54 = vld [vmem:[%s14560_s19 + $0x358] sm:$0xff]   ;;  %v10534_v22 = vld [vmem:[%s14560_s19 + $0x388] sm:$0xff]   ;;  %v10536_v23 = vld [vmem:[%s14560_s19 + $0x3d0] sm:$0xff]  }
0x1483   :  { %8795 = vmatpush3.bf16.msra.mxu1 %v10522_v19  ;;  %v4907_v50 = vadd.f32 1.0, %v4891_v9  ;;  %v4733_v4 = vadd.f32 0.2548296, %v4717_v37  ;;  %8805 = vmatpush3.bf16.msra.mxu0 %v10529_v16  ;;  %v10642_v38 = vpop.eup %10641  ;;  %10647 = vpow2.f32 %v4812_v63  ;;  %v4938_v42 = vpack.c.bf16 %v4922_v29, %v4922_v29  ;;  %v10541_v53 = vld [vmem:[%s14560_s19 + $0x318] sm:$0xff]   ;;  %v10538_v20 = vld [vmem:[%s14560_s19 + $0x390] sm:$0xff]   ;;  %v10545_v63 = vld [vmem:[%s14560_s19 + $0x320] sm:$0xff]  }
0x1484   :  { %8796 = vmatprep.subr.bf16.mxu1 %v10524_v21  ;;  %v4687_v10 = vmul.f32 %v13851_v47, %v4671_v60  ;;  %8806 = vmatprep.subr.bf16.mxu0 %v10531_v40  ;;  %v4734_v30 = vadd.f32 0.2548296, %v4718_v7  ;;  %v10549_v7 = vld [vmem:[%s14560_s19 + $0x328] sm:$0xff]  }
0x1485   :  { %v4923_v2 = vmul.f32 %v4907_v50, %v4507_v55  ;;  %v4749_v27 = vmul.f32 %v13807_v62, %v4733_v4  ;;  %v10537_v62 = vld [vmem:[%s14560_s19 + $0x310] sm:$0xff]   ;;  %v10547_v55 = vld [vmem:[%s14560_s19 + $0x368] sm:$0xff]  }
0x1486   :  { %v4703_v13 = vadd.f32 -0.28449672, %v4687_v10  ;;  %v4750_v5 = vmul.f32 %v13782_v32, %v4734_v30  ;;  %v10540_v32 = vld [vmem:[%s14560_s19 + $0x3d8] sm:$0xff]   ;;  %v10544_v10 = vld [vmem:[%s14560_s19 + $0x3e0] sm:$0xff]  }
0x1487   :  { %8797 = vmatpush3.bf16.msra.mxu1 %v10526_v14  ;;  %v4939_v36 = vpack.c.bf16 %v4923_v2, %v4923_v2  ;;  %v4829_v19 = vmul.f32 %v10642_v38, %v4749_v27  ;;  %8807 = vmatpush3.bf16.msra.mxu0 %v10533_v11  ;;  %v10644_v21 = vpop.eup %10643  ;;  %v10542_v11 = vld [vmem:[%s14560_s19 + $0x398] sm:$0xff]   ;;  %v10551_v27 = vld [vmem:[%s14560_s19 + $0x370] sm:$0xff]  }
0x1488   :  { %8826 = vmatprep.subr.bf16.mxu1 %v10528_v6  ;;  %v4719_v48 = vmul.f32 %v13851_v47, %v4703_v13  ;;  %8808 = vmatprep.subr.bf16.mxu0 %v10535_v51  ;;  %v4828_v59 = vmul.f32 %v10644_v21, %v4748_v17  ;;  %v4509_v6 = vmul.f32 0.5, %v13691_v15  ;;  %v10546_v13 = vld [vmem:[%s14560_s19 + $0x3a0] sm:$0xff]   ;;  %v10552_v21 = vld [vmem:[%s14560_s19 + $0x3f0] sm:$0xff]   ;;  %v10557_v30 = vld [vmem:[%s14560_s19 + $0x338] sm:$0xff]  }
0x1489   :  { %6207 = vmatprep.mubr.bf16.mxu1 %v4939_v36  ;;  %v4845_v33 = vsub.f32 1.0, %v4829_v19 }
0x148a   :  { %6208 = vmatmul.mubr.bf16.vlgmr.msra.gmra.mrb[184].mxu1 %v4938_v42  ;;  %v4735_v46 = vadd.f32 0.2548296, %v4719_v48  ;;  %v4844_v14 = vsub.f32 1.0, %v4828_v59  ;;  %v10555_v42 = vld [vmem:[%s14560_s19 + $0x378] sm:$0xff]   ;;  %v10550_v48 = vld [vmem:[%s14560_s19 + $0x3a8] sm:$0xff]  }
0x148b   :  { %8827 = vmatpush3.bf16.msra.mxu1 %v10530_v49  ;;  %v4877_v57 = vsub.f32 0.0, %v4845_v33  ;;  %8809 = vmatpush3.bf16.msra.mxu0 %v10537_v62  ;;  %v10646_v1 = vpop.eup %10645  ;;  %v4508_v62 = vmul.f32 0.5, %v13658_v3 }
0x148c   :  { %8828 = vmatprep.subr.bf16.mxu1 %v10532_v61  ;;  %v4751_v16 = vmul.f32 %v13851_v47, %v4735_v46  ;;  %8810 = vmatprep.subr.bf16.mxu0 %v10539_v54  ;;  %v4876_v50 = vsub.f32 0.0, %v4844_v14 }
0x148d   :  { %v4893_v12 = vsel %vm4861_vm5, %v4845_v33, %v4877_v57  ;;  %v10648_v47 = vpop.eup %10647  ;;  %v10554_v33 = vld [vmem:[%s14560_s19 + $0x3b0] sm:$0xff]   ;;  %v10558_v57 = vld [vmem:[%s14560_s19 + $0x3b8] sm:$0xff]  }
0x148e   :  { %v4909_v40 = vadd.f32 1.0, %v4893_v12  ;;  %v4831_v37 = vmul.f32 %v10646_v1, %v4751_v16  ;;  %v4830_v60 = vmul.f32 %v10648_v47, %v4750_v5  ;;  %v4892_v17 = vsel %vm4860_vm7, %v4844_v14, %v4876_v50  ;;  %v8026_v12 = vld [vmem:[%s14562_s20] ss:$0 sm:$0xff] }
0x148f   :  { %8829 = vmatpush3.bf16.msra.mxu1 %v10534_v22  ;;  %8811 = vmatpush3.bf16.msra.mxu0 %v10541_v53  ;;  %v4908_v49 = vadd.f32 1.0, %v4892_v17  ;;  %v4510_v22 = vmul.f32 0.5, %v13660_v8 }
0x1490   :  { %8830 = vmatprep.subr.bf16.mxu1 %v10536_v23  ;;  %v4925_v9 = vmul.f32 %v4909_v40, %v4509_v6  ;;  %v4847_v15 = vsub.f32 1.0, %v4831_v37  ;;  %8812 = vmatprep.subr.bf16.mxu0 %v10543_v18  ;;  %v4846_v51 = vsub.f32 1.0, %v4830_v60 }
0x1491   :  { %v4924_v54 = vmul.f32 %v4908_v49, %v4508_v62 }
0x1492   :  { %v4941_v4 = vpack.c.bf16 %v4925_v9, %v4925_v9  ;;  %v4879_v29 = vsub.f32 0.0, %v4847_v15  ;;  %v4878_v19 = vsub.f32 0.0, %v4846_v51 }
0x1493   :  { %8831 = vmatpush3.bf16.msra.mxu1 %v10538_v20  ;;  %8813 = vmatpush3.bf16.msra.mxu0 %v10545_v63  ;;  %v4940_v46 = vpack.c.bf16 %v4924_v54, %v4924_v54 }
0x1494   :  { %8832 = vmatprep.subr.bf16.mxu1 %v10540_v32  ;;  %v4895_v2 = vsel %vm4863_vm6, %v4847_v15, %v4879_v29  ;;  %8814 = vmatprep.subr.bf16.mxu0 %v10547_v55  ;;  %v4894_v3 = vsel %vm4862_vm8, %v4846_v51, %v4878_v19 }
0x1495   :  { %6247 = vmatprep.mubr.bf16.mxu0 %v4941_v4  ;;  %v4911_v38 = vadd.f32 1.0, %v4895_v2  ;;  %v4910_v59 = vadd.f32 1.0, %v4894_v3 }
0x1497   :  { %8833 = vmatpush3.bf16.msra.mxu1 %v10542_v11  ;;  %v4927_v36 = vmul.f32 %v4911_v38, %v4511_v41  ;;  %8815 = vmatpush3.bf16.msra.mxu0 %v10549_v7  ;;  %v4926_v23 = vmul.f32 %v4910_v59, %v4510_v22 }
0x1498   :  { %8834 = vmatprep.subr.bf16.mxu1 %v10544_v10  ;;  %8816 = vmatprep.subr.bf16.mxu0 %v10551_v27 }
0x1499   :  { %v4943_v61 = vpack.c.bf16 %v4927_v36, %v4927_v36  ;;  %v4942_v53 = vpack.c.bf16 %v4926_v23, %v4926_v23  ;;  %v6325_v23 = vld [vmem:[%s14563_s23] sm:$0xff] }
0x149b   :  { %8835 = vmatpush3.bf16.msra.mxu1 %v10546_v13  ;;  %6287 = vmatprep.mubr.bf16.mxu1 %v4943_v61 }
0x149c   :  { %8836 = vmatprep.subr.bf16.mxu1 %v10548_v25  ;;  %8817 = vmatpush3.bf16.msra.mxu0 %v10553_v39 }
0x149d   :  { %8818 = vmatprep.subr.bf16.mxu0 %v10555_v42 }
0x149f   :  { %8837 = vmatpush3.bf16.msra.mxu1 %v10550_v48 }
0x14a0   :  { %8838 = vmatprep.subr.bf16.mxu1 %v10552_v21  ;;  %8819 = vmatpush3.bf16.msra.mxu0 %v10557_v30 }
0x14a3   :  { %8839 = vmatpush3.bf16.msra.mxu1 %v10554_v33  ;;  %6248 = vmatmul.mubr.bf16.vlgmr.msra.gmra.mrb[180].mxu0 %v4940_v46 }
0x14a4   :  { %8840 = vmatprep.subr.bf16.mxu1 %v10556_v45  ;;  %7209 = vmatprep.mubr.bf16.mxu0 %v10687_v58 }
0x14a7   :  { %8841 = vmatpush3.bf16.msra.mxu1 %v10558_v57 }
0x14aa   :  { %6288 = vmatmul.mubr.bf16.vlgmr.msra.gmra.mrb[188].mxu1 %v4942_v53  ;;  %v6333_v53 = vld [vmem:[%s14563_s23 + $0x40] sm:$0xff] }
0x14ab   :  { %7250 = vmatprep.mubr.bf16.mxu1 %v10687_v58 }
0x150e   :  { %v8688_v16 = vpop.f32.mrb[168].mxu0 }
0x150f   :  { %v8689_v1 = vpop.f32.mrb[169].mxu0 }
0x1510   :  { %v8690_v5 = vadd.f32 %v8689_v1, %v8688_v16  ;;  %v8691_v18 = vpop.f32.mrb[170].mxu0  ;;  %v6326_v16 = vld [vmem:[%s14563_s23 + $0x8] sm:$0xff]  ;;  %v8157_v1 = vcombine.low %v6325_v23, %v6333_v53 }
0x1511   :  { %v8692_v8 = vpop.f32.mrb[171].mxu0  ;;  %v6334_v18 = vld [vmem:[%s14563_s23 + $0x48] sm:$0xff] }
0x1512   :  { %v6010_v6 = vadd.f32 %v8690_v5, %v8026_v12  ;;  %v8158_v5 = vcombine.high %v6325_v23, %v6333_v53  ;;  %v6349_v8 = vld [vmem:[%s14563_s23 + $0xc0] sm:$0xff]  ;;  %v8159_v12 = vcombine.low %v6326_v16, %v6334_v18  ;;  %v6422_v53 = vld [vmem:[%s14563_s23 + $0x308] sm:$0xff] }
0x1513   :  { %v6429_v23 = vld [vmem:[%s14563_s23 + $0x340] sm:$0xff] }
0x1514   :  { %7177 = vmatprep.subr.bf16.mxu0 %v8158_v5 }
0x1515   :  { %7178 = vmatpush1.bf16.msra.mxu0 %v8157_v1  ;;  %v6430_v1 = vld [vmem:[%s14563_s23 + $0x348] sm:$0xff] }
0x1518   :  { %v8710_v14 = vpop.f32.mrb[176].mxu1 }
0x1519   :  { %v8711_v40 = vpop.f32.mrb[177].mxu1 }
0x151a   :  { %v8712_v37 = vadd.f32 %v8711_v40, %v8710_v14  ;;  %v8713_v20 = vpop.f32.mrb[178].mxu1  ;;  %v8160_v14 = vcombine.high %v6326_v16, %v6334_v18  ;;  %v6342_v40 = vld [vmem:[%s14563_s23 + $0x88] sm:$0xff]  ;;  %v8255_v18 = vcombine.low %v6422_v53, %v6430_v1 }
0x151b   :  { %v8714_v47 = vpop.f32.mrb[179].mxu1 }
0x151c   :  { %v6050_v32 = vadd.f32 %v8712_v37, %v6010_v6  ;;  %v6350_v37 = vld [vmem:[%s14563_s23 + $0xc8] sm:$0xff]  ;;  %7218 = vmatprep.subr.bf16.mxu1 %v8160_v14 }
0x151d   :  { %v8176_v20 = vcombine.high %v6342_v40, %v6350_v37  ;;  %7219 = vmatpush1.bf16.msra.mxu1 %v8159_v12  ;;  %v6445_v12 = vld [vmem:[%s14563_s23 + $0x3c0] sm:$0xff]  ;;  %v6438_v14 = vld [vmem:[%s14563_s23 + $0x388] sm:$0xff] }
0x151f   :  { %7220 = vmatprep.subr.bf16.mxu1 %v8176_v20 }
0x1535   :  { %v8732_v63 = vpop.f32.mrb[172].mxu0 }
0x1536   :  { %v8733_v9 = vpop.f32.mrb[173].mxu0 }
0x1537   :  { %v8734_v15 = vadd.f32 %v8733_v9, %v8732_v63  ;;  %v8735_v60 = vpop.f32.mrb[174].mxu0 }
0x1538   :  { %v8736_v55 = vpop.f32.mrb[175].mxu0 }
0x1539   :  { %v6090_v50 = vadd.f32 %v8734_v15, %v6050_v32  ;;  %v8175_v32 = vcombine.low %v6342_v40, %v6350_v37  ;;  %v6357_v55 = vld [vmem:[%s14563_s23 + $0x100] sm:$0xff]  ;;  %v6446_v40 = vld [vmem:[%s14563_s23 + $0x3c8] sm:$0xff] }
0x153a   :  { %v8271_v20 = vcombine.low %v6438_v14, %v6446_v40 }
0x153b   :  { %7221 = vmatpush1.bf16.msra.mxu1 %v8175_v32  ;;  %v6327_v32 = vld [vmem:[%s14563_s23 + $0x10] sm:$0xff] }
0x153d   :  { %v8754_v4 = vpop.f32.mrb[180].mxu1 }
0x153e   :  { %v8755_v29 = vpop.f32.mrb[181].mxu1 }
0x153f   :  { %v8756_v11 = vadd.f32 %v8755_v29, %v8754_v4  ;;  %v8757_v10 = vpop.f32.mrb[182].mxu1  ;;  %v6358_v4 = vld [vmem:[%s14563_s23 + $0x108] sm:$0xff] }
0x1540   :  { %v8758_v7 = vpop.f32.mrb[183].mxu1 }
0x1541   :  { %v6130_v2 = vadd.f32 %v8756_v11, %v6090_v50  ;;  %v6365_v50 = vld [vmem:[%s14563_s23 + $0x140] sm:$0xff]  ;;  %v6366_v11 = vld [vmem:[%s14563_s23 + $0x148] sm:$0xff] }
0x1542   :  { %v8190_v29 = vcombine.high %v6357_v55, %v6365_v50  ;;  %v8189_v10 = vcombine.low %v6357_v55, %v6365_v50  ;;  %v8191_v7 = vcombine.low %v6358_v4, %v6366_v11  ;;  %v6336_v50 = vld [vmem:[%s14563_s23 + $0x58] sm:$0xff] }
0x1555   :  { %v8776_v51 = vpop.f32.mrb[176].mxu0 }
0x1556   :  { %v8777_v41 = vpop.f32.mrb[177].mxu0 }
0x1557   :  { %v8778_v27 = vadd.f32 %v8777_v41, %v8776_v51  ;;  %v8779_v38 = vpop.f32.mrb[178].mxu0  ;;  %v6373_v51 = vld [vmem:[%s14563_s23 + $0x180] sm:$0xff] }
0x1558   :  { %v8780_v17 = vpop.f32.mrb[179].mxu0  ;;  %v6381_v41 = vld [vmem:[%s14563_s23 + $0x1c0] sm:$0xff] }
0x1559   :  { %v6170_v13 = vadd.f32 %v8778_v27, %v6130_v2  ;;  %v8192_v2 = vcombine.high %v6358_v4, %v6366_v11  ;;  %v6374_v27 = vld [vmem:[%s14563_s23 + $0x188] sm:$0xff]  ;;  %v8206_v38 = vcombine.high %v6373_v51, %v6381_v41 }
0x155a   :  { %v6382_v17 = vld [vmem:[%s14563_s23 + $0x1c8] sm:$0xff] }
0x155b   :  { %7222 = vmatprep.subr.bf16.mxu1 %v8192_v2 }
0x155c   :  { %7223 = vmatpush1.bf16.msra.mxu1 %v8191_v7 }
0x155d   :  { %v8798_v36 = vpop.f32.mrb[184].mxu1 }
0x155e   :  { %v8799_v25 = vpop.f32.mrb[185].mxu1 }
0x155f   :  { %v8800_v39 = vadd.f32 %v8799_v25, %v8798_v36  ;;  %v8801_v49 = vpop.f32.mrb[186].mxu1  ;;  %v8207_v36 = vcombine.low %v6374_v27, %v6382_v17  ;;  %v8208_v25 = vcombine.high %v6374_v27, %v6382_v17  ;;  %v8156_v27 = vld [vmem:[%s14565_s22] ss:$0 sm:$0xff] }
0x1560   :  { %v8802_v19 = vpop.f32.mrb[187].mxu1  ;;  %v6397_v49 = vld [vmem:[%s14563_s23 + $0x240] sm:$0xff] }
0x1561   :  { %v6210_v42 = vadd.f32 %v8800_v39, %v6170_v13  ;;  %v8205_v13 = vcombine.low %v6373_v51, %v6381_v41  ;;  %7224 = vmatprep.subr.bf16.mxu1 %v8208_v25  ;;  %v6389_v39 = vld [vmem:[%s14563_s23 + $0x200] sm:$0xff]  ;;  %v6390_v19 = vld [vmem:[%s14563_s23 + $0x208] sm:$0xff]  ;;  %v6344_v25 = vld [vmem:[%s14563_s23 + $0x98] sm:$0xff] }
0x1562   :  { %7225 = vmatpush1.bf16.msra.mxu1 %v8207_v36  ;;  %v8155_v51 = vld [vmem:[%s14564_s21] ss:$0 sm:$0xff]  ;;  %v6351_v36 = vld [vmem:[%s14563_s23 + $0xd0] sm:$0xff] }
0x1576   :  { %v8820_v61 = vpop.f32.mrb[180].mxu0 }
0x1577   :  { %v8821_v62 = vpop.f32.mrb[181].mxu0 }
0x1578   :  { %v8822_v48 = vadd.f32 %v8821_v62, %v8820_v61  ;;  %v8823_v21 = vpop.f32.mrb[182].mxu0  ;;  %v6398_v61 = vld [vmem:[%s14563_s23 + $0x248] sm:$0xff]  ;;  %v8221_v62 = vcombine.low %v6389_v39, %v6397_v49 }
0x1579   :  { %v8824_v30 = vpop.f32.mrb[183].mxu0  ;;  %v8224_v21 = vcombine.high %v6390_v19, %v6398_v61 }
0x157a   :  { %v6250_v54 = vadd.f32 %v8822_v48, %v6210_v42  ;;  %v8222_v42 = vcombine.high %v6389_v39, %v6397_v49  ;;  %v8223_v48 = vcombine.low %v6390_v19, %v6398_v61  ;;  %v6405_v30 = vld [vmem:[%s14563_s23 + $0x280] sm:$0xff]  ;;  %v6359_v61 = vld [vmem:[%s14563_s23 + $0x110] sm:$0xff] }
0x157b   :  { %7226 = vmatprep.subr.bf16.mxu1 %v8224_v21 }
0x157c   :  { %7227 = vmatpush1.bf16.msra.mxu1 %v8223_v48  ;;  %v6360_v48 = vld [vmem:[%s14563_s23 + $0x118] sm:$0xff] }
0x157d   :  { %v8842_v3 = vpop.f32.mrb[188].mxu1 }
0x157e   :  { %v8843_v33 = vpop.f32.mrb[189].mxu1 }
0x157f   :  { %v8844_v59 = vadd.f32 %v8843_v33, %v8842_v3  ;;  %v8845_v45 = vpop.f32.mrb[190].mxu1  ;;  %v6406_v3 = vld [vmem:[%s14563_s23 + $0x288] sm:$0xff] }
0x1580   :  { %v8846_v46 = vpop.f32.mrb[191].mxu1 }
0x1581   :  { %v6290_v22 = vadd.f32 %v8844_v59, %v6250_v54  ;;  %v6413_v54 = vld [vmem:[%s14563_s23 + $0x2c0] sm:$0xff]  ;;  %v6414_v59 = vld [vmem:[%s14563_s23 + $0x2c8] sm:$0xff] }
0x1582   :  { %v8238_v33 = vcombine.high %v6405_v30, %v6413_v54  ;;  %v8237_v45 = vcombine.low %v6405_v30, %v6413_v54  ;;  %v8239_v46 = vcombine.low %v6406_v3, %v6414_v59 }
0x1583   :  { %v6295_v57 = vadd.f32 %v6290_v22, %v12912_v24  ;;  %v6341_v24 = vld [vmem:[%s14563_s23 + $0x80] sm:$0xff]  ;;  %v8240_v22 = vcombine.high %v6406_v3, %v6414_v59  ;;  %v6383_v59 = vld [vmem:[%s14563_s23 + $0x1d0] sm:$0xff] }
0x1584   :  { %v8174_v6 = vcombine.high %v6341_v24, %v6349_v8  ;;  %v8173_v47 = vcombine.low %v6341_v24, %v6349_v8  ;;  %v8256_v24 = vcombine.high %v6422_v53, %v6430_v1  ;;  %v6437_v8 = vld [vmem:[%s14563_s23 + $0x380] sm:$0xff]  ;;  %v6399_v1 = vld [vmem:[%s14563_s23 + $0x250] sm:$0xff] }
0x1585   :  { %6298 = vadd.xlane.f32.xlu0 %v6295_v57  ;;  %7228 = vmatprep.subr.bf16.mxu1 %v8240_v22  ;;  %v8269_v37 = vcombine.low %v6437_v8, %v6445_v12 }
0x1586   :  { %7179 = vmatprep.subr.bf16.mxu0 %v8174_v6  ;;  %7229 = vmatpush1.bf16.msra.mxu1 %v8239_v46  ;;  %v8270_v6 = vcombine.high %v6437_v8, %v6445_v12  ;;  %v6384_v46 = vld [vmem:[%s14563_s23 + $0x1d8] sm:$0xff] }
0x1587   :  { %7180 = vmatpush1.bf16.msra.mxu0 %v8173_v47  ;;  %7230 = vmatprep.subr.bf16.mxu1 %v8256_v24  ;;  %v8272_v47 = vcombine.high %v6438_v14, %v6446_v40  ;;  %v6415_v40 = vld [vmem:[%s14563_s23 + $0x2d0] sm:$0xff] }
0x1588   :  { %7181 = vmatprep.subr.bf16.mxu0 %v8190_v29 }
0x158a   :  { %7231 = vmatpush1.bf16.msra.mxu1 %v8255_v18  ;;  %v6400_v18 = vld [vmem:[%s14563_s23 + $0x258] sm:$0xff] }
0x158b   :  { %7182 = vmatpush1.bf16.msra.mxu0 %v8189_v10  ;;  %7232 = vmatprep.subr.bf16.mxu1 %v8272_v47 }
0x158c   :  { %7183 = vmatprep.subr.bf16.mxu0 %v8206_v38 }
0x158e   :  { %7233 = vmatpush1.bf16.msra.mxu1 %v8271_v20  ;;  %v6416_v20 = vld [vmem:[%s14563_s23 + $0x2d8] sm:$0xff] }
0x158f   :  { %7184 = vmatpush1.bf16.msra.mxu0 %v8205_v13  ;;  %v6343_v13 = vld [vmem:[%s14563_s23 + $0x90] sm:$0xff] }
0x1590   :  { %7185 = vmatprep.subr.bf16.mxu0 %v8222_v42  ;;  %v8178_v19 = vcombine.high %v6343_v13, %v6351_v36  ;;  %v8177_v21 = vcombine.low %v6343_v13, %v6351_v36 }
0x1593   :  { %7186 = vmatpush1.bf16.msra.mxu0 %v8221_v62  ;;  %v6367_v62 = vld [vmem:[%s14563_s23 + $0x150] sm:$0xff] }
0x1594   :  { %7187 = vmatprep.subr.bf16.mxu0 %v8238_v33  ;;  %v8194_v54 = vcombine.high %v6359_v61, %v6367_v62  ;;  %v6375_v33 = vld [vmem:[%s14563_s23 + $0x190] sm:$0xff]  ;;  %v8193_v22 = vcombine.low %v6359_v61, %v6367_v62 }
0x1595   :  { %v8209_v24 = vcombine.low %v6375_v33, %v6383_v59 }
0x1597   :  { %7188 = vmatpush1.bf16.msra.mxu0 %v8237_v45  ;;  %v6376_v45 = vld [vmem:[%s14563_s23 + $0x198] sm:$0xff] }
0x1598   :  { %v8212_v53 = vcombine.high %v6376_v45, %v6384_v46  ;;  %v8211_v8 = vcombine.low %v6376_v45, %v6384_v46 }
0x1612   :  { %v6299_v63 = vpop.xlane.xlu0 %6298 }
0x1613   :  { %v6300_v9 = vmul.f32 0.0078125, %v6299_v63  ;;  %v6335_v63 = vld [vmem:[%s14563_s23 + $0x50] sm:$0xff] }
0x1614   :  { %v8162_v55 = vcombine.high %v6327_v32, %v6335_v63 }
0x1615   :  { %v14015_v15 = vsub.f32 %v6295_v57, %v6300_v9  ;;  %v6421_v57 = vld [vmem:[%s14563_s23 + $0x300] sm:$0xff]  ;;  %v6328_v9 = vld [vmem:[%s14563_s23 + $0x18] sm:$0xff] }
0x1616   :  { %v8254_v16 = vcombine.high %v6421_v57, %v6429_v23  ;;  %v8253_v5 = vcombine.low %v6421_v57, %v6429_v23  ;;  %v8163_v4 = vcombine.low %v6328_v9, %v6336_v50  ;;  %v8164_v29 = vcombine.high %v6328_v9, %v6336_v50  ;;  %v6424_v50 = vld [vmem:[%s14563_s23 + $0x318] sm:$0xff] }
0x1617   :  { %v6302_v60 = vmul.f32 %v14015_v15, %v14015_v15  ;;  %v8210_v23 = vcombine.high %v6375_v33, %v6383_v59 }
0x1618   :  { %7189 = vmatprep.subr.bf16.mxu0 %v8254_v16  ;;  %7300 = vmatprep.subr.bf16.mxu1 %v8164_v29  ;;  %v6391_v16 = vld [vmem:[%s14563_s23 + $0x210] sm:$0xff] }
0x1619   :  { %6303 = vadd.xlane.f32.xlu1 %v6302_v60  ;;  %7190 = vmatpush1.bf16.msra.mxu0 %v8253_v5  ;;  %v8161_v60 = vcombine.low %v6327_v32, %v6335_v63  ;;  %v6392_v5 = vld [vmem:[%s14563_s23 + $0x218] sm:$0xff]  ;;  %v8226_v12 = vcombine.high %v6391_v16, %v6399_v1  ;;  %v8225_v47 = vcombine.low %v6391_v16, %v6399_v1 }
0x161a   :  { %7191 = vmatprep.subr.bf16.mxu0 %v8270_v6  ;;  %v8228_v14 = vcombine.high %v6392_v5, %v6400_v18  ;;  %v6407_v6 = vld [vmem:[%s14563_s23 + $0x290] sm:$0xff]  ;;  %v8227_v32 = vcombine.low %v6392_v5, %v6400_v18 }
0x161b   :  { %v8242_v63 = vcombine.high %v6407_v6, %v6415_v40  ;;  %v8241_v29 = vcombine.low %v6407_v6, %v6415_v40 }
0x161d   :  { %7192 = vmatpush1.bf16.msra.mxu0 %v8269_v37  ;;  %v6408_v37 = vld [vmem:[%s14563_s23 + $0x298] sm:$0xff] }
0x161e   :  { %7259 = vmatprep.subr.bf16.mxu0 %v8162_v55  ;;  %v8244_v9 = vcombine.high %v6408_v37, %v6416_v20  ;;  %v6431_v55 = vld [vmem:[%s14563_s23 + $0x350] sm:$0xff] }
0x16a6   :  { %v6304_v11 = vpop.xlane.xlu1 %6303 }
0x16a7   :  { %v6305_v10 = vmul.f32 0.0078125, %v6304_v11  ;;  %v8243_v11 = vcombine.low %v6408_v37, %v6416_v20 }
0x16a9   :  { %v6306_v7 = vadd.f32 1e-05, %v6305_v10 }
0x16ab   :  { %10649 = vrsqrt.f32 %v6306_v7 }
0x16b5   :  { %v10650_v2 = vpop.eup %10649 }
0x16b6   :  { %v6308_v41 = vmul.f32 %v10650_v2, %v14015_v15  ;;  %v6352_v15 = vld [vmem:[%s14563_s23 + $0xd8] sm:$0xff]  ;;  %v6439_v2 = vld [vmem:[%s14563_s23 + $0x390] sm:$0xff] }
0x16b7   :  { %v8180_v42 = vcombine.high %v6344_v25, %v6352_v15  ;;  %v8179_v30 = vcombine.low %v6344_v25, %v6352_v15  ;;  %v6329_v15 = vld [vmem:[%s14563_s23 + $0x20] sm:$0xff] }
0x16b8   :  { %v6315_v38 = vmul.f32 %v8155_v51, %v6308_v41  ;;  %v6447_v51 = vld [vmem:[%s14563_s23 + $0x3d0] sm:$0xff]  ;;  %v6440_v41 = vld [vmem:[%s14563_s23 + $0x398] sm:$0xff] }
0x16b9   :  { %v8274_v36 = vcombine.high %v6439_v2, %v6447_v51  ;;  %v8273_v61 = vcombine.low %v6439_v2, %v6447_v51 }
0x16ba   :  { %v14110_v17 = vadd.f32 %v8156_v27, %v6315_v38  ;;  %v6448_v27 = vld [vmem:[%s14563_s23 + $0x3d8] sm:$0xff] }
0x16bb   :  { %v8276_v25 = vcombine.high %v6440_v41, %v6448_v27  ;;  %v8275_v62 = vcombine.low %v6440_v41, %v6448_v27 }
0x16bc   :  { %v6323_v39 = vadd.f32 %v14110_v17, %v12776_v43  ;;  %v6368_v43 = vld [vmem:[%s14563_s23 + $0x158] sm:$0xff] }
0x16bd   :  { %v8196_v3 = vcombine.high %v6360_v48, %v6368_v43  ;;  %v8195_v57 = vcombine.low %v6360_v48, %v6368_v43 }
0x16be   :  { %v14126_v49 = vpack.c.bf16 %v6323_v39, %v6323_v39  ;;  %v6337_v39 = vld [vmem:[%s14563_s23 + $0x60] sm:$0xff] }
0x16bf   :  { %v8166_v48 = vcombine.high %v6329_v15, %v6337_v39  ;;  %v8165_v33 = vcombine.low %v6329_v15, %v6337_v39 }
0x16c0   :  { %7210 = vmatmul.mubr.bf16.vlgmr.msra.gmra.mrb[184].mxu0 %v14126_v49  ;;  %7251 = vmatmul.mubr.bf16.vlgmr.msra.gmra.mrb[192].mxu1 %v14126_v49 }
0x16c1   :  { %7260 = vmatpush1.bf16.msra.mxu0 %v8161_v60  ;;  %7301 = vmatpush1.bf16.msra.mxu1 %v8163_v4  ;;  %v6423_v60 = vld [vmem:[%s14563_s23 + $0x310] sm:$0xff]  ;;  %v6432_v4 = vld [vmem:[%s14563_s23 + $0x358] sm:$0xff] }
0x16c2   :  { %7261 = vmatprep.subr.bf16.mxu0 %v8178_v19  ;;  %7302 = vmatprep.subr.bf16.mxu1 %v8180_v42  ;;  %v8258_v10 = vcombine.high %v6423_v60, %v6431_v55  ;;  %v8260_v7 = vcombine.high %v6424_v50, %v6432_v4  ;;  %v8257_v38 = vcombine.low %v6423_v60, %v6431_v55  ;;  %v6330_v19 = vld [vmem:[%s14563_s23 + $0x28] sm:$0xff] }
0x16c3   :  { %7291 = vmatprep.mubr.bf16.mxu0 %v10687_v58  ;;  %7332 = vmatprep.mubr.bf16.mxu1 %v10687_v58  ;;  %v8259_v13 = vcombine.low %v6424_v50, %v6432_v4  ;;  %v6338_v42 = vld [vmem:[%s14563_s23 + $0x68] sm:$0xff] }
0x16c4   :  { %v8168_v43 = vcombine.high %v6330_v19, %v6338_v42  ;;  %v8167_v59 = vcombine.low %v6330_v19, %v6338_v42 }
0x16c5   :  { %7262 = vmatpush1.bf16.msra.mxu0 %v8177_v21  ;;  %7303 = vmatpush1.bf16.msra.mxu1 %v8179_v30  ;;  %v6345_v21 = vld [vmem:[%s14563_s23 + $0xa0] sm:$0xff] }
0x16c6   :  { %7263 = vmatprep.subr.bf16.mxu0 %v8194_v54  ;;  %7304 = vmatprep.subr.bf16.mxu1 %v8196_v3  ;;  %v6353_v30 = vld [vmem:[%s14563_s23 + $0xe0] sm:$0xff]  ;;  %v6346_v54 = vld [vmem:[%s14563_s23 + $0xa8] sm:$0xff] }
0x16c7   :  { %v6354_v3 = vld [vmem:[%s14563_s23 + $0xe8] sm:$0xff]  ;;  %v8182_v45 = vcombine.high %v6345_v21, %v6353_v30  ;;  %v8181_v16 = vcombine.low %v6345_v21, %v6353_v30 }
0x16c8   :  { %v8184_v46 = vcombine.high %v6346_v54, %v6354_v3  ;;  %v8183_v1 = vcombine.low %v6346_v54, %v6354_v3 }
0x16c9   :  { %7264 = vmatpush1.bf16.msra.mxu0 %v8193_v22  ;;  %7305 = vmatpush1.bf16.msra.mxu1 %v8195_v57  ;;  %v6361_v22 = vld [vmem:[%s14563_s23 + $0x120] sm:$0xff] }
0x16ca   :  { %7265 = vmatprep.subr.bf16.mxu0 %v8210_v23  ;;  %7306 = vmatprep.subr.bf16.mxu1 %v8212_v53  ;;  %v6369_v57 = vld [vmem:[%s14563_s23 + $0x160] sm:$0xff]  ;;  %v6362_v23 = vld [vmem:[%s14563_s23 + $0x128] sm:$0xff] }
0x16cb   :  { %v6370_v53 = vld [vmem:[%s14563_s23 + $0x168] sm:$0xff]  ;;  %v8198_v5 = vcombine.high %v6361_v22, %v6369_v57  ;;  %v8197_v6 = vcombine.low %v6361_v22, %v6369_v57 }
0x16cc   :  { %v8200_v18 = vcombine.high %v6362_v23, %v6370_v53  ;;  %v8199_v40 = vcombine.low %v6362_v23, %v6370_v53 }
0x16cd   :  { %7266 = vmatpush1.bf16.msra.mxu0 %v8209_v24  ;;  %7307 = vmatpush1.bf16.msra.mxu1 %v8211_v8  ;;  %v6377_v24 = vld [vmem:[%s14563_s23 + $0x1a0] sm:$0xff] }
0x16ce   :  { %7267 = vmatprep.subr.bf16.mxu0 %v8226_v12  ;;  %7308 = vmatprep.subr.bf16.mxu1 %v8228_v14  ;;  %v6385_v8 = vld [vmem:[%s14563_s23 + $0x1e0] sm:$0xff]  ;;  %v6378_v12 = vld [vmem:[%s14563_s23 + $0x1a8] sm:$0xff] }
0x16cf   :  { %v6386_v14 = vld [vmem:[%s14563_s23 + $0x1e8] sm:$0xff]  ;;  %v8214_v37 = vcombine.high %v6377_v24, %v6385_v8  ;;  %v8213_v60 = vcombine.low %v6377_v24, %v6385_v8 }
0x16d0   :  { %v8216_v20 = vcombine.high %v6378_v12, %v6386_v14  ;;  %v8215_v55 = vcombine.low %v6378_v12, %v6386_v14 }
0x16d1   :  { %7268 = vmatpush1.bf16.msra.mxu0 %v8225_v47  ;;  %7309 = vmatpush1.bf16.msra.mxu1 %v8227_v32  ;;  %v6393_v47 = vld [vmem:[%s14563_s23 + $0x220] sm:$0xff] }
0x16d2   :  { %7269 = vmatprep.subr.bf16.mxu0 %v8242_v63  ;;  %7310 = vmatprep.subr.bf16.mxu1 %v8244_v9  ;;  %v6401_v32 = vld [vmem:[%s14563_s23 + $0x260] sm:$0xff]  ;;  %v6394_v63 = vld [vmem:[%s14563_s23 + $0x228] sm:$0xff] }
0x16d3   :  { %v6402_v9 = vld [vmem:[%s14563_s23 + $0x268] sm:$0xff]  ;;  %v8230_v50 = vcombine.high %v6393_v47, %v6401_v32  ;;  %v8229_v2 = vcombine.low %v6393_v47, %v6401_v32 }
0x16d4   :  { %v8232_v4 = vcombine.high %v6394_v63, %v6402_v9  ;;  %v8231_v51 = vcombine.low %v6394_v63, %v6402_v9 }
0x16d5   :  { %7270 = vmatpush1.bf16.msra.mxu0 %v8241_v29  ;;  %7311 = vmatpush1.bf16.msra.mxu1 %v8243_v11  ;;  %v6409_v29 = vld [vmem:[%s14563_s23 + $0x2a0] sm:$0xff] }
0x16d6   :  { %7271 = vmatprep.subr.bf16.mxu0 %v8258_v10  ;;  %7312 = vmatprep.subr.bf16.mxu1 %v8260_v7  ;;  %v6417_v11 = vld [vmem:[%s14563_s23 + $0x2e0] sm:$0xff]  ;;  %v6410_v10 = vld [vmem:[%s14563_s23 + $0x2a8] sm:$0xff] }
0x16d7   :  { %v6418_v7 = vld [vmem:[%s14563_s23 + $0x2e8] sm:$0xff]  ;;  %v8246_v41 = vcombine.high %v6409_v29, %v6417_v11  ;;  %v8245_v15 = vcombine.low %v6409_v29, %v6417_v11 }
0x16d8   :  { %v8248_v27 = vcombine.high %v6410_v10, %v6418_v7  ;;  %v8247_v39 = vcombine.low %v6410_v10, %v6418_v7 }
0x16d9   :  { %7272 = vmatpush1.bf16.msra.mxu0 %v8257_v38  ;;  %7313 = vmatpush1.bf16.msra.mxu1 %v8259_v13  ;;  %v6425_v38 = vld [vmem:[%s14563_s23 + $0x320] sm:$0xff] }
0x16da   :  { %7273 = vmatprep.subr.bf16.mxu0 %v8274_v36  ;;  %7314 = vmatprep.subr.bf16.mxu1 %v8276_v25  ;;  %v6433_v13 = vld [vmem:[%s14563_s23 + $0x360] sm:$0xff]  ;;  %v6426_v36 = vld [vmem:[%s14563_s23 + $0x328] sm:$0xff] }
0x16db   :  { %v6434_v25 = vld [vmem:[%s14563_s23 + $0x368] sm:$0xff]  ;;  %v8262_v19 = vcombine.high %v6425_v38, %v6433_v13  ;;  %v8261_v21 = vcombine.low %v6425_v38, %v6433_v13 }
0x16dc   :  { %v8264_v42 = vcombine.high %v6426_v36, %v6434_v25  ;;  %v8263_v30 = vcombine.low %v6426_v36, %v6434_v25  ;;  %v6411_v25 = vld [vmem:[%s14563_s23 + $0x2b0] sm:$0xff] }
0x16dd   :  { %7274 = vmatpush1.bf16.msra.mxu0 %v8273_v61  ;;  %7315 = vmatpush1.bf16.msra.mxu1 %v8275_v62  ;;  %v6441_v61 = vld [vmem:[%s14563_s23 + $0x3a0] sm:$0xff] }
0x16de   :  { %7341 = vmatprep.subr.bf16.mxu0 %v8166_v48  ;;  %7382 = vmatprep.subr.bf16.mxu1 %v8168_v43  ;;  %v6449_v62 = vld [vmem:[%s14563_s23 + $0x3e0] sm:$0xff]  ;;  %v6442_v48 = vld [vmem:[%s14563_s23 + $0x3a8] sm:$0xff] }
0x16df   :  { %v6450_v43 = vld [vmem:[%s14563_s23 + $0x3e8] sm:$0xff]  ;;  %v8278_v54 = vcombine.high %v6441_v61, %v6449_v62  ;;  %v8277_v22 = vcombine.low %v6441_v61, %v6449_v62 }
0x16e0   :  { %7292 = vmatmul.mubr.bf16.vlgmr.msra.gmra.mrb[188].mxu0 %v14126_v49  ;;  %7333 = vmatmul.mubr.bf16.vlgmr.msra.gmra.mrb[196].mxu1 %v14126_v49  ;;  %v8280_v3 = vcombine.high %v6442_v48, %v6450_v43  ;;  %v8279_v57 = vcombine.low %v6442_v48, %v6450_v43  ;;  %v6427_v43 = vld [vmem:[%s14563_s23 + $0x330] sm:$0xff] }
0x16e1   :  { %7342 = vmatpush1.bf16.msra.mxu0 %v8165_v33  ;;  %7383 = vmatpush1.bf16.msra.mxu1 %v8167_v59  ;;  %v6331_v33 = vld [vmem:[%s14563_s23 + $0x30] sm:$0xff] }
0x16e2   :  { %7343 = vmatprep.subr.bf16.mxu0 %v8182_v45  ;;  %7384 = vmatprep.subr.bf16.mxu1 %v8184_v46  ;;  %v6339_v59 = vld [vmem:[%s14563_s23 + $0x70] sm:$0xff]  ;;  %v6332_v45 = vld [vmem:[%s14563_s23 + $0x38] sm:$0xff] }
0x16e3   :  { %7373 = vmatprep.mubr.bf16.mxu0 %v10687_v58  ;;  %7414 = vmatprep.mubr.bf16.mxu1 %v10687_v58  ;;  %v6340_v46 = vld [vmem:[%s14563_s23 + $0x78] sm:$0xff]  ;;  %v8170_v23 = vcombine.high %v6331_v33, %v6339_v59  ;;  %v8169_v24 = vcombine.low %v6331_v33, %v6339_v59 }
0x16e4   :  { %v8172_v53 = vcombine.high %v6332_v45, %v6340_v46  ;;  %v8171_v8 = vcombine.low %v6332_v45, %v6340_v46  ;;  %v6443_v46 = vld [vmem:[%s14563_s23 + $0x3b0] sm:$0xff] }
0x16e5   :  { %7344 = vmatpush1.bf16.msra.mxu0 %v8181_v16  ;;  %7385 = vmatpush1.bf16.msra.mxu1 %v8183_v1  ;;  %v6347_v16 = vld [vmem:[%s14563_s23 + $0xb0] sm:$0xff] }
0x16e6   :  { %7345 = vmatprep.subr.bf16.mxu0 %v8198_v5  ;;  %7386 = vmatprep.subr.bf16.mxu1 %v8200_v18  ;;  %v6355_v1 = vld [vmem:[%s14563_s23 + $0xf0] sm:$0xff]  ;;  %v6348_v5 = vld [vmem:[%s14563_s23 + $0xb8] sm:$0xff] }
0x16e7   :  { %v6356_v18 = vld [vmem:[%s14563_s23 + $0xf8] sm:$0xff]  ;;  %v8186_v12 = vcombine.high %v6347_v16, %v6355_v1  ;;  %v8185_v47 = vcombine.low %v6347_v16, %v6355_v1 }
0x16e8   :  { %v8188_v14 = vcombine.high %v6348_v5, %v6356_v18  ;;  %v8187_v32 = vcombine.low %v6348_v5, %v6356_v18 }
0x16e9   :  { %7346 = vmatpush1.bf16.msra.mxu0 %v8197_v6  ;;  %7387 = vmatpush1.bf16.msra.mxu1 %v8199_v40  ;;  %v6363_v6 = vld [vmem:[%s14563_s23 + $0x130] sm:$0xff] }
0x16ea   :  { %7347 = vmatprep.subr.bf16.mxu0 %v8214_v37  ;;  %7388 = vmatprep.subr.bf16.mxu1 %v8216_v20  ;;  %v6371_v40 = vld [vmem:[%s14563_s23 + $0x170] sm:$0xff]  ;;  %v6364_v37 = vld [vmem:[%s14563_s23 + $0x138] sm:$0xff] }
0x16eb   :  { %v6372_v20 = vld [vmem:[%s14563_s23 + $0x178] sm:$0xff]  ;;  %v8202_v63 = vcombine.high %v6363_v6, %v6371_v40  ;;  %v8201_v29 = vcombine.low %v6363_v6, %v6371_v40  ;;  %v7523_v6 = vld [vmem:[%s14566_s25 + $0x10] sm:$0xff] }
0x16ec   :  { %v8204_v9 = vcombine.high %v6364_v37, %v6372_v20  ;;  %v8203_v11 = vcombine.low %v6364_v37, %v6372_v20  ;;  %v7524_v40 = vld [vmem:[%s14566_s25 + $0x18] sm:$0xff]  ;;  %v14610_v20 = vmov 0.0  }
0x16ed   :  { %7348 = vmatpush1.bf16.msra.mxu0 %v8213_v60  ;;  %7389 = vmatpush1.bf16.msra.mxu1 %v8215_v55  ;;  %v6379_v60 = vld [vmem:[%s14563_s23 + $0x1b0] sm:$0xff]  ;;  %v10406_v37 = vpack.c.bf16 %v7524_v40, %v7523_v6 }
0x16ee   :  { %7349 = vmatprep.subr.bf16.mxu0 %v8230_v50  ;;  %7390 = vmatprep.subr.bf16.mxu1 %v8232_v4  ;;  %v6387_v55 = vld [vmem:[%s14563_s23 + $0x1f0] sm:$0xff]  ;;  %v6380_v50 = vld [vmem:[%s14563_s23 + $0x1b8] sm:$0xff] }
0x16ef   :  { %v6388_v4 = vld [vmem:[%s14563_s23 + $0x1f8] sm:$0xff]  ;;  %v8218_v10 = vcombine.high %v6379_v60, %v6387_v55 }
0x16f0   :  { %v8220_v7 = vcombine.high %v6380_v50, %v6388_v4  ;;  %v8219_v38 = vcombine.low %v6380_v50, %v6388_v4  ;;  %v7530_v50 = vld [vmem:[%s14566_s25 + $0x48] sm:$0xff] }
0x16f1   :  { %7350 = vmatpush1.bf16.msra.mxu0 %v8229_v2  ;;  %7391 = vmatpush1.bf16.msra.mxu1 %v8231_v51  ;;  %v6395_v2 = vld [vmem:[%s14563_s23 + $0x230] sm:$0xff] }
0x16f2   :  { %7351 = vmatprep.subr.bf16.mxu0 %v8246_v41  ;;  %7392 = vmatprep.subr.bf16.mxu1 %v8248_v27  ;;  %v6403_v51 = vld [vmem:[%s14563_s23 + $0x270] sm:$0xff]  ;;  %v6404_v41 = vld [vmem:[%s14563_s23 + $0x278] sm:$0xff]  ;;  %v8217_v27 = vcombine.low %v6379_v60, %v6387_v55  ;;  %v7529_v55 = vld [vmem:[%s14566_s25 + $0x40] sm:$0xff] }
0x16f3   :  { %v8234_v13 = vcombine.high %v6395_v2, %v6403_v51  ;;  %v10415_v4 = vpack.c.bf16 %v7530_v50, %v7529_v55 }
0x16f5   :  { %7352 = vmatpush1.bf16.msra.mxu0 %v8245_v15  ;;  %7393 = vmatpush1.bf16.msra.mxu1 %v8247_v39  ;;  %v6419_v15 = vld [vmem:[%s14563_s23 + $0x2f0] sm:$0xff]  ;;  %v6412_v39 = vld [vmem:[%s14563_s23 + $0x2b8] sm:$0xff] }
0x16f6   :  { %7353 = vmatprep.subr.bf16.mxu0 %v8262_v19  ;;  %7394 = vmatprep.subr.bf16.mxu1 %v8264_v42  ;;  %v6420_v19 = vld [vmem:[%s14563_s23 + $0x2f8] sm:$0xff]  ;;  %v8233_v42 = vcombine.low %v6395_v2, %v6403_v51  ;;  %v8250_v62 = vcombine.high %v6411_v25, %v6419_v15  ;;  %v7534_v2 = vld [vmem:[%s14566_s25 + $0x68] sm:$0xff] }
0x16f7   :  { %v8252_v48 = vcombine.high %v6412_v39, %v6420_v19  ;;  %v8251_v33 = vcombine.low %v6412_v39, %v6420_v19 }
0x16f9   :  { %7354 = vmatpush1.bf16.msra.mxu0 %v8261_v21  ;;  %7395 = vmatpush1.bf16.msra.mxu1 %v8263_v30  ;;  %v6435_v21 = vld [vmem:[%s14563_s23 + $0x370] sm:$0xff]  ;;  %v6428_v30 = vld [vmem:[%s14563_s23 + $0x338] sm:$0xff] }
0x16fa   :  { %7355 = vmatprep.subr.bf16.mxu0 %v8278_v54  ;;  %7396 = vmatprep.subr.bf16.mxu1 %v8280_v3  ;;  %v6436_v54 = vld [vmem:[%s14563_s23 + $0x378] sm:$0xff]  ;;  %v8249_v3 = vcombine.low %v6411_v25, %v6419_v15  ;;  %v8266_v59 = vcombine.high %v6427_v43, %v6435_v21 }
0x16fb   :  { %v8268_v45 = vcombine.high %v6428_v30, %v6436_v54  ;;  %v8267_v16 = vcombine.low %v6428_v30, %v6436_v54 }
0x16fd   :  { %7356 = vmatpush1.bf16.msra.mxu0 %v8277_v22  ;;  %7397 = vmatpush1.bf16.msra.mxu1 %v8279_v57  ;;  %v6451_v22 = vld [vmem:[%s14563_s23 + $0x3f0] sm:$0xff]  ;;  %v6444_v57 = vld [vmem:[%s14563_s23 + $0x3b8] sm:$0xff] }
0x16fe   :  { %7423 = vmatprep.subr.bf16.mxu0 %v8170_v23  ;;  %7464 = vmatprep.subr.bf16.mxu1 %v8172_v53  ;;  %v6452_v23 = vld [vmem:[%s14563_s23 + $0x3f8] sm:$0xff]  ;;  %v8265_v53 = vcombine.low %v6427_v43, %v6435_v21  ;;  %v8282_v1 = vcombine.high %v6443_v46, %v6451_v22  ;;  %v8281_v18 = vcombine.low %v6443_v46, %v6451_v22 }
0x16ff   :  { %v8284_v5 = vcombine.high %v6444_v57, %v6452_v23 }
0x1700   :  { %7374 = vmatmul.mubr.bf16.vlgmr.msra.gmra.mrb[192].mxu0 %v14126_v49  ;;  %7415 = vmatmul.mubr.bf16.vlgmr.msra.gmra.mrb[200].mxu1 %v14126_v49 }
0x1701   :  { %7424 = vmatpush1.bf16.msra.mxu0 %v8169_v24  ;;  %7465 = vmatpush1.bf16.msra.mxu1 %v8171_v8  ;;  %v8283_v24 = vcombine.low %v6444_v57, %v6452_v23  ;;  %v7521_v8 = vld [vmem:[%s14566_s25] sm:$0xff] }
0x1702   :  { %7425 = vmatprep.subr.bf16.mxu0 %v8186_v12  ;;  %7466 = vmatprep.subr.bf16.mxu1 %v8188_v14  ;;  %v7522_v12 = vld [vmem:[%s14566_s25 + $0x8] sm:$0xff] }
0x1703   :  { %7455 = vmatprep.mubr.bf16.mxu0 %v10687_v58  ;;  %7496 = vmatprep.mubr.bf16.mxu1 %v10687_v58  ;;  %v6396_v58 = vld [vmem:[%s14563_s23 + $0x238] sm:$0xff]  ;;  %v10403_v14 = vpack.c.bf16 %v7522_v12, %v7521_v8 }
0x1704   :  { %v8236_v36 = vcombine.high %v6396_v58, %v6404_v41  ;;  %v8235_v61 = vcombine.low %v6396_v58, %v6404_v41  ;;  %v7535_v58 = vld [vmem:[%s14566_s25 + $0x70] sm:$0xff]  ;;  %v7536_v41 = vld [vmem:[%s14566_s25 + $0x78] sm:$0xff] }
0x1705   :  { %7426 = vmatpush1.bf16.msra.mxu0 %v8185_v47  ;;  %7467 = vmatpush1.bf16.msra.mxu1 %v8187_v32  ;;  %v7525_v47 = vld [vmem:[%s14566_s25 + $0x20] sm:$0xff]  ;;  %v7526_v32 = vld [vmem:[%s14566_s25 + $0x28] sm:$0xff] }
0x1706   :  { %7427 = vmatprep.subr.bf16.mxu0 %v8202_v63  ;;  %7468 = vmatprep.subr.bf16.mxu1 %v8204_v9  ;;  %v10409_v63 = vpack.c.bf16 %v7526_v32, %v7525_v47  ;;  %v7528_v9 = vld [vmem:[%s14566_s25 + $0x38] sm:$0xff] }
0x1709   :  { %7428 = vmatpush1.bf16.msra.mxu0 %v8201_v29  ;;  %7469 = vmatpush1.bf16.msra.mxu1 %v8203_v11  ;;  %v7531_v29 = vld [vmem:[%s14566_s25 + $0x50] sm:$0xff]  ;;  %v7532_v11 = vld [vmem:[%s14566_s25 + $0x58] sm:$0xff] }
0x170a   :  { %7429 = vmatprep.subr.bf16.mxu0 %v8218_v10  ;;  %7470 = vmatprep.subr.bf16.mxu1 %v8220_v7  ;;  %v10418_v10 = vpack.c.bf16 %v7532_v11, %v7531_v29  ;;  %v7533_v7 = vld [vmem:[%s14566_s25 + $0x60] sm:$0xff] }
0x170b   :  { %v10421_v51 = vpack.c.bf16 %v7534_v2, %v7533_v7 }
0x170d   :  { %7430 = vmatpush1.bf16.msra.mxu0 %v8217_v27  ;;  %7471 = vmatpush1.bf16.msra.mxu1 %v8219_v38  ;;  %v10424_v27 = vpack.c.bf16 %v7536_v41, %v7535_v58  ;;  %v6453_v38 = vld [vmem:[%s14567_s24] sm:$0xff] }
0x170e   :  { %7431 = vmatprep.subr.bf16.mxu0 %v8234_v13  ;;  %7472 = vmatprep.subr.bf16.mxu1 %v8236_v36  ;;  %v6460_v13 = vrot.slane %v6453_v38, %v13302_v52  ;;  %v6468_v36 = vrot.slane %v6453_v38, %v13305_v56  ;;  %v6464_v25 = vrot.slane %v6453_v38, %v13313_v35 }
0x170f   :  { %v6472_v15 = vrot.slane %v6453_v38, %v13316_v31 }
0x1711   :  { %7432 = vmatpush1.bf16.msra.mxu0 %v8233_v42  ;;  %7473 = vmatpush1.bf16.msra.mxu1 %v8235_v61 }
0x1712   :  { %7433 = vmatprep.subr.bf16.mxu0 %v8250_v62  ;;  %7474 = vmatprep.subr.bf16.mxu1 %v8252_v48 }
0x1715   :  { %7434 = vmatpush1.bf16.msra.mxu0 %v8249_v3  ;;  %7475 = vmatpush1.bf16.msra.mxu1 %v8251_v33  ;;  %v6476_v3 = vrot.slane %v6453_v38, %v13357_v26  ;;  %v6484_v33 = vrot.slane %v6453_v38, %v13360_v28 }
0x1716   :  { %7435 = vmatprep.subr.bf16.mxu0 %v8266_v59  ;;  %7476 = vmatprep.subr.bf16.mxu1 %v8268_v45  ;;  %v6480_v59 = vrot.slane %v6453_v38, %v13365_v34  ;;  %v6488_v45 = vrot.slane %v6453_v38, %v13393_v44 }
0x1719   :  { %7436 = vmatpush1.bf16.msra.mxu0 %v8265_v53  ;;  %7477 = vmatpush1.bf16.msra.mxu1 %v8267_v16 }
0x171a   :  { %7437 = vmatprep.subr.bf16.mxu0 %v8282_v1  ;;  %7478 = vmatprep.subr.bf16.mxu1 %v8284_v5 }
0x171d   :  { %7438 = vmatpush1.bf16.msra.mxu0 %v8281_v18  ;;  %7479 = vmatpush1.bf16.msra.mxu1 %v8283_v24 }
0x171e   :  { %10402 = vmatprep.subr.bf16.mxu0 %v10683_v0 }
0x1720   :  { %7456 = vmatmul.mubr.bf16.vlgmr.msra.gmra.mrb[196].mxu0 %v14126_v49  ;;  %7497 = vmatmul.mubr.bf16.vlgmr.msra.gmra.mrb[204].mxu1 %v14126_v49  ;;  %v7527_v49 = vld [vmem:[%s14566_s25 + $0x30] sm:$0xff] }
0x1721   :  { %10404 = vmatpush3.bf16.msra.mxu0 %v10403_v14  ;;  %9815 = vmatprep.mubr.msk.f32.mxu0 %vm10684_vm0, %v14610_v20  ;;  %v10412_v60 = vpack.c.bf16 %v7528_v9, %v7527_v49  ;;  %v6454_v14 = vld [vmem:[%s14567_s24 + $0x8] sm:$0xff] }
0x1722   :  { %10405 = vmatprep.subr.bf16.mxu0 %v10683_v0  ;;  %v6492_v6 = vrot.slane %v6454_v14, %v13302_v52  ;;  %v6500_v40 = vrot.slane %v6454_v14, %v13305_v56  ;;  %v6504_v20 = vrot.slane %v6454_v14, %v13316_v31  ;;  %v6516_v31 = vrot.slane %v6454_v14, %v13360_v28 }
0x1723   :  { %v6512_v11 = vrot.slane %v6454_v14, %v13365_v34  ;;  %v8285_v34 = vld [vmem:[%s14569_s26] ss:$0 sm:$0xff] }
0x1725   :  { %10407 = vmatpush3.bf16.msra.mxu0 %v10406_v37  ;;  %v6496_v37 = vrot.slane %v6454_v14, %v13313_v35  ;;  %v6508_v35 = vrot.slane %v6454_v14, %v13357_v26 }
0x1726   :  { %10408 = vmatprep.subr.bf16.mxu0 %v10683_v0 }
0x1729   :  { %10410 = vmatpush3.bf16.msra.mxu0 %v10409_v63 }
0x172a   :  { %10411 = vmatprep.subr.bf16.mxu0 %v10683_v0 }
0x172d   :  { %10413 = vmatpush3.bf16.msra.mxu0 %v10412_v60 }
0x172e   :  { %10414 = vmatprep.subr.bf16.mxu0 %v10683_v0 }
0x1731   :  { %10416 = vmatpush3.bf16.msra.mxu0 %v10415_v4 }
0x1732   :  { %10417 = vmatprep.subr.bf16.mxu0 %v10683_v0 }
0x1735   :  { %10419 = vmatpush3.bf16.msra.mxu0 %v10418_v10  ;;  %v6520_v10 = vrot.slane %v6454_v14, %v13393_v44 }
0x1736   :  { %10420 = vmatprep.subr.bf16.mxu0 %v10683_v0 }
0x1739   :  { %10422 = vmatpush3.bf16.msra.mxu0 %v10421_v51 }
0x173a   :  { %10423 = vmatprep.subr.bf16.mxu0 %v10683_v0 }
0x173d   :  { %10425 = vmatpush3.bf16.msra.mxu0 %v10424_v27 }
0x1740   :  { %9816 = vmatmul.mubr.f32.vlgmr.msra.gmra.mrb[150].mxu0 %v14110_v17 }
0x1793   :  { %v7211_v39 = vpop.f32.mrb[184].mxu0  ;;  %v7252_v19 = vpop.f32.mrb[192].mxu1 }
0x1794   :  { %v7212_v42 = vadd.f32 %v7211_v39, %v6460_v13  ;;  %v7253_v61 = vadd.f32 %v7252_v19, %v6468_v36  ;;  %v7213_v0 = vpop.f32.mrb[185].mxu0  ;;  %v7254_v62 = vpop.f32.mrb[193].mxu1 }
0x1795   :  { %v7214_v48 = vadd.f32 %v7213_v0, %v6464_v25  ;;  %v7255_v17 = vadd.f32 %v7254_v62, %v6472_v15  ;;  %v7215_v43 = vpop.f32.mrb[186].mxu0  ;;  %v7256_v21 = vpop.f32.mrb[194].mxu1 }
0x1796   :  { %7505 = vst [vmem:[%s14568_s27] sm:$0xff] %v7212_v42  ;;  %7507 = vst [vmem:[%s14568_s27 + $0x10] sm:$0xff] %v7253_v61  ;;  %v7216_v30 = vpop.f32.mrb[187].mxu0  ;;  %v7257_v54 = vpop.f32.mrb[195].mxu1 }
0x1797   :  { %7506 = vst [vmem:[%s14568_s27 + $0x8] sm:$0xff] %v7214_v48  ;;  %7508 = vst [vmem:[%s14568_s27 + $0x18] sm:$0xff] %v7255_v17 }
0x17b3   :  { %v7293_v46 = vpop.f32.mrb[188].mxu0  ;;  %v7334_v22 = vpop.f32.mrb[196].mxu1 }
0x17b4   :  { %v7294_v57 = vadd.f32 %v7293_v46, %v6476_v3  ;;  %v7335_v23 = vadd.f32 %v7334_v22, %v6484_v33  ;;  %v7295_v53 = vpop.f32.mrb[189].mxu0  ;;  %v7336_v16 = vpop.f32.mrb[197].mxu1 }
0x17b5   :  { %v7296_v1 = vadd.f32 %v7295_v53, %v6480_v59  ;;  %v7337_v5 = vadd.f32 %v7336_v16, %v6488_v45  ;;  %v7297_v18 = vpop.f32.mrb[190].mxu0  ;;  %v7338_v24 = vpop.f32.mrb[198].mxu1 }
0x17b6   :  { %7509 = vst [vmem:[%s14568_s27 + $0x20] sm:$0xff] %v7294_v57  ;;  %7511 = vst [vmem:[%s14568_s27 + $0x30] sm:$0xff] %v7335_v23  ;;  %v7298_v8 = vpop.f32.mrb[191].mxu0  ;;  %v7339_v12 = vpop.f32.mrb[199].mxu1 }
0x17b7   :  { %7510 = vst [vmem:[%s14568_s27 + $0x28] sm:$0xff] %v7296_v1  ;;  %7512 = vst [vmem:[%s14568_s27 + $0x38] sm:$0xff] %v7337_v5 }
0x17d3   :  { %v7375_v47 = vpop.f32.mrb[192].mxu0  ;;  %v7416_v32 = vpop.f32.mrb[200].mxu1 }
0x17d4   :  { %v7376_v63 = vadd.f32 %v7375_v47, %v6492_v6  ;;  %v7417_v49 = vadd.f32 %v7416_v32, %v6500_v40  ;;  %v7377_v9 = vpop.f32.mrb[193].mxu0  ;;  %v7418_v60 = vpop.f32.mrb[201].mxu1 }
0x17d5   :  { %v7378_v55 = vadd.f32 %v7377_v9, %v6496_v37  ;;  %v7419_v50 = vadd.f32 %v7418_v60, %v6504_v20  ;;  %v7379_v4 = vpop.f32.mrb[194].mxu0  ;;  %v7420_v29 = vpop.f32.mrb[202].mxu1 }
0x17d6   :  { %7513 = vst [vmem:[%s14568_s27 + $0x40] sm:$0xff] %v7376_v63  ;;  %7515 = vst [vmem:[%s14568_s27 + $0x50] sm:$0xff] %v7417_v49  ;;  %v7380_v52 = vpop.f32.mrb[195].mxu0  ;;  %v7421_v56 = vpop.f32.mrb[203].mxu1 }
0x17d7   :  { %7514 = vst [vmem:[%s14568_s27 + $0x48] sm:$0xff] %v7378_v55  ;;  %7516 = vst [vmem:[%s14568_s27 + $0x58] sm:$0xff] %v7419_v50 }
0x17f3   :  { %v7457_v7 = vpop.f32.mrb[196].mxu0  ;;  %v7498_v2 = vpop.f32.mrb[204].mxu1 }
0x17f4   :  { %v7458_v51 = vadd.f32 %v7457_v7, %v6508_v35  ;;  %v7499_v58 = vadd.f32 %v7498_v2, %v6516_v31  ;;  %v7459_v41 = vpop.f32.mrb[197].mxu0  ;;  %v7500_v27 = vpop.f32.mrb[205].mxu1 }
0x17f5   :  { %v7460_v38 = vadd.f32 %v7459_v41, %v6512_v11  ;;  %v7501_v13 = vadd.f32 %v7500_v27, %v6520_v10  ;;  %v7461_v36 = vpop.f32.mrb[198].mxu0  ;;  %v7502_v25 = vpop.f32.mrb[206].mxu1 }
0x17f6   :  { %7517 = vst [vmem:[%s14568_s27 + $0x60] sm:$0xff] %v7458_v51  ;;  %7519 = vst [vmem:[%s14568_s27 + $0x70] sm:$0xff] %v7499_v58  ;;  %v7462_v26 = vpop.f32.mrb[199].mxu0  ;;  %v7503_v28 = vpop.f32.mrb[207].mxu1 }
0x17f7   :  { %7518 = vst [vmem:[%s14568_s27 + $0x68] sm:$0xff] %v7460_v38  ;;  %7520 = vst [vmem:[%s14568_s27 + $0x78] sm:$0xff] %v7501_v13 }
0x1813   :  { %v7610_v44 = vpop.f32.mrb[150].mxu0 }
0x1814   :  { %v7611_v15 = vadd.f32 %v8285_v34, %v7610_v44  ;;  %v9817_v39 = vpop.f32.mrb[151].mxu0 }
0x1816   :  { %7614 = vst.msk [vmem:[%s14611_s10] sm:$0xff] %vm752_vm3, %v7611_v15 }

</bundles_post_ra>
